<compile_context>
chip_gen: v7x
topology: tpu7x:2x2x1
jax: 0.10.0
libtpu: 0.0.40
codegen_flags: <defaults>
</compile_context>

<pallas_src>
import functools

import jax
import jax.numpy as jnp
from jax.experimental import pallas as pl
from jax.experimental.pallas import tpu as pltpu

FEAT_DIM = 2048          # resnet50 avgpool feature size
H1 = 1024
H2 = 512
EMB_DIM = 256
VMEM_LIMIT = 48 * 1024 * 1024   # explicit scoped-VMEM limit (safe on v7x 64 MiB)


def _round_up(x, m):
    return ((x + m - 1) // m) * m


def _pad_rows(a, rows):
    pad = rows - a.shape[0]
    if pad == 0:
        return a
    return jnp.pad(a, [(0, pad)] + [(0, 0)] * (a.ndim - 1))


# ----------------------------------------------------------------------------
# Kernel 1: fused backbone stand-in + MLP head, row-tiled over (2N) proposals.
#   feats = relu(avgpool(x) @ wproj)            (VPU FMAs, K=3 -> skip MXU)
#   h1    = relu(feats @ w1_feat + boxes4 "FMA" w1_box + b1)
#   h2    = relu(h1 @ w2 + b2)
#   h3    = h2 @ w3 + b3
#   out   = h3 * rsqrt(max(sum(h3^2), eps^2))   (== F.normalize p=2 dim=1)
# ----------------------------------------------------------------------------
def _fused_embed_kernel(x_ref, boxes_ref, wproj_ref, w1f_ref, w1b_ref, b1_ref,
                        w2_ref, b2_ref, w3_ref, b3_ref, out_ref, *, n_ch, hw):
    x = x_ref[...]                                          # (tm, C*HW) f32

    # --- backbone stand-in: per-channel global average pool + frozen proj ---
    # TODO(synk): real ResNet-50 conv stack not implemented (stand-in only).
    pooled0 = jnp.mean(x[:, 0:hw], axis=1, keepdims=True)   # (tm, 1)
    feats = pooled0 * wproj_ref[0:1, :]                     # (tm, 2048) VPU FMA
    for c in range(1, n_ch):
        pooled_c = jnp.mean(x[:, c * hw:(c + 1) * hw], axis=1, keepdims=True)
        feats = feats + pooled_c * wproj_ref[c:c + 1, :]
    feats = jnp.maximum(feats, 0.0)                         # resnet feats post-ReLU

    # --- fc1: 2048-wide part on MXU (bf16, f32 acc); 4 box cols as VPU FMAs --
    h = jnp.dot(feats.astype(jnp.bfloat16), w1f_ref[...],
                preferred_element_type=jnp.float32)         # (tm, 1024)
    boxes = boxes_ref[...]                                  # (tm, 4)
    for c in range(boxes.shape[1]):
        h = h + boxes[:, c:c + 1] * w1b_ref[c:c + 1, :]
    h = jnp.maximum(h + b1_ref[...], 0.0)

    # --- fc2 + relu ---
    h = jnp.dot(h.astype(jnp.bfloat16), w2_ref[...],
                preferred_element_type=jnp.float32)         # (tm, 512)
    h = jnp.maximum(h + b2_ref[...], 0.0)

    # --- fc3 ---
    h = jnp.dot(h.astype(jnp.bfloat16), w3_ref[...],
                preferred_element_type=jnp.float32)         # (tm, 256)
    h = h + b3_ref[...]

    # --- F.normalize(p=2, dim=1): x / max(||x||, 1e-12) via rsqrt on the EUP --
    ss = jnp.sum(h * h, axis=1, keepdims=True)
    out_ref[...] = (h * jax.lax.rsqrt(jnp.maximum(ss, 1e-24))).astype(out_ref.dtype)


def run_embed(x_flat, boxes4, params):
    rows, cl = x_flat.shape
    n_ch = params["wproj"].shape[0]
    hw = cl // n_ch

    # Row tile: target 256 (MXU height v6e/v7x) but bound the x-tile to ~4 MB.
    per_row_bytes = cl * 4
    tm = max(8, min(256, ((4 << 20) // max(per_row_bytes, 1)) // 8 * 8))
    tm = min(tm, _round_up(rows, 8))
    rows_pad = _round_up(rows, tm)

    x_p = _pad_rows(x_flat, rows_pad)
    b_p = _pad_rows(boxes4, rows_pad)

    kernel = functools.partial(_fused_embed_kernel, n_ch=n_ch, hw=hw)

    def full_spec(shape):
        return pl.BlockSpec(shape, lambda i, _s=shape: (0,) * len(_s))

    out = pl.pallas_call(
        kernel,
        out_shape=jax.ShapeDtypeStruct((rows_pad, EMB_DIM), jnp.float32),
        grid=(rows_pad // tm,),
        in_specs=[
            pl.BlockSpec((tm, cl), lambda i: (i, 0)),       # x (row-tiled)
            pl.BlockSpec((tm, 4), lambda i: (i, 0)),        # boxes[:, :4]
            full_spec(params["wproj"].shape),               # weights: VMEM-resident
            full_spec(params["w1f"].shape),
            full_spec(params["w1b"].shape),
            full_spec(params["b1"].shape),
            full_spec(params["w2"].shape),
            full_spec(params["b2"].shape),
            full_spec(params["w3"].shape),
            full_spec(params["b3"].shape),
        ],
        out_specs=pl.BlockSpec((tm, EMB_DIM), lambda i: (i, 0)),
        compiler_params=pltpu.CompilerParams(
            dimension_semantics=("parallel",),
            vmem_limit_bytes=VMEM_LIMIT),
    )(x_p, b_p, params["wproj"], params["w1f"], params["w1b"], params["b1"],
      params["w2"], params["b2"], params["w3"], params["b3"])
    return out[:rows]


# ----------------------------------------------------------------------------
# Kernel 2: tiled cross-view context + weighted running row-max + score add
#   context = emb0 @ emb1.T (contracted last dims, no transpose materialized)
#   preds   = max_j(context[i, j] * score1[i]) + score0[i]
# (Faithful to the PyTorch (N0,N1)*(N1,1) broadcast, which requires N0==N1 and
#  multiplies row i by score1[i].)
# ----------------------------------------------------------------------------
def _context_kernel(e0_ref, e1_ref, s1_ref, s0_ref, out_ref, acc_ref, *,
                    n_valid, tn):
    j = pl.program_id(1)

    @pl.when(j == 0)
    def _():
        acc_ref[...] = jnp.full(acc_ref.shape, -jnp.inf, acc_ref.dtype)

    ctx = jax.lax.dot_general(
        e0_ref[...], e1_ref[...],
        dimension_numbers=(((1,), (1,)), ((), ())),
        preferred_element_type=jnp.float32)                 # (tm, tn)
    weighted = ctx * s1_ref[...]                            # row-wise score1[i]

    # Mask out padded columns (past the real N) before the max.
    col = jax.lax.broadcasted_iota(jnp.int32, weighted.shape, 1) + j * tn
    weighted = jnp.where(col < n_valid, weighted, -jnp.inf)

    acc_ref[...] = jnp.maximum(acc_ref[...],
                               jnp.max(weighted, axis=1, keepdims=True))

    @pl.when(j == pl.num_programs(1) - 1)
    def _():
        out_ref[...] = acc_ref[...] + s0_ref[...]


def run_context(emb0, emb1, score1_col, score0_col, *, block_m=256, block_n=512):
    n = emb0.shape[0]
    tm = min(block_m, _round_up(n, 8))
    tn = min(block_n, _round_up(n, 8))
    n_rows = _round_up(n, tm)
    n_cols = _round_up(n, tn)

    e0 = _pad_rows(emb0, n_rows)
    e1 = _pad_rows(emb1, n_cols)
    s1 = _pad_rows(score1_col, n_rows)
    s0 = _pad_rows(score0_col, n_rows)

    kernel = functools.partial(_context_kernel, n_valid=n, tn=tn)
    out = pl.pallas_call(
        kernel,
        out_shape=jax.ShapeDtypeStruct((n_rows, 1), jnp.float32),
        grid=(n_rows // tm, n_cols // tn),
        in_specs=[
            pl.BlockSpec((tm, EMB_DIM), lambda i, j: (i, 0)),
            pl.BlockSpec((tn, EMB_DIM), lambda i, j: (j, 0)),
            pl.BlockSpec((tm, 1), lambda i, j: (i, 0)),
            pl.BlockSpec((tm, 1), lambda i, j: (i, 0)),
        ],
        out_specs=pl.BlockSpec((tm, 1), lambda i, j: (i, 0)),
        scratch_shapes=[pltpu.VMEM((tm, 1), jnp.float32)],
        compiler_params=pltpu.CompilerParams(
            dimension_semantics=("parallel", "arbitrary"),
            vmem_limit_bytes=VMEM_LIMIT),
    )(e0, e1, s1, s0)
    return out[:n, 0]


# ----------------------------------------------------------------------------
# Model wrapper (glue in plain JAX: reshape, stack views, column slicing)
# ----------------------------------------------------------------------------
def init_params(key, in_channels):
    ks = jax.random.split(key, 7)

    def lin_w(k, fan_in, fan_out):
        scale = 1.0 / jnp.sqrt(jnp.float32(fan_in))
        return jax.random.uniform(k, (fan_in, fan_out), jnp.float32, -scale, scale)

    w1 = lin_w(ks[1], FEAT_DIM + 4, H1)                     # fc1: 2052 -> 1024
    return {
        # frozen backbone stand-in projection (f32, tiny, VPU path)
        "wproj": 0.05 * jax.random.normal(ks[0], (in_channels, FEAT_DIM), jnp.float32),
        # fc1 split: feature part (bf16, MXU) + box part (f32, VPU FMAs)
        "w1f": w1[:FEAT_DIM].astype(jnp.bfloat16),
        "w1b": w1[FEAT_DIM:],
        "b1": 0.01 * jax.random.normal(ks[2], (1, H1), jnp.float32),
        "w2": lin_w(ks[3], H1, H2).astype(jnp.bfloat16),
        "b2": 0.01 * jax.random.normal(ks[4], (1, H2), jnp.float32),
        "w3": lin_w(ks[5], H2, EMB_DIM).astype(jnp.bfloat16),
        "b3": 0.01 * jax.random.normal(ks[6], (1, EMB_DIM), jnp.float32),
    }


def max_model_forward(params, view_0, view_1):
    x0, boxes0 = view_0
    x1, boxes1 = view_1
    n0, c, h, w = x0.shape
    n1 = x1.shape[0]
    assert n0 == n1, "forward assumes equal proposal counts (as in the spec)"

    # Stack both views so the fused backbone+head kernel runs ONCE
    # (weights DMA'd from HBM a single time).
    x_all = jnp.concatenate([x0.reshape(n0, c * h * w),
                             x1.reshape(n1, c * h * w)], axis=0)    # (2N, C*HW)
    boxes_all = jnp.concatenate([boxes0[:, :4], boxes1[:, :4]], axis=0)

    emb = run_embed(x_all, boxes_all, params)                       # (2N, 256)
    emb0, emb1 = emb[:n0], emb[n0:n0 + n1]

    preds = run_context(emb0, emb1, boxes1[:, 4:5], boxes0[:, 4:5])  # (N,)
    return preds


if __name__ == "__main__":
    key = jax.random.PRNGKey(0)
    k_params, k0, k1, k2, k3 = jax.random.split(key, 5)

    N, C, H, W = 8, 3, 16, 16
    params = init_params(k_params, C)

    x0 = jax.random.normal(k0, (N, C, H, W), jnp.float32)
    boxes0 = jax.random.normal(k1, (N, 5), jnp.float32)
    x1 = jax.random.normal(k2, (N, C, H, W), jnp.float32)
    boxes1 = jax.random.normal(k3, (N, 5), jnp.float32)

    preds = max_model_forward(params, (x0, boxes0), (x1, boxes1))
    jax.block_until_ready(preds)
    assert preds.shape == (N,)
    print("KERNEL_OK")
</pallas_src>

<mosaic_0001>
module attributes {stable_mosaic.version = 11 : i64} {
  func.func @_fused_embed_kernel(%arg0: i32, %arg1: memref<16x768xf32, #tpu.memory_space<vmem>>, %arg2: memref<16x4xf32, #tpu.memory_space<vmem>>, %arg3: memref<3x2048xf32, #tpu.memory_space<vmem>>, %arg4: memref<2048x1024xbf16, #tpu.memory_space<vmem>>, %arg5: memref<4x1024xf32, #tpu.memory_space<vmem>>, %arg6: memref<1x1024xf32, #tpu.memory_space<vmem>>, %arg7: memref<1024x512xbf16, #tpu.memory_space<vmem>>, %arg8: memref<1x512xf32, #tpu.memory_space<vmem>>, %arg9: memref<512x256xbf16, #tpu.memory_space<vmem>>, %arg10: memref<1x256xf32, #tpu.memory_space<vmem>>, %arg11: memref<16x256xf32, #tpu.memory_space<vmem>>) attributes {dimension_semantics = [#tpu.dimension_semantics<parallel>], iteration_bounds = array<i64: 1>, scalar_prefetch = 0 : i64, scratch_operands = 0 : i64, tpu.core_type = #tpu.core_type<tc>, window_params = [{transform_indices = @transform_0, window_bounds = array<i64: 16, 768>}, {transform_indices = @transform_1, window_bounds = array<i64: 16, 4>}, {pipeline_mode = #tpu.pipeline_mode<synchronous>, transform_indices = @transform_2, window_bounds = array<i64: 3, 2048>}, {pipeline_mode = #tpu.pipeline_mode<synchronous>, transform_indices = @transform_3, window_bounds = array<i64: 2048, 1024>}, {pipeline_mode = #tpu.pipeline_mode<synchronous>, transform_indices = @transform_4, window_bounds = array<i64: 4, 1024>}, {pipeline_mode = #tpu.pipeline_mode<synchronous>, transform_indices = @transform_5, window_bounds = array<i64: 1, 1024>}, {pipeline_mode = #tpu.pipeline_mode<synchronous>, transform_indices = @transform_6, window_bounds = array<i64: 1024, 512>}, {pipeline_mode = #tpu.pipeline_mode<synchronous>, transform_indices = @transform_7, window_bounds = array<i64: 1, 512>}, {pipeline_mode = #tpu.pipeline_mode<synchronous>, transform_indices = @transform_8, window_bounds = array<i64: 512, 256>}, {pipeline_mode = #tpu.pipeline_mode<synchronous>, transform_indices = @transform_9, window_bounds = array<i64: 1, 256>}, {transform_indices = @transform_10, window_bounds = array<i64: 16, 256>}]} {
    %c0 = arith.constant 0 : index
    %c0_0 = arith.constant 0 : index
    %0 = vector.load %arg1[%c0, %c0_0] : memref<16x768xf32, #tpu.memory_space<vmem>>, vector<16x768xf32>
    %1 = vector.extract_strided_slice %0 {offsets = [0, 0], sizes = [16, 256], strides = [1, 1]} : vector<16x768xf32> to vector<16x256xf32>
    %cst = arith.constant dense<0.000000e+00> : vector<16xf32>
    %2 = vector.multi_reduction <add>, %1, %cst [1] : vector<16x256xf32> to vector<16xf32>
    %3 = vector.shape_cast %2 : vector<16xf32> to vector<16x1xf32>
    %cst_1 = arith.constant 2.560000e+02 : f32
    %4 = vector.broadcast %cst_1 : f32 to vector<16x1xf32>
    %5 = arith.divf %3, %4 : vector<16x1xf32>
    %c0_2 = arith.constant 0 : index
    %c0_3 = arith.constant 0 : index
    %6 = vector.load %arg3[%c0_2, %c0_3] : memref<3x2048xf32, #tpu.memory_space<vmem>>, vector<1x2048xf32>
    %7 = vector.broadcast %5 : vector<16x1xf32> to vector<16x2048xf32>
    %8 = vector.broadcast %6 : vector<1x2048xf32> to vector<16x2048xf32>
    %9 = arith.mulf %7, %8 : vector<16x2048xf32>
    %10 = vector.extract_strided_slice %0 {offsets = [0, 256], sizes = [16, 256], strides = [1, 1]} : vector<16x768xf32> to vector<16x256xf32>
    %cst_4 = arith.constant dense<0.000000e+00> : vector<16xf32>
    %11 = vector.multi_reduction <add>, %10, %cst_4 [1] : vector<16x256xf32> to vector<16xf32>
    %12 = vector.shape_cast %11 : vector<16xf32> to vector<16x1xf32>
    %cst_5 = arith.constant 2.560000e+02 : f32
    %13 = vector.broadcast %cst_5 : f32 to vector<16x1xf32>
    %14 = arith.divf %12, %13 : vector<16x1xf32>
    %c1 = arith.constant 1 : index
    %c0_6 = arith.constant 0 : index
    %15 = vector.load %arg3[%c1, %c0_6] : memref<3x2048xf32, #tpu.memory_space<vmem>>, vector<1x2048xf32>
    %16 = vector.broadcast %14 : vector<16x1xf32> to vector<16x2048xf32>
    %17 = vector.broadcast %15 : vector<1x2048xf32> to vector<16x2048xf32>
    %18 = arith.mulf %16, %17 : vector<16x2048xf32>
    %19 = arith.addf %9, %18 : vector<16x2048xf32>
    %20 = vector.extract_strided_slice %0 {offsets = [0, 512], sizes = [16, 256], strides = [1, 1]} : vector<16x768xf32> to vector<16x256xf32>
    %cst_7 = arith.constant dense<0.000000e+00> : vector<16xf32>
    %21 = vector.multi_reduction <add>, %20, %cst_7 [1] : vector<16x256xf32> to vector<16xf32>
    %22 = vector.shape_cast %21 : vector<16xf32> to vector<16x1xf32>
    %cst_8 = arith.constant 2.560000e+02 : f32
    %23 = vector.broadcast %cst_8 : f32 to vector<16x1xf32>
    %24 = arith.divf %22, %23 : vector<16x1xf32>
    %c2 = arith.constant 2 : index
    %c0_9 = arith.constant 0 : index
    %25 = vector.load %arg3[%c2, %c0_9] : memref<3x2048xf32, #tpu.memory_space<vmem>>, vector<1x2048xf32>
    %26 = vector.broadcast %24 : vector<16x1xf32> to vector<16x2048xf32>
    %27 = vector.broadcast %25 : vector<1x2048xf32> to vector<16x2048xf32>
    %28 = arith.mulf %26, %27 : vector<16x2048xf32>
    %29 = arith.addf %19, %28 : vector<16x2048xf32>
    %cst_10 = arith.constant 0.000000e+00 : f32
    %30 = vector.broadcast %cst_10 : f32 to vector<16x2048xf32>
    %31 = arith.maximumf %29, %30 : vector<16x2048xf32>
    %32 = arith.truncf %31 : vector<16x2048xf32> to vector<16x2048xbf16>
    %c0_11 = arith.constant 0 : index
    %c0_12 = arith.constant 0 : index
    %33 = vector.load %arg4[%c0_11, %c0_12] : memref<2048x1024xbf16, #tpu.memory_space<vmem>>, vector<2048x1024xbf16>
    %cst_13 = arith.constant dense<0.000000e+00> : vector<16x1024xf32>
    %34 = tpu.matmul %32, %33, %cst_13 {dimension_numbers = #tpu.dot_dimension_numbers<[1], [0], [0], [1], [0, 0, 1, 1], [], []>} : vector<16x2048xbf16>, vector<2048x1024xbf16>, vector<16x1024xf32> -> vector<16x1024xf32>
    %c0_14 = arith.constant 0 : index
    %c0_15 = arith.constant 0 : index
    %35 = vector.load %arg2[%c0_14, %c0_15] : memref<16x4xf32, #tpu.memory_space<vmem>>, vector<16x4xf32>
    %36 = vector.extract_strided_slice %35 {offsets = [0, 0], sizes = [16, 1], strides = [1, 1]} : vector<16x4xf32> to vector<16x1xf32>
    %c0_16 = arith.constant 0 : index
    %c0_17 = arith.constant 0 : index
    %37 = vector.load %arg5[%c0_16, %c0_17] : memref<4x1024xf32, #tpu.memory_space<vmem>>, vector<1x1024xf32>
    %38 = vector.broadcast %36 : vector<16x1xf32> to vector<16x1024xf32>
    %39 = vector.broadcast %37 : vector<1x1024xf32> to vector<16x1024xf32>
    %40 = arith.mulf %38, %39 : vector<16x1024xf32>
    %41 = arith.addf %34, %40 : vector<16x1024xf32>
    %42 = vector.extract_strided_slice %35 {offsets = [0, 1], sizes = [16, 1], strides = [1, 1]} : vector<16x4xf32> to vector<16x1xf32>
    %c1_18 = arith.constant 1 : index
    %c0_19 = arith.constant 0 : index
    %43 = vector.load %arg5[%c1_18, %c0_19] : memref<4x1024xf32, #tpu.memory_space<vmem>>, vector<1x1024xf32>
    %44 = vector.broadcast %42 : vector<16x1xf32> to vector<16x1024xf32>
    %45 = vector.broadcast %43 : vector<1x1024xf32> to vector<16x1024xf32>
    %46 = arith.mulf %44, %45 : vector<16x1024xf32>
    %47 = arith.addf %41, %46 : vector<16x1024xf32>
    %48 = vector.extract_strided_slice %35 {offsets = [0, 2], sizes = [16, 1], strides = [1, 1]} : vector<16x4xf32> to vector<16x1xf32>
    %c2_20 = arith.constant 2 : index
    %c0_21 = arith.constant 0 : index
    %49 = vector.load %arg5[%c2_20, %c0_21] : memref<4x1024xf32, #tpu.memory_space<vmem>>, vector<1x1024xf32>
    %50 = vector.broadcast %48 : vector<16x1xf32> to vector<16x1024xf32>
    %51 = vector.broadcast %49 : vector<1x1024xf32> to vector<16x1024xf32>
    %52 = arith.mulf %50, %51 : vector<16x1024xf32>
    %53 = arith.addf %47, %52 : vector<16x1024xf32>
    %54 = vector.extract_strided_slice %35 {offsets = [0, 3], sizes = [16, 1], strides = [1, 1]} : vector<16x4xf32> to vector<16x1xf32>
    %c3 = arith.constant 3 : index
    %c0_22 = arith.constant 0 : index
    %55 = vector.load %arg5[%c3, %c0_22] : memref<4x1024xf32, #tpu.memory_space<vmem>>, vector<1x1024xf32>
    %56 = vector.broadcast %54 : vector<16x1xf32> to vector<16x1024xf32>
    %57 = vector.broadcast %55 : vector<1x1024xf32> to vector<16x1024xf32>
    %58 = arith.mulf %56, %57 : vector<16x1024xf32>
    %59 = arith.addf %53, %58 : vector<16x1024xf32>
    %c0_23 = arith.constant 0 : index
    %c0_24 = arith.constant 0 : index
    %60 = vector.load %arg6[%c0_23, %c0_24] : memref<1x1024xf32, #tpu.memory_space<vmem>>, vector<1x1024xf32>
    %61 = vector.broadcast %60 : vector<1x1024xf32> to vector<16x1024xf32>
    %62 = arith.addf %59, %61 : vector<16x1024xf32>
    %cst_25 = arith.constant 0.000000e+00 : f32
    %63 = vector.broadcast %cst_25 : f32 to vector<16x1024xf32>
    %64 = arith.maximumf %62, %63 : vector<16x1024xf32>
    %65 = arith.truncf %64 : vector<16x1024xf32> to vector<16x1024xbf16>
    %c0_26 = arith.constant 0 : index
    %c0_27 = arith.constant 0 : index
    %66 = vector.load %arg7[%c0_26, %c0_27] : memref<1024x512xbf16, #tpu.memory_space<vmem>>, vector<1024x512xbf16>
    %cst_28 = arith.constant dense<0.000000e+00> : vector<16x512xf32>
    %67 = tpu.matmul %65, %66, %cst_28 {dimension_numbers = #tpu.dot_dimension_numbers<[1], [0], [0], [1], [0, 0, 1, 1], [], []>} : vector<16x1024xbf16>, vector<1024x512xbf16>, vector<16x512xf32> -> vector<16x512xf32>
    %c0_29 = arith.constant 0 : index
    %c0_30 = arith.constant 0 : index
    %68 = vector.load %arg8[%c0_29, %c0_30] : memref<1x512xf32, #tpu.memory_space<vmem>>, vector<1x512xf32>
    %69 = vector.broadcast %68 : vector<1x512xf32> to vector<16x512xf32>
    %70 = arith.addf %67, %69 : vector<16x512xf32>
    %cst_31 = arith.constant 0.000000e+00 : f32
    %71 = vector.broadcast %cst_31 : f32 to vector<16x512xf32>
    %72 = arith.maximumf %70, %71 : vector<16x512xf32>
    %73 = arith.truncf %72 : vector<16x512xf32> to vector<16x512xbf16>
    %c0_32 = arith.constant 0 : index
    %c0_33 = arith.constant 0 : index
    %74 = vector.load %arg9[%c0_32, %c0_33] : memref<512x256xbf16, #tpu.memory_space<vmem>>, vector<512x256xbf16>
    %cst_34 = arith.constant dense<0.000000e+00> : vector<16x256xf32>
    %75 = tpu.matmul %73, %74, %cst_34 {dimension_numbers = #tpu.dot_dimension_numbers<[1], [0], [0], [1], [0, 0, 1, 1], [], []>} : vector<16x512xbf16>, vector<512x256xbf16>, vector<16x256xf32> -> vector<16x256xf32>
    %c0_35 = arith.constant 0 : index
    %c0_36 = arith.constant 0 : index
    %76 = vector.load %arg10[%c0_35, %c0_36] : memref<1x256xf32, #tpu.memory_space<vmem>>, vector<1x256xf32>
    %77 = vector.broadcast %76 : vector<1x256xf32> to vector<16x256xf32>
    %78 = arith.addf %75, %77 : vector<16x256xf32>
    %79 = arith.mulf %78, %78 : vector<16x256xf32>
    %cst_37 = arith.constant dense<0.000000e+00> : vector<16xf32>
    %80 = vector.multi_reduction <add>, %79, %cst_37 [1] : vector<16x256xf32> to vector<16xf32>
    %81 = vector.shape_cast %80 : vector<16xf32> to vector<16x1xf32>
    %cst_38 = arith.constant 1.000000e-24 : f32
    %82 = vector.broadcast %cst_38 : f32 to vector<16x1xf32>
    %83 = arith.maximumf %81, %82 : vector<16x1xf32>
    %84 = math.rsqrt %83 : vector<16x1xf32>
    %85 = vector.broadcast %84 : vector<16x1xf32> to vector<16x256xf32>
    %86 = arith.mulf %78, %85 : vector<16x256xf32>
    %c0_39 = arith.constant 0 : index
    %c0_40 = arith.constant 0 : index
    %87 = vector.load %arg11[%c0_39, %c0_40] : memref<16x256xf32, #tpu.memory_space<vmem>>, vector<16x256xf32>
    tpu.vector_store %arg11[%c0_39, %c0_40], %86 {strides = array<i32>} : memref<16x256xf32, #tpu.memory_space<vmem>>, vector<16x256xf32>,
    return
  }
  func.func @transform_0(%arg0: i32) -> (i32, i32) {
    %c0_i32 = arith.constant 0 : i32
    %c0_i32_0 = arith.constant 0 : i32
    return %arg0, %c0_i32 : i32, i32
  }
  func.func @transform_1(%arg0: i32) -> (i32, i32) {
    %c0_i32 = arith.constant 0 : i32
    %c0_i32_0 = arith.constant 0 : i32
    return %arg0, %c0_i32 : i32, i32
  }
  func.func @transform_2(%arg0: i32) -> (i32, i32) {
    %c0_i32 = arith.constant 0 : i32
    %c0_i32_0 = arith.constant 0 : i32
    %c0_i32_1 = arith.constant 0 : i32
    return %c0_i32, %c0_i32_0 : i32, i32
  }
  func.func @transform_3(%arg0: i32) -> (i32, i32) {
    %c0_i32 = arith.constant 0 : i32
    %c0_i32_0 = arith.constant 0 : i32
    %c0_i32_1 = arith.constant 0 : i32
    return %c0_i32, %c0_i32_0 : i32, i32
  }
  func.func @transform_4(%arg0: i32) -> (i32, i32) {
    %c0_i32 = arith.constant 0 : i32
    %c0_i32_0 = arith.constant 0 : i32
    %c0_i32_1 = arith.constant 0 : i32
    return %c0_i32, %c0_i32_0 : i32, i32
  }
  func.func @transform_5(%arg0: i32) -> (i32, i32) {
    %c0_i32 = arith.constant 0 : i32
    %c0_i32_0 = arith.constant 0 : i32
    %c0_i32_1 = arith.constant 0 : i32
    return %c0_i32, %c0_i32_0 : i32, i32
  }
  func.func @transform_6(%arg0: i32) -> (i32, i32) {
    %c0_i32 = arith.constant 0 : i32
    %c0_i32_0 = arith.constant 0 : i32
    %c0_i32_1 = arith.constant 0 : i32
    return %c0_i32, %c0_i32_0 : i32, i32
  }
  func.func @transform_7(%arg0: i32) -> (i32, i32) {
    %c0_i32 = arith.constant 0 : i32
    %c0_i32_0 = arith.constant 0 : i32
    %c0_i32_1 = arith.constant 0 : i32
    return %c0_i32, %c0_i32_0 : i32, i32
  }
  func.func @transform_8(%arg0: i32) -> (i32, i32) {
    %c0_i32 = arith.constant 0 : i32
    %c0_i32_0 = arith.constant 0 : i32
    %c0_i32_1 = arith.constant 0 : i32
    return %c0_i32, %c0_i32_0 : i32, i32
  }
  func.func @transform_9(%arg0: i32) -> (i32, i32) {
    %c0_i32 = arith.constant 0 : i32
    %c0_i32_0 = arith.constant 0 : i32
    %c0_i32_1 = arith.constant 0 : i32
    return %c0_i32, %c0_i32_0 : i32, i32
  }
  func.func @transform_10(%arg0: i32) -> (i32, i32) {
    %c0_i32 = arith.constant 0 : i32
    %c0_i32_0 = arith.constant 0 : i32
    return %arg0, %c0_i32 : i32, i32
  }
}

</mosaic_0001>

<bundles_post_ra>
// kernel: tpu_custom_call.1
= control target key start
LH: loop header
LB: loop body
LE: loop exit
PB: predicated region body
PF: predicated region fallthrough
CT: control target
= control target key end

     0   :  { %15 = vsyncpa [#allocation3], 0  ;;  %s14461_s0 = inlined_call_operand.hbm [shape: f32[16,768], index: 0, kind: input, shape index: {}]   ;;  %s14462_s1 = inlined_call_operand.vmem [shape: f32[16,4], index: 1, kind: input, shape index: {}]   ;;  %s14463_s2 = inlined_call_operand.hbm [shape: f32[3,2048], index: 2, kind: input, shape index: {}]   ;;  %s14464_s3 = inlined_call_operand.hbm [shape: bf16[2048,1024], index: 3, kind: input, shape index: {}]   ;;  %s14465_s4 = inlined_call_operand.hbm [shape: f32[4,1024], index: 4, kind: input, shape index: {}]   ;;  %s14466_s5 = inlined_call_operand.hbm [shape: f32[1,1024], index: 5, kind: input, shape index: {}]   ;;  %s14467_s6 = inlined_call_operand.hbm [shape: bf16[1024,512], index: 6, kind: input, shape index: {}]   ;;  %s14468_s7 = inlined_call_operand.hbm [shape: f32[1,512], index: 7, kind: input, shape index: {}]   ;;  %s14469_s8 = inlined_call_operand.hbm [shape: bf16[512,256], index: 8, kind: input, shape index: {}]   ;;  %s14470_s9 = inlined_call_operand.hbm [shape: f32[1,256], index: 9, kind: input, shape index: {}]   ;;  %s14471_s10 = inlined_call_operand.hbm [shape: f32[16,256], index: 10, kind: output, shape index: {}]  }
   0x1   :  { %16 = vsyncpa [#allocation6], 0 }
   0x2   :  { %17 = vsyncpa [#allocation9], 0 }
   0x3   :  { %18 = vsyncpa [#allocation12], 0 }
   0x4   :  { %19 = vsyncpa [#allocation15], 0 }
   0x5   :  { %20 = vsyncpa [#allocation4], 0  ;;  %s13273_s13 = smov [#allocation5]   ;;  %s13274_s15 = smov [#allocation8]  }
   0x6   :  { %s41_s14 = sshll.u32 %s13273_s13, 4  ;;  %s63_s16 = sshll.u32 %s13274_s15, 4  ;;  %s42_s14 = int_to_ptr.vmem [resolvable:$true] %s41_s14  ;;  %s64_s16 = int_to_ptr.vmem [resolvable:$true] %s63_s16 }
   0x7   :  { %s13041_s19 = scalar_lea.hbm %s14463_s2, 1024 }
   0x8   :  { %p13042_p0 = scmp.ne.s32.totalorder %s14463_s2, %s13041_s19  ;;  %p13045_p1 = scmp.lt.u32.totalorder %s13041_s19, %s14463_s2 }
   0xa   :  { %p13047_p2 = pnand %p13045_p1, %p13042_p0 }
   0xc   :  { %13050 = shalt.err (!%p13047_p2)
}
   0xd   :  { %s13051_s24 = scalar_lea.vmem %s42_s14, 1024  ;;  %p13056_p4 = scmp.lt.s32.totalorder %s42_s14, %s42_s14 }
   0xe   :  { %p13052_p3 = scmp.ne.s32.totalorder %s42_s14, %s13051_s24  ;;  %p13057_p5 = scmp.lt.s32.totalorder %s13051_s24, %s13051_s24 }
  0x10   :  { %p13058_p6 = por %p13057_p5, %p13056_p4 }
  0x12   :  { %p13059_p7 = pnand %p13058_p6, %p13052_p3 }
  0x14   :  { %13062 = shalt.err (!%p13059_p7)
}
  0x15   :  { %44 = dma.hbm_to_vmem [thread:$0]  %s14463_s2, 1024, %s42_s14, [#allocation6]  }
  0x16   :  { %s13063_s29 = scalar_lea.hbm %s14465_s4, 512 }
  0x17   :  { %p13064_p8 = scmp.ne.s32.totalorder %s14465_s4, %s13063_s29  ;;  %p13067_p9 = scmp.lt.u32.totalorder %s13063_s29, %s14465_s4 }
  0x19   :  { %p13069_p10 = pnand %p13067_p9, %p13064_p8 }
  0x1b   :  { %13072 = shalt.err (!%p13069_p10)
}
  0x1c   :  { %s13073_s15 = scalar_lea.vmem %s64_s16, 512  ;;  %p13078_p12 = scmp.lt.s32.totalorder %s64_s16, %s64_s16 }
  0x1d   :  { %p13074_p11 = scmp.ne.s32.totalorder %s64_s16, %s13073_s15  ;;  %p13079_p13 = scmp.lt.s32.totalorder %s13073_s15, %s13073_s15 }
  0x1f   :  { %p13080_p0 = por %p13079_p13, %p13078_p12 }
  0x21   :  { %p13081_p1 = pnand %p13080_p0, %p13074_p11 }
  0x23   :  { %13084 = shalt.err (!%p13081_p1)
}
  0x24   :  { %66 = dma.hbm_to_vmem [thread:$0]  %s14465_s4, 512, %s64_s16, [#allocation9]  }
  0x25   :  { %s13275_s17 = smov [#allocation11]   ;;  %s13085_s21 = scalar_lea.hbm %s14467_s6, 32768 }
  0x26   :  { %s82_s18 = sshll.u32 %s13275_s17, 4  ;;  %p13086_p2 = scmp.ne.s32.totalorder %s14467_s6, %s13085_s21  ;;  %s83_s18 = int_to_ptr.vmem [resolvable:$true] %s82_s18 }
  0x27   :  { %p13089_p3 = scmp.lt.u32.totalorder %s13085_s21, %s14467_s6 }
  0x29   :  { %p13091_p4 = pnand %p13089_p3, %p13086_p2 }
  0x2b   :  { %13094 = shalt.err (!%p13091_p4)
}
  0x2c   :  { %s13095_s26 = scalar_lea.vmem %s83_s18, 32768  ;;  %p13100_p6 = scmp.lt.s32.totalorder %s83_s18, %s83_s18 }
  0x2d   :  { %p13096_p5 = scmp.ne.s32.totalorder %s83_s18, %s13095_s26  ;;  %p13101_p7 = scmp.lt.s32.totalorder %s13095_s26, %s13095_s26 }
  0x2f   :  { %p13102_p8 = por %p13101_p7, %p13100_p6 }
  0x31   :  { %p13103_p9 = pnand %p13102_p8, %p13096_p5 }
  0x33   :  { %13106 = shalt.err (!%p13103_p9)
}
  0x34   :  { %s13276_s4 = smov 256   ;;  %s13277_s16 = smov 16  }
  0x35   :  { %88 = dma.hbm_to_vmem [thread:$0]  %s14467_s6, 32768, %s83_s18, [#allocation12], %s13276_s4, %s13276_s4, %s13277_s16  }
  0x36   :  { %s13278_s29 = smov [#allocation14]   ;;  %s13107_s13 = scalar_lea.hbm %s14469_s8, 8192 }
  0x37   :  { %s104_s30 = sshll.u32 %s13278_s29, 4  ;;  %p13108_p10 = scmp.ne.s32.totalorder %s14469_s8, %s13107_s13  ;;  %s105_s30 = int_to_ptr.vmem [resolvable:$true] %s104_s30 }
  0x38   :  { %p13111_p11 = scmp.lt.u32.totalorder %s13107_s13, %s14469_s8 }
  0x3a   :  { %p13113_p12 = pnand %p13111_p11, %p13108_p10 }
  0x3c   :  { %13116 = shalt.err (!%p13113_p12)
}
  0x3d   :  { %s13117_s19 = scalar_lea.vmem %s105_s30, 8192  ;;  %p13122_p0 = scmp.lt.s32.totalorder %s105_s30, %s105_s30 }
  0x3e   :  { %p13118_p13 = scmp.ne.s32.totalorder %s105_s30, %s13117_s19  ;;  %p13123_p1 = scmp.lt.s32.totalorder %s13117_s19, %s13117_s19 }
  0x40   :  { %p13124_p2 = por %p13123_p1, %p13122_p0 }
  0x42   :  { %p13125_p3 = pnand %p13124_p2, %p13118_p13 }
  0x44   :  { %13128 = shalt.err (!%p13125_p3)
}
  0x45   :  { %s13279_s6 = smov 128   ;;  %s13280_s18 = smov 8  }
  0x46   :  { %110 = dma.hbm_to_vmem [thread:$0]  %s14469_s8, 8192, %s105_s30, [#allocation15], %s13279_s6, %s13279_s6, %s13280_s18  }
  0x47   :  { %s13281_s22 = smov [#allocation2]   ;;  %s13129_s26 = scalar_lea.hbm %s14461_s0, 1536 }
  0x48   :  { %s26_s23 = sshll.u32 %s13281_s22, 4  ;;  %p13130_p4 = scmp.ne.s32.totalorder %s14461_s0, %s13129_s26  ;;  %s27_s23 = int_to_ptr.vmem [resolvable:$true] %s26_s23 }
  0x49   :  { %p13133_p5 = scmp.lt.u32.totalorder %s13129_s26, %s14461_s0 }
  0x4b   :  { %p13135_p6 = pnand %p13133_p5, %p13130_p4 }
  0x4d   :  { %13138 = shalt.err (!%p13135_p6)
}
  0x4e   :  { %s13139_s12 = scalar_lea.vmem %s27_s23, 1536  ;;  %p13144_p8 = scmp.lt.s32.totalorder %s27_s23, %s27_s23 }
  0x4f   :  { %p13140_p7 = scmp.ne.s32.totalorder %s27_s23, %s13139_s12  ;;  %p13145_p9 = scmp.lt.s32.totalorder %s13139_s12, %s13139_s12 }
  0x51   :  { %p13146_p10 = por %p13145_p9, %p13144_p8 }
  0x53   :  { %p13147_p11 = pnand %p13146_p10, %p13140_p7 }
  0x55   :  { %13150 = shalt.err (!%p13147_p11)
}
  0x56   :  { %s13282_s8 = smov 768   ;;  %s13283_s30 = smov 48  }
  0x57   :  { %32 = dma.hbm_to_vmem [thread:$0]  %s14461_s0, 1536, %s27_s23, [#allocation3], %s13282_s8, %s13282_s8, %s13283_s30  }
  0x58   :  { %s13284_s2 = smov [#allocation7]   ;;  %s13151_s6 = scalar_lea.hbm %s14464_s3, 131072 }
  0x59   :  { %s50_s14 = sshll.u32 %s13284_s2, 4  ;;  %p13152_p12 = scmp.ne.s32.totalorder %s14464_s3, %s13151_s6  ;;  %s51_s14 = int_to_ptr.vmem [resolvable:$true] %s50_s14 }
  0x5a   :  { %p13155_p13 = scmp.lt.u32.totalorder %s13151_s6, %s14464_s3 }
  0x5c   :  { %p13157_p0 = pnand %p13155_p13, %p13152_p12 }
  0x5e   :  { %13160 = shalt.err (!%p13157_p0)
}
  0x5f   :  { %s13161_s24 = scalar_lea.vmem %s51_s14, 131072  ;;  %p13166_p2 = scmp.lt.s32.totalorder %s51_s14, %s51_s14 }
  0x60   :  { %p13162_p1 = scmp.ne.s32.totalorder %s51_s14, %s13161_s24  ;;  %p13167_p3 = scmp.lt.s32.totalorder %s13161_s24, %s13161_s24 }
  0x62   :  { %p13168_p4 = por %p13167_p3, %p13166_p2 }
  0x64   :  { %p13169_p5 = pnand %p13168_p4, %p13162_p1 }
  0x66   :  { %13172 = shalt.err (!%p13169_p5)
}
  0x67   :  { %s13285_s0 = smov 512   ;;  %s13286_s23 = smov 32  }
  0x68   :  { %56 = dma.hbm_to_vmem [thread:$0]  %s14464_s3, 131072, %s51_s14, [#allocation6], %s13285_s0, %s13285_s0, %s13286_s23  }
  0x69   :  { %s13287_s27 = smov [#allocation10]   ;;  %s13288_s29 = smov [#allocation13]  }
  0x6a   :  { %s73_s28 = sshll.u32 %s13287_s27, 4  ;;  %s95_s11 = sshll.u32 %s13288_s29, 4  ;;  %s74_s28 = int_to_ptr.vmem [resolvable:$true] %s73_s28  ;;  %s96_s11 = int_to_ptr.vmem [resolvable:$true] %s95_s11 }
  0x6b   :  { %s13173_s30 = scalar_lea.hbm %s14466_s5, 128 }
  0x6c   :  { %p13174_p6 = scmp.ne.s32.totalorder %s14466_s5, %s13173_s30  ;;  %p13177_p7 = scmp.lt.u32.totalorder %s13173_s30, %s14466_s5 }
  0x6e   :  { %p13179_p8 = pnand %p13177_p7, %p13174_p6 }
  0x70   :  { %13182 = shalt.err (!%p13179_p8)
}
  0x71   :  { %s13183_s3 = scalar_lea.vmem %s74_s28, 128  ;;  %p13188_p10 = scmp.lt.s32.totalorder %s74_s28, %s74_s28 }
  0x72   :  { %p13184_p9 = scmp.ne.s32.totalorder %s74_s28, %s13183_s3  ;;  %p13189_p11 = scmp.lt.s32.totalorder %s13183_s3, %s13183_s3 }
  0x74   :  { %p13190_p12 = por %p13189_p11, %p13188_p10 }
  0x76   :  { %p13191_p13 = pnand %p13190_p12, %p13184_p9 }
  0x78   :  { %13194 = shalt.err (!%p13191_p13)
}
  0x79   :  { %76 = dma.hbm_to_vmem [thread:$0]  %s14466_s5, 128, %s74_s28, [#allocation9]  }
  0x7a   :  { %s13195_s20 = scalar_lea.hbm %s14468_s7, 64 }
  0x7b   :  { %p13196_p0 = scmp.ne.s32.totalorder %s14468_s7, %s13195_s20  ;;  %p13199_p1 = scmp.lt.u32.totalorder %s13195_s20, %s14468_s7 }
  0x7d   :  { %p13201_p2 = pnand %p13199_p1, %p13196_p0 }
  0x7f   :  { %13204 = shalt.err (!%p13201_p2)
}
  0x80   :  { %s13205_s23 = scalar_lea.vmem %s96_s11, 64  ;;  %p13210_p4 = scmp.lt.s32.totalorder %s96_s11, %s96_s11 }
  0x81   :  { %p13206_p3 = scmp.ne.s32.totalorder %s96_s11, %s13205_s23  ;;  %p13211_p5 = scmp.lt.s32.totalorder %s13205_s23, %s13205_s23 }
  0x83   :  { %p13212_p6 = por %p13211_p5, %p13210_p4 }
  0x85   :  { %p13213_p7 = pnand %p13212_p6, %p13206_p3 }
  0x87   :  { %13216 = shalt.err (!%p13213_p7)
}
  0x88   :  { %98 = dma.hbm_to_vmem [thread:$0]  %s14468_s7, 64, %s96_s11, [#allocation12]  }
  0x89   :  { %s13289_s26 = smov [#allocation16]   ;;  %s13217_s12 = scalar_lea.hbm %s14470_s9, 32 }
  0x8a   :  { %s117_s27 = sshll.u32 %s13289_s26, 4  ;;  %p13218_p8 = scmp.ne.s32.totalorder %s14470_s9, %s13217_s12  ;;  %s118_s27 = int_to_ptr.vmem [resolvable:$true] %s117_s27 }
  0x8b   :  { %p13221_p9 = scmp.lt.u32.totalorder %s13217_s12, %s14470_s9 }
  0x8d   :  { %p13223_p10 = pnand %p13221_p9, %p13218_p8 }
  0x8f   :  { %13226 = shalt.err (!%p13223_p10)
}
  0x90   :  { %s13227_s2 = scalar_lea.vmem %s118_s27, 32  ;;  %p13232_p12 = scmp.lt.s32.totalorder %s118_s27, %s118_s27 }
  0x91   :  { %p13228_p11 = scmp.ne.s32.totalorder %s118_s27, %s13227_s2  ;;  %p13233_p13 = scmp.lt.s32.totalorder %s13227_s2, %s13227_s2 }
  0x93   :  { %p13234_p0 = por %p13233_p13, %p13232_p12 }
  0x95   :  { %p13235_p1 = pnand %p13234_p0, %p13228_p11 }
  0x97   :  { %13238 = shalt.err (!%p13235_p1)
}
  0x98   :  { %120 = dma.hbm_to_vmem [thread:$0]  %s14470_s9, 32, %s118_s27, [#allocation15]  }
  0x99   :  { %13261 = dma.done.wait [#allocation3], 1536  }
  0x9a   :  { %13262 = vsyncadd [#allocation3], 4294965760 }
  0x9b   :  { %13263 = dma.done.wait [#allocation6], 132096  }
  0x9c   :  { %13264 = vsyncadd [#allocation6], 4294835200 }
  0x9d   :  { %13265 = dma.done.wait [#allocation9], 640  }
  0x9e   :  { %13266 = vsyncadd [#allocation9], 4294966656 }
  0x9f   :  { %13267 = dma.done.wait [#allocation12], 32832  }
  0xa0   :  { %13268 = vsyncadd [#allocation12], 4294934464 }
  0xa1   :  { %13269 = dma.done.wait [#allocation15], 8224  }
  0xa2   :  { %13270 = vsyncadd [#allocation15], 4294959072  ;;  %v150_v0 = vld [vmem:[#allocation2 + $0x10] sm:$0xff]  ;;  %v151_v1 = vld [vmem:[#allocation2 + $0x18] sm:$0xff] }
  0xa3   :  { %v148_v2 = vld [vmem:[#allocation2] sm:$0xff]  ;;  %v286_v3 = vadd.f32 %v151_v1, %v150_v0  ;;  %v149_v4 = vld [vmem:[#allocation2 + $0x8] sm:$0xff]  ;;  %v154_v8 = vld [vmem:[#allocation2 + $0x30] sm:$0xff] }
  0xa4   :  { %v156_v5 = vld [vmem:[#allocation2 + $0x40] sm:$0xff]  ;;  %v157_v6 = vld [vmem:[#allocation2 + $0x48] sm:$0xff]  ;;  %v160_v7 = vadd.f32 %v149_v4, %v148_v2  ;;  %v155_v9 = vld [vmem:[#allocation2 + $0x38] sm:$0xff] }
  0xa5   :  { %v158_v10 = vld [vmem:[#allocation2 + $0x50] sm:$0xff]  ;;  %287 = vadd.xlane.f32.xlu1 %v286_v3  ;;  %v289_v11 = vadd.f32 %v157_v6, %v156_v5  ;;  %v159_v12 = vld [vmem:[#allocation2 + $0x58] sm:$0xff]  ;;  %v152_v13 = vld [vmem:[#allocation2 + $0x20] sm:$0xff]  ;;  %v163_v15 = vadd.f32 %v155_v9, %v154_v8 }
  0xa6   :  { %v153_v14 = vld [vmem:[#allocation2 + $0x28] sm:$0xff]  ;;  %161 = vadd.xlane.f32.xlu0 %v160_v7  ;;  %v650_v16 = vld [vmem:[#allocation7] sm:$0xff]  ;;  %v447_v30 = vadd.f32 %v159_v12, %v158_v10 }
  0xa7   :  { %v654_v17 = vld [vmem:[#allocation7 + $0x20] sm:$0xff]  ;;  %v444_v35 = vadd.f32 %v153_v14, %v152_v13 }
  0xa8   :  { %v778_v18 = vld [vmem:[#allocation7 + $0x400] sm:$0xff]  ;;  %v11011_v19 = vcombine.high %v650_v16, %v654_v17  ;;  %v11010_v21 = vcombine.low %v650_v16, %v654_v17 }
  0xa9   :  { %v782_v20 = vld [vmem:[#allocation7 + $0x420] sm:$0xff]  ;;  %290 = vadd.xlane.f32.xlu1 %v289_v11 }
  0xaa   :  { %v658_v22 = vld [vmem:[#allocation7 + $0x40] sm:$0xff]  ;;  %v11139_v24 = vcombine.high %v778_v18, %v782_v20  ;;  %v11138_v25 = vcombine.low %v778_v18, %v782_v20  ;;  %6864 = vmatprep.subr.bf16.mxu1 %v11011_v19  ;;  %164 = vadd.xlane.f32.xlu0 %v163_v15 }
  0xab   :  { %v662_v23 = vld [vmem:[#allocation7 + $0x60] sm:$0xff]  ;;  %6865 = vmatpush1.bf16.msra.mxu1 %v11010_v21 }
  0xac   :  { %v11019_v26 = vcombine.high %v658_v22, %v662_v23  ;;  %v786_v27 = vld [vmem:[#allocation7 + $0x440] sm:$0xff]  ;;  %6907 = vmatprep.subr.bf16.mxu0 %v11139_v24  ;;  %v11018_v36 = vcombine.low %v658_v22, %v662_v23 }
  0xad   :  { %v790_v28 = vld [vmem:[#allocation7 + $0x460] sm:$0xff]  ;;  %6908 = vmatpush1.bf16.msra.mxu0 %v11138_v25  ;;  %448 = vadd.xlane.f32.xlu1 %v447_v30 }
  0xae   :  { %v666_v29 = vld [vmem:[#allocation7 + $0x80] sm:$0xff]  ;;  %v11147_v31 = vcombine.high %v786_v27, %v790_v28  ;;  %v11146_v37 = vcombine.low %v786_v27, %v790_v28  ;;  %6866 = vmatprep.subr.bf16.mxu1 %v11019_v26  ;;  %445 = vadd.xlane.f32.xlu0 %v444_v35  ;;  %v13465_v28 = vld [vmem:[#allocation7 + $0x8] sm:$0xff] }
  0xaf   :  { %v670_v32 = vld [vmem:[#allocation7 + $0xa0] sm:$0xff]  ;;  %6867 = vmatpush1.bf16.msra.mxu1 %v11018_v36 }
  0xb0   :  { %v794_v33 = vld [vmem:[#allocation7 + $0x480] sm:$0xff]  ;;  %6909 = vmatprep.subr.bf16.mxu0 %v11147_v31  ;;  %v11027_v38 = vcombine.high %v666_v29, %v670_v32  ;;  %v11026_v44 = vcombine.low %v666_v29, %v670_v32  ;;  %v13467_v31 = vld [vmem:[#allocation7 + $0x28] sm:$0xff] }
  0xb1   :  { %v798_v34 = vld [vmem:[#allocation7 + $0x4a0] sm:$0xff]  ;;  %6910 = vmatpush1.bf16.msra.mxu0 %v11146_v37 }
  0xb2   :  { %v11155_v39 = vcombine.high %v794_v33, %v798_v34  ;;  %v674_v40 = vld [vmem:[#allocation7 + $0xc0] sm:$0xff]  ;;  %v11154_v45 = vcombine.low %v794_v33, %v798_v34  ;;  %6868 = vmatprep.subr.bf16.mxu1 %v11027_v38 }
  0xb3   :  { %v678_v41 = vld [vmem:[#allocation7 + $0xe0] sm:$0xff]  ;;  %6869 = vmatpush1.bf16.msra.mxu1 %v11026_v44 }
  0xb4   :  { %v802_v42 = vld [vmem:[#allocation7 + $0x4c0] sm:$0xff]  ;;  %6911 = vmatprep.subr.bf16.mxu0 %v11155_v39  ;;  %v11035_v46 = vcombine.high %v674_v40, %v678_v41  ;;  %v11034_v52 = vcombine.low %v674_v40, %v678_v41 }
  0xb5   :  { %v806_v43 = vld [vmem:[#allocation7 + $0x4e0] sm:$0xff]  ;;  %6912 = vmatpush1.bf16.msra.mxu0 %v11154_v45 }
  0xb6   :  { %v11163_v47 = vcombine.high %v802_v42, %v806_v43  ;;  %v682_v48 = vld [vmem:[#allocation7 + $0x100] sm:$0xff]  ;;  %v11162_v53 = vcombine.low %v802_v42, %v806_v43  ;;  %6870 = vmatprep.subr.bf16.mxu1 %v11035_v46 }
  0xb7   :  { %v686_v49 = vld [vmem:[#allocation7 + $0x120] sm:$0xff]  ;;  %6871 = vmatpush1.bf16.msra.mxu1 %v11034_v52 }
  0xb8   :  { %v810_v50 = vld [vmem:[#allocation7 + $0x500] sm:$0xff]  ;;  %6913 = vmatprep.subr.bf16.mxu0 %v11163_v47  ;;  %v11043_v54 = vcombine.high %v682_v48, %v686_v49  ;;  %v11042_v60 = vcombine.low %v682_v48, %v686_v49 }
  0xb9   :  { %v814_v51 = vld [vmem:[#allocation7 + $0x520] sm:$0xff]  ;;  %6914 = vmatpush1.bf16.msra.mxu0 %v11162_v53 }
  0xba   :  { %v11171_v55 = vcombine.high %v810_v50, %v814_v51  ;;  %v690_v56 = vld [vmem:[#allocation7 + $0x140] sm:$0xff]  ;;  %v11170_v61 = vcombine.low %v810_v50, %v814_v51  ;;  %6872 = vmatprep.subr.bf16.mxu1 %v11043_v54 }
  0xbb   :  { %v694_v57 = vld [vmem:[#allocation7 + $0x160] sm:$0xff]  ;;  %6873 = vmatpush1.bf16.msra.mxu1 %v11042_v60 }
  0xbc   :  { %v818_v58 = vld [vmem:[#allocation7 + $0x540] sm:$0xff]  ;;  %6915 = vmatprep.subr.bf16.mxu0 %v11171_v55  ;;  %v11051_v62 = vcombine.high %v690_v56, %v694_v57  ;;  %v11050_v4 = vcombine.low %v690_v56, %v694_v57 }
  0xbd   :  { %v822_v59 = vld [vmem:[#allocation7 + $0x560] sm:$0xff]  ;;  %6916 = vmatpush1.bf16.msra.mxu0 %v11170_v61 }
  0xbe   :  { %v11179_v63 = vcombine.high %v818_v58, %v822_v59  ;;  %v698_v0 = vld [vmem:[#allocation7 + $0x180] sm:$0xff]  ;;  %v11178_v5 = vcombine.low %v818_v58, %v822_v59  ;;  %6874 = vmatprep.subr.bf16.mxu1 %v11051_v62 }
  0xbf   :  { %v702_v1 = vld [vmem:[#allocation7 + $0x1a0] sm:$0xff]  ;;  %6875 = vmatpush1.bf16.msra.mxu1 %v11050_v4 }
  0xc0   :  { %v826_v2 = vld [vmem:[#allocation7 + $0x580] sm:$0xff]  ;;  %6917 = vmatprep.subr.bf16.mxu0 %v11179_v63  ;;  %v11059_v6 = vcombine.high %v698_v0, %v702_v1  ;;  %v11058_v12 = vcombine.low %v698_v0, %v702_v1 }
  0xc1   :  { %v830_v3 = vld [vmem:[#allocation7 + $0x5a0] sm:$0xff]  ;;  %6918 = vmatpush1.bf16.msra.mxu0 %v11178_v5 }
  0xc2   :  { %v11187_v7 = vcombine.high %v826_v2, %v830_v3  ;;  %v706_v8 = vld [vmem:[#allocation7 + $0x1c0] sm:$0xff]  ;;  %v11186_v13 = vcombine.low %v826_v2, %v830_v3  ;;  %6876 = vmatprep.subr.bf16.mxu1 %v11059_v6 }
  0xc3   :  { %v710_v9 = vld [vmem:[#allocation7 + $0x1e0] sm:$0xff]  ;;  %6877 = vmatpush1.bf16.msra.mxu1 %v11058_v12 }
  0xc4   :  { %v834_v10 = vld [vmem:[#allocation7 + $0x5c0] sm:$0xff]  ;;  %6919 = vmatprep.subr.bf16.mxu0 %v11187_v7  ;;  %v11067_v18 = vcombine.high %v706_v8, %v710_v9  ;;  %v11066_v20 = vcombine.low %v706_v8, %v710_v9 }
  0xc5   :  { %v838_v11 = vld [vmem:[#allocation7 + $0x5e0] sm:$0xff]  ;;  %6920 = vmatpush1.bf16.msra.mxu0 %v11186_v13 }
  0xc6   :  { %v714_v14 = vld [vmem:[#allocation7 + $0x200] sm:$0xff]  ;;  %v11195_v19 = vcombine.high %v834_v10, %v838_v11  ;;  %v11194_v21 = vcombine.low %v834_v10, %v838_v11  ;;  %6878 = vmatprep.subr.bf16.mxu1 %v11067_v18 }
  0xc7   :  { %v718_v15 = vld [vmem:[#allocation7 + $0x220] sm:$0xff]  ;;  %6879 = vmatpush1.bf16.msra.mxu1 %v11066_v20 }
  0xc8   :  { %v842_v16 = vld [vmem:[#allocation7 + $0x600] sm:$0xff]  ;;  %6921 = vmatprep.subr.bf16.mxu0 %v11195_v19  ;;  %v11075_v29 = vcombine.high %v714_v14, %v718_v15  ;;  %v11074_v34 = vcombine.low %v714_v14, %v718_v15 }
  0xc9   :  { %v846_v17 = vld [vmem:[#allocation7 + $0x620] sm:$0xff]  ;;  %6922 = vmatpush1.bf16.msra.mxu0 %v11194_v21 }
  0xca   :  { %v722_v22 = vld [vmem:[#allocation7 + $0x240] sm:$0xff]  ;;  %v11203_v30 = vcombine.high %v842_v16, %v846_v17  ;;  %v11202_v35 = vcombine.low %v842_v16, %v846_v17  ;;  %6880 = vmatprep.subr.bf16.mxu1 %v11075_v29 }
  0xcb   :  { %v726_v23 = vld [vmem:[#allocation7 + $0x260] sm:$0xff]  ;;  %6881 = vmatpush1.bf16.msra.mxu1 %v11074_v34  ;;  %v1675_v34 = vld [vmem:[%s14462_s1 + $0x8] sm:$0xff] }
  0xcc   :  { %v850_v24 = vld [vmem:[#allocation7 + $0x640] sm:$0xff]  ;;  %6923 = vmatprep.subr.bf16.mxu0 %v11203_v30  ;;  %v11083_v40 = vcombine.high %v722_v22, %v726_v23  ;;  %v11082_v42 = vcombine.low %v722_v22, %v726_v23  ;;  %v13290_v30 = vmov 0  }
  0xcd   :  { %v854_v25 = vld [vmem:[#allocation7 + $0x660] sm:$0xff]  ;;  %6924 = vmatpush1.bf16.msra.mxu0 %v11202_v35  ;;  %12544 = vset.pattern.permute.xlu0 %v13290_v30  ;;  %v174_v35 = vlaneseq }
  0xce   :  { %v13461_v26 = vld [vmem:[#allocation7 + $0x800] sm:$0xff]  ;;  %v11211_v41 = vcombine.high %v850_v24, %v854_v25  ;;  %v11210_v43 = vcombine.low %v850_v24, %v854_v25  ;;  %6882 = vmatprep.subr.bf16.mxu1 %v11083_v40  ;;  %v11013_v25 = vcombine.high %v13465_v28, %v13467_v31  ;;  %12545 = vset.pattern.permute.xlu1 %v13290_v30 }
  0xcf   :  { %v13463_v27 = vld [vmem:[#allocation7 + $0x820] sm:$0xff]  ;;  %6883 = vmatpush1.bf16.msra.mxu1 %v11082_v42  ;;  %1684 = vperm.xlu1 %12545, %v1675_v34  }
  0xd0   :  { %v730_v36 = vld [vmem:[#allocation7 + $0x280] sm:$0xff]  ;;  %6925 = vmatprep.subr.bf16.mxu0 %v11211_v41  ;;  %v11267_v24 = vcombine.high %v13461_v26, %v13463_v27 }
  0xd1   :  { %v734_v37 = vld [vmem:[#allocation7 + $0x2a0] sm:$0xff]  ;;  %6926 = vmatpush1.bf16.msra.mxu0 %v11210_v43 }
  0xd2   :  { %v858_v38 = vld [vmem:[#allocation7 + $0x680] sm:$0xff]  ;;  %v11091_v44 = vcombine.high %v730_v36, %v734_v37  ;;  %v11090_v50 = vcombine.low %v730_v36, %v734_v37  ;;  %v175_v36 = vshrl.u32 %v174_v35, 7 }
  0xd3   :  { %v862_v39 = vld [vmem:[#allocation7 + $0x6a0] sm:$0xff] }
  0xd4   :  { %v11219_v45 = vcombine.high %v858_v38, %v862_v39  ;;  %v738_v46 = vld [vmem:[#allocation7 + $0x2c0] sm:$0xff]  ;;  %v11218_v51 = vcombine.low %v858_v38, %v862_v39  ;;  %6884 = vmatprep.subr.bf16.mxu1 %v11091_v44  ;;  %v13483_v38 = vsub.s32 1, %v175_v36  ;;  %v13485_v39 = vsub.s32 3, %v175_v36 }
  0xd5   :  { %v742_v47 = vld [vmem:[#allocation7 + $0x2e0] sm:$0xff]  ;;  %6885 = vmatpush1.bf16.msra.mxu1 %v11090_v50  ;;  %v13487_v41 = vsub.s32 0, %v175_v36  ;;  %v13489_v42 = vsub.s32 2, %v175_v36  ;;  %v13493_v44 = vsub.s32 5, %v175_v36 }
  0xd6   :  { %v866_v48 = vld [vmem:[#allocation7 + $0x6c0] sm:$0xff]  ;;  %6927 = vmatprep.subr.bf16.mxu0 %v11219_v45  ;;  %v11099_v53 = vcombine.high %v738_v46, %v742_v47  ;;  %v11098_v58 = vcombine.low %v738_v46, %v742_v47  ;;  %14520 = vst [vmem:[#allocation24_spill] sm:$0xff] %v13483_v38  ;;  %14521 = vst [vmem:[#allocation25_spill] sm:$0xff] %v13485_v39  ;;  %v13498_v46 = vsub.s32 4, %v175_v36 }
  0xd7   :  { %v870_v49 = vld [vmem:[#allocation7 + $0x6e0] sm:$0xff]  ;;  %6928 = vmatpush1.bf16.msra.mxu0 %v11218_v51  ;;  %14522 = vst [vmem:[#allocation26_spill] sm:$0xff] %v13487_v41  ;;  %14523 = vst [vmem:[#allocation27_spill] sm:$0xff] %v13489_v42  ;;  %v13510_v51 = vsub.s32 7, %v175_v36 }
  0xd8   :  { %v746_v52 = vld [vmem:[#allocation7 + $0x300] sm:$0xff]  ;;  %v11227_v54 = vcombine.high %v866_v48, %v870_v49  ;;  %v11226_v59 = vcombine.low %v866_v48, %v870_v49  ;;  %6886 = vmatprep.subr.bf16.mxu1 %v11099_v53  ;;  %14525 = vst [vmem:[#allocation29_spill] sm:$0xff] %v13493_v44  ;;  %14526 = vst [vmem:[#allocation30_spill] sm:$0xff] %v13498_v46 }
  0xd9   :  { %v750_v55 = vld [vmem:[#allocation7 + $0x320] sm:$0xff]  ;;  %6887 = vmatpush1.bf16.msra.mxu1 %v11098_v58  ;;  %14527 = vst [vmem:[#allocation31_spill] sm:$0xff] %v13510_v51  ;;  %v13524_v58 = vld [vmem:[#allocation7 + $0x68] sm:$0xff] }
  0xda   :  { %v874_v56 = vld [vmem:[#allocation7 + $0x700] sm:$0xff]  ;;  %6929 = vmatprep.subr.bf16.mxu0 %v11227_v54  ;;  %v11107_v61 = vcombine.high %v746_v52, %v750_v55  ;;  %v11106_v2 = vcombine.low %v746_v52, %v750_v55  ;;  %v13512_v52 = vsub.s32 6, %v175_v36 }
  0xdb   :  { %v878_v57 = vld [vmem:[#allocation7 + $0x720] sm:$0xff]  ;;  %6930 = vmatpush1.bf16.msra.mxu0 %v11226_v59 }
  0xdc   :  { %v754_v60 = vld [vmem:[#allocation7 + $0x340] sm:$0xff]  ;;  %v11235_v62 = vcombine.high %v874_v56, %v878_v57  ;;  %v11234_v3 = vcombine.low %v874_v56, %v878_v57  ;;  %6888 = vmatprep.subr.bf16.mxu1 %v11107_v61  ;;  %14528 = vst [vmem:[#allocation32_spill] sm:$0xff] %v13512_v52  ;;  %v13522_v57 = vld [vmem:[#allocation7 + $0x48] sm:$0xff] }
  0xdd   :  { %v758_v63 = vld [vmem:[#allocation7 + $0x360] sm:$0xff]  ;;  %6889 = vmatpush1.bf16.msra.mxu1 %v11106_v2  ;;  %v13542_v2 = vld [vmem:[#allocation7 + $0xa8] sm:$0xff] }
  0xde   :  { %v882_v0 = vld [vmem:[#allocation7 + $0x740] sm:$0xff]  ;;  %6931 = vmatprep.subr.bf16.mxu0 %v11235_v62  ;;  %v11115_v5 = vcombine.high %v754_v60, %v758_v63  ;;  %v11114_v10 = vcombine.low %v754_v60, %v758_v63  ;;  %14531 = vst [vmem:[#allocation35_spill] sm:$0xff] %v13542_v2 }
  0xdf   :  { %v886_v1 = vld [vmem:[#allocation7 + $0x760] sm:$0xff]  ;;  %6932 = vmatpush1.bf16.msra.mxu0 %v11234_v3 }
  0xe0   :  { %v762_v4 = vld [vmem:[#allocation7 + $0x380] sm:$0xff]  ;;  %v11243_v6 = vcombine.high %v882_v0, %v886_v1  ;;  %v11242_v11 = vcombine.low %v882_v0, %v886_v1  ;;  %6890 = vmatprep.subr.bf16.mxu1 %v11115_v5  ;;  %v13540_v1 = vld [vmem:[#allocation7 + $0x88] sm:$0xff] }
  0xe1   :  { %v766_v7 = vld [vmem:[#allocation7 + $0x3a0] sm:$0xff]  ;;  %6891 = vmatpush1.bf16.msra.mxu1 %v11114_v10  ;;  %14530 = vst [vmem:[#allocation34_spill] sm:$0xff] %v13540_v1 }
  0xe2   :  { %v890_v8 = vld [vmem:[#allocation7 + $0x780] sm:$0xff]  ;;  %6933 = vmatprep.subr.bf16.mxu0 %v11243_v6  ;;  %v11123_v13 = vcombine.high %v762_v4, %v766_v7  ;;  %v11122_v18 = vcombine.low %v762_v4, %v766_v7 }
  0xe3   :  { %v894_v9 = vld [vmem:[#allocation7 + $0x7a0] sm:$0xff]  ;;  %6934 = vmatpush1.bf16.msra.mxu0 %v11242_v11 }
  0xe4   :  { %v770_v12 = vld [vmem:[#allocation7 + $0x3c0] sm:$0xff]  ;;  %v11251_v14 = vcombine.high %v890_v8, %v894_v9  ;;  %v11250_v19 = vcombine.low %v890_v8, %v894_v9  ;;  %6892 = vmatprep.subr.bf16.mxu1 %v11123_v13 }
  0xe5   :  { %v774_v15 = vld [vmem:[#allocation7 + $0x3e0] sm:$0xff]  ;;  %6893 = vmatpush1.bf16.msra.mxu1 %v11122_v18 }
  0xe6   :  { %v898_v16 = vld [vmem:[#allocation7 + $0x7c0] sm:$0xff]  ;;  %6935 = vmatprep.subr.bf16.mxu0 %v11251_v14  ;;  %v11131_v20 = vcombine.high %v770_v12, %v774_v15  ;;  %v11130_v22 = vcombine.low %v770_v12, %v774_v15 }
  0xe7   :  { %v902_v17 = vld [vmem:[#allocation7 + $0x7e0] sm:$0xff]  ;;  %6936 = vmatpush1.bf16.msra.mxu0 %v11250_v19 }
  0xe8   :  { %v11259_v21 = vcombine.high %v898_v16, %v902_v17  ;;  %v11258_v23 = vcombine.low %v898_v16, %v902_v17  ;;  %6894 = vmatprep.subr.bf16.mxu1 %v11131_v20  ;;  %v1674_v29 = vld [vmem:[%s14462_s1] sm:$0xff] }
  0xe9   :  { %6895 = vmatpush1.bf16.msra.mxu1 %v11130_v22  ;;  %1679 = vperm.xlu0 %12544, %v1674_v29   ;;  %v169_v37 = vld [vmem:[#allocation5] ss:$4 sm:$0xff]  ;;  %v295_v40 = vld [vmem:[#allocation5 + $0x1] ss:$4 sm:$0xff]  ;;  %v13491_v43 = vld [vmem:[#allocation5 + $0x2] ss:$4 sm:$0xff] }
  0xea   :  { %6937 = vmatprep.subr.bf16.mxu0 %v11259_v21  ;;  %7208 = vmatprep.subr.bf16.mxu1 %v11013_v25  ;;  %14524 = vst [vmem:[#allocation28_spill] sm:$0xff] %v13491_v43  ;;  %v13496_v45 = vrot.slane %v169_v37, %v13483_v38  ;;  %v13501_v47 = vrot.slane %v295_v40, %v13483_v38  ;;  %v13506_v49 = vld [vmem:[#allocation7 + $0x840] sm:$0xff] }
  0xeb   :  { %6938 = vmatpush1.bf16.msra.mxu0 %v11258_v23  ;;  %v13504_v48 = vrot.slane %v169_v37, %v13485_v39  ;;  %v13508_v50 = vld [vmem:[#allocation7 + $0x860] sm:$0xff]  ;;  %v315_v53 = vrot.slane %v295_v40, %v13485_v39  ;;  %v13516_v54 = vrot.slane %v169_v37, %v13487_v41  ;;  %v303_v55 = vrot.slane %v295_v40, %v13487_v41 }
  0xec   :  { %6950 = vmatprep.subr.bf16.mxu0 %v11267_v24  ;;  %v13520_v56 = vrot.slane %v169_v37, %v13489_v42  ;;  %v13526_v59 = vld [vmem:[#allocation7 + $0x880] sm:$0xff]  ;;  %v13532_v61 = vrot.slane %v13491_v43, %v13483_v38  ;;  %v13536_v62 = vrot.slane %v13491_v43, %v13485_v39  ;;  %v311_v63 = vrot.slane %v295_v40, %v13489_v42 }
  0xed   :  { %v13528_v60 = vld [vmem:[#allocation7 + $0x8a0] sm:$0xff]  ;;  %v197_v0 = vrot.slane %v169_v37, %v13493_v44  ;;  %v13546_v3 = vrot.slane %v13491_v43, %v13487_v41  ;;  %v13550_v4 = vrot.slane %v13491_v43, %v13489_v42  ;;  %v323_v5 = vrot.slane %v295_v40, %v13493_v44 }
  0xee   :  { %14529 = vst [vmem:[#allocation33_spill] sm:$0xff] %v13528_v60  ;;  %v13554_v6 = vrot.slane %v169_v37, %v13498_v46  ;;  %v13557_v7 = vrot.slane %v295_v40, %v13498_v46  ;;  %v13560_v8 = vrot.slane %v169_v37, %v13510_v51  ;;  %v13563_v9 = vrot.slane %v295_v40, %v13510_v51  ;;  %v13576_v14 = vld [vmem:[#allocation7 + $0x8c0] sm:$0xff] }
  0xef   :  { %v13566_v10 = vrot.slane %v169_v37, %v13512_v52  ;;  %v13570_v11 = vrot.slane %v13491_v43, %v13493_v44  ;;  %v13578_v15 = vld [vmem:[#allocation7 + $0x8e0] sm:$0xff]  ;;  %v13582_v16 = vrot.slane %v13491_v43, %v13498_v46  ;;  %v13602_v30 = vrot.slane %v13491_v43, %v13510_v51 }
  0xf0   :  { %v13584_v17 = vld [vmem:[#allocation5 + $0x20] ss:$4 sm:$0xff]  ;;  %v13609_v36 = vrot.slane %v295_v40, %v13512_v52 }
  0xf1   :  { %14532 = vst [vmem:[#allocation36_spill] sm:$0xff] %v13566_v10  ;;  %14533 = vst [vmem:[#allocation37_spill] sm:$0xff] %v13584_v17  ;;  %v13613_v37 = vrot.slane %v13584_v17, %v13483_v38 }
  0xf2   :  { %14534 = vst [vmem:[#allocation38_spill] sm:$0xff] %v13609_v36 }
  0xf3   :  { %14535 = vst [vmem:[#allocation39_spill] sm:$0xff] %v13613_v37 }
 0x132   :  { %v288_v18 = vpop.xlane.xlu1 %287 }
 0x133   :  { %v13594_v23 = vmul.f32 0.00390625, %v288_v18  ;;  %v162_v24 = vpop.xlane.xlu0 %161 }
 0x134   :  { %v13604_v34 = vmul.f32 0.00390625, %v162_v24 }
 0x135   :  { %v381_v18 = vmul.f32 %v13501_v47, %v13594_v23  ;;  %v383_v25 = vmul.f32 %v315_v53, %v13594_v23  ;;  %v380_v21 = vmul.f32 %v303_v55, %v13594_v23  ;;  %v382_v24 = vmul.f32 %v311_v63, %v13594_v23 }
 0x136   :  { %v291_v29 = vpop.xlane.xlu1 %290  ;;  %v255_v35 = vmul.f32 %v13496_v45, %v13604_v34  ;;  %v257_v40 = vmul.f32 %v13504_v48, %v13604_v34  ;;  %v254_v22 = vmul.f32 %v13516_v54, %v13604_v34  ;;  %v256_v19 = vmul.f32 %v13520_v56, %v13604_v34 }
 0x137   :  { %v13628_v12 = vmul.f32 0.00390625, %v291_v29  ;;  %v165_v20 = vpop.xlane.xlu0 %164  ;;  %v259_v13 = vmul.f32 %v197_v0, %v13604_v34  ;;  %v385_v33 = vmul.f32 %v323_v5, %v13594_v23  ;;  %v13634_v32 = vmul.f32 %v13554_v6, %v13604_v34 }
 0x138   :  { %v13636_v51 = vmul.f32 0.00390625, %v165_v20  ;;  %v413_v46 = vadd.f32 %v381_v18, %v255_v35  ;;  %v415_v44 = vadd.f32 %v383_v25, %v257_v40  ;;  %v412_v42 = vadd.f32 %v380_v21, %v254_v22 }
 0x139   :  { %v397_v37 = vmul.f32 %v13501_v47, %v13628_v12  ;;  %v399_v29 = vmul.f32 %v315_v53, %v13628_v12  ;;  %v396_v39 = vmul.f32 %v303_v55, %v13628_v12  ;;  %v398_v36 = vmul.f32 %v311_v63, %v13628_v12 }
 0x13a   :  { %v449_v10 = vpop.xlane.xlu1 %448  ;;  %v271_v43 = vmul.f32 %v13496_v45, %v13636_v51  ;;  %v273_v20 = vmul.f32 %v13504_v48, %v13636_v51  ;;  %v270_v25 = vmul.f32 %v13516_v54, %v13636_v51  ;;  %v272_v21 = vmul.f32 %v13520_v56, %v13636_v51 }
 0x13b   :  { %v13651_v47 = vmul.f32 0.00390625, %v449_v10  ;;  %v446_v53 = vpop.xlane.xlu0 %445  ;;  %v414_v22 = vadd.f32 %v382_v24, %v256_v19  ;;  %v275_v55 = vmul.f32 %v197_v0, %v13636_v51  ;;  %v401_v63 = vmul.f32 %v323_v5, %v13628_v12 }
 0x13c   :  { %v13655_v35 = vmul.f32 0.00390625, %v446_v53  ;;  %v429_v45 = vadd.f32 %v397_v37, %v271_v43  ;;  %v431_v18 = vadd.f32 %v399_v29, %v273_v20  ;;  %v428_v40 = vadd.f32 %v396_v39, %v270_v25 }
 0x13d   :  { %v555_v48 = vmul.f32 %v13532_v61, %v13651_v47  ;;  %v557_v54 = vmul.f32 %v13536_v62, %v13651_v47  ;;  %v554_v56 = vmul.f32 %v13546_v3, %v13651_v47  ;;  %v430_v10 = vadd.f32 %v398_v36, %v272_v21 }
 0x13e   :  { %v539_v0 = vmul.f32 %v13532_v61, %v13655_v35  ;;  %v541_v5 = vmul.f32 %v13536_v62, %v13655_v35  ;;  %v538_v43 = vmul.f32 %v13546_v3, %v13655_v35  ;;  %v540_v39 = vmul.f32 %v13550_v4, %v13655_v35 }
 0x13f   :  { %v587_v19 = vadd.f32 %v555_v48, %v429_v45  ;;  %v589_v37 = vadd.f32 %v557_v54, %v431_v18  ;;  %v586_v24 = vadd.f32 %v554_v56, %v428_v40  ;;  %v556_v29 = vmul.f32 %v13550_v4, %v13651_v47  ;;  %v13714_v56 = vld [vmem:[#allocation7 + $0x900] sm:$0xff] }
 0x140   :  { %v571_v20 = vadd.f32 %v539_v0, %v413_v46  ;;  %v573_v36 = vadd.f32 %v541_v5, %v415_v44  ;;  %v570_v25 = vadd.f32 %v538_v43, %v412_v42  ;;  %v572_v21 = vadd.f32 %v540_v39, %v414_v22  ;;  %v13735_v43 = vld [vmem:[#allocation7 + $0x108] sm:$0xff] }
 0x141   :  { %v619_v61 = vmax.f32 %v587_v19, 0.0  ;;  %v621_v53 = vmax.f32 %v589_v37, 0.0  ;;  %v618_v52 = vmax.f32 %v586_v24, 0.0  ;;  %v588_v62 = vadd.f32 %v556_v29, %v430_v10  ;;  %v13737_v39 = vld [vmem:[#allocation7 + $0x128] sm:$0xff]  ;;  %v13739_v19 = vld [vmem:[#allocation7 + $0x940] sm:$0xff] }
 0x142   :  { %v603_v2 = vmax.f32 %v571_v20, 0.0  ;;  %v605_v1 = vmax.f32 %v573_v36, 0.0  ;;  %v602_v3 = vmax.f32 %v570_v25, 0.0  ;;  %v604_v17 = vmax.f32 %v572_v21, 0.0  ;;  %v13741_v37 = vld [vmem:[#allocation7 + $0x960] sm:$0xff]  ;;  %v13749_v25 = vld [vmem:[#allocation7 + $0x148] sm:$0xff] }
 0x143   :  { %v620_v41 = vmax.f32 %v588_v62, 0.0  ;;  %v417_v60 = vadd.f32 %v385_v33, %v259_v13  ;;  %v433_v45 = vadd.f32 %v401_v63, %v275_v55  ;;  %v543_v18 = vmul.f32 %v13570_v11, %v13655_v35  ;;  %v13706_v55 = vld [vmem:[#allocation5 + $0x21] ss:$4 sm:$0xff] }
 0x144   :  { %v13675_v40 = vpack.c.bf16 %v619_v61, %v603_v2  ;;  %v13677_v46 = vpack.c.bf16 %v621_v53, %v605_v1  ;;  %v13679_v42 = vpack.c.bf16 %v618_v52, %v602_v3  ;;  %v559_v44 = vmul.f32 %v13570_v11, %v13651_v47  ;;  %v13691_v2 = vld [vmem:[#allocation7 + $0xc8] sm:$0xff] }
 0x145   :  { %v13683_v4 = vpack.c.bf16 %v620_v41, %v604_v17  ;;  %v575_v22 = vadd.f32 %v543_v18, %v417_v60  ;;  %v274_v48 = vmul.f32 %v13554_v6, %v13636_v51  ;;  %v384_v33 = vmul.f32 %v13557_v7, %v13594_v23  ;;  %v13699_v6 = vld [vmem:[#allocation7 + $0xe8] sm:$0xff] }
 0x146   :  { %14536 = vst [vmem:[#allocation40_spill] sm:$0xff] %v13675_v40  ;;  %6896 = vmatprep.mubr.bf16.mxu1 %v13675_v40  ;;  %6939 = vmatprep.mubr.bf16.mxu0 %v13677_v46  ;;  %v591_v1 = vadd.f32 %v559_v44, %v433_v45  ;;  %v400_v52 = vmul.f32 %v13557_v7, %v13628_v12  ;;  %v14545_v44 = vld [vmem:[#allocation33_spill] sm:$0xff] }
 0x147   :  { %14537 = vst [vmem:[#allocation41_spill] sm:$0xff] %v13683_v4  ;;  %v542_v41 = vmul.f32 %v13582_v16, %v13655_v35  ;;  %6897 = vmatmul.mubr.bf16.vlgmr.msra.gmra.mrb[0].mxu1 %v13679_v42  ;;  %6940 = vmatmul.mubr.bf16.vlgmr.msra.gmra.mrb[0].mxu0 %v13683_v4  ;;  %v607_v60 = vmax.f32 %v575_v22, 0.0  ;;  %v416_v11 = vadd.f32 %v384_v33, %v13634_v32  ;;  %v13716_v32 = vld [vmem:[#allocation7 + $0x920] sm:$0xff] }
 0x148   :  { %v558_v13 = vmul.f32 %v13582_v16, %v13651_v47  ;;  %v261_v17 = vmul.f32 %v13560_v8, %v13604_v34  ;;  %v14538_v7 = vcombine.low %v13461_v26, %v13463_v27  ;;  %v14539_v63 = vcombine.low %v13465_v28, %v13467_v31  ;;  %7240 = vmatprep.mubr.bf16.mxu1 %v13675_v40  ;;  %v13974_v40 = vld [vmem:[#allocation7 + $0xac0] sm:$0xff] }
 0x149   :  { %v623_v54 = vmax.f32 %v591_v1, 0.0  ;;  %v432_v10 = vadd.f32 %v400_v52, %v274_v48  ;;  %v277_v16 = vmul.f32 %v13560_v8, %v13636_v51  ;;  %v387_v0 = vmul.f32 %v13563_v9, %v13594_v23  ;;  %v13769_v48 = vld [vmem:[#allocation7 + $0x980] sm:$0xff]  ;;  %v14548_v52 = vld [vmem:[#allocation37_spill] sm:$0xff] }
 0x14a   :  { %6951 = vmatpush1.bf16.msra.mxu0 %v14538_v7  ;;  %7209 = vmatpush1.bf16.msra.mxu1 %v14539_v63  ;;  %v14540_v26 = vcombine.high %v13506_v49, %v13508_v50  ;;  %v574_v27 = vadd.f32 %v542_v41, %v416_v11  ;;  %v403_v28 = vmul.f32 %v13563_v9, %v13628_v12  ;;  %v13771_v1 = vld [vmem:[#allocation5 + $0x22] ss:$4 sm:$0xff] }
 0x14b   :  { %v545_v31 = vmul.f32 %v13602_v30, %v13655_v35  ;;  %v13730_v5 = vpack.c.bf16 %v623_v54, %v607_v60  ;;  %v14542_v8 = vcombine.high %v13522_v57, %v13524_v58  ;;  %v590_v24 = vadd.f32 %v558_v13, %v432_v10  ;;  %v13782_v11 = vld [vmem:[#allocation7 + $0x9a0] sm:$0xff]  ;;  %v14552_v7 = vld [vmem:[#allocation32_spill] sm:$0xff] }
 0x14c   :  { %6952 = vmatprep.subr.bf16.mxu0 %v14540_v26  ;;  %v419_v29 = vadd.f32 %v387_v0, %v261_v17  ;;  %v561_v9 = vmul.f32 %v13602_v30, %v13651_v47  ;;  %v11291_v20 = vcombine.high %v13576_v14, %v13578_v15  ;;  %v11036_v36 = vcombine.low %v13691_v2, %v13699_v6  ;;  %v14553_v63 = vld [vmem:[#allocation28_spill] sm:$0xff] }
 0x14d   :  { %14541 = vst [vmem:[#allocation42_spill] sm:$0xff] %v13730_v5  ;;  %7210 = vmatprep.subr.bf16.mxu1 %v14542_v8  ;;  %v606_v21 = vmax.f32 %v574_v27, 0.0  ;;  %v435_v61 = vadd.f32 %v403_v28, %v277_v16  ;;  %6982 = vmatprep.mubr.bf16.mxu0 %v13730_v5  ;;  %v14543_v53 = vcombine.low %v13506_v49, %v13508_v50  ;;  %v622_v30 = vmax.f32 %v590_v24, 0.0  ;;  %v13767_v50 = vld [vmem:[#allocation7 + $0x168] sm:$0xff]  ;;  %v13976_v5 = vld [vmem:[#allocation7 + $0xae0] sm:$0xff] }
 0x14e   :  { %v11037_v62 = vcombine.high %v13691_v2, %v13699_v6  ;;  %v577_v3 = vadd.f32 %v545_v31, %v419_v29  ;;  %v339_v45 = vrot.slane %v13706_v55, %v13483_v38  ;;  %v14544_v18 = vcombine.low %v13522_v57, %v13524_v58  ;;  %v14547_v2 = vld [vmem:[#allocation26_spill] sm:$0xff]  ;;  %v14550_v58 = vld [vmem:[#allocation35_spill] sm:$0xff] }
 0x14f   :  { %6953 = vmatpush1.bf16.msra.mxu0 %v14543_v53  ;;  %v14546_v22 = vcombine.high %v13526_v59, %v14545_v44  ;;  %v11298_v49 = vcombine.low %v13714_v56, %v13716_v32  ;;  %v593_v33 = vadd.f32 %v561_v9, %v435_v61  ;;  %v13775_v41 = vrot.slane %v14548_v52, %v14547_v2  ;;  %v14549_v57 = vld [vmem:[#allocation34_spill] sm:$0xff]  ;;  %v13810_v24 = vld [vmem:[#allocation7 + $0x188] sm:$0xff] }
 0x150   :  { %7211 = vmatpush1.bf16.msra.mxu1 %v14544_v18  ;;  %v14551_v60 = vcombine.high %v14549_v57, %v14550_v58  ;;  %v11299_v6 = vcombine.high %v13714_v56, %v13716_v32  ;;  %v13784_v13 = vpack.c.bf16 %v622_v30, %v606_v21  ;;  %v609_v17 = vmax.f32 %v577_v3, 0.0  ;;  %v13812_v29 = vld [vmem:[#allocation7 + $0x1a8] sm:$0xff]  ;;  %v14557_v30 = vld [vmem:[#allocation38_spill] sm:$0xff] }
 0x151   :  { %6954 = vmatprep.subr.bf16.mxu0 %v14546_v22  ;;  %v485_v54 = vrot.slane %v14553_v63, %v14552_v7  ;;  %v11044_v10 = vcombine.low %v13735_v43, %v13737_v39  ;;  %v11045_v16 = vcombine.high %v13735_v43, %v13737_v39  ;;  %v11306_v0 = vcombine.low %v13739_v19, %v13741_v37  ;;  %v14556_v21 = vld [vmem:[#allocation36_spill] sm:$0xff]  ;;  %v13827_v22 = vld [vmem:[#allocation7 + $0x9c0] sm:$0xff] }
 0x152   :  { %7212 = vmatprep.subr.bf16.mxu1 %v14551_v60  ;;  %v625_v26 = vmax.f32 %v593_v33, 0.0  ;;  %v14554_v27 = vcombine.low %v13526_v59, %v14545_v44  ;;  %v11307_v28 = vcombine.high %v13739_v19, %v13741_v37  ;;  %v11053_v8 = vcombine.high %v13749_v25, %v13767_v50  ;;  %v13863_v59 = vld [vmem:[#allocation7 + $0x208] sm:$0xff]  ;;  %v13884_v56 = vld [vmem:[#allocation7 + $0xa60] sm:$0xff] }
 0x153   :  { %v497_v43 = vrot.slane %v13771_v1, %v13483_v38  ;;  %v14555_v39 = vcombine.low %v14549_v57, %v14550_v58  ;;  %v260_v61 = vmul.f32 %v14556_v21, %v13604_v34  ;;  %v276_v53 = vmul.f32 %v14556_v21, %v13636_v51  ;;  %v14558_v57 = vld [vmem:[#allocation25_spill] sm:$0xff]  ;;  %v13847_v21 = vld [vmem:[#allocation7 + $0x1c8] sm:$0xff] }
 0x154   :  { %6955 = vmatpush1.bf16.msra.mxu0 %v14554_v27  ;;  %v13814_v9 = vpack.c.bf16 %v625_v26, %v609_v17  ;;  %v386_v3 = vmul.f32 %v14557_v30, %v13594_v23  ;;  %v544_v18 = vmul.f32 %v485_v54, %v13655_v35  ;;  %v11315_v44 = vcombine.high %v13769_v48, %v13782_v11  ;;  %v14560_v27 = vld [vmem:[#allocation39_spill] sm:$0xff] }
 0x155   :  { %7213 = vmatpush1.bf16.msra.mxu1 %v14555_v39  ;;  %6956 = vmatprep.subr.bf16.mxu0 %v11291_v20  ;;  %v402_v20 = vmul.f32 %v14557_v30, %v13628_v12  ;;  %v560_v33 = vmul.f32 %v485_v54, %v13651_v47  ;;  %v13836_v58 = vrot.slane %v14548_v52, %v14558_v57  ;;  %v13845_v39 = vld [vmem:[#allocation7 + $0x9e0] sm:$0xff]  ;;  %v13849_v30 = vld [vmem:[#allocation7 + $0x1e8] sm:$0xff] }
 0x156   :  { %7214 = vmatprep.subr.bf16.mxu1 %v11037_v62  ;;  %v13832_v62 = vrot.slane %v13706_v55, %v14547_v2  ;;  %v14559_v60 = vcombine.low %v13576_v14, %v13578_v15  ;;  %v418_v63 = vadd.f32 %v386_v3, %v260_v61  ;;  %v263_v54 = vmul.f32 %v14560_v27, %v13604_v34  ;;  %v13855_v61 = vld [vmem:[#allocation7 + $0xa00] sm:$0xff] }
 0x157   :  { %v434_v26 = vadd.f32 %v402_v20, %v276_v53  ;;  %v279_v14 = vmul.f32 %v14560_v27, %v13636_v51  ;;  %v389_v15 = vmul.f32 %v339_v45, %v13594_v23  ;;  %v13857_v53 = vld [vmem:[#allocation7 + $0xa20] sm:$0xff]  ;;  %v547_v3 = vmul.f32 %v497_v43, %v13655_v35 }
 0x158   :  { %6957 = vmatpush1.bf16.msra.mxu0 %v14559_v60  ;;  %v405_v60 = vmul.f32 %v339_v45, %v13628_v12  ;;  %v563_v20 = vmul.f32 %v497_v43, %v13651_v47  ;;  %v11061_v17 = vcombine.high %v13810_v24, %v13812_v29  ;;  %v13867_v45 = vrot.slane %v13706_v55, %v14558_v57 }
 0x159   :  { %7215 = vmatpush1.bf16.msra.mxu1 %v11036_v36  ;;  %6958 = vmatprep.subr.bf16.mxu0 %v11299_v6  ;;  %v576_v36 = vadd.f32 %v544_v18, %v418_v63  ;;  %v592_v6 = vadd.f32 %v560_v33, %v434_v26  ;;  %v421_v27 = vadd.f32 %v389_v15, %v263_v54  ;;  %v14561_v33 = vld [vmem:[#allocation27_spill] sm:$0xff] }
 0x15a   :  { %7216 = vmatprep.subr.bf16.mxu1 %v11045_v16  ;;  %v437_v31 = vadd.f32 %v405_v60, %v279_v14  ;;  %v13876_v63 = vrot.slane %v14548_v52, %v14561_v33  ;;  %v11323_v26 = vcombine.high %v13827_v22, %v13845_v39  ;;  %v13880_v54 = vld [vmem:[#allocation7 + $0x228] sm:$0xff]  ;;  %v13882_v14 = vld [vmem:[#allocation7 + $0xa40] sm:$0xff]  ;;  %v11068_v15 = vcombine.low %v13847_v21, %v13849_v30 }
 0x15b   :  { %v608_v18 = vmax.f32 %v576_v36, 0.0  ;;  %v624_v43 = vmax.f32 %v592_v6, 0.0  ;;  %v579_v32 = vadd.f32 %v547_v3, %v421_v27  ;;  %v11069_v60 = vcombine.high %v13847_v21, %v13849_v30  ;;  %v13911_v27 = vld [vmem:[#allocation7 + $0xa80] sm:$0xff]  ;;  %v14563_v6 = vld [vmem:[#allocation29_spill] sm:$0xff] }
 0x15c   :  { %6959 = vmatpush1.bf16.msra.mxu0 %v11298_v49  ;;  %v595_v49 = vadd.f32 %v563_v20, %v437_v31  ;;  %v13896_v36 = vrot.slane %v13706_v55, %v14561_v33  ;;  %v11331_v31 = vcombine.high %v13855_v61, %v13857_v53  ;;  %v11077_v30 = vcombine.high %v13863_v59, %v13880_v54  ;;  %v14566_v21 = vld [vmem:[#allocation30_spill] sm:$0xff] }
 0x15d   :  { %7217 = vmatpush1.bf16.msra.mxu1 %v11044_v10  ;;  %6960 = vmatprep.subr.bf16.mxu0 %v11307_v28  ;;  %v13890_v10 = vld [vmem:[#allocation7 + $0x248] sm:$0xff]  ;;  %v13892_v28 = vpack.c.bf16 %v624_v43, %v608_v18  ;;  %v611_v3 = vmax.f32 %v579_v32, 0.0  ;;  %v13913_v18 = vld [vmem:[#allocation7 + $0xaa0] sm:$0xff]  ;;  %v493_v43 = vrot.slane %v13771_v1, %v14547_v2  ;;  %v13919_v32 = vrot.slane %v14548_v52, %v14563_v6 }
 0x15e   :  { %7218 = vmatprep.subr.bf16.mxu1 %v11053_v8  ;;  %v13902_v8 = vld [vmem:[#allocation7 + $0x268] sm:$0xff]  ;;  %v627_v20 = vmax.f32 %v595_v49, 0.0  ;;  %v14564_v19 = vcombine.low %v13749_v25, %v13767_v50  ;;  %v13930_v49 = vrot.slane %v13706_v55, %v14563_v6  ;;  %v11339_v16 = vcombine.high %v13882_v14, %v13884_v56 }
 0x15f   :  { %14562 = vst [vmem:[#allocation33_spill] sm:$0xff] %v13892_v28  ;;  %v11085_v50 = vcombine.high %v13890_v10, %v13902_v8  ;;  %v14567_v25 = vcombine.low %v13769_v48, %v13782_v11  ;;  %v388_v38 = vmul.f32 %v13832_v62, %v13594_v23  ;;  %v14568_v2 = vcombine.low %v13810_v24, %v13812_v29 }
 0x160   :  { %6961 = vmatpush1.bf16.msra.mxu0 %v11306_v0  ;;  %v13924_v37 = vpack.c.bf16 %v627_v20, %v611_v3  ;;  %v505_v0 = vrot.slane %v13771_v1, %v14558_v57  ;;  %v13944_v20 = vld [vmem:[#allocation7 + $0x288] sm:$0xff]  ;;  %v13952_v57 = vrot.slane %v14548_v52, %v14566_v21  ;;  %v278_v3 = vmul.f32 %v13775_v41, %v13636_v51 }
 0x161   :  { %7219 = vmatpush1.bf16.msra.mxu1 %v14564_v19  ;;  %6962 = vmatprep.subr.bf16.mxu0 %v11315_v44  ;;  %v501_v19 = vrot.slane %v13771_v1, %v14561_v33  ;;  %v262_v44 = vmul.f32 %v13775_v41, %v13604_v34  ;;  %v404_v33 = vmul.f32 %v13832_v62, %v13628_v12 }
 0x162   :  { %14565 = vst [vmem:[#allocation37_spill] sm:$0xff] %v13924_v37  ;;  %7220 = vmatprep.subr.bf16.mxu1 %v11061_v17  ;;  %v13946_v17 = vld [vmem:[#allocation7 + $0x2a8] sm:$0xff]  ;;  %v546_v48 = vmul.f32 %v493_v43, %v13655_v35  ;;  %v562_v11 = vmul.f32 %v493_v43, %v13651_v47  ;;  %v281_v29 = vmul.f32 %v13836_v58, %v13636_v51 }
 0x163   :  { %v420_v62 = vadd.f32 %v388_v38, %v262_v44  ;;  %v436_v37 = vadd.f32 %v404_v33, %v278_v3  ;;  %v11093_v24 = vcombine.high %v13944_v20, %v13946_v17  ;;  %v14570_v38 = vcombine.low %v13827_v22, %v13845_v39 }
 0x164   :  { %6963 = vmatpush1.bf16.msra.mxu0 %v14567_v25  ;;  %v265_v25 = vmul.f32 %v13836_v58, %v13604_v34  ;;  %v407_v3 = vmul.f32 %v13867_v45, %v13628_v12  ;;  %v549_v41 = vmul.f32 %v505_v0, %v13655_v35  ;;  %v11354_v58 = vcombine.low %v13974_v40, %v13976_v5 }
 0x165   :  { %7221 = vmatpush1.bf16.msra.mxu1 %v14568_v2  ;;  %6964 = vmatprep.subr.bf16.mxu0 %v11323_v26  ;;  %v13980_v2 = vrot.slane %v13706_v55, %v14566_v21  ;;  %v391_v26 = vmul.f32 %v13867_v45, %v13594_v23  ;;  %v578_v33 = vadd.f32 %v546_v48, %v420_v62  ;;  %v14005_v45 = vld [vmem:[#allocation7 + $0x2c8] sm:$0xff]  ;;  %v14018_v62 = vld [vmem:[#allocation7 + $0xb00] sm:$0xff] }
 0x166   :  { %7222 = vmatprep.subr.bf16.mxu1 %v11069_v60  ;;  %v14569_v60 = vld [vmem:[#allocation31_spill] sm:$0xff]  ;;  %v594_v44 = vadd.f32 %v562_v11, %v436_v37  ;;  %v565_v28 = vmul.f32 %v505_v0, %v13651_v47  ;;  %v11355_v22 = vcombine.high %v13974_v40, %v13976_v5  ;;  %v264_v37 = vmul.f32 %v13876_v63, %v13604_v34 }
 0x167   :  { %v13990_v43 = vrot.slane %v14548_v52, %v14569_v60  ;;  %v423_v4 = vadd.f32 %v391_v26, %v265_v25  ;;  %v610_v39 = vmax.f32 %v578_v33, 0.0  ;;  %v14007_v11 = vld [vmem:[#allocation7 + $0x2e8] sm:$0xff]  ;;  %v513_v25 = vrot.slane %v13771_v1, %v14563_v6  ;;  %v14020_v26 = vld [vmem:[#allocation7 + $0xb20] sm:$0xff] }
 0x168   :  { %6965 = vmatpush1.bf16.msra.mxu0 %v14570_v38  ;;  %v626_v48 = vmax.f32 %v594_v44, 0.0  ;;  %v14571_v0 = vcombine.low %v13855_v61, %v13857_v53  ;;  %v14572_v33 = vcombine.low %v13863_v59, %v13880_v54  ;;  %v548_v44 = vmul.f32 %v501_v19, %v13655_v35 }
 0x169   :  { %7223 = vmatpush1.bf16.msra.mxu1 %v11068_v15  ;;  %6966 = vmatprep.subr.bf16.mxu0 %v11331_v31  ;;  %v439_v15 = vadd.f32 %v407_v3, %v281_v29  ;;  %v581_v31 = vadd.f32 %v549_v41, %v423_v4  ;;  %v280_v4 = vmul.f32 %v13876_v63, %v13636_v51 }
 0x16a   :  { %7224 = vmatprep.subr.bf16.mxu1 %v11077_v30  ;;  %v14013_v30 = vrot.slane %v13706_v55, %v14569_v60  ;;  %v14022_v38 = vpack.c.bf16 %v626_v48, %v610_v39  ;;  %v390_v41 = vmul.f32 %v13896_v36, %v13594_v23  ;;  %v406_v29 = vmul.f32 %v13896_v36, %v13628_v12 }
 0x16b   :  { %v597_v61 = vadd.f32 %v565_v28, %v439_v15  ;;  %v613_v53 = vmax.f32 %v581_v31, 0.0  ;;  %v564_v3 = vmul.f32 %v501_v19, %v13651_v47  ;;  %v11100_v63 = vcombine.low %v14005_v45, %v14007_v11  ;;  %v14050_v19 = vld [vmem:[#allocation7 + $0x308] sm:$0xff] }
 0x16c   :  { %6967 = vmatpush1.bf16.msra.mxu0 %v14571_v0  ;;  %v11101_v39 = vcombine.high %v14005_v45, %v14007_v11  ;;  %v422_v48 = vadd.f32 %v390_v41, %v264_v37  ;;  %v438_v36 = vadd.f32 %v406_v29, %v280_v4  ;;  %v11362_v59 = vcombine.low %v14018_v62, %v14020_v26  ;;  %v14052_v45 = vld [vmem:[#allocation7 + $0x328] sm:$0xff] }
 0x16d   :  { %7225 = vmatpush1.bf16.msra.mxu1 %v14572_v33  ;;  %6968 = vmatprep.subr.bf16.mxu0 %v11339_v16  ;;  %v629_v54 = vmax.f32 %v597_v61, 0.0  ;;  %v267_v16 = vmul.f32 %v13919_v32, %v13604_v34  ;;  %v14045_v28 = vrot.slane %v14548_v52, %v14552_v7  ;;  %v283_v15 = vmul.f32 %v13919_v32, %v13636_v51  ;;  %v14077_v61 = vld [vmem:[#allocation7 + $0xb40] sm:$0xff] }
 0x16e   :  { %7226 = vmatprep.subr.bf16.mxu1 %v11085_v50  ;;  %v14573_v50 = vcombine.low %v13882_v14, %v13884_v56  ;;  %v580_v37 = vadd.f32 %v548_v44, %v422_v48  ;;  %v596_v11 = vadd.f32 %v564_v3, %v438_v36  ;;  %v393_v31 = vmul.f32 %v13930_v49, %v13594_v23 }
 0x16f   :  { %v14574_v52 = vcombine.low %v13890_v10, %v13902_v8  ;;  %v14575_v14 = vcombine.high %v13911_v27, %v13913_v18  ;;  %v14064_v56 = vpack.c.bf16 %v629_v54, %v613_v53  ;;  %v409_v0 = vmul.f32 %v13930_v49, %v13628_v12  ;;  %v14079_v49 = vld [vmem:[#allocation7 + $0xb60] sm:$0xff] }
 0x170   :  { %6969 = vmatpush1.bf16.msra.mxu0 %v14573_v50  ;;  %v551_v4 = vmul.f32 %v513_v25, %v13655_v35  ;;  %v11363_v32 = vcombine.high %v14018_v62, %v14020_v26  ;;  %v612_v41 = vmax.f32 %v580_v37, 0.0  ;;  %v628_v29 = vmax.f32 %v596_v11, 0.0  ;;  %v1030_v62 = vld [vmem:[#allocation7 + $0xbe0] sm:$0xff] }
 0x171   :  { %7227 = vmatpush1.bf16.msra.mxu1 %v14574_v52  ;;  %6970 = vmatprep.subr.bf16.mxu0 %v14575_v14  ;;  %v509_v10 = vrot.slane %v13771_v1, %v14566_v21  ;;  %v11108_v8 = vcombine.low %v14050_v19, %v14052_v45  ;;  %v11109_v33 = vcombine.high %v14050_v19, %v14052_v45  ;;  %v849_v21 = vld [vmem:[#allocation7 + $0x638] sm:$0xff] }
 0x172   :  { %7228 = vmatprep.subr.bf16.mxu1 %v11093_v24  ;;  %v425_v53 = vadd.f32 %v393_v31, %v267_v16  ;;  %v441_v24 = vadd.f32 %v409_v0, %v283_v15  ;;  %v14576_v44 = vcombine.low %v13911_v27, %v13913_v18  ;;  %v14084_v3 = vpack.c.bf16 %v628_v29, %v612_v41  ;;  %v1022_v15 = vld [vmem:[#allocation7 + $0xba0] sm:$0xff] }
 0x173   :  { %v567_v48 = vmul.f32 %v513_v25, %v13651_v47  ;;  %v266_v36 = vmul.f32 %v13952_v57, %v13604_v34  ;;  %v282_v54 = vmul.f32 %v13952_v57, %v13636_v51  ;;  %v14577_v50 = vcombine.low %v13944_v20, %v13946_v17  ;;  %v755_v17 = vld [vmem:[#allocation7 + $0x348] sm:$0xff] }
 0x174   :  { %6971 = vmatpush1.bf16.msra.mxu0 %v14576_v44  ;;  %v583_v16 = vadd.f32 %v551_v4, %v425_v53  ;;  %v392_v27 = vmul.f32 %v13980_v2, %v13594_v23  ;;  %v408_v18 = vmul.f32 %v13980_v2, %v13628_v12  ;;  %v11370_v25 = vcombine.low %v14077_v61, %v14079_v49 }
 0x175   :  { %7229 = vmatpush1.bf16.msra.mxu1 %v14577_v50  ;;  %6972 = vmatprep.subr.bf16.mxu0 %v11355_v22  ;;  %v599_v19 = vadd.f32 %v567_v48, %v441_v24  ;;  %v550_v45 = vmul.f32 %v509_v10, %v13655_v35  ;;  %v359_v57 = vrot.slane %v13706_v55, %v14552_v7  ;;  %v759_v22 = vld [vmem:[#allocation7 + $0x368] sm:$0xff] }
 0x176   :  { %7230 = vmatprep.subr.bf16.mxu1 %v11101_v39  ;;  %v11371_v20 = vcombine.high %v14077_v61, %v14079_v49  ;;  %v615_v37 = vmax.f32 %v583_v16, 0.0  ;;  %v424_v11 = vadd.f32 %v392_v27, %v266_v36  ;;  %v521_v2 = vrot.slane %v13771_v1, %v14569_v60  ;;  %v14110_v39 = vld [vmem:[#allocation7 + $0xb80] sm:$0xff]  ;;  %v763_v61 = vld [vmem:[#allocation7 + $0x388] sm:$0xff] }
 0x177   :  { %v631_v31 = vmax.f32 %v599_v19, 0.0  ;;  %v440_v52 = vadd.f32 %v408_v18, %v282_v54  ;;  %v566_v55 = vmul.f32 %v509_v10, %v13651_v47  ;;  %v269_v14 = vmul.f32 %v13990_v43, %v13604_v34  ;;  %v767_v49 = vld [vmem:[#allocation7 + $0x3a8] sm:$0xff]  ;;  %v1026_v54 = vld [vmem:[#allocation7 + $0xbc0] sm:$0xff] }
 0x178   :  { %6973 = vmatpush1.bf16.msra.mxu0 %v11354_v58  ;;  %v582_v0 = vadd.f32 %v550_v45, %v424_v11  ;;  %v285_v4 = vmul.f32 %v13990_v43, %v13636_v51  ;;  %v395_v40 = vmul.f32 %v14013_v30, %v13594_v23  ;;  %v11116_v5 = vcombine.low %v755_v17, %v759_v22  ;;  %v771_v16 = vld [vmem:[#allocation7 + $0x3c8] sm:$0xff]  ;;  %v1034_v11 = vld [vmem:[#allocation7 + $0xc00] sm:$0xff] }
 0x179   :  { %7231 = vmatpush1.bf16.msra.mxu1 %v11100_v63  ;;  %6974 = vmatprep.subr.bf16.mxu0 %v11363_v32  ;;  %v11117_v58 = vcombine.high %v755_v17, %v759_v22  ;;  %v14119_v41 = vpack.c.bf16 %v631_v31, %v615_v37  ;;  %v598_v29 = vadd.f32 %v566_v55, %v440_v52  ;;  %v775_v27 = vld [vmem:[#allocation7 + $0x3e8] sm:$0xff] }
 0x17a   :  { %7232 = vmatprep.subr.bf16.mxu1 %v11109_v33  ;;  %v11379_v10 = vcombine.high %v14110_v39, %v1022_v15  ;;  %v614_v53 = vmax.f32 %v582_v0, 0.0  ;;  %v411_v63 = vmul.f32 %v14013_v30, %v13628_v12  ;;  %v517_v43 = vrot.slane %v13771_v1, %v14552_v7  ;;  %v1042_v0 = vld [vmem:[#allocation7 + $0xc40] sm:$0xff] }
 0x17b   :  { %v630_v32 = vmax.f32 %v598_v29, 0.0  ;;  %v427_v33 = vadd.f32 %v395_v40, %v269_v14  ;;  %v553_v24 = vmul.f32 %v521_v2, %v13655_v35  ;;  %v569_v44 = vmul.f32 %v521_v2, %v13651_v47  ;;  %v1038_v2 = vld [vmem:[#allocation7 + $0xc20] sm:$0xff] }
 0x17c   :  { %6975 = vmatpush1.bf16.msra.mxu0 %v11362_v59  ;;  %v443_v48 = vadd.f32 %v411_v63, %v285_v4  ;;  %v268_v36 = vmul.f32 %v14045_v28, %v13604_v34  ;;  %v284_v30 = vmul.f32 %v14045_v28, %v13636_v51  ;;  %v11125_v1 = vcombine.high %v763_v61, %v767_v49  ;;  %v1046_v4 = vld [vmem:[#allocation7 + $0xc60] sm:$0xff] }
 0x17d   :  { %7233 = vmatpush1.bf16.msra.mxu1 %v11108_v8  ;;  %6976 = vmatprep.subr.bf16.mxu0 %v11371_v20  ;;  %v14135_v26 = vpack.c.bf16 %v630_v32, %v614_v53  ;;  %v585_v59 = vadd.f32 %v553_v24, %v427_v33  ;;  %v11378_v50 = vcombine.low %v14110_v39, %v1022_v15  ;;  %v1054_v53 = vld [vmem:[#allocation7 + $0xca0] sm:$0xff]  ;;  %v799_v32 = vld [vmem:[#allocation7 + $0x4a8] sm:$0xff] }
 0x17e   :  { %7234 = vmatprep.subr.bf16.mxu1 %v11117_v58  ;;  %v601_v8 = vadd.f32 %v569_v44, %v443_v48  ;;  %v394_v18 = vmul.f32 %v359_v57, %v13594_v23  ;;  %v410_v34 = vmul.f32 %v359_v57, %v13628_v12  ;;  %v552_v51 = vmul.f32 %v517_v43, %v13655_v35  ;;  %v779_v23 = vld [vmem:[#allocation7 + $0x408] sm:$0xff] }
 0x17f   :  { %v617_v19 = vmax.f32 %v585_v59, 0.0  ;;  %v568_v28 = vmul.f32 %v517_v43, %v13651_v47  ;;  %v11124_v45 = vcombine.low %v763_v61, %v767_v49  ;;  %v11387_v20 = vcombine.high %v1026_v54, %v1030_v62  ;;  %v791_v58 = vld [vmem:[#allocation7 + $0x468] sm:$0xff]  ;;  %v1050_v49 = vld [vmem:[#allocation7 + $0xc80] sm:$0xff] }
 0x180   :  { %6977 = vmatpush1.bf16.msra.mxu0 %v11370_v25  ;;  %v633_v17 = vmax.f32 %v601_v8, 0.0  ;;  %v426_v22 = vadd.f32 %v394_v18, %v268_v36  ;;  %v11133_v37 = vcombine.high %v771_v16, %v775_v27  ;;  %v442_v39 = vadd.f32 %v410_v34, %v284_v30  ;;  %v783_v25 = vld [vmem:[#allocation7 + $0x428] sm:$0xff]  ;;  %v1058_v36 = vld [vmem:[#allocation7 + $0xcc0] sm:$0xff] }
 0x181   :  { %7235 = vmatpush1.bf16.msra.mxu1 %v11116_v5  ;;  %6978 = vmatprep.subr.bf16.mxu0 %v11379_v10  ;;  %v11386_v35 = vcombine.low %v1026_v54, %v1030_v62  ;;  %v11132_v47 = vcombine.low %v771_v16, %v775_v27  ;;  %v11395_v31 = vcombine.high %v1034_v11, %v1038_v2  ;;  %v787_v5 = vld [vmem:[#allocation7 + $0x448] sm:$0xff]  ;;  %v1062_v30 = vld [vmem:[#allocation7 + $0xce0] sm:$0xff] }
 0x182   :  { %7236 = vmatprep.subr.bf16.mxu1 %v11125_v1  ;;  %v14142_v15 = vpack.c.bf16 %v633_v17, %v617_v19  ;;  %v584_v12 = vadd.f32 %v552_v51, %v426_v22  ;;  %v600_v57 = vadd.f32 %v568_v28, %v442_v39  ;;  %v11141_v55 = vcombine.high %v779_v23, %v783_v25  ;;  %v795_v43 = vld [vmem:[#allocation7 + $0x488] sm:$0xff]  ;;  %v1066_v27 = vld [vmem:[#allocation7 + $0xd00] sm:$0xff] }
 0x183   :  { %v11394_v40 = vcombine.low %v1034_v11, %v1038_v2  ;;  %v11140_v10 = vcombine.low %v779_v23, %v783_v25  ;;  %v11403_v61 = vcombine.high %v1042_v0, %v1046_v4  ;;  %v11149_v63 = vcombine.high %v787_v5, %v791_v58  ;;  %v803_v1 = vld [vmem:[#allocation7 + $0x4c8] sm:$0xff]  ;;  %v1070_v8 = vld [vmem:[#allocation7 + $0xd20] sm:$0xff] }
 0x184   :  { %6979 = vmatpush1.bf16.msra.mxu0 %v11378_v50  ;;  %v616_v52 = vmax.f32 %v584_v12, 0.0  ;;  %v632_v14 = vmax.f32 %v600_v57, 0.0  ;;  %v11402_v33 = vcombine.low %v1042_v0, %v1046_v4  ;;  %v11148_v24 = vcombine.low %v787_v5, %v791_v58  ;;  %v807_v54 = vld [vmem:[#allocation7 + $0x4e8] sm:$0xff]  ;;  %v1078_v17 = vld [vmem:[#allocation7 + $0xd60] sm:$0xff] }
 0x185   :  { %7237 = vmatpush1.bf16.msra.mxu1 %v11124_v45  ;;  %6980 = vmatprep.subr.bf16.mxu0 %v11387_v20  ;;  %v11411_v44 = vcombine.high %v1050_v49, %v1054_v53  ;;  %v11157_v48 = vcombine.high %v795_v43, %v799_v32  ;;  %v11410_v62 = vcombine.low %v1050_v49, %v1054_v53  ;;  %v811_v18 = vld [vmem:[#allocation7 + $0x508] sm:$0xff]  ;;  %v1074_v20 = vld [vmem:[#allocation7 + $0xd40] sm:$0xff] }
 0x186   :  { %7238 = vmatprep.subr.bf16.mxu1 %v11133_v37  ;;  %v14144_v29 = vpack.c.bf16 %v632_v14, %v616_v52  ;;  %v11156_v59 = vcombine.low %v795_v43, %v799_v32  ;;  %v11419_v50 = vcombine.high %v1058_v36, %v1062_v30  ;;  %v11165_v16 = vcombine.high %v803_v1, %v807_v54  ;;  %v815_v19 = vld [vmem:[#allocation7 + $0x528] sm:$0xff]  ;;  %v1082_v25 = vld [vmem:[#allocation7 + $0xd80] sm:$0xff] }
 0x187   :  { %v11418_v34 = vcombine.low %v1058_v36, %v1062_v30  ;;  %v11164_v51 = vcombine.low %v803_v1, %v807_v54  ;;  %v11427_v28 = vcombine.high %v1066_v27, %v1070_v8  ;;  %v11173_v45 = vcombine.high %v811_v18, %v815_v19  ;;  %v819_v22 = vld [vmem:[#allocation7 + $0x548] sm:$0xff]  ;;  %v1086_v12 = vld [vmem:[#allocation7 + $0xda0] sm:$0xff] }
 0x188   :  { %6981 = vmatpush1.bf16.msra.mxu0 %v11386_v35  ;;  %14578 = vst [vmem:[#allocation34_spill] sm:$0xff] %v14144_v29  ;;  %v823_v37 = vld [vmem:[#allocation7 + $0x568] sm:$0xff]  ;;  %v11426_v11 = vcombine.low %v1066_v27, %v1070_v8  ;;  %v11172_v2 = vcombine.low %v811_v18, %v815_v19  ;;  %v11435_v39 = vcombine.high %v1074_v20, %v1078_v17  ;;  %v1090_v14 = vld [vmem:[#allocation7 + $0xdc0] sm:$0xff] }
 0x189   :  { %7239 = vmatpush1.bf16.msra.mxu1 %v11132_v47  ;;  %6993 = vmatprep.subr.bf16.mxu0 %v11395_v31  ;;  %v11181_v23 = vcombine.high %v819_v22, %v823_v37  ;;  %v827_v35 = vld [vmem:[#allocation7 + $0x588] sm:$0xff]  ;;  %v11434_v47 = vcombine.low %v1074_v20, %v1078_v17  ;;  %v11180_v31 = vcombine.low %v819_v22, %v823_v37  ;;  %v1094_v0 = vld [vmem:[#allocation7 + $0xde0] sm:$0xff] }
 0x18a   :  { %7251 = vmatprep.subr.bf16.mxu1 %v11141_v55  ;;  %v831_v57 = vld [vmem:[#allocation7 + $0x5a8] sm:$0xff]  ;;  %v11443_v52 = vcombine.high %v1082_v25, %v1086_v12  ;;  %v11442_v5 = vcombine.low %v1082_v25, %v1086_v12  ;;  %v1098_v49 = vld [vmem:[#allocation7 + $0xe00] sm:$0xff]  ;;  %v11450_v32 = vcombine.low %v1090_v14, %v1094_v0 }
 0x18b   :  { %6983 = vmatmul.mubr.bf16.vlgmr.msra.gmra.mrb[0].mxu0 %v13784_v13  ;;  %v11189_v55 = vcombine.high %v827_v35, %v831_v57  ;;  %v835_v4 = vld [vmem:[#allocation7 + $0x5c8] sm:$0xff]  ;;  %v11188_v58 = vcombine.low %v827_v35, %v831_v57  ;;  %v1102_v53 = vld [vmem:[#allocation7 + $0xe20] sm:$0xff] }
 0x18c   :  { %7241 = vmatmul.mubr.bf16.vlgmr.msra.gmra.mrb[4].mxu1 %v13679_v42  ;;  %6994 = vmatpush1.bf16.msra.mxu0 %v11394_v40  ;;  %v839_v40 = vld [vmem:[#allocation7 + $0x5e8] sm:$0xff]  ;;  %v1110_v36 = vld [vmem:[#allocation7 + $0xe60] sm:$0xff]  ;;  %v11458_v54 = vcombine.low %v1098_v49, %v1102_v53 }
 0x18d   :  { %7025 = vmatprep.mubr.bf16.mxu0 %v13814_v9  ;;  %7252 = vmatpush1.bf16.msra.mxu1 %v11140_v10  ;;  %v11451_v10 = vcombine.high %v1090_v14, %v1094_v0  ;;  %v847_v43 = vld [vmem:[#allocation7 + $0x628] sm:$0xff]  ;;  %v1118_v27 = vld [vmem:[#allocation7 + $0xea0] sm:$0xff] }
 0x18e   :  { %7283 = vmatprep.mubr.bf16.mxu1 %v13677_v46  ;;  %6995 = vmatprep.subr.bf16.mxu0 %v11403_v61  ;;  %v11197_v61 = vcombine.high %v835_v4, %v839_v40  ;;  %v851_v30 = vld [vmem:[#allocation7 + $0x648] sm:$0xff]  ;;  %v1126_v20 = vld [vmem:[#allocation7 + $0xee0] sm:$0xff] }
 0x18f   :  { %7253 = vmatprep.subr.bf16.mxu1 %v11149_v63  ;;  %v843_v63 = vld [vmem:[#allocation7 + $0x608] sm:$0xff]  ;;  %v1134_v25 = vld [vmem:[#allocation7 + $0xf20] sm:$0xff] }
 0x190   :  { %6996 = vmatpush1.bf16.msra.mxu0 %v11402_v33  ;;  %v11196_v33 = vcombine.low %v835_v4, %v839_v40  ;;  %v855_v1 = vld [vmem:[#allocation7 + $0x668] sm:$0xff]  ;;  %v1142_v14 = vld [vmem:[#allocation7 + $0xf60] sm:$0xff] }
 0x191   :  { %7254 = vmatpush1.bf16.msra.mxu1 %v11148_v24  ;;  %6997 = vmatprep.subr.bf16.mxu0 %v11411_v44  ;;  %v11459_v24 = vcombine.high %v1098_v49, %v1102_v53  ;;  %v11205_v44 = vcombine.high %v843_v63, %v847_v43  ;;  %v859_v8 = vld [vmem:[#allocation7 + $0x688] sm:$0xff]  ;;  %v1150_v49 = vld [vmem:[#allocation7 + $0xfa0] sm:$0xff] }
 0x192   :  { %7255 = vmatprep.subr.bf16.mxu1 %v11157_v48  ;;  %v1106_v48 = vld [vmem:[#allocation7 + $0xe40] sm:$0xff]  ;;  %v863_v18 = vld [vmem:[#allocation7 + $0x6a8] sm:$0xff] }
 0x193   :  { %v11466_v19 = vcombine.low %v1106_v48, %v1110_v36  ;;  %v867_v17 = vld [vmem:[#allocation7 + $0x6c8] sm:$0xff] }
 0x194   :  { %6998 = vmatpush1.bf16.msra.mxu0 %v11410_v62  ;;  %v11204_v62 = vcombine.low %v843_v63, %v847_v43  ;;  %v871_v22 = vld [vmem:[#allocation7 + $0x6e8] sm:$0xff] }
 0x195   :  { %7256 = vmatpush1.bf16.msra.mxu1 %v11156_v59  ;;  %6999 = vmatprep.subr.bf16.mxu0 %v11419_v50  ;;  %v11467_v59 = vcombine.high %v1106_v48, %v1110_v36  ;;  %v11213_v50 = vcombine.high %v851_v30, %v855_v1  ;;  %v875_v12 = vld [vmem:[#allocation7 + $0x708] sm:$0xff]  ;;  %v1158_v48 = vld [vmem:[#allocation7 + $0xfe0] sm:$0xff] }
 0x196   :  { %7257 = vmatprep.subr.bf16.mxu1 %v11165_v16  ;;  %v1114_v16 = vld [vmem:[#allocation7 + $0xe80] sm:$0xff]  ;;  %v879_v35 = vld [vmem:[#allocation7 + $0x728] sm:$0xff] }
 0x197   :  { %v11474_v37 = vcombine.low %v1114_v16, %v1118_v27  ;;  %v883_v0 = vld [vmem:[#allocation7 + $0x748] sm:$0xff] }
 0x198   :  { %7000 = vmatpush1.bf16.msra.mxu0 %v11418_v34  ;;  %v11212_v34 = vcombine.low %v851_v30, %v855_v1  ;;  %v887_v4 = vld [vmem:[#allocation7 + $0x768] sm:$0xff] }
 0x199   :  { %7258 = vmatpush1.bf16.msra.mxu1 %v11164_v51  ;;  %7001 = vmatprep.subr.bf16.mxu0 %v11427_v28  ;;  %v11475_v51 = vcombine.high %v1114_v16, %v1118_v27  ;;  %v11221_v28 = vcombine.high %v859_v8, %v863_v18  ;;  %v891_v53 = vld [vmem:[#allocation7 + $0x788] sm:$0xff]  ;;  %v1166_v16 = vld [vmem:[#allocation7 + $0x1020] sm:$0xff] }
 0x19a   :  { %7259 = vmatprep.subr.bf16.mxu1 %v11173_v45  ;;  %v1122_v45 = vld [vmem:[#allocation7 + $0xec0] sm:$0xff]  ;;  %v895_v63 = vld [vmem:[#allocation7 + $0x7a8] sm:$0xff] }
 0x19b   :  { %v11482_v57 = vcombine.low %v1122_v45, %v1126_v20  ;;  %v899_v36 = vld [vmem:[#allocation7 + $0x7c8] sm:$0xff] }
 0x19c   :  { %7002 = vmatpush1.bf16.msra.mxu0 %v11426_v11  ;;  %v11220_v11 = vcombine.low %v859_v8, %v863_v18  ;;  %v903_v30 = vld [vmem:[#allocation7 + $0x7e8] sm:$0xff] }
 0x19d   :  { %7260 = vmatpush1.bf16.msra.mxu1 %v11172_v2  ;;  %7003 = vmatprep.subr.bf16.mxu0 %v11435_v39  ;;  %v11483_v2 = vcombine.high %v1122_v45, %v1126_v20  ;;  %v11229_v39 = vcombine.high %v867_v17, %v871_v22  ;;  %v907_v27 = vld [vmem:[#allocation7 + $0x808] sm:$0xff]  ;;  %v1174_v45 = vld [vmem:[#allocation7 + $0x1060] sm:$0xff] }
 0x19e   :  { %7261 = vmatprep.subr.bf16.mxu1 %v11181_v23  ;;  %v1130_v23 = vld [vmem:[#allocation7 + $0xf00] sm:$0xff]  ;;  %v911_v8 = vld [vmem:[#allocation7 + $0x828] sm:$0xff] }
 0x19f   :  { %v11490_v40 = vcombine.low %v1130_v23, %v1134_v25 }
 0x1a0   :  { %7004 = vmatpush1.bf16.msra.mxu0 %v11434_v47  ;;  %v11228_v47 = vcombine.low %v867_v17, %v871_v22  ;;  %v915_v17 = vld [vmem:[#allocation7 + $0x848] sm:$0xff] }
 0x1a1   :  { %7262 = vmatpush1.bf16.msra.mxu1 %v11180_v31  ;;  %7005 = vmatprep.subr.bf16.mxu0 %v11443_v52  ;;  %v11491_v31 = vcombine.high %v1130_v23, %v1134_v25  ;;  %v11237_v52 = vcombine.high %v875_v12, %v879_v35  ;;  %v919_v22 = vld [vmem:[#allocation7 + $0x868] sm:$0xff]  ;;  %v14579_v23 = vld [vmem:[#allocation33_spill] sm:$0xff] }
 0x1a2   :  { %7263 = vmatprep.subr.bf16.mxu1 %v11189_v55  ;;  %v1138_v55 = vld [vmem:[#allocation7 + $0xf40] sm:$0xff]  ;;  %v11277_v25 = vcombine.high %v915_v17, %v919_v22 }
 0x1a3   :  { %v11498_v43 = vcombine.low %v1138_v55, %v1142_v14 }
 0x1a4   :  { %7006 = vmatpush1.bf16.msra.mxu0 %v11442_v5  ;;  %v11236_v5 = vcombine.low %v875_v12, %v879_v35  ;;  %v923_v12 = vld [vmem:[#allocation7 + $0x888] sm:$0xff] }
 0x1a5   :  { %7264 = vmatpush1.bf16.msra.mxu1 %v11188_v58  ;;  %7007 = vmatprep.subr.bf16.mxu0 %v11451_v10  ;;  %v11499_v58 = vcombine.high %v1138_v55, %v1142_v14  ;;  %v11245_v10 = vcombine.high %v883_v0, %v887_v4  ;;  %v927_v35 = vld [vmem:[#allocation7 + $0x8a8] sm:$0xff]  ;;  %v14582_v14 = vld [vmem:[#allocation42_spill] sm:$0xff] }
 0x1a6   :  { %7265 = vmatprep.subr.bf16.mxu1 %v11197_v61  ;;  %v1146_v61 = vld [vmem:[#allocation7 + $0xf80] sm:$0xff] }
 0x1a7   :  { %v11506_v1 = vcombine.low %v1146_v61, %v1150_v49 }
 0x1a8   :  { %7008 = vmatpush1.bf16.msra.mxu0 %v11450_v32  ;;  %v11244_v32 = vcombine.low %v883_v0, %v887_v4  ;;  %v11285_v0 = vcombine.high %v923_v12, %v927_v35  ;;  %v1186_v4 = vld [vmem:[#allocation7 + $0x10c0] sm:$0xff] }
 0x1a9   :  { %7266 = vmatpush1.bf16.msra.mxu1 %v11196_v33  ;;  %7009 = vmatprep.subr.bf16.mxu0 %v11459_v24  ;;  %v11507_v33 = vcombine.high %v1146_v61, %v1150_v49  ;;  %v11253_v24 = vcombine.high %v891_v53, %v895_v63  ;;  %v11284_v61 = vcombine.low %v923_v12, %v927_v35  ;;  %v1226_v35 = vld [vmem:[#allocation7 + $0x1200] sm:$0xff] }
 0x1aa   :  { %7267 = vmatprep.subr.bf16.mxu1 %v11205_v44  ;;  %v1154_v44 = vld [vmem:[#allocation7 + $0xfc0] sm:$0xff] }
 0x1ab   :  { %v11514_v18 = vcombine.low %v1154_v44, %v1158_v48 }
 0x1ac   :  { %7010 = vmatpush1.bf16.msra.mxu0 %v11458_v54  ;;  %v11252_v54 = vcombine.low %v891_v53, %v895_v63  ;;  %v1194_v63 = vld [vmem:[#allocation7 + $0x1100] sm:$0xff] }
 0x1ad   :  { %7268 = vmatpush1.bf16.msra.mxu1 %v11204_v62  ;;  %7011 = vmatprep.subr.bf16.mxu0 %v11467_v59  ;;  %v11515_v62 = vcombine.high %v1154_v44, %v1158_v48  ;;  %v11261_v59 = vcombine.high %v899_v36, %v903_v30 }
 0x1ae   :  { %7269 = vmatprep.subr.bf16.mxu1 %v11213_v50  ;;  %v1162_v50 = vld [vmem:[#allocation7 + $0x1000] sm:$0xff] }
 0x1af   :  { %v11522_v20 = vcombine.low %v1162_v50, %v1166_v16 }
 0x1b0   :  { %7012 = vmatpush1.bf16.msra.mxu0 %v11466_v19  ;;  %v11260_v19 = vcombine.low %v899_v36, %v903_v30  ;;  %v1202_v30 = vld [vmem:[#allocation7 + $0x1140] sm:$0xff] }
 0x1b1   :  { %7270 = vmatpush1.bf16.msra.mxu1 %v11212_v34  ;;  %7013 = vmatprep.subr.bf16.mxu0 %v11475_v51  ;;  %v11523_v34 = vcombine.high %v1162_v50, %v1166_v16  ;;  %v11269_v51 = vcombine.high %v907_v27, %v911_v8 }
 0x1b2   :  { %7271 = vmatprep.subr.bf16.mxu1 %v11221_v28  ;;  %v1170_v28 = vld [vmem:[#allocation7 + $0x1040] sm:$0xff] }
 0x1b4   :  { %7014 = vmatpush1.bf16.msra.mxu0 %v11474_v37  ;;  %v11268_v37 = vcombine.low %v907_v27, %v911_v8  ;;  %v1210_v8 = vld [vmem:[#allocation7 + $0x1180] sm:$0xff] }
 0x1b5   :  { %7272 = vmatpush1.bf16.msra.mxu1 %v11220_v11  ;;  %7015 = vmatprep.subr.bf16.mxu0 %v11483_v2  ;;  %v11531_v11 = vcombine.high %v1170_v28, %v1174_v45  ;;  %v1178_v2 = vld [vmem:[#allocation7 + $0x1080] sm:$0xff] }
 0x1b6   :  { %7273 = vmatprep.subr.bf16.mxu1 %v11229_v39  ;;  %v1182_v39 = vld [vmem:[#allocation7 + $0x10a0] sm:$0xff] }
 0x1b7   :  { %v11539_v55 = vcombine.high %v1178_v2, %v1182_v39 }
 0x1b8   :  { %7016 = vmatpush1.bf16.msra.mxu0 %v11482_v57  ;;  %v14580_v57 = vld [vmem:[#allocation41_spill] sm:$0xff] }
 0x1b9   :  { %7274 = vmatpush1.bf16.msra.mxu1 %v11228_v47  ;;  %7017 = vmatprep.subr.bf16.mxu0 %v11491_v31  ;;  %v11530_v47 = vcombine.low %v1170_v28, %v1174_v45  ;;  %v14581_v31 = vld [vmem:[#allocation37_spill] sm:$0xff] }
 0x1ba   :  { %7275 = vmatprep.subr.bf16.mxu1 %v11237_v52  ;;  %v11276_v52 = vcombine.low %v915_v17, %v919_v22  ;;  %v1218_v17 = vld [vmem:[#allocation7 + $0x11c0] sm:$0xff] }
 0x1bb   :  { %v1222_v22 = vld [vmem:[#allocation7 + $0x11e0] sm:$0xff] }
 0x1bc   :  { %7018 = vmatpush1.bf16.msra.mxu0 %v11490_v40  ;;  %v1190_v40 = vld [vmem:[#allocation7 + $0x10e0] sm:$0xff] }
 0x1bd   :  { %7276 = vmatpush1.bf16.msra.mxu1 %v11236_v5  ;;  %7019 = vmatprep.subr.bf16.mxu0 %v11499_v58  ;;  %v931_v5 = vld [vmem:[#allocation7 + $0x8c8] sm:$0xff]  ;;  %v11547_v49 = vcombine.high %v1186_v4, %v1190_v40 }
 0x1be   :  { %7277 = vmatprep.subr.bf16.mxu1 %v11245_v10  ;;  %v935_v58 = vld [vmem:[#allocation7 + $0x8e8] sm:$0xff]  ;;  %v11538_v10 = vcombine.low %v1178_v2, %v1182_v39 }
 0x1bf   :  { %v11293_v53 = vcombine.high %v931_v5, %v935_v58  ;;  %v11292_v44 = vcombine.low %v931_v5, %v935_v58  ;;  %v1234_v58 = vld [vmem:[#allocation7 + $0x1240] sm:$0xff] }
 0x1c0   :  { %7020 = vmatpush1.bf16.msra.mxu0 %v11498_v43  ;;  %v1198_v43 = vld [vmem:[#allocation7 + $0x1120] sm:$0xff] }
 0x1c1   :  { %7278 = vmatpush1.bf16.msra.mxu1 %v11244_v32  ;;  %7021 = vmatprep.subr.bf16.mxu0 %v11507_v33  ;;  %v939_v32 = vld [vmem:[#allocation7 + $0x908] sm:$0xff]  ;;  %v11555_v48 = vcombine.high %v1194_v63, %v1198_v43 }
 0x1c2   :  { %7279 = vmatprep.subr.bf16.mxu1 %v11253_v24  ;;  %v943_v33 = vld [vmem:[#allocation7 + $0x928] sm:$0xff]  ;;  %v11546_v24 = vcombine.low %v1186_v4, %v1190_v40 }
 0x1c3   :  { %v11301_v36 = vcombine.high %v939_v32, %v943_v33  ;;  %v11300_v50 = vcombine.low %v939_v32, %v943_v33  ;;  %v1242_v33 = vld [vmem:[#allocation7 + $0x1280] sm:$0xff] }
 0x1c4   :  { %7022 = vmatpush1.bf16.msra.mxu0 %v11506_v1  ;;  %v1206_v1 = vld [vmem:[#allocation7 + $0x1160] sm:$0xff] }
 0x1c5   :  { %7280 = vmatpush1.bf16.msra.mxu1 %v11252_v54  ;;  %7023 = vmatprep.subr.bf16.mxu0 %v11515_v62  ;;  %v947_v54 = vld [vmem:[#allocation7 + $0x948] sm:$0xff]  ;;  %v11563_v16 = vcombine.high %v1202_v30, %v1206_v1 }
 0x1c6   :  { %7281 = vmatprep.subr.bf16.mxu1 %v11261_v59  ;;  %v951_v62 = vld [vmem:[#allocation7 + $0x968] sm:$0xff]  ;;  %v11554_v59 = vcombine.low %v1194_v63, %v1198_v43 }
 0x1c7   :  { %v11309_v27 = vcombine.high %v947_v54, %v951_v62  ;;  %v11308_v28 = vcombine.low %v947_v54, %v951_v62  ;;  %v1250_v62 = vld [vmem:[#allocation7 + $0x12c0] sm:$0xff] }
 0x1c8   :  { %7024 = vmatpush1.bf16.msra.mxu0 %v11514_v18  ;;  %v1214_v18 = vld [vmem:[#allocation7 + $0x11a0] sm:$0xff] }
 0x1c9   :  { %7282 = vmatpush1.bf16.msra.mxu1 %v11260_v19  ;;  %7036 = vmatprep.subr.bf16.mxu0 %v11523_v34  ;;  %v955_v19 = vld [vmem:[#allocation7 + $0x988] sm:$0xff]  ;;  %v11571_v45 = vcombine.high %v1210_v8, %v1214_v18  ;;  %v11570_v2 = vcombine.low %v1210_v8, %v1214_v18 }
 0x1ca   :  { %7294 = vmatprep.subr.bf16.mxu1 %v11269_v51  ;;  %v959_v34 = vld [vmem:[#allocation7 + $0x9a8] sm:$0xff]  ;;  %v11562_v51 = vcombine.low %v1202_v30, %v1206_v1 }
 0x1cb   :  { %7026 = vmatmul.mubr.bf16.vlgmr.msra.gmra.mrb[0].mxu0 %v14579_v23  ;;  %v11316_v39 = vcombine.low %v955_v19, %v959_v34 }
 0x1cc   :  { %7284 = vmatmul.mubr.bf16.vlgmr.msra.gmra.mrb[4].mxu1 %v14580_v57  ;;  %7037 = vmatpush1.bf16.msra.mxu0 %v11522_v20  ;;  %v11317_v20 = vcombine.high %v955_v19, %v959_v34  ;;  %v1258_v34 = vld [vmem:[#allocation7 + $0x1300] sm:$0xff] }
 0x1cd   :  { %7068 = vmatprep.mubr.bf16.mxu0 %v14581_v31  ;;  %7295 = vmatpush1.bf16.msra.mxu1 %v11268_v37  ;;  %v963_v37 = vld [vmem:[#allocation7 + $0x9c8] sm:$0xff] }
 0x1ce   :  { %7326 = vmatprep.mubr.bf16.mxu1 %v14582_v14  ;;  %7038 = vmatprep.subr.bf16.mxu0 %v11531_v11  ;;  %v967_v11 = vld [vmem:[#allocation7 + $0x9e8] sm:$0xff] }
 0x1cf   :  { %7296 = vmatprep.subr.bf16.mxu1 %v11277_v25  ;;  %v11579_v25 = vcombine.high %v1218_v17, %v1222_v22  ;;  %v11325_v12 = vcombine.high %v963_v37, %v967_v11  ;;  %v11324_v4 = vcombine.low %v963_v37, %v967_v11  ;;  %v1266_v11 = vld [vmem:[#allocation7 + $0x1340] sm:$0xff] }
 0x1d0   :  { %7039 = vmatpush1.bf16.msra.mxu0 %v11530_v47  ;;  %v1230_v47 = vld [vmem:[#allocation7 + $0x1220] sm:$0xff] }
 0x1d1   :  { %7297 = vmatpush1.bf16.msra.mxu1 %v11276_v52  ;;  %7040 = vmatprep.subr.bf16.mxu0 %v11539_v55  ;;  %v971_v52 = vld [vmem:[#allocation7 + $0xa08] sm:$0xff]  ;;  %v11587_v40 = vcombine.high %v1226_v35, %v1230_v47 }
 0x1d2   :  { %7298 = vmatprep.subr.bf16.mxu1 %v11285_v0  ;;  %v975_v55 = vld [vmem:[#allocation7 + $0xa28] sm:$0xff]  ;;  %v11578_v0 = vcombine.low %v1218_v17, %v1222_v22 }
 0x1d3   :  { %v11333_v5 = vcombine.high %v971_v52, %v975_v55  ;;  %v11332_v63 = vcombine.low %v971_v52, %v975_v55  ;;  %v1274_v55 = vld [vmem:[#allocation7 + $0x1380] sm:$0xff] }
 0x1d4   :  { %7041 = vmatpush1.bf16.msra.mxu0 %v11538_v10  ;;  %v1238_v10 = vld [vmem:[#allocation7 + $0x1260] sm:$0xff] }
 0x1d5   :  { %7299 = vmatpush1.bf16.msra.mxu1 %v11284_v61  ;;  %7042 = vmatprep.subr.bf16.mxu0 %v11547_v49  ;;  %v979_v61 = vld [vmem:[#allocation7 + $0xa48] sm:$0xff]  ;;  %v11595_v43 = vcombine.high %v1234_v58, %v1238_v10 }
 0x1d6   :  { %7300 = vmatprep.subr.bf16.mxu1 %v11293_v53  ;;  %v983_v49 = vld [vmem:[#allocation7 + $0xa68] sm:$0xff]  ;;  %v11586_v53 = vcombine.low %v1226_v35, %v1230_v47 }
 0x1d7   :  { %v11341_v32 = vcombine.high %v979_v61, %v983_v49  ;;  %v11340_v30 = vcombine.low %v979_v61, %v983_v49  ;;  %v1282_v49 = vld [vmem:[#allocation7 + $0x13c0] sm:$0xff] }
 0x1d8   :  { %7043 = vmatpush1.bf16.msra.mxu0 %v11546_v24  ;;  %v1246_v24 = vld [vmem:[#allocation7 + $0x12a0] sm:$0xff] }
 0x1d9   :  { %7301 = vmatpush1.bf16.msra.mxu1 %v11292_v44  ;;  %7044 = vmatprep.subr.bf16.mxu0 %v11555_v48  ;;  %v987_v44 = vld [vmem:[#allocation7 + $0xa88] sm:$0xff]  ;;  %v11603_v1 = vcombine.high %v1242_v33, %v1246_v24 }
 0x1da   :  { %7302 = vmatprep.subr.bf16.mxu1 %v11301_v36  ;;  %v991_v48 = vld [vmem:[#allocation7 + $0xaa8] sm:$0xff]  ;;  %v11594_v36 = vcombine.low %v1234_v58, %v1238_v10 }
 0x1db   :  { %v11349_v54 = vcombine.high %v987_v44, %v991_v48  ;;  %v11348_v8 = vcombine.low %v987_v44, %v991_v48  ;;  %v1290_v48 = vld [vmem:[#allocation7 + $0x1400] sm:$0xff] }
 0x1dc   :  { %7045 = vmatpush1.bf16.msra.mxu0 %v11554_v59  ;;  %v1254_v59 = vld [vmem:[#allocation7 + $0x12e0] sm:$0xff] }
 0x1dd   :  { %7303 = vmatpush1.bf16.msra.mxu1 %v11300_v50  ;;  %7046 = vmatprep.subr.bf16.mxu0 %v11563_v16  ;;  %v995_v50 = vld [vmem:[#allocation7 + $0xac8] sm:$0xff]  ;;  %v11611_v18 = vcombine.high %v1250_v62, %v1254_v59 }
 0x1de   :  { %7304 = vmatprep.subr.bf16.mxu1 %v11309_v27  ;;  %v999_v16 = vld [vmem:[#allocation7 + $0xae8] sm:$0xff]  ;;  %v11602_v27 = vcombine.low %v1242_v33, %v1246_v24 }
 0x1df   :  { %v11357_v19 = vcombine.high %v995_v50, %v999_v16  ;;  %v11356_v17 = vcombine.low %v995_v50, %v999_v16  ;;  %v1298_v16 = vld [vmem:[#allocation7 + $0x1440] sm:$0xff] }
 0x1e0   :  { %7047 = vmatpush1.bf16.msra.mxu0 %v11562_v51  ;;  %v1262_v51 = vld [vmem:[#allocation7 + $0x1320] sm:$0xff] }
 0x1e1   :  { %7305 = vmatpush1.bf16.msra.mxu1 %v11308_v28  ;;  %7048 = vmatprep.subr.bf16.mxu0 %v11571_v45  ;;  %v1003_v28 = vld [vmem:[#allocation7 + $0xb08] sm:$0xff]  ;;  %v11619_v22 = vcombine.high %v1258_v34, %v1262_v51 }
 0x1e2   :  { %7306 = vmatprep.subr.bf16.mxu1 %v11317_v20  ;;  %v1007_v45 = vld [vmem:[#allocation7 + $0xb28] sm:$0xff]  ;;  %v11610_v20 = vcombine.low %v1250_v62, %v1254_v59 }
 0x1e3   :  { %v11365_v37 = vcombine.high %v1003_v28, %v1007_v45  ;;  %v11364_v35 = vcombine.low %v1003_v28, %v1007_v45  ;;  %v1306_v28 = vld [vmem:[#allocation7 + $0x1480] sm:$0xff] }
 0x1e4   :  { %7049 = vmatpush1.bf16.msra.mxu0 %v11570_v2  ;;  %v1270_v2 = vld [vmem:[#allocation7 + $0x1360] sm:$0xff] }
 0x1e5   :  { %7307 = vmatpush1.bf16.msra.mxu1 %v11316_v39  ;;  %7050 = vmatprep.subr.bf16.mxu0 %v11579_v25  ;;  %v1011_v39 = vld [vmem:[#allocation7 + $0xb48] sm:$0xff]  ;;  %v11627_v47 = vcombine.high %v1266_v11, %v1270_v2  ;;  %v1310_v45 = vld [vmem:[#allocation7 + $0x14a0] sm:$0xff] }
 0x1e6   :  { %7308 = vmatprep.subr.bf16.mxu1 %v11325_v12  ;;  %v1015_v25 = vld [vmem:[#allocation7 + $0xb68] sm:$0xff]  ;;  %v11618_v12 = vcombine.low %v1258_v34, %v1262_v51 }
 0x1e7   :  { %v11373_v52 = vcombine.high %v1011_v39, %v1015_v25  ;;  %v11372_v58 = vcombine.low %v1011_v39, %v1015_v25  ;;  %v1314_v25 = vld [vmem:[#allocation7 + $0x14c0] sm:$0xff] }
 0x1e8   :  { %7051 = vmatpush1.bf16.msra.mxu0 %v11578_v0  ;;  %v1278_v0 = vld [vmem:[#allocation7 + $0x13a0] sm:$0xff] }
 0x1e9   :  { %7309 = vmatpush1.bf16.msra.mxu1 %v11324_v4  ;;  %7052 = vmatprep.subr.bf16.mxu0 %v11587_v40  ;;  %v1019_v4 = vld [vmem:[#allocation7 + $0xb88] sm:$0xff]  ;;  %v11635_v10 = vcombine.high %v1274_v55, %v1278_v0 }
 0x1ea   :  { %7310 = vmatprep.subr.bf16.mxu1 %v11333_v5  ;;  %v1023_v40 = vld [vmem:[#allocation7 + $0xba8] sm:$0xff]  ;;  %v11626_v5 = vcombine.low %v1266_v11, %v1270_v2  ;;  %v11667_v2 = vcombine.high %v1306_v28, %v1310_v45 }
 0x1eb   :  { %v11381_v61 = vcombine.high %v1019_v4, %v1023_v40  ;;  %v11380_v33 = vcombine.low %v1019_v4, %v1023_v40  ;;  %v1322_v40 = vld [vmem:[#allocation7 + $0x1500] sm:$0xff] }
 0x1ec   :  { %7053 = vmatpush1.bf16.msra.mxu0 %v11586_v53  ;;  %v1286_v53 = vld [vmem:[#allocation7 + $0x13e0] sm:$0xff] }
 0x1ed   :  { %7311 = vmatpush1.bf16.msra.mxu1 %v11332_v63  ;;  %7054 = vmatprep.subr.bf16.mxu0 %v11595_v43  ;;  %v1027_v63 = vld [vmem:[#allocation7 + $0xbc8] sm:$0xff]  ;;  %v11643_v24 = vcombine.high %v1282_v49, %v1286_v53 }
 0x1ee   :  { %7312 = vmatprep.subr.bf16.mxu1 %v11341_v32  ;;  %v1031_v43 = vld [vmem:[#allocation7 + $0xbe8] sm:$0xff]  ;;  %v11634_v32 = vcombine.low %v1274_v55, %v1278_v0 }
 0x1ef   :  { %v11389_v44 = vcombine.high %v1027_v63, %v1031_v43  ;;  %v11388_v62 = vcombine.low %v1027_v63, %v1031_v43  ;;  %v1330_v43 = vld [vmem:[#allocation7 + $0x1540] sm:$0xff] }
 0x1f0   :  { %7055 = vmatpush1.bf16.msra.mxu0 %v11594_v36  ;;  %v1294_v36 = vld [vmem:[#allocation7 + $0x1420] sm:$0xff] }
 0x1f1   :  { %7313 = vmatpush1.bf16.msra.mxu1 %v11340_v30  ;;  %7056 = vmatprep.subr.bf16.mxu0 %v11603_v1  ;;  %v1035_v30 = vld [vmem:[#allocation7 + $0xc08] sm:$0xff]  ;;  %v11651_v59 = vcombine.high %v1290_v48, %v1294_v36 }
 0x1f2   :  { %7314 = vmatprep.subr.bf16.mxu1 %v11349_v54  ;;  %v1039_v1 = vld [vmem:[#allocation7 + $0xc28] sm:$0xff]  ;;  %v11642_v54 = vcombine.low %v1282_v49, %v1286_v53 }
 0x1f3   :  { %v11397_v50 = vcombine.high %v1035_v30, %v1039_v1  ;;  %v11396_v34 = vcombine.low %v1035_v30, %v1039_v1  ;;  %v1338_v1 = vld [vmem:[#allocation7 + $0x1580] sm:$0xff] }
 0x1f4   :  { %7057 = vmatpush1.bf16.msra.mxu0 %v11602_v27  ;;  %v1302_v27 = vld [vmem:[#allocation7 + $0x1460] sm:$0xff] }
 0x1f5   :  { %7315 = vmatpush1.bf16.msra.mxu1 %v11348_v8  ;;  %7058 = vmatprep.subr.bf16.mxu0 %v11611_v18  ;;  %v11650_v8 = vcombine.low %v1290_v48, %v1294_v36  ;;  %v1043_v18 = vld [vmem:[#allocation7 + $0xc48] sm:$0xff]  ;;  %v11659_v51 = vcombine.high %v1298_v16, %v1302_v27 }
 0x1f6   :  { %7316 = vmatprep.subr.bf16.mxu1 %v11357_v19  ;;  %v1047_v19 = vld [vmem:[#allocation7 + $0xc68] sm:$0xff] }
 0x1f7   :  { %v11404_v11 = vcombine.low %v1043_v18, %v1047_v19 }
 0x1f8   :  { %7059 = vmatpush1.bf16.msra.mxu0 %v11610_v20  ;;  %v11405_v20 = vcombine.high %v1043_v18, %v1047_v19  ;;  %v1346_v19 = vld [vmem:[#allocation7 + $0x15c0] sm:$0xff] }
 0x1f9   :  { %7317 = vmatpush1.bf16.msra.mxu1 %v11356_v17  ;;  %7060 = vmatprep.subr.bf16.mxu0 %v11619_v22  ;;  %v1051_v17 = vld [vmem:[#allocation7 + $0xc88] sm:$0xff] }
 0x1fa   :  { %7318 = vmatprep.subr.bf16.mxu1 %v11365_v37  ;;  %v1055_v22 = vld [vmem:[#allocation7 + $0xca8] sm:$0xff]  ;;  %v11658_v37 = vcombine.low %v1298_v16, %v1302_v27 }
 0x1fb   :  { %v11413_v39 = vcombine.high %v1051_v17, %v1055_v22  ;;  %v11412_v55 = vcombine.low %v1051_v17, %v1055_v22 }
 0x1fc   :  { %7061 = vmatpush1.bf16.msra.mxu0 %v11618_v12  ;;  %v1318_v12 = vld [vmem:[#allocation7 + $0x14e0] sm:$0xff] }
 0x1fd   :  { %7319 = vmatpush1.bf16.msra.mxu1 %v11364_v35  ;;  %7062 = vmatprep.subr.bf16.mxu0 %v11627_v47  ;;  %v1059_v35 = vld [vmem:[#allocation7 + $0xcc8] sm:$0xff]  ;;  %v11675_v0 = vcombine.high %v1314_v25, %v1318_v12 }
 0x1fe   :  { %7320 = vmatprep.subr.bf16.mxu1 %v11373_v52  ;;  %v1063_v47 = vld [vmem:[#allocation7 + $0xce8] sm:$0xff]  ;;  %v11666_v52 = vcombine.low %v1306_v28, %v1310_v45 }
 0x1ff   :  { %v11421_v4 = vcombine.high %v1059_v35, %v1063_v47  ;;  %v11420_v49 = vcombine.low %v1059_v35, %v1063_v47  ;;  %v1091_v28 = vld [vmem:[#allocation7 + $0xdc8] sm:$0xff] }
 0x200   :  { %7063 = vmatpush1.bf16.msra.mxu0 %v11626_v5  ;;  %v1326_v5 = vld [vmem:[#allocation7 + $0x1520] sm:$0xff]  ;;  %v1095_v45 = vld [vmem:[#allocation7 + $0xde8] sm:$0xff] }
 0x201   :  { %7321 = vmatpush1.bf16.msra.mxu1 %v11372_v58  ;;  %7064 = vmatprep.subr.bf16.mxu0 %v11635_v10  ;;  %v1067_v58 = vld [vmem:[#allocation7 + $0xd08] sm:$0xff]  ;;  %v11683_v53 = vcombine.high %v1322_v40, %v1326_v5 }
 0x202   :  { %7322 = vmatprep.subr.bf16.mxu1 %v11381_v61  ;;  %v1071_v10 = vld [vmem:[#allocation7 + $0xd28] sm:$0xff]  ;;  %v11674_v61 = vcombine.low %v1314_v25, %v1318_v12  ;;  %v1358_v25 = vld [vmem:[#allocation7 + $0x1620] sm:$0xff] }
 0x203   :  { %v11429_v63 = vcombine.high %v1067_v58, %v1071_v10  ;;  %v11428_v48 = vcombine.low %v1067_v58, %v1071_v10  ;;  %v1099_v12 = vld [vmem:[#allocation7 + $0xe08] sm:$0xff] }
 0x204   :  { %7065 = vmatpush1.bf16.msra.mxu0 %v11634_v32  ;;  %v1334_v32 = vld [vmem:[#allocation7 + $0x1560] sm:$0xff]  ;;  %v1103_v35 = vld [vmem:[#allocation7 + $0xe28] sm:$0xff] }
 0x205   :  { %7323 = vmatpush1.bf16.msra.mxu1 %v11380_v33  ;;  %7066 = vmatprep.subr.bf16.mxu0 %v11643_v24  ;;  %v1075_v33 = vld [vmem:[#allocation7 + $0xd48] sm:$0xff]  ;;  %v11691_v36 = vcombine.high %v1330_v43, %v1334_v32 }
 0x206   :  { %7324 = vmatprep.subr.bf16.mxu1 %v11389_v44  ;;  %v1079_v24 = vld [vmem:[#allocation7 + $0xd68] sm:$0xff]  ;;  %v11682_v44 = vcombine.low %v1322_v40, %v1326_v5  ;;  %v1366_v40 = vld [vmem:[#allocation7 + $0x1660] sm:$0xff] }
 0x207   :  { %v11437_v30 = vcombine.high %v1075_v33, %v1079_v24  ;;  %v11436_v16 = vcombine.low %v1075_v33, %v1079_v24  ;;  %v1107_v5 = vld [vmem:[#allocation7 + $0xe48] sm:$0xff] }
 0x208   :  { %7067 = vmatpush1.bf16.msra.mxu0 %v11642_v54  ;;  %v1342_v54 = vld [vmem:[#allocation7 + $0x15a0] sm:$0xff]  ;;  %v1111_v58 = vld [vmem:[#allocation7 + $0xe68] sm:$0xff] }
 0x209   :  { %7325 = vmatpush1.bf16.msra.mxu1 %v11388_v62  ;;  %7079 = vmatprep.subr.bf16.mxu0 %v11651_v59  ;;  %v1083_v62 = vld [vmem:[#allocation7 + $0xd88] sm:$0xff]  ;;  %v11699_v27 = vcombine.high %v1338_v1, %v1342_v54  ;;  %v11698_v17 = vcombine.low %v1338_v1, %v1342_v54  ;;  %v1382_v1 = vld [vmem:[#allocation7 + $0x16e0] sm:$0xff] }
 0x20a   :  { %7337 = vmatprep.subr.bf16.mxu1 %v11397_v50  ;;  %v1087_v59 = vld [vmem:[#allocation7 + $0xda8] sm:$0xff]  ;;  %v11690_v50 = vcombine.low %v1330_v43, %v1334_v32  ;;  %v1374_v43 = vld [vmem:[#allocation7 + $0x16a0] sm:$0xff] }
 0x20b   :  { %7069 = vmatmul.mubr.bf16.vlgmr.msra.gmra.mrb[0].mxu0 %v14022_v38  ;;  %v11445_v18 = vcombine.high %v1083_v62, %v1087_v59  ;;  %v1115_v32 = vld [vmem:[#allocation7 + $0xe88] sm:$0xff] }
 0x20c   :  { %7327 = vmatmul.mubr.bf16.vlgmr.msra.gmra.mrb[4].mxu1 %v13784_v13  ;;  %7080 = vmatpush1.bf16.msra.mxu0 %v11650_v8  ;;  %v1119_v33 = vld [vmem:[#allocation7 + $0xea8] sm:$0xff] }
 0x20d   :  { %7111 = vmatprep.mubr.bf16.mxu0 %v14064_v56  ;;  %7338 = vmatpush1.bf16.msra.mxu1 %v11396_v34  ;;  %v1350_v34 = vld [vmem:[#allocation7 + $0x15e0] sm:$0xff]  ;;  %v1123_v54 = vld [vmem:[#allocation7 + $0xec8] sm:$0xff] }
 0x20e   :  { %7369 = vmatprep.mubr.bf16.mxu1 %v13814_v9  ;;  %7081 = vmatprep.subr.bf16.mxu0 %v11659_v51  ;;  %v11706_v47 = vcombine.low %v1346_v19, %v1350_v34 }
 0x20f   :  { %7339 = vmatprep.subr.bf16.mxu1 %v11405_v20 }
 0x210   :  { %7082 = vmatpush1.bf16.msra.mxu0 %v11658_v37  ;;  %v11444_v37 = vcombine.low %v1083_v62, %v1087_v59  ;;  %v1127_v62 = vld [vmem:[#allocation7 + $0xee8] sm:$0xff] }
 0x211   :  { %7340 = vmatpush1.bf16.msra.mxu1 %v11404_v11  ;;  %7083 = vmatprep.subr.bf16.mxu0 %v11667_v2  ;;  %v11707_v11 = vcombine.high %v1346_v19, %v1350_v34  ;;  %v11453_v2 = vcombine.high %v1091_v28, %v1095_v45  ;;  %v1390_v19 = vld [vmem:[#allocation7 + $0x1720] sm:$0xff]  ;;  %v1131_v34 = vld [vmem:[#allocation7 + $0xf08] sm:$0xff] }
 0x212   :  { %7341 = vmatprep.subr.bf16.mxu1 %v11413_v39  ;;  %v1354_v39 = vld [vmem:[#allocation7 + $0x1600] sm:$0xff] }
 0x213   :  { %v11714_v10 = vcombine.low %v1354_v39, %v1358_v25 }
 0x214   :  { %7084 = vmatpush1.bf16.msra.mxu0 %v11666_v52  ;;  %v11452_v52 = vcombine.low %v1091_v28, %v1095_v45  ;;  %v1135_v28 = vld [vmem:[#allocation7 + $0xf28] sm:$0xff] }
 0x215   :  { %7342 = vmatpush1.bf16.msra.mxu1 %v11412_v55  ;;  %7085 = vmatprep.subr.bf16.mxu0 %v11675_v0  ;;  %v11715_v55 = vcombine.high %v1354_v39, %v1358_v25  ;;  %v11461_v0 = vcombine.high %v1099_v12, %v1103_v35  ;;  %v1398_v39 = vld [vmem:[#allocation7 + $0x1760] sm:$0xff]  ;;  %v1139_v25 = vld [vmem:[#allocation7 + $0xf48] sm:$0xff] }
 0x216   :  { %7343 = vmatprep.subr.bf16.mxu1 %v11421_v4  ;;  %v1362_v4 = vld [vmem:[#allocation7 + $0x1640] sm:$0xff] }
 0x217   :  { %v11722_v24 = vcombine.low %v1362_v4, %v1366_v40 }
 0x218   :  { %7086 = vmatpush1.bf16.msra.mxu0 %v11674_v61  ;;  %v11460_v61 = vcombine.low %v1099_v12, %v1103_v35  ;;  %v1143_v12 = vld [vmem:[#allocation7 + $0xf68] sm:$0xff] }
 0x219   :  { %7344 = vmatpush1.bf16.msra.mxu1 %v11420_v49  ;;  %7087 = vmatprep.subr.bf16.mxu0 %v11683_v53  ;;  %v11723_v49 = vcombine.high %v1362_v4, %v1366_v40  ;;  %v11469_v53 = vcombine.high %v1107_v5, %v1111_v58  ;;  %v1406_v4 = vld [vmem:[#allocation7 + $0x17a0] sm:$0xff]  ;;  %v1147_v40 = vld [vmem:[#allocation7 + $0xf88] sm:$0xff] }
 0x21a   :  { %7345 = vmatprep.subr.bf16.mxu1 %v11429_v63  ;;  %v14158_v8 = vpop.f32.mrb[0].mxu1  ;;  %v1370_v63 = vld [vmem:[#allocation7 + $0x1680] sm:$0xff] }
 0x21b   :  { %v14160_v51 = vpop.f32.mrb[1].mxu1  ;;  %v11730_v59 = vcombine.low %v1370_v63, %v1374_v43 }
 0x21c   :  { %7088 = vmatpush1.bf16.msra.mxu0 %v11682_v44  ;;  %v14162_v20 = vpop.f32.mrb[2].mxu1  ;;  %v11468_v44 = vcombine.low %v1107_v5, %v1111_v58  ;;  %v1151_v5 = vld [vmem:[#allocation7 + $0xfa8] sm:$0xff] }
 0x21d   :  { %7346 = vmatpush1.bf16.msra.mxu1 %v11428_v48  ;;  %7089 = vmatprep.subr.bf16.mxu0 %v11691_v36  ;;  %v14164_v22 = vpop.f32.mrb[3].mxu1  ;;  %v11731_v48 = vcombine.high %v1370_v63, %v1374_v43  ;;  %v11477_v36 = vcombine.high %v1115_v32, %v1119_v33  ;;  %v1414_v63 = vld [vmem:[#allocation7 + $0x17e0] sm:$0xff]  ;;  %v1155_v43 = vld [vmem:[#allocation7 + $0xfc8] sm:$0xff] }
 0x21e   :  { %7347 = vmatprep.subr.bf16.mxu1 %v11437_v30  ;;  %v1378_v30 = vld [vmem:[#allocation7 + $0x16c0] sm:$0xff] }
 0x21f   :  { %v11738_v45 = vcombine.low %v1378_v30, %v1382_v1 }
 0x220   :  { %7090 = vmatpush1.bf16.msra.mxu0 %v11690_v50  ;;  %v11476_v50 = vcombine.low %v1115_v32, %v1119_v33  ;;  %v1159_v32 = vld [vmem:[#allocation7 + $0xfe8] sm:$0xff] }
 0x221   :  { %7348 = vmatpush1.bf16.msra.mxu1 %v11436_v16  ;;  %7091 = vmatprep.subr.bf16.mxu0 %v11699_v27  ;;  %v11739_v16 = vcombine.high %v1378_v30, %v1382_v1  ;;  %v11485_v27 = vcombine.high %v1123_v54, %v1127_v62  ;;  %v1422_v30 = vld [vmem:[#allocation7 + $0x1820] sm:$0xff]  ;;  %v1163_v1 = vld [vmem:[#allocation7 + $0x1008] sm:$0xff] }
 0x222   :  { %7349 = vmatprep.subr.bf16.mxu1 %v11445_v18  ;;  %v1386_v18 = vld [vmem:[#allocation7 + $0x1700] sm:$0xff] }
 0x223   :  { %v11746_v35 = vcombine.low %v1386_v18, %v1390_v19 }
 0x224   :  { %7092 = vmatpush1.bf16.msra.mxu0 %v11698_v17  ;;  %v11484_v17 = vcombine.low %v1123_v54, %v1127_v62  ;;  %v1167_v54 = vld [vmem:[#allocation7 + $0x1028] sm:$0xff] }
 0x225   :  { %7350 = vmatpush1.bf16.msra.mxu1 %v11444_v37  ;;  %7093 = vmatprep.subr.bf16.mxu0 %v11707_v11  ;;  %v11747_v37 = vcombine.high %v1386_v18, %v1390_v19  ;;  %v11493_v11 = vcombine.high %v1131_v34, %v1135_v28  ;;  %v1430_v18 = vld [vmem:[#allocation7 + $0x1860] sm:$0xff] }
 0x226   :  { %7351 = vmatprep.subr.bf16.mxu1 %v11453_v2  ;;  %v1394_v2 = vld [vmem:[#allocation7 + $0x1740] sm:$0xff] }
 0x227   :  { %v11754_v58 = vcombine.low %v1394_v2, %v1398_v39 }
 0x228   :  { %7094 = vmatpush1.bf16.msra.mxu0 %v11706_v47  ;;  %v11492_v47 = vcombine.low %v1131_v34, %v1135_v28  ;;  %v1171_v34 = vld [vmem:[#allocation7 + $0x1048] sm:$0xff] }
 0x229   :  { %7352 = vmatpush1.bf16.msra.mxu1 %v11452_v52  ;;  %7095 = vmatprep.subr.bf16.mxu0 %v11715_v55  ;;  %v11755_v52 = vcombine.high %v1394_v2, %v1398_v39  ;;  %v11501_v55 = vcombine.high %v1139_v25, %v1143_v12  ;;  %v1175_v28 = vld [vmem:[#allocation7 + $0x1068] sm:$0xff] }
 0x22a   :  { %7353 = vmatprep.subr.bf16.mxu1 %v11461_v0  ;;  %v1402_v0 = vld [vmem:[#allocation7 + $0x1780] sm:$0xff]  ;;  %v11533_v2 = vcombine.high %v1171_v34, %v1175_v28  ;;  %v1179_v39 = vld [vmem:[#allocation7 + $0x1088] sm:$0xff] }
 0x22b   :  { %v11762_v33 = vcombine.low %v1402_v0, %v1406_v4 }
 0x22c   :  { %7096 = vmatpush1.bf16.msra.mxu0 %v11714_v10  ;;  %v11500_v10 = vcombine.low %v1139_v25, %v1143_v12  ;;  %v1183_v25 = vld [vmem:[#allocation7 + $0x10a8] sm:$0xff] }
 0x22d   :  { %7354 = vmatpush1.bf16.msra.mxu1 %v11460_v61  ;;  %7097 = vmatprep.subr.bf16.mxu0 %v11723_v49  ;;  %v11763_v61 = vcombine.high %v1402_v0, %v1406_v4  ;;  %v11509_v49 = vcombine.high %v1147_v40, %v1151_v5  ;;  %v1446_v0 = vld [vmem:[#allocation7 + $0x18e0] sm:$0xff]  ;;  %v1187_v4 = vld [vmem:[#allocation7 + $0x10c8] sm:$0xff] }
 0x22e   :  { %7355 = vmatprep.subr.bf16.mxu1 %v11469_v53  ;;  %v1410_v53 = vld [vmem:[#allocation7 + $0x17c0] sm:$0xff] }
 0x22f   :  { %v11770_v62 = vcombine.low %v1410_v53, %v1414_v63 }
 0x230   :  { %7098 = vmatpush1.bf16.msra.mxu0 %v11722_v24  ;;  %v11508_v24 = vcombine.low %v1147_v40, %v1151_v5  ;;  %v1191_v40 = vld [vmem:[#allocation7 + $0x10e8] sm:$0xff] }
 0x231   :  { %7356 = vmatpush1.bf16.msra.mxu1 %v11468_v44  ;;  %7099 = vmatprep.subr.bf16.mxu0 %v11731_v48  ;;  %v11771_v44 = vcombine.high %v1410_v53, %v1414_v63  ;;  %v11517_v48 = vcombine.high %v1155_v43, %v1159_v32  ;;  %v1454_v53 = vld [vmem:[#allocation7 + $0x1920] sm:$0xff]  ;;  %v1195_v63 = vld [vmem:[#allocation7 + $0x1108] sm:$0xff] }
 0x232   :  { %7357 = vmatprep.subr.bf16.mxu1 %v11477_v36  ;;  %v1418_v36 = vld [vmem:[#allocation7 + $0x1800] sm:$0xff] }
 0x233   :  { %v11778_v19 = vcombine.low %v1418_v36, %v1422_v30 }
 0x234   :  { %7100 = vmatpush1.bf16.msra.mxu0 %v11730_v59  ;;  %v11516_v59 = vcombine.low %v1155_v43, %v1159_v32  ;;  %v1199_v43 = vld [vmem:[#allocation7 + $0x1128] sm:$0xff] }
 0x235   :  { %7358 = vmatpush1.bf16.msra.mxu1 %v11476_v50  ;;  %7101 = vmatprep.subr.bf16.mxu0 %v11739_v16  ;;  %v11779_v50 = vcombine.high %v1418_v36, %v1422_v30  ;;  %v11525_v16 = vcombine.high %v1163_v1, %v1167_v54  ;;  %v1462_v36 = vld [vmem:[#allocation7 + $0x1960] sm:$0xff]  ;;  %v1203_v30 = vld [vmem:[#allocation7 + $0x1148] sm:$0xff] }
 0x236   :  { %7359 = vmatprep.subr.bf16.mxu1 %v11485_v27  ;;  %v1426_v27 = vld [vmem:[#allocation7 + $0x1840] sm:$0xff] }
 0x237   :  { %v11786_v12 = vcombine.low %v1426_v27, %v1430_v18 }
 0x238   :  { %7102 = vmatpush1.bf16.msra.mxu0 %v11738_v45  ;;  %v11524_v45 = vcombine.low %v1163_v1, %v1167_v54  ;;  %v1207_v1 = vld [vmem:[#allocation7 + $0x1168] sm:$0xff] }
 0x239   :  { %7360 = vmatpush1.bf16.msra.mxu1 %v11484_v17  ;;  %7103 = vmatprep.subr.bf16.mxu0 %v11747_v37  ;;  %v11787_v17 = vcombine.high %v1426_v27, %v1430_v18  ;;  %v1434_v37 = vld [vmem:[#allocation7 + $0x1880] sm:$0xff]  ;;  %v1211_v18 = vld [vmem:[#allocation7 + $0x1188] sm:$0xff] }
 0x23a   :  { %7361 = vmatprep.subr.bf16.mxu1 %v11493_v11  ;;  %v1438_v11 = vld [vmem:[#allocation7 + $0x18a0] sm:$0xff] }
 0x23b   :  { %v11794_v5 = vcombine.low %v1434_v37, %v1438_v11  ;;  %v1470_v27 = vld [vmem:[#allocation7 + $0x19a0] sm:$0xff] }
 0x23c   :  { %7104 = vmatpush1.bf16.msra.mxu0 %v11746_v35  ;;  %v11532_v35 = vcombine.low %v1171_v34, %v1175_v28  ;;  %v11564_v28 = vcombine.low %v1203_v30, %v1207_v1 }
 0x23d   :  { %7362 = vmatpush1.bf16.msra.mxu1 %v11492_v47  ;;  %7105 = vmatprep.subr.bf16.mxu0 %v11755_v52  ;;  %v11795_v47 = vcombine.high %v1434_v37, %v1438_v11  ;;  %v11541_v52 = vcombine.high %v1179_v39, %v1183_v25  ;;  %v1474_v37 = vld [vmem:[#allocation7 + $0x19c0] sm:$0xff] }
 0x23e   :  { %7363 = vmatprep.subr.bf16.mxu1 %v11501_v55  ;;  %v1442_v55 = vld [vmem:[#allocation7 + $0x18c0] sm:$0xff] }
 0x23f   :  { %v11802_v32 = vcombine.low %v1442_v55, %v1446_v0  ;;  %v1478_v11 = vld [vmem:[#allocation7 + $0x19e0] sm:$0xff] }
 0x240   :  { %7106 = vmatpush1.bf16.msra.mxu0 %v11754_v58  ;;  %v11540_v58 = vcombine.low %v1179_v39, %v1183_v25  ;;  %v1223_v39 = vld [vmem:[#allocation7 + $0x11e8] sm:$0xff] }
 0x241   :  { %7364 = vmatpush1.bf16.msra.mxu1 %v11500_v10  ;;  %7107 = vmatprep.subr.bf16.mxu0 %v11763_v61  ;;  %v11803_v10 = vcombine.high %v1442_v55, %v1446_v0  ;;  %v11549_v61 = vcombine.high %v1187_v4, %v1191_v40  ;;  %v1486_v55 = vld [vmem:[#allocation7 + $0x1a20] sm:$0xff]  ;;  %v1227_v0 = vld [vmem:[#allocation7 + $0x1208] sm:$0xff] }
 0x242   :  { %7365 = vmatprep.subr.bf16.mxu1 %v11509_v49  ;;  %v1450_v49 = vld [vmem:[#allocation7 + $0x1900] sm:$0xff] }
 0x243   :  { %v11810_v54 = vcombine.low %v1450_v49, %v1454_v53 }
 0x244   :  { %7108 = vmatpush1.bf16.msra.mxu0 %v11762_v33  ;;  %v11548_v33 = vcombine.low %v1187_v4, %v1191_v40  ;;  %v1231_v4 = vld [vmem:[#allocation7 + $0x1228] sm:$0xff]  ;;  %v11834_v40 = vcombine.low %v1474_v37, %v1478_v11 }
 0x245   :  { %7366 = vmatpush1.bf16.msra.mxu1 %v11508_v24  ;;  %7109 = vmatprep.subr.bf16.mxu0 %v11771_v44  ;;  %v11811_v24 = vcombine.high %v1450_v49, %v1454_v53  ;;  %v11557_v44 = vcombine.high %v1195_v63, %v1199_v43  ;;  %v1494_v49 = vld [vmem:[#allocation7 + $0x1a60] sm:$0xff]  ;;  %v1235_v53 = vld [vmem:[#allocation7 + $0x1248] sm:$0xff] }
 0x246   :  { %7367 = vmatprep.subr.bf16.mxu1 %v11517_v48  ;;  %v1458_v48 = vld [vmem:[#allocation7 + $0x1940] sm:$0xff] }
 0x247   :  { %v11818_v34 = vcombine.low %v1458_v48, %v1462_v36 }
 0x248   :  { %7110 = vmatpush1.bf16.msra.mxu0 %v11770_v62  ;;  %v11556_v62 = vcombine.low %v1195_v63, %v1199_v43  ;;  %v1239_v63 = vld [vmem:[#allocation7 + $0x1268] sm:$0xff] }
 0x249   :  { %7368 = vmatpush1.bf16.msra.mxu1 %v11516_v59  ;;  %7122 = vmatprep.subr.bf16.mxu0 %v11779_v50  ;;  %v11819_v59 = vcombine.high %v1458_v48, %v1462_v36  ;;  %v11565_v50 = vcombine.high %v1203_v30, %v1207_v1  ;;  %v1502_v48 = vld [vmem:[#allocation7 + $0x1aa0] sm:$0xff]  ;;  %v1243_v36 = vld [vmem:[#allocation7 + $0x1288] sm:$0xff] }
 0x24a   :  { %7380 = vmatprep.subr.bf16.mxu1 %v11525_v16  ;;  %v1466_v16 = vld [vmem:[#allocation7 + $0x1980] sm:$0xff]  ;;  %v1247_v30 = vld [vmem:[#allocation7 + $0x12a8] sm:$0xff] }
 0x24b   :  { %7112 = vmatmul.mubr.bf16.vlgmr.msra.gmra.mrb[0].mxu0 %v14084_v3  ;;  %v11826_v25 = vcombine.low %v1466_v16, %v1470_v27 }
 0x24c   :  { %7370 = vmatmul.mubr.bf16.vlgmr.msra.gmra.mrb[4].mxu1 %v14579_v23  ;;  %7123 = vmatpush1.bf16.msra.mxu0 %v11778_v19  ;;  %v1215_v19 = vld [vmem:[#allocation7 + $0x11a8] sm:$0xff] }
 0x24d   :  { %7154 = vmatprep.mubr.bf16.mxu0 %v14119_v41  ;;  %7381 = vmatpush1.bf16.msra.mxu1 %v11524_v45  ;;  %v11827_v45 = vcombine.high %v1466_v16, %v1470_v27  ;;  %v1510_v16 = vld [vmem:[#allocation7 + $0x1ae0] sm:$0xff]  ;;  %v1251_v27 = vld [vmem:[#allocation7 + $0x12c8] sm:$0xff] }
 0x24e   :  { %7412 = vmatprep.mubr.bf16.mxu1 %v14581_v31  ;;  %7124 = vmatprep.subr.bf16.mxu0 %v11787_v17  ;;  %v11573_v17 = vcombine.high %v1211_v18, %v1215_v19 }
 0x24f   :  { %7382 = vmatprep.subr.bf16.mxu1 %v11533_v2  ;;  %v1219_v2 = vld [vmem:[#allocation7 + $0x11c8] sm:$0xff] }
 0x250   :  { %7125 = vmatpush1.bf16.msra.mxu0 %v11786_v12  ;;  %v11572_v12 = vcombine.low %v1211_v18, %v1215_v19  ;;  %v1255_v18 = vld [vmem:[#allocation7 + $0x12e8] sm:$0xff] }
 0x251   :  { %7383 = vmatpush1.bf16.msra.mxu1 %v11532_v35  ;;  %7126 = vmatprep.subr.bf16.mxu0 %v11795_v47  ;;  %v11835_v35 = vcombine.high %v1474_v37, %v1478_v11  ;;  %v11581_v47 = vcombine.high %v1219_v2, %v1223_v39  ;;  %v1518_v37 = vld [vmem:[#allocation7 + $0x1b20] sm:$0xff]  ;;  %v1259_v11 = vld [vmem:[#allocation7 + $0x1308] sm:$0xff] }
 0x252   :  { %7384 = vmatprep.subr.bf16.mxu1 %v11541_v52  ;;  %v1482_v52 = vld [vmem:[#allocation7 + $0x1a00] sm:$0xff] }
 0x253   :  { %v11842_v43 = vcombine.low %v1482_v52, %v1486_v55 }
 0x254   :  { %7127 = vmatpush1.bf16.msra.mxu0 %v11794_v5  ;;  %v11580_v5 = vcombine.low %v1219_v2, %v1223_v39  ;;  %v1263_v2 = vld [vmem:[#allocation7 + $0x1328] sm:$0xff] }
 0x255   :  { %7385 = vmatpush1.bf16.msra.mxu1 %v11540_v58  ;;  %7128 = vmatprep.subr.bf16.mxu0 %v11803_v10  ;;  %v11843_v58 = vcombine.high %v1482_v52, %v1486_v55  ;;  %v11589_v10 = vcombine.high %v1227_v0, %v1231_v4  ;;  %v1526_v52 = vld [vmem:[#allocation7 + $0x1b60] sm:$0xff]  ;;  %v1267_v55 = vld [vmem:[#allocation7 + $0x1348] sm:$0xff] }
 0x256   :  { %7386 = vmatprep.subr.bf16.mxu1 %v11549_v61  ;;  %v1490_v61 = vld [vmem:[#allocation7 + $0x1a40] sm:$0xff] }
 0x257   :  { %v11850_v1 = vcombine.low %v1490_v61, %v1494_v49 }
 0x258   :  { %7129 = vmatpush1.bf16.msra.mxu0 %v11802_v32  ;;  %v11588_v32 = vcombine.low %v1227_v0, %v1231_v4  ;;  %v1271_v0 = vld [vmem:[#allocation7 + $0x1368] sm:$0xff] }
 0x259   :  { %7387 = vmatpush1.bf16.msra.mxu1 %v11548_v33  ;;  %7130 = vmatprep.subr.bf16.mxu0 %v11811_v24  ;;  %v11851_v33 = vcombine.high %v1490_v61, %v1494_v49  ;;  %v11597_v24 = vcombine.high %v1235_v53, %v1239_v63  ;;  %v1534_v61 = vld [vmem:[#allocation7 + $0x1ba0] sm:$0xff]  ;;  %v1275_v49 = vld [vmem:[#allocation7 + $0x1388] sm:$0xff] }
 0x25a   :  { %7388 = vmatprep.subr.bf16.mxu1 %v11557_v44  ;;  %v1498_v44 = vld [vmem:[#allocation7 + $0x1a80] sm:$0xff] }
 0x25b   :  { %v11858_v19 = vcombine.low %v1498_v44, %v1502_v48 }
 0x25c   :  { %7131 = vmatpush1.bf16.msra.mxu0 %v11810_v54  ;;  %v11596_v54 = vcombine.low %v1235_v53, %v1239_v63  ;;  %v1279_v53 = vld [vmem:[#allocation7 + $0x13a8] sm:$0xff] }
 0x25d   :  { %7389 = vmatpush1.bf16.msra.mxu1 %v11556_v62  ;;  %7132 = vmatprep.subr.bf16.mxu0 %v11819_v59  ;;  %v11859_v62 = vcombine.high %v1498_v44, %v1502_v48  ;;  %v11605_v59 = vcombine.high %v1243_v36, %v1247_v30  ;;  %v1542_v44 = vld [vmem:[#allocation7 + $0x1be0] sm:$0xff]  ;;  %v1283_v48 = vld [vmem:[#allocation7 + $0x13c8] sm:$0xff] }
 0x25e   :  { %7390 = vmatprep.subr.bf16.mxu1 %v11565_v50  ;;  %v1506_v50 = vld [vmem:[#allocation7 + $0x1ac0] sm:$0xff] }
 0x25f   :  { %v11866_v39 = vcombine.low %v1506_v50, %v1510_v16 }
 0x260   :  { %7133 = vmatpush1.bf16.msra.mxu0 %v11818_v34  ;;  %v11604_v34 = vcombine.low %v1243_v36, %v1247_v30  ;;  %v1287_v36 = vld [vmem:[#allocation7 + $0x13e8] sm:$0xff] }
 0x261   :  { %7391 = vmatpush1.bf16.msra.mxu1 %v11564_v28  ;;  %7134 = vmatprep.subr.bf16.mxu0 %v11827_v45  ;;  %v11867_v28 = vcombine.high %v1506_v50, %v1510_v16  ;;  %v11613_v45 = vcombine.high %v1251_v27, %v1255_v18  ;;  %v1550_v50 = vld [vmem:[#allocation7 + $0x1c20] sm:$0xff]  ;;  %v1291_v16 = vld [vmem:[#allocation7 + $0x1408] sm:$0xff] }
 0x262   :  { %7392 = vmatprep.subr.bf16.mxu1 %v11573_v17  ;;  %v1514_v17 = vld [vmem:[#allocation7 + $0x1b00] sm:$0xff] }
 0x263   :  { %v11874_v4 = vcombine.low %v1514_v17, %v1518_v37 }
 0x264   :  { %7135 = vmatpush1.bf16.msra.mxu0 %v11826_v25  ;;  %v11612_v25 = vcombine.low %v1251_v27, %v1255_v18  ;;  %v1295_v27 = vld [vmem:[#allocation7 + $0x1428] sm:$0xff] }
 0x265   :  { %7393 = vmatpush1.bf16.msra.mxu1 %v11572_v12  ;;  %7136 = vmatprep.subr.bf16.mxu0 %v11835_v35  ;;  %v11875_v12 = vcombine.high %v1514_v17, %v1518_v37  ;;  %v11621_v35 = vcombine.high %v1259_v11, %v1263_v2  ;;  %v1558_v17 = vld [vmem:[#allocation7 + $0x1c60] sm:$0xff] }
 0x266   :  { %7394 = vmatprep.subr.bf16.mxu1 %v11581_v47  ;;  %v1522_v47 = vld [vmem:[#allocation7 + $0x1b40] sm:$0xff] }
 0x267   :  { %v11882_v63 = vcombine.low %v1522_v47, %v1526_v52 }
 0x268   :  { %7137 = vmatpush1.bf16.msra.mxu0 %v11834_v40  ;;  %v11620_v40 = vcombine.low %v1259_v11, %v1263_v2  ;;  %v1299_v11 = vld [vmem:[#allocation7 + $0x1448] sm:$0xff] }
 0x269   :  { %7395 = vmatpush1.bf16.msra.mxu1 %v11580_v5  ;;  %7138 = vmatprep.subr.bf16.mxu0 %v11843_v58  ;;  %v11883_v5 = vcombine.high %v1522_v47, %v1526_v52  ;;  %v11629_v58 = vcombine.high %v1267_v55, %v1271_v0  ;;  %v1303_v2 = vld [vmem:[#allocation7 + $0x1468] sm:$0xff] }
 0x26a   :  { %7396 = vmatprep.subr.bf16.mxu1 %v11589_v10  ;;  %v1530_v10 = vld [vmem:[#allocation7 + $0x1b80] sm:$0xff]  ;;  %v11661_v47 = vcombine.high %v1299_v11, %v1303_v2  ;;  %v1307_v52 = vld [vmem:[#allocation7 + $0x1488] sm:$0xff] }
 0x26b   :  { %v11890_v30 = vcombine.low %v1530_v10, %v1534_v61 }
 0x26c   :  { %7139 = vmatpush1.bf16.msra.mxu0 %v11842_v43  ;;  %v11628_v43 = vcombine.low %v1267_v55, %v1271_v0  ;;  %v1311_v55 = vld [vmem:[#allocation7 + $0x14a8] sm:$0xff] }
 0x26d   :  { %7397 = vmatpush1.bf16.msra.mxu1 %v11588_v32  ;;  %7140 = vmatprep.subr.bf16.mxu0 %v11851_v33  ;;  %v11891_v32 = vcombine.high %v1530_v10, %v1534_v61  ;;  %v11637_v33 = vcombine.high %v1275_v49, %v1279_v53  ;;  %v1574_v10 = vld [vmem:[#allocation7 + $0x1ce0] sm:$0xff]  ;;  %v1315_v61 = vld [vmem:[#allocation7 + $0x14c8] sm:$0xff] }
 0x26e   :  { %7398 = vmatprep.subr.bf16.mxu1 %v11597_v24  ;;  %v1538_v24 = vld [vmem:[#allocation7 + $0x1bc0] sm:$0xff] }
 0x26f   :  { %v11898_v18 = vcombine.low %v1538_v24, %v1542_v44 }
 0x270   :  { %7141 = vmatpush1.bf16.msra.mxu0 %v11850_v1  ;;  %v11636_v1 = vcombine.low %v1275_v49, %v1279_v53  ;;  %v1319_v49 = vld [vmem:[#allocation7 + $0x14e8] sm:$0xff]  ;;  %v13291_v53 = vmov 1  }
 0x271   :  { %7399 = vmatpush1.bf16.msra.mxu1 %v11596_v54  ;;  %7142 = vmatprep.subr.bf16.mxu0 %v11859_v62  ;;  %v11899_v54 = vcombine.high %v1538_v24, %v1542_v44  ;;  %v11645_v62 = vcombine.high %v1283_v48, %v1287_v36  ;;  %v11677_v24 = vcombine.high %v1315_v61, %v1319_v49  ;;  %v1578_v44 = vld [vmem:[#allocation7 + $0x1d00] sm:$0xff] }
 0x272   :  { %7400 = vmatprep.subr.bf16.mxu1 %v11605_v59  ;;  %v1546_v59 = vld [vmem:[#allocation7 + $0x1c00] sm:$0xff]  ;;  %12546 = vset.pattern.permute.xlu1 %v13291_v53 }
 0x273   :  { %v11906_v37 = vcombine.low %v1546_v59, %v1550_v50  ;;  %v1610_v53 = vld [vmem:[#allocation7 + $0x1e00] sm:$0xff] }
 0x274   :  { %7143 = vmatpush1.bf16.msra.mxu0 %v11858_v19  ;;  %v11644_v19 = vcombine.low %v1283_v48, %v1287_v36  ;;  %v1582_v48 = vld [vmem:[#allocation7 + $0x1d20] sm:$0xff]  ;;  %v1323_v36 = vld [vmem:[#allocation7 + $0x1508] sm:$0xff] }
 0x275   :  { %7401 = vmatpush1.bf16.msra.mxu1 %v11604_v34  ;;  %7144 = vmatprep.subr.bf16.mxu0 %v11867_v28  ;;  %v11907_v34 = vcombine.high %v1546_v59, %v1550_v50  ;;  %v11653_v28 = vcombine.high %v1291_v16, %v1295_v27  ;;  %v11939_v59 = vcombine.high %v1578_v44, %v1582_v48 }
 0x276   :  { %7402 = vmatprep.subr.bf16.mxu1 %v11613_v45  ;;  %v1554_v45 = vld [vmem:[#allocation7 + $0x1c40] sm:$0xff] }
 0x277   :  { %v11914_v0 = vcombine.low %v1554_v45, %v1558_v17 }
 0x278   :  { %7145 = vmatpush1.bf16.msra.mxu0 %v11866_v39  ;;  %v11652_v39 = vcombine.low %v1291_v16, %v1295_v27  ;;  %v1586_v16 = vld [vmem:[#allocation7 + $0x1d40] sm:$0xff] }
 0x279   :  { %7403 = vmatpush1.bf16.msra.mxu1 %v11612_v25  ;;  %7146 = vmatprep.subr.bf16.mxu0 %v11875_v12  ;;  %v11915_v25 = vcombine.high %v1554_v45, %v1558_v17  ;;  %v1562_v12 = vld [vmem:[#allocation7 + $0x1c80] sm:$0xff] }
 0x27a   :  { %7404 = vmatprep.subr.bf16.mxu1 %v11621_v35  ;;  %v1566_v35 = vld [vmem:[#allocation7 + $0x1ca0] sm:$0xff] }
 0x27b   :  { %v1590_v27 = vld [vmem:[#allocation7 + $0x1d60] sm:$0xff] }
 0x27c   :  { %7147 = vmatpush1.bf16.msra.mxu0 %v11874_v4  ;;  %v11660_v4 = vcombine.low %v1299_v11, %v1303_v2  ;;  %v11947_v17 = vcombine.high %v1586_v16, %v1590_v27  ;;  %v1594_v11 = vld [vmem:[#allocation7 + $0x1d80] sm:$0xff] }
 0x27d   :  { %7405 = vmatpush1.bf16.msra.mxu1 %v11620_v40  ;;  %7148 = vmatprep.subr.bf16.mxu0 %v11883_v5  ;;  %v11923_v40 = vcombine.high %v1562_v12, %v1566_v35  ;;  %v11669_v5 = vcombine.high %v1307_v52, %v1311_v55  ;;  %v1598_v2 = vld [vmem:[#allocation7 + $0x1da0] sm:$0xff] }
 0x27e   :  { %7406 = vmatprep.subr.bf16.mxu1 %v11629_v58  ;;  %v1570_v58 = vld [vmem:[#allocation7 + $0x1cc0] sm:$0xff] }
 0x280   :  { %7149 = vmatpush1.bf16.msra.mxu0 %v11882_v63  ;;  %v11922_v63 = vcombine.low %v1562_v12, %v1566_v35  ;;  %v11946_v12 = vcombine.low %v1586_v16, %v1590_v27 }
 0x281   :  { %7407 = vmatpush1.bf16.msra.mxu1 %v11628_v43  ;;  %7150 = vmatprep.subr.bf16.mxu0 %v11891_v32  ;;  %v14177_v43 = vld [vmem:[%s14462_s1] sm:$0xff]  ;;  %v11668_v32 = vcombine.low %v1307_v52, %v1311_v55 }
 0x282   :  { %7408 = vmatprep.subr.bf16.mxu1 %v11637_v33  ;;  %8243 = vperm.xlu1 %12546, %v14177_v43   ;;  %v11931_v33 = vcombine.high %v1570_v58, %v1574_v10  ;;  %v1602_v55 = vld [vmem:[#allocation7 + $0x1dc0] sm:$0xff] }
 0x284   :  { %7151 = vmatpush1.bf16.msra.mxu0 %v11890_v30  ;;  %v1327_v30 = vld [vmem:[#allocation7 + $0x1528] sm:$0xff] }
 0x285   :  { %7409 = vmatpush1.bf16.msra.mxu1 %v11636_v1  ;;  %7152 = vmatprep.subr.bf16.mxu0 %v11899_v54  ;;  %v11930_v1 = vcombine.low %v1570_v58, %v1574_v10  ;;  %v14183_v54 = vld [vmem:[%s14462_s1 + $0x8] sm:$0xff]  ;;  %v11685_v50 = vcombine.high %v1323_v36, %v1327_v30  ;;  %v11684_v45 = vcombine.low %v1323_v36, %v1327_v30  ;;  %v1618_v30 = vld [vmem:[#allocation7 + $0x1e40] sm:$0xff]  ;;  %s13294_s1 = smov [#allocation17]  }
 0x286   :  { %7410 = vmatprep.subr.bf16.mxu1 %v11645_v62  ;;  %8247 = vperm.xlu1 %12546, %v14183_v54   ;;  %v11676_v62 = vcombine.low %v1315_v61, %v1319_v49  ;;  %v11954_v58 = vcombine.low %v1594_v11, %v1598_v2  ;;  %s10994_s21 = sshll.u32 %s13294_s1, 4  ;;  %s10995_s21 = int_to_ptr.vmem [resolvable:$true] %s10994_s21 }
 0x287   :  { %s13239_s22 = scalar_lea.vmem %s10995_s21, 512  ;;  %p13244_p3 = scmp.lt.s32.totalorder %s10995_s21, %s10995_s21 }
 0x288   :  { %7153 = vmatpush1.bf16.msra.mxu0 %v11898_v18  ;;  %v1331_v18 = vld [vmem:[#allocation7 + $0x1548] sm:$0xff]  ;;  %p13240_p2 = scmp.ne.s32.totalorder %s10995_s21, %s13239_s22  ;;  %p13245_p4 = scmp.lt.s32.totalorder %s13239_s22, %s13239_s22 }
 0x289   :  { %7411 = vmatpush1.bf16.msra.mxu1 %v11644_v19  ;;  %7165 = vmatprep.subr.bf16.mxu0 %v11907_v34  ;;  %v1335_v19 = vld [vmem:[#allocation7 + $0x1568] sm:$0xff]  ;;  %v11938_v34 = vcombine.low %v1578_v44, %v1582_v48 }
 0x28a   :  { %7423 = vmatprep.subr.bf16.mxu1 %v11653_v28  ;;  %v13292_v28 = vmov 2   ;;  %v11692_v35 = vcombine.low %v1331_v18, %v1335_v19  ;;  %p13246_p5 = por %p13245_p4, %p13244_p3 }
 0x28b   :  { %7155 = vmatmul.mubr.bf16.vlgmr.msra.gmra.mrb[0].mxu0 %v14135_v26  ;;  %12547 = vset.pattern.permute.xlu1 %v13292_v28  ;;  %v1375_v28 = vld [vmem:[#allocation7 + $0x16a8] sm:$0xff] }
 0x28c   :  { %7413 = vmatmul.mubr.bf16.vlgmr.msra.gmra.mrb[4].mxu1 %v14022_v38  ;;  %7166 = vmatpush1.bf16.msra.mxu0 %v11906_v37  ;;  %v11693_v37 = vcombine.high %v1331_v18, %v1335_v19  ;;  %v1626_v18 = vld [vmem:[#allocation7 + $0x1e80] sm:$0xff]  ;;  %p13247_p6 = pnand %p13246_p5, %p13240_p2 }
 0x28d   :  { %7197 = vmatprep.mubr.bf16.mxu0 %v14142_v15  ;;  %7424 = vmatpush1.bf16.msra.mxu1 %v11652_v39  ;;  %v1339_v39 = vld [vmem:[#allocation7 + $0x1588] sm:$0xff]  ;;  %v1630_v19 = vld [vmem:[#allocation7 + $0x1ea0] sm:$0xff] }
 0x28e   :  { %7455 = vmatprep.mubr.bf16.mxu1 %v14064_v56  ;;  %7167 = vmatprep.subr.bf16.mxu0 %v11915_v25  ;;  %v1343_v25 = vld [vmem:[#allocation7 + $0x15a8] sm:$0xff] }
 0x28f   :  { %7425 = vmatprep.subr.bf16.mxu1 %v11661_v47  ;;  %8326 = vperm.xlu1 %12547, %v14177_v43   ;;  %v11955_v47 = vcombine.high %v1594_v11, %v1598_v2  ;;  %v11701_v52 = vcombine.high %v1339_v39, %v1343_v25  ;;  %v11700_v10 = vcombine.low %v1339_v39, %v1343_v25  ;;  %v1634_v11 = vld [vmem:[#allocation7 + $0x1ec0] sm:$0xff]  ;;  %v1379_v39 = vld [vmem:[#allocation7 + $0x16c8] sm:$0xff] }
 0x290   :  { %7168 = vmatpush1.bf16.msra.mxu0 %v11914_v0  ;;  %v1606_v0 = vld [vmem:[#allocation7 + $0x1de0] sm:$0xff]  ;;  %v1383_v25 = vld [vmem:[#allocation7 + $0x16e8] sm:$0xff] }
 0x291   :  { %7426 = vmatpush1.bf16.msra.mxu1 %v11660_v4  ;;  %7169 = vmatprep.subr.bf16.mxu0 %v11923_v40  ;;  %v1347_v4 = vld [vmem:[#allocation7 + $0x15c8] sm:$0xff]  ;;  %v11963_v61 = vcombine.high %v1602_v55, %v1606_v0  ;;  %v1638_v2 = vld [vmem:[#allocation7 + $0x1ee0] sm:$0xff] }
 0x292   :  { %7427 = vmatprep.subr.bf16.mxu1 %v11669_v5  ;;  %v1351_v40 = vld [vmem:[#allocation7 + $0x15e8] sm:$0xff]  ;;  %v13293_v5 = vmov 3  }
 0x293   :  { %8330 = vperm.xlu1 %12547, %v14183_v54   ;;  %12549 = vset.pattern.permute.xlu0 %v13293_v5  ;;  %v11709_v49 = vcombine.high %v1347_v4, %v1351_v40  ;;  %v11708_v44 = vcombine.low %v1347_v4, %v1351_v40  ;;  %v1387_v4 = vld [vmem:[#allocation7 + $0x1708] sm:$0xff] }
 0x294   :  { %7170 = vmatpush1.bf16.msra.mxu0 %v11922_v63  ;;  %v1614_v63 = vld [vmem:[#allocation7 + $0x1e20] sm:$0xff]  ;;  %v1391_v40 = vld [vmem:[#allocation7 + $0x1728] sm:$0xff] }
 0x295   :  { %7428 = vmatpush1.bf16.msra.mxu1 %v11668_v32  ;;  %7171 = vmatprep.subr.bf16.mxu0 %v11931_v33  ;;  %v1355_v32 = vld [vmem:[#allocation7 + $0x1608] sm:$0xff]  ;;  %v11971_v48 = vcombine.high %v1610_v53, %v1614_v63 }
 0x296   :  { %7429 = vmatprep.subr.bf16.mxu1 %v11677_v24  ;;  %v1359_v33 = vld [vmem:[#allocation7 + $0x1628] sm:$0xff]  ;;  %v11962_v24 = vcombine.low %v1602_v55, %v1606_v0  ;;  %v1642_v55 = vld [vmem:[#allocation7 + $0x1f00] sm:$0xff] }
 0x297   :  { %12548 = vset.pattern.permute.xlu1 %v13293_v5  ;;  %v11717_v36 = vcombine.high %v1355_v32, %v1359_v33  ;;  %v11716_v16 = vcombine.low %v1355_v32, %v1359_v33  ;;  %v1646_v0 = vld [vmem:[#allocation7 + $0x1f20] sm:$0xff]  ;;  %v11994_v5 = vcombine.low %v1634_v11, %v1638_v2  ;;  %v1399_v32 = vld [vmem:[#allocation7 + $0x1768] sm:$0xff] }
 0x298   :  { %7172 = vmatpush1.bf16.msra.mxu0 %v11930_v1  ;;  %8409 = vperm.xlu1 %12548, %v14177_v43   ;;  %v1622_v1 = vld [vmem:[#allocation7 + $0x1e60] sm:$0xff]  ;;  %v12002_v33 = vcombine.low %v1642_v55, %v1646_v0 }
 0x299   :  { %7430 = vmatpush1.bf16.msra.mxu1 %v11676_v62  ;;  %7173 = vmatprep.subr.bf16.mxu0 %v11939_v59  ;;  %v1363_v62 = vld [vmem:[#allocation7 + $0x1648] sm:$0xff]  ;;  %v11979_v43 = vcombine.high %v1618_v30, %v1622_v1 }
 0x29a   :  { %7431 = vmatprep.subr.bf16.mxu1 %v11685_v50  ;;  %v1367_v59 = vld [vmem:[#allocation7 + $0x1668] sm:$0xff]  ;;  %v11970_v50 = vcombine.low %v1610_v53, %v1614_v63  ;;  %v1654_v53 = vld [vmem:[#allocation7 + $0x1f60] sm:$0xff] }
 0x29b   :  { %v11725_v27 = vcombine.high %v1363_v62, %v1367_v59  ;;  %v1395_v63 = vld [vmem:[#allocation7 + $0x1748] sm:$0xff] }
 0x29c   :  { %7174 = vmatpush1.bf16.msra.mxu0 %v11938_v34  ;;  %8413 = vperm.xlu1 %12548, %v14183_v54   ;;  %v1371_v34 = vld [vmem:[#allocation7 + $0x1688] sm:$0xff] }
 0x29d   :  { %7432 = vmatpush1.bf16.msra.mxu1 %v11684_v45  ;;  %7175 = vmatprep.subr.bf16.mxu0 %v11947_v17  ;;  %v11978_v45 = vcombine.low %v1618_v30, %v1622_v1  ;;  %v11724_v17 = vcombine.low %v1363_v62, %v1367_v59  ;;  %v11733_v54 = vcombine.high %v1371_v34, %v1375_v28  ;;  %v1662_v30 = vld [vmem:[#allocation7 + $0x1fa0] sm:$0xff]  ;;  %v1403_v1 = vld [vmem:[#allocation7 + $0x1788] sm:$0xff] }
 0x29e   :  { %7433 = vmatprep.subr.bf16.mxu1 %v11693_v37  ;;  %v11987_v37 = vcombine.high %v1626_v18, %v1630_v19  ;;  %v1407_v62 = vld [vmem:[#allocation7 + $0x17a8] sm:$0xff] }
 0x2a0   :  { %7176 = vmatpush1.bf16.msra.mxu0 %v11946_v12  ;;  %v11986_v12 = vcombine.low %v1626_v18, %v1630_v19  ;;  %v1670_v18 = vld [vmem:[#allocation7 + $0x1fe0] sm:$0xff]  ;;  %v1411_v19 = vld [vmem:[#allocation7 + $0x17c8] sm:$0xff] }
 0x2a1   :  { %7434 = vmatpush1.bf16.msra.mxu1 %v11692_v35  ;;  %7177 = vmatprep.subr.bf16.mxu0 %v11955_v47  ;;  %v11732_v35 = vcombine.low %v1371_v34, %v1375_v28  ;;  %v11995_v47 = vcombine.high %v1634_v11, %v1638_v2  ;;  %v1415_v34 = vld [vmem:[#allocation7 + $0x17e8] sm:$0xff]  ;;  %v656_v11 = vld [vmem:[#allocation7 + $0x30] sm:$0xff] }
 0x2a2   :  { %7435 = vmatprep.subr.bf16.mxu1 %v11701_v52  ;;  %v11741_v52 = vcombine.high %v1379_v39, %v1383_v25  ;;  %v1419_v2 = vld [vmem:[#allocation7 + $0x1808] sm:$0xff] }
 0x2a4   :  { %7178 = vmatpush1.bf16.msra.mxu0 %v11954_v58  ;;  %v11740_v58 = vcombine.low %v1379_v39, %v1383_v25  ;;  %v1423_v39 = vld [vmem:[#allocation7 + $0x1828] sm:$0xff] }
 0x2a5   :  { %7436 = vmatpush1.bf16.msra.mxu1 %v11700_v10  ;;  %7179 = vmatprep.subr.bf16.mxu0 %v11963_v61  ;;  %v12003_v10 = vcombine.high %v1642_v55, %v1646_v0  ;;  %v11749_v61 = vcombine.high %v1387_v4, %v1391_v40  ;;  %v1431_v55 = vld [vmem:[#allocation7 + $0x1868] sm:$0xff] }
 0x2a6   :  { %7437 = vmatprep.subr.bf16.mxu1 %v11709_v49  ;;  %v1650_v49 = vld [vmem:[#allocation7 + $0x1f40] sm:$0xff] }
 0x2a7   :  { %v12010_v59 = vcombine.low %v1650_v49, %v1654_v53 }
 0x2a8   :  { %7180 = vmatpush1.bf16.msra.mxu0 %v11962_v24  ;;  %v11748_v24 = vcombine.low %v1387_v4, %v1391_v40  ;;  %v660_v4 = vld [vmem:[#allocation7 + $0x50] sm:$0xff] }
 0x2a9   :  { %7438 = vmatpush1.bf16.msra.mxu1 %v11708_v44  ;;  %7181 = vmatprep.subr.bf16.mxu0 %v11971_v48  ;;  %v12011_v44 = vcombine.high %v1650_v49, %v1654_v53  ;;  %v11757_v48 = vcombine.high %v1395_v63, %v1399_v32  ;;  %v664_v40 = vld [vmem:[#allocation7 + $0x70] sm:$0xff]  ;;  %v1435_v53 = vld [vmem:[#allocation7 + $0x1888] sm:$0xff] }
 0x2aa   :  { %7439 = vmatprep.subr.bf16.mxu1 %v11717_v36  ;;  %v1658_v36 = vld [vmem:[#allocation7 + $0x1f80] sm:$0xff]  ;;  %v11023_v49 = vcombine.high %v660_v4, %v664_v40 }
 0x2ab   :  { %v12018_v28 = vcombine.low %v1658_v36, %v1662_v30 }
 0x2ac   :  { %7182 = vmatpush1.bf16.msra.mxu0 %v11970_v50  ;;  %v11756_v50 = vcombine.low %v1395_v63, %v1399_v32  ;;  %v1439_v63 = vld [vmem:[#allocation7 + $0x18a8] sm:$0xff]  ;;  %v11022_v32 = vcombine.low %v660_v4, %v664_v40 }
 0x2ad   :  { %7440 = vmatpush1.bf16.msra.mxu1 %v11716_v16  ;;  %7183 = vmatprep.subr.bf16.mxu0 %v11979_v43  ;;  %v12019_v16 = vcombine.high %v1658_v36, %v1662_v30  ;;  %v11765_v43 = vcombine.high %v1403_v1, %v1407_v62  ;;  %v676_v36 = vld [vmem:[#allocation7 + $0xd0] sm:$0xff]  ;;  %v1471_v4 = vld [vmem:[#allocation7 + $0x19a8] sm:$0xff] }
 0x2ae   :  { %7441 = vmatprep.subr.bf16.mxu1 %v11725_v27  ;;  %v1666_v27 = vld [vmem:[#allocation7 + $0x1fc0] sm:$0xff]  ;;  %v680_v30 = vld [vmem:[#allocation7 + $0xf0] sm:$0xff] }
 0x2af   :  { %v12026_v25 = vcombine.low %v1666_v27, %v1670_v18 }
 0x2b0   :  { %7184 = vmatpush1.bf16.msra.mxu0 %v11978_v45  ;;  %v11764_v45 = vcombine.low %v1403_v1, %v1407_v62  ;;  %v1443_v1 = vld [vmem:[#allocation7 + $0x18c8] sm:$0xff] }
 0x2b1   :  { %7442 = vmatpush1.bf16.msra.mxu1 %v11724_v17  ;;  %7185 = vmatprep.subr.bf16.mxu0 %v11987_v37  ;;  %v12027_v17 = vcombine.high %v1666_v27, %v1670_v18  ;;  %v11773_v37 = vcombine.high %v1411_v19, %v1415_v34  ;;  %v1447_v62 = vld [vmem:[#allocation7 + $0x18e8] sm:$0xff]  ;;  %v684_v27 = vld [vmem:[#allocation7 + $0x110] sm:$0xff] }
 0x2b2   :  { %7443 = vmatprep.subr.bf16.mxu1 %v11733_v54  ;;  %v652_v54 = vld [vmem:[#allocation7 + $0x10] sm:$0xff] }
 0x2b3   :  { %v11014_v0 = vcombine.low %v652_v54, %v656_v11  ;;  %v688_v18 = vld [vmem:[#allocation7 + $0x130] sm:$0xff] }
 0x2b4   :  { %7186 = vmatpush1.bf16.msra.mxu0 %v11986_v12  ;;  %v11772_v12 = vcombine.low %v1411_v19, %v1415_v34  ;;  %v1451_v19 = vld [vmem:[#allocation7 + $0x1908] sm:$0xff] }
 0x2b5   :  { %7444 = vmatpush1.bf16.msra.mxu1 %v11732_v35  ;;  %7187 = vmatprep.subr.bf16.mxu0 %v11995_v47  ;;  %v11015_v35 = vcombine.high %v652_v54, %v656_v11  ;;  %v11781_v47 = vcombine.high %v1419_v2, %v1423_v39  ;;  %v1455_v34 = vld [vmem:[#allocation7 + $0x1928] sm:$0xff]  ;;  %v692_v54 = vld [vmem:[#allocation7 + $0x150] sm:$0xff] }
 0x2b6   :  { %7445 = vmatprep.subr.bf16.mxu1 %v11741_v52  ;;  %v1427_v52 = vld [vmem:[#allocation7 + $0x1848] sm:$0xff]  ;;  %v696_v11 = vld [vmem:[#allocation7 + $0x170] sm:$0xff] }
 0x2b7   :  { %v11054_v40 = vcombine.low %v692_v54, %v696_v11 }
 0x2b8   :  { %7188 = vmatpush1.bf16.msra.mxu0 %v11994_v5  ;;  %v11780_v5 = vcombine.low %v1419_v2, %v1423_v39  ;;  %v1459_v2 = vld [vmem:[#allocation7 + $0x1948] sm:$0xff] }
 0x2b9   :  { %7446 = vmatpush1.bf16.msra.mxu1 %v11740_v58  ;;  %7189 = vmatprep.subr.bf16.mxu0 %v12003_v10  ;;  %v11789_v58 = vcombine.high %v1427_v52, %v1431_v55  ;;  %v668_v10 = vld [vmem:[#allocation7 + $0x90] sm:$0xff]  ;;  %v1463_v39 = vld [vmem:[#allocation7 + $0x1968] sm:$0xff] }
 0x2ba   :  { %7447 = vmatprep.subr.bf16.mxu1 %v11749_v61  ;;  %v672_v61 = vld [vmem:[#allocation7 + $0xb0] sm:$0xff] }
 0x2bc   :  { %7190 = vmatpush1.bf16.msra.mxu0 %v12002_v33  ;;  %v11788_v33 = vcombine.low %v1427_v52, %v1431_v55  ;;  %v700_v52 = vld [vmem:[#allocation7 + $0x190] sm:$0xff] }
 0x2bd   :  { %7448 = vmatpush1.bf16.msra.mxu1 %v11748_v24  ;;  %7191 = vmatprep.subr.bf16.mxu0 %v12011_v44  ;;  %v11031_v24 = vcombine.high %v668_v10, %v672_v61  ;;  %v14583_v44 = vld [vmem:[#allocation40_spill] sm:$0xff] }
 0x2be   :  { %7449 = vmatprep.subr.bf16.mxu1 %v11757_v48  ;;  %v11797_v48 = vcombine.high %v1435_v53, %v1439_v63  ;;  %v704_v55 = vld [vmem:[#allocation7 + $0x1b0] sm:$0xff] }
 0x2c0   :  { %7192 = vmatpush1.bf16.msra.mxu0 %v12010_v59  ;;  %v11030_v59 = vcombine.low %v668_v10, %v672_v61  ;;  %v708_v61 = vld [vmem:[#allocation7 + $0x1d0] sm:$0xff] }
 0x2c1   :  { %7450 = vmatpush1.bf16.msra.mxu1 %v11756_v50  ;;  %7193 = vmatprep.subr.bf16.mxu0 %v12019_v16  ;;  %v11796_v50 = vcombine.low %v1435_v53, %v1439_v63  ;;  %v11039_v16 = vcombine.high %v676_v36, %v680_v30  ;;  %v1475_v53 = vld [vmem:[#allocation7 + $0x19c8] sm:$0xff] }
 0x2c2   :  { %7451 = vmatprep.subr.bf16.mxu1 %v11765_v43  ;;  %v11805_v43 = vcombine.high %v1443_v1, %v1447_v62  ;;  %v1479_v63 = vld [vmem:[#allocation7 + $0x19e8] sm:$0xff] }
 0x2c4   :  { %7194 = vmatpush1.bf16.msra.mxu0 %v12018_v28  ;;  %v11038_v28 = vcombine.low %v676_v36, %v680_v30  ;;  %v716_v36 = vld [vmem:[#allocation7 + $0x210] sm:$0xff] }
 0x2c5   :  { %7452 = vmatpush1.bf16.msra.mxu1 %v11764_v45  ;;  %7195 = vmatprep.subr.bf16.mxu0 %v12027_v17  ;;  %v11804_v45 = vcombine.low %v1443_v1, %v1447_v62  ;;  %v11047_v17 = vcombine.high %v684_v27, %v688_v18  ;;  %v720_v30 = vld [vmem:[#allocation7 + $0x230] sm:$0xff]  ;;  %v1483_v1 = vld [vmem:[#allocation7 + $0x1a08] sm:$0xff] }
 0x2c6   :  { %7453 = vmatprep.subr.bf16.mxu1 %v11773_v37  ;;  %v11813_v37 = vcombine.high %v1451_v19, %v1455_v34  ;;  %v1487_v62 = vld [vmem:[#allocation7 + $0x1a28] sm:$0xff] }
 0x2c8   :  { %7196 = vmatpush1.bf16.msra.mxu0 %v12026_v25  ;;  %v11046_v25 = vcombine.low %v684_v27, %v688_v18  ;;  %v724_v27 = vld [vmem:[#allocation7 + $0x250] sm:$0xff] }
 0x2c9   :  { %7454 = vmatpush1.bf16.msra.mxu1 %v11772_v12  ;;  %7552 = vmatprep.subr.bf16.mxu0 %v11015_v35  ;;  %v11812_v12 = vcombine.low %v1451_v19, %v1455_v34  ;;  %v11055_v35 = vcombine.high %v692_v54, %v696_v11  ;;  %v728_v18 = vld [vmem:[#allocation7 + $0x270] sm:$0xff]  ;;  %v1491_v19 = vld [vmem:[#allocation7 + $0x1a48] sm:$0xff] }
 0x2ca   :  { %7466 = vmatprep.subr.bf16.mxu1 %v11781_v47  ;;  %v11821_v47 = vcombine.high %v1459_v2, %v1463_v39  ;;  %v1495_v34 = vld [vmem:[#allocation7 + $0x1a68] sm:$0xff]  ;;  %v732_v54 = vld [vmem:[#allocation7 + $0x290] sm:$0xff] }
 0x2cb   :  { %7198 = vmatmul.mubr.bf16.vlgmr.msra.gmra.mrb[0].mxu0 %v14144_v29  ;;  %v736_v11 = vld [vmem:[#allocation7 + $0x2b0] sm:$0xff] }
 0x2cc   :  { %7456 = vmatmul.mubr.bf16.vlgmr.msra.gmra.mrb[4].mxu1 %v14084_v3  ;;  %7553 = vmatpush1.bf16.msra.mxu0 %v11014_v0  ;;  %v1467_v0 = vld [vmem:[#allocation7 + $0x1988] sm:$0xff] }
 0x2cd   :  { %7467 = vmatpush1.bf16.msra.mxu1 %v11780_v5  ;;  %7498 = vmatprep.mubr.bf16.mxu1 %v14119_v41  ;;  %v11820_v5 = vcombine.low %v1459_v2, %v1463_v39  ;;  %v11829_v10 = vcombine.high %v1467_v0, %v1471_v4  ;;  %v1499_v2 = vld [vmem:[#allocation7 + $0x1a88] sm:$0xff] }
 0x2ce   :  { %7584 = vmatprep.mubr.bf16.mxu0 %v14583_v44  ;;  %7468 = vmatprep.subr.bf16.mxu1 %v11789_v58  ;;  %v11063_v58 = vcombine.high %v700_v52, %v704_v55  ;;  %v1503_v39 = vld [vmem:[#allocation7 + $0x1aa8] sm:$0xff] }
 0x2cf   :  { %7554 = vmatprep.subr.bf16.mxu0 %v11023_v49  ;;  %v712_v49 = vld [vmem:[#allocation7 + $0x1f0] sm:$0xff] }
 0x2d0   :  { %7555 = vmatpush1.bf16.msra.mxu0 %v11022_v32  ;;  %v11062_v32 = vcombine.low %v700_v52, %v704_v55  ;;  %v740_v52 = vld [vmem:[#allocation7 + $0x2d0] sm:$0xff] }
 0x2d1   :  { %7469 = vmatpush1.bf16.msra.mxu1 %v11788_v33  ;;  %7556 = vmatprep.subr.bf16.mxu0 %v11031_v24  ;;  %v11828_v33 = vcombine.low %v1467_v0, %v1471_v4  ;;  %v11071_v24 = vcombine.high %v708_v61, %v712_v49  ;;  %v744_v55 = vld [vmem:[#allocation7 + $0x2f0] sm:$0xff]  ;;  %v1507_v0 = vld [vmem:[#allocation7 + $0x1ac8] sm:$0xff] }
 0x2d2   :  { %7470 = vmatprep.subr.bf16.mxu1 %v11797_v48  ;;  %v11837_v48 = vcombine.high %v1475_v53, %v1479_v63  ;;  %v1511_v4 = vld [vmem:[#allocation7 + $0x1ae8] sm:$0xff] }
 0x2d4   :  { %7557 = vmatpush1.bf16.msra.mxu0 %v11030_v59  ;;  %v11070_v59 = vcombine.low %v708_v61, %v712_v49  ;;  %v748_v61 = vld [vmem:[#allocation7 + $0x310] sm:$0xff] }
 0x2d5   :  { %7471 = vmatpush1.bf16.msra.mxu1 %v11796_v50  ;;  %7558 = vmatprep.subr.bf16.mxu0 %v11039_v16  ;;  %v11836_v50 = vcombine.low %v1475_v53, %v1479_v63  ;;  %v11079_v16 = vcombine.high %v716_v36, %v720_v30  ;;  %v752_v49 = vld [vmem:[#allocation7 + $0x330] sm:$0xff]  ;;  %v1515_v53 = vld [vmem:[#allocation7 + $0x1b08] sm:$0xff] }
 0x2d6   :  { %7472 = vmatprep.subr.bf16.mxu1 %v11805_v43  ;;  %v11845_v43 = vcombine.high %v1483_v1, %v1487_v62  ;;  %v1519_v63 = vld [vmem:[#allocation7 + $0x1b28] sm:$0xff] }
 0x2d8   :  { %7559 = vmatpush1.bf16.msra.mxu0 %v11038_v28  ;;  %v11078_v28 = vcombine.low %v716_v36, %v720_v30  ;;  %v756_v36 = vld [vmem:[#allocation7 + $0x350] sm:$0xff] }
 0x2d9   :  { %7473 = vmatpush1.bf16.msra.mxu1 %v11804_v45  ;;  %7560 = vmatprep.subr.bf16.mxu0 %v11047_v17  ;;  %v11844_v45 = vcombine.low %v1483_v1, %v1487_v62  ;;  %v11087_v17 = vcombine.high %v724_v27, %v728_v18  ;;  %v760_v30 = vld [vmem:[#allocation7 + $0x370] sm:$0xff]  ;;  %v1523_v1 = vld [vmem:[#allocation7 + $0x1b48] sm:$0xff] }
 0x2da   :  { %7474 = vmatprep.subr.bf16.mxu1 %v11813_v37  ;;  %v11853_v37 = vcombine.high %v1491_v19, %v1495_v34  ;;  %v1527_v62 = vld [vmem:[#allocation7 + $0x1b68] sm:$0xff] }
 0x2dc   :  { %7561 = vmatpush1.bf16.msra.mxu0 %v11046_v25  ;;  %v11086_v25 = vcombine.low %v724_v27, %v728_v18  ;;  %v764_v27 = vld [vmem:[#allocation7 + $0x390] sm:$0xff] }
 0x2dd   :  { %7475 = vmatpush1.bf16.msra.mxu1 %v11812_v12  ;;  %7562 = vmatprep.subr.bf16.mxu0 %v11055_v35  ;;  %v11852_v12 = vcombine.low %v1491_v19, %v1495_v34  ;;  %v11095_v35 = vcombine.high %v732_v54, %v736_v11  ;;  %v768_v18 = vld [vmem:[#allocation7 + $0x3b0] sm:$0xff]  ;;  %v1531_v19 = vld [vmem:[#allocation7 + $0x1b88] sm:$0xff] }
 0x2de   :  { %7476 = vmatprep.subr.bf16.mxu1 %v11821_v47  ;;  %v11861_v47 = vcombine.high %v1499_v2, %v1503_v39  ;;  %v1535_v34 = vld [vmem:[#allocation7 + $0x1ba8] sm:$0xff] }
 0x2e0   :  { %7563 = vmatpush1.bf16.msra.mxu0 %v11054_v40  ;;  %v11094_v40 = vcombine.low %v732_v54, %v736_v11  ;;  %v772_v54 = vld [vmem:[#allocation7 + $0x3d0] sm:$0xff] }
 0x2e1   :  { %7477 = vmatpush1.bf16.msra.mxu1 %v11820_v5  ;;  %7564 = vmatprep.subr.bf16.mxu0 %v11063_v58  ;;  %v11860_v5 = vcombine.low %v1499_v2, %v1503_v39  ;;  %v11103_v58 = vcombine.high %v740_v52, %v744_v55  ;;  %v776_v11 = vld [vmem:[#allocation7 + $0x3f0] sm:$0xff]  ;;  %v1539_v2 = vld [vmem:[#allocation7 + $0x1bc8] sm:$0xff] }
 0x2e2   :  { %7478 = vmatprep.subr.bf16.mxu1 %v11829_v10  ;;  %v11869_v10 = vcombine.high %v1507_v0, %v1511_v4  ;;  %v1543_v39 = vld [vmem:[#allocation7 + $0x1be8] sm:$0xff] }
 0x2e4   :  { %7565 = vmatpush1.bf16.msra.mxu0 %v11062_v32  ;;  %v11102_v32 = vcombine.low %v740_v52, %v744_v55  ;;  %v780_v52 = vld [vmem:[#allocation7 + $0x410] sm:$0xff] }
 0x2e5   :  { %7479 = vmatpush1.bf16.msra.mxu1 %v11828_v33  ;;  %7566 = vmatprep.subr.bf16.mxu0 %v11071_v24  ;;  %v11868_v33 = vcombine.low %v1507_v0, %v1511_v4  ;;  %v11111_v24 = vcombine.high %v748_v61, %v752_v49  ;;  %v784_v55 = vld [vmem:[#allocation7 + $0x430] sm:$0xff]  ;;  %v1547_v0 = vld [vmem:[#allocation7 + $0x1c08] sm:$0xff] }
 0x2e6   :  { %7480 = vmatprep.subr.bf16.mxu1 %v11837_v48  ;;  %v11877_v48 = vcombine.high %v1515_v53, %v1519_v63  ;;  %v1551_v4 = vld [vmem:[#allocation7 + $0x1c28] sm:$0xff] }
 0x2e8   :  { %7567 = vmatpush1.bf16.msra.mxu0 %v11070_v59  ;;  %v11110_v59 = vcombine.low %v748_v61, %v752_v49  ;;  %v1555_v61 = vld [vmem:[#allocation7 + $0x1c48] sm:$0xff] }
 0x2e9   :  { %7481 = vmatpush1.bf16.msra.mxu1 %v11836_v50  ;;  %7568 = vmatprep.subr.bf16.mxu0 %v11079_v16  ;;  %v11876_v50 = vcombine.low %v1515_v53, %v1519_v63  ;;  %v11119_v16 = vcombine.high %v756_v36, %v760_v30  ;;  %v1559_v49 = vld [vmem:[#allocation7 + $0x1c68] sm:$0xff]  ;;  %v11142_v53 = vcombine.low %v780_v52, %v784_v55  ;;  %v788_v63 = vld [vmem:[#allocation7 + $0x450] sm:$0xff] }
 0x2ea   :  { %7482 = vmatprep.subr.bf16.mxu1 %v11845_v43  ;;  %v11885_v43 = vcombine.high %v1523_v1, %v1527_v62 }
 0x2ec   :  { %7569 = vmatpush1.bf16.msra.mxu0 %v11078_v28  ;;  %v11118_v28 = vcombine.low %v756_v36, %v760_v30  ;;  %v800_v36 = vld [vmem:[#allocation7 + $0x4b0] sm:$0xff] }
 0x2ed   :  { %7483 = vmatpush1.bf16.msra.mxu1 %v11844_v45  ;;  %7570 = vmatprep.subr.bf16.mxu0 %v11087_v17  ;;  %v11884_v45 = vcombine.low %v1523_v1, %v1527_v62  ;;  %v11127_v17 = vcombine.high %v764_v27, %v768_v18  ;;  %v1563_v1 = vld [vmem:[#allocation7 + $0x1c88] sm:$0xff] }
 0x2ee   :  { %7484 = vmatprep.subr.bf16.mxu1 %v11853_v37  ;;  %v11893_v37 = vcombine.high %v1531_v19, %v1535_v34  ;;  %v1567_v62 = vld [vmem:[#allocation7 + $0x1ca8] sm:$0xff] }
 0x2f0   :  { %7571 = vmatpush1.bf16.msra.mxu0 %v11086_v25  ;;  %v11126_v25 = vcombine.low %v764_v27, %v768_v18  ;;  %v804_v27 = vld [vmem:[#allocation7 + $0x4d0] sm:$0xff] }
 0x2f1   :  { %7485 = vmatpush1.bf16.msra.mxu1 %v11852_v12  ;;  %7572 = vmatprep.subr.bf16.mxu0 %v11095_v35  ;;  %v11892_v12 = vcombine.low %v1531_v19, %v1535_v34  ;;  %v11135_v35 = vcombine.high %v772_v54, %v776_v11  ;;  %v808_v18 = vld [vmem:[#allocation7 + $0x4f0] sm:$0xff]  ;;  %v1571_v19 = vld [vmem:[#allocation7 + $0x1cc8] sm:$0xff] }
 0x2f2   :  { %7486 = vmatprep.subr.bf16.mxu1 %v11861_v47  ;;  %v11901_v47 = vcombine.high %v1539_v2, %v1543_v39  ;;  %v1575_v34 = vld [vmem:[#allocation7 + $0x1ce8] sm:$0xff] }
 0x2f4   :  { %7573 = vmatpush1.bf16.msra.mxu0 %v11094_v40  ;;  %v11134_v40 = vcombine.low %v772_v54, %v776_v11  ;;  %v812_v54 = vld [vmem:[#allocation7 + $0x510] sm:$0xff] }
 0x2f5   :  { %7487 = vmatpush1.bf16.msra.mxu1 %v11860_v5  ;;  %7574 = vmatprep.subr.bf16.mxu0 %v11103_v58  ;;  %v11900_v5 = vcombine.low %v1539_v2, %v1543_v39  ;;  %v11143_v58 = vcombine.high %v780_v52, %v784_v55  ;;  %v816_v11 = vld [vmem:[#allocation7 + $0x530] sm:$0xff]  ;;  %v1579_v2 = vld [vmem:[#allocation7 + $0x1d08] sm:$0xff] }
 0x2f6   :  { %7488 = vmatprep.subr.bf16.mxu1 %v11869_v10  ;;  %v11909_v10 = vcombine.high %v1547_v0, %v1551_v4  ;;  %v1583_v39 = vld [vmem:[#allocation7 + $0x1d28] sm:$0xff]  ;;  %v820_v52 = vld [vmem:[#allocation7 + $0x550] sm:$0xff] }
 0x2f7   :  { %v824_v55 = vld [vmem:[#allocation7 + $0x570] sm:$0xff] }
 0x2f8   :  { %7575 = vmatpush1.bf16.msra.mxu0 %v11102_v32  ;;  %v792_v32 = vld [vmem:[#allocation7 + $0x470] sm:$0xff] }
 0x2f9   :  { %7489 = vmatpush1.bf16.msra.mxu1 %v11868_v33  ;;  %7576 = vmatprep.subr.bf16.mxu0 %v11111_v24  ;;  %v11908_v33 = vcombine.low %v1547_v0, %v1551_v4  ;;  %v11917_v24 = vcombine.high %v1555_v61, %v1559_v49  ;;  %v11151_v30 = vcombine.high %v788_v63, %v792_v32  ;;  %v1587_v0 = vld [vmem:[#allocation7 + $0x1d48] sm:$0xff] }
 0x2fa   :  { %7490 = vmatprep.subr.bf16.mxu1 %v11877_v48  ;;  %v796_v48 = vld [vmem:[#allocation7 + $0x490] sm:$0xff]  ;;  %v1591_v4 = vld [vmem:[#allocation7 + $0x1d68] sm:$0xff] }
 0x2fc   :  { %7577 = vmatpush1.bf16.msra.mxu0 %v11110_v59  ;;  %v11150_v59 = vcombine.low %v788_v63, %v792_v32  ;;  %v1599_v63 = vld [vmem:[#allocation7 + $0x1da8] sm:$0xff]  ;;  %v11182_v32 = vcombine.low %v820_v52, %v824_v55 }
 0x2fd   :  { %7491 = vmatpush1.bf16.msra.mxu1 %v11876_v50  ;;  %7578 = vmatprep.subr.bf16.mxu0 %v11119_v16  ;;  %v11916_v50 = vcombine.low %v1555_v61, %v1559_v49  ;;  %v11159_v16 = vcombine.high %v796_v48, %v800_v36  ;;  %v828_v61 = vld [vmem:[#allocation7 + $0x590] sm:$0xff] }
 0x2fe   :  { %7492 = vmatprep.subr.bf16.mxu1 %v11885_v43  ;;  %v11925_v43 = vcombine.high %v1563_v1, %v1567_v62  ;;  %v832_v49 = vld [vmem:[#allocation7 + $0x5b0] sm:$0xff] }
 0x300   :  { %7579 = vmatpush1.bf16.msra.mxu0 %v11118_v28  ;;  %v11158_v28 = vcombine.low %v796_v48, %v800_v36  ;;  %v836_v36 = vld [vmem:[#allocation7 + $0x5d0] sm:$0xff] }
 0x301   :  { %7493 = vmatpush1.bf16.msra.mxu1 %v11884_v45  ;;  %7580 = vmatprep.subr.bf16.mxu0 %v11127_v17  ;;  %v11924_v45 = vcombine.low %v1563_v1, %v1567_v62  ;;  %v11167_v17 = vcombine.high %v804_v27, %v808_v18  ;;  %v1603_v1 = vld [vmem:[#allocation7 + $0x1dc8] sm:$0xff] }
 0x302   :  { %7494 = vmatprep.subr.bf16.mxu1 %v11893_v37  ;;  %v11933_v37 = vcombine.high %v1571_v19, %v1575_v34  ;;  %v1607_v62 = vld [vmem:[#allocation7 + $0x1de8] sm:$0xff] }
 0x304   :  { %7581 = vmatpush1.bf16.msra.mxu0 %v11126_v25  ;;  %v11166_v25 = vcombine.low %v804_v27, %v808_v18  ;;  %v844_v27 = vld [vmem:[#allocation7 + $0x610] sm:$0xff] }
 0x305   :  { %7495 = vmatpush1.bf16.msra.mxu1 %v11892_v12  ;;  %7582 = vmatprep.subr.bf16.mxu0 %v11135_v35  ;;  %v11932_v12 = vcombine.low %v1571_v19, %v1575_v34  ;;  %v11175_v35 = vcombine.high %v812_v54, %v816_v11  ;;  %v848_v18 = vld [vmem:[#allocation7 + $0x630] sm:$0xff]  ;;  %v1611_v19 = vld [vmem:[#allocation7 + $0x1e08] sm:$0xff] }
 0x306   :  { %7496 = vmatprep.subr.bf16.mxu1 %v11901_v47  ;;  %v11941_v47 = vcombine.high %v1579_v2, %v1583_v39  ;;  %v1615_v34 = vld [vmem:[#allocation7 + $0x1e28] sm:$0xff] }
 0x308   :  { %7583 = vmatpush1.bf16.msra.mxu0 %v11134_v40  ;;  %v11174_v40 = vcombine.low %v812_v54, %v816_v11  ;;  %v852_v54 = vld [vmem:[#allocation7 + $0x650] sm:$0xff] }
 0x309   :  { %7497 = vmatpush1.bf16.msra.mxu1 %v11900_v5  ;;  %7595 = vmatprep.subr.bf16.mxu0 %v11143_v58  ;;  %v11940_v5 = vcombine.low %v1579_v2, %v1583_v39  ;;  %v11183_v58 = vcombine.high %v820_v52, %v824_v55  ;;  %v856_v11 = vld [vmem:[#allocation7 + $0x670] sm:$0xff]  ;;  %v1619_v2 = vld [vmem:[#allocation7 + $0x1e48] sm:$0xff] }
 0x30a   :  { %7509 = vmatprep.subr.bf16.mxu1 %v11909_v10  ;;  %v11949_v10 = vcombine.high %v1587_v0, %v1591_v4  ;;  %v1623_v39 = vld [vmem:[#allocation7 + $0x1e68] sm:$0xff]  ;;  %v860_v52 = vld [vmem:[#allocation7 + $0x690] sm:$0xff] }
 0x30b   :  { %7585 = vmatmul.mubr.bf16.vlgmr.msra.gmra.mrb[4].mxu0 %v13679_v42  ;;  %v864_v55 = vld [vmem:[#allocation7 + $0x6b0] sm:$0xff] }
 0x30c   :  { %7499 = vmatmul.mubr.bf16.vlgmr.msra.gmra.mrb[4].mxu1 %v14135_v26  ;;  %7596 = vmatpush1.bf16.msra.mxu0 %v11142_v53  ;;  %v1595_v53 = vld [vmem:[#allocation7 + $0x1d88] sm:$0xff] }
 0x30d   :  { %7510 = vmatpush1.bf16.msra.mxu1 %v11908_v33  ;;  %7541 = vmatprep.mubr.bf16.mxu1 %v14142_v15  ;;  %v11948_v33 = vcombine.low %v1587_v0, %v1591_v4  ;;  %v11957_v48 = vcombine.high %v1595_v53, %v1599_v63  ;;  %v1627_v0 = vld [vmem:[#allocation7 + $0x1e88] sm:$0xff] }
 0x30e   :  { %7627 = vmatprep.mubr.bf16.mxu0 %v13677_v46  ;;  %7511 = vmatprep.subr.bf16.mxu1 %v11917_v24  ;;  %v11191_v24 = vcombine.high %v828_v61, %v832_v49  ;;  %v1631_v4 = vld [vmem:[#allocation7 + $0x1ea8] sm:$0xff] }
 0x30f   :  { %7597 = vmatprep.subr.bf16.mxu0 %v11151_v30  ;;  %v840_v30 = vld [vmem:[#allocation7 + $0x5f0] sm:$0xff] }
 0x310   :  { %7598 = vmatpush1.bf16.msra.mxu0 %v11150_v59  ;;  %v11190_v59 = vcombine.low %v828_v61, %v832_v49  ;;  %v868_v61 = vld [vmem:[#allocation7 + $0x6d0] sm:$0xff] }
 0x311   :  { %7512 = vmatpush1.bf16.msra.mxu1 %v11916_v50  ;;  %7599 = vmatprep.subr.bf16.mxu0 %v11159_v16  ;;  %v11956_v50 = vcombine.low %v1595_v53, %v1599_v63  ;;  %v11199_v16 = vcombine.high %v836_v36, %v840_v30  ;;  %v872_v49 = vld [vmem:[#allocation7 + $0x6f0] sm:$0xff]  ;;  %v1635_v53 = vld [vmem:[#allocation7 + $0x1ec8] sm:$0xff] }
 0x312   :  { %7513 = vmatprep.subr.bf16.mxu1 %v11925_v43  ;;  %v11965_v43 = vcombine.high %v1603_v1, %v1607_v62  ;;  %v1639_v63 = vld [vmem:[#allocation7 + $0x1ee8] sm:$0xff] }
 0x314   :  { %7600 = vmatpush1.bf16.msra.mxu0 %v11158_v28  ;;  %v11198_v28 = vcombine.low %v836_v36, %v840_v30  ;;  %v876_v36 = vld [vmem:[#allocation7 + $0x710] sm:$0xff] }
 0x315   :  { %7514 = vmatpush1.bf16.msra.mxu1 %v11924_v45  ;;  %7601 = vmatprep.subr.bf16.mxu0 %v11167_v17  ;;  %v11964_v45 = vcombine.low %v1603_v1, %v1607_v62  ;;  %v11207_v17 = vcombine.high %v844_v27, %v848_v18  ;;  %v880_v30 = vld [vmem:[#allocation7 + $0x730] sm:$0xff]  ;;  %v1643_v1 = vld [vmem:[#allocation7 + $0x1f08] sm:$0xff] }
 0x316   :  { %7515 = vmatprep.subr.bf16.mxu1 %v11933_v37  ;;  %v11973_v37 = vcombine.high %v1611_v19, %v1615_v34  ;;  %v1647_v62 = vld [vmem:[#allocation7 + $0x1f28] sm:$0xff] }
 0x318   :  { %7602 = vmatpush1.bf16.msra.mxu0 %v11166_v25  ;;  %v11206_v25 = vcombine.low %v844_v27, %v848_v18  ;;  %v884_v27 = vld [vmem:[#allocation7 + $0x750] sm:$0xff] }
 0x319   :  { %7516 = vmatpush1.bf16.msra.mxu1 %v11932_v12  ;;  %7603 = vmatprep.subr.bf16.mxu0 %v11175_v35  ;;  %v11972_v12 = vcombine.low %v1611_v19, %v1615_v34  ;;  %v11215_v35 = vcombine.high %v852_v54, %v856_v11  ;;  %v888_v18 = vld [vmem:[#allocation7 + $0x770] sm:$0xff]  ;;  %v1651_v19 = vld [vmem:[#allocation7 + $0x1f48] sm:$0xff] }
 0x31a   :  { %7517 = vmatprep.subr.bf16.mxu1 %v11941_v47  ;;  %v11981_v47 = vcombine.high %v1619_v2, %v1623_v39  ;;  %v1655_v34 = vld [vmem:[#allocation7 + $0x1f68] sm:$0xff] }
 0x31c   :  { %7604 = vmatpush1.bf16.msra.mxu0 %v11174_v40  ;;  %v11214_v40 = vcombine.low %v852_v54, %v856_v11  ;;  %v892_v54 = vld [vmem:[#allocation7 + $0x790] sm:$0xff] }
 0x31d   :  { %7518 = vmatpush1.bf16.msra.mxu1 %v11940_v5  ;;  %7605 = vmatprep.subr.bf16.mxu0 %v11183_v58  ;;  %v11980_v5 = vcombine.low %v1619_v2, %v1623_v39  ;;  %v11223_v58 = vcombine.high %v860_v52, %v864_v55  ;;  %v896_v11 = vld [vmem:[#allocation7 + $0x7b0] sm:$0xff]  ;;  %v1659_v2 = vld [vmem:[#allocation7 + $0x1f88] sm:$0xff] }
 0x31e   :  { %7519 = vmatprep.subr.bf16.mxu1 %v11949_v10  ;;  %v11989_v10 = vcombine.high %v1627_v0, %v1631_v4  ;;  %v1663_v39 = vld [vmem:[#allocation7 + $0x1fa8] sm:$0xff] }
 0x320   :  { %7606 = vmatpush1.bf16.msra.mxu0 %v11182_v32  ;;  %v11222_v32 = vcombine.low %v860_v52, %v864_v55  ;;  %v900_v52 = vld [vmem:[#allocation7 + $0x7d0] sm:$0xff] }
 0x321   :  { %7520 = vmatpush1.bf16.msra.mxu1 %v11948_v33  ;;  %7607 = vmatprep.subr.bf16.mxu0 %v11191_v24  ;;  %v11988_v33 = vcombine.low %v1627_v0, %v1631_v4  ;;  %v11231_v24 = vcombine.high %v868_v61, %v872_v49  ;;  %v904_v55 = vld [vmem:[#allocation7 + $0x7f0] sm:$0xff]  ;;  %v1667_v0 = vld [vmem:[#allocation7 + $0x1fc8] sm:$0xff] }
 0x322   :  { %7521 = vmatprep.subr.bf16.mxu1 %v11957_v48  ;;  %v11997_v48 = vcombine.high %v1635_v53, %v1639_v63  ;;  %v1671_v4 = vld [vmem:[#allocation7 + $0x1fe8] sm:$0xff] }
 0x324   :  { %7608 = vmatpush1.bf16.msra.mxu0 %v11190_v59  ;;  %v11230_v59 = vcombine.low %v868_v61, %v872_v49  ;;  %v908_v61 = vld [vmem:[#allocation7 + $0x810] sm:$0xff] }
 0x325   :  { %7522 = vmatpush1.bf16.msra.mxu1 %v11956_v50  ;;  %7609 = vmatprep.subr.bf16.mxu0 %v11199_v16  ;;  %v11996_v50 = vcombine.low %v1635_v53, %v1639_v63  ;;  %v11239_v16 = vcombine.high %v876_v36, %v880_v30  ;;  %v912_v49 = vld [vmem:[#allocation7 + $0x830] sm:$0xff]  ;;  %v653_v53 = vld [vmem:[#allocation7 + $0x18] sm:$0xff] }
 0x326   :  { %7523 = vmatprep.subr.bf16.mxu1 %v11965_v43  ;;  %v12005_v43 = vcombine.high %v1643_v1, %v1647_v62  ;;  %v657_v63 = vld [vmem:[#allocation7 + $0x38] sm:$0xff] }
 0x328   :  { %7610 = vmatpush1.bf16.msra.mxu0 %v11198_v28  ;;  %v11238_v28 = vcombine.low %v876_v36, %v880_v30  ;;  %v916_v36 = vld [vmem:[#allocation7 + $0x850] sm:$0xff] }
 0x329   :  { %7524 = vmatpush1.bf16.msra.mxu1 %v11964_v45  ;;  %7611 = vmatprep.subr.bf16.mxu0 %v11207_v17  ;;  %v12004_v45 = vcombine.low %v1643_v1, %v1647_v62  ;;  %v11247_v17 = vcombine.high %v884_v27, %v888_v18  ;;  %v920_v30 = vld [vmem:[#allocation7 + $0x870] sm:$0xff]  ;;  %v11270_v1 = vcombine.low %v908_v61, %v912_v49  ;;  %v661_v62 = vld [vmem:[#allocation7 + $0x58] sm:$0xff] }
 0x32a   :  { %7525 = vmatprep.subr.bf16.mxu1 %v11973_v37  ;;  %v12013_v37 = vcombine.high %v1651_v19, %v1655_v34 }
 0x32c   :  { %7612 = vmatpush1.bf16.msra.mxu0 %v11206_v25  ;;  %v11246_v25 = vcombine.low %v884_v27, %v888_v18  ;;  %v928_v27 = vld [vmem:[#allocation7 + $0x8b0] sm:$0xff] }
 0x32d   :  { %7526 = vmatpush1.bf16.msra.mxu1 %v11972_v12  ;;  %7613 = vmatprep.subr.bf16.mxu0 %v11215_v35  ;;  %v12012_v12 = vcombine.low %v1651_v19, %v1655_v34  ;;  %v11255_v35 = vcombine.high %v892_v54, %v896_v11  ;;  %v669_v19 = vld [vmem:[#allocation7 + $0x98] sm:$0xff] }
 0x32e   :  { %7527 = vmatprep.subr.bf16.mxu1 %v11981_v47  ;;  %v12021_v47 = vcombine.high %v1659_v2, %v1663_v39  ;;  %v673_v34 = vld [vmem:[#allocation7 + $0xb8] sm:$0xff] }
 0x330   :  { %7614 = vmatpush1.bf16.msra.mxu0 %v11214_v40  ;;  %v11254_v40 = vcombine.low %v892_v54, %v896_v11  ;;  %v932_v54 = vld [vmem:[#allocation7 + $0x8d0] sm:$0xff] }
 0x331   :  { %7528 = vmatpush1.bf16.msra.mxu1 %v11980_v5  ;;  %7615 = vmatprep.subr.bf16.mxu0 %v11223_v58  ;;  %v12020_v5 = vcombine.low %v1659_v2, %v1663_v39  ;;  %v11263_v58 = vcombine.high %v900_v52, %v904_v55  ;;  %v936_v11 = vld [vmem:[#allocation7 + $0x8f0] sm:$0xff]  ;;  %v677_v2 = vld [vmem:[#allocation7 + $0xd8] sm:$0xff] }
 0x332   :  { %7529 = vmatprep.subr.bf16.mxu1 %v11989_v10  ;;  %v12029_v10 = vcombine.high %v1667_v0, %v1671_v4  ;;  %v681_v39 = vld [vmem:[#allocation7 + $0xf8] sm:$0xff] }
 0x334   :  { %7616 = vmatpush1.bf16.msra.mxu0 %v11222_v32  ;;  %v11262_v32 = vcombine.low %v900_v52, %v904_v55  ;;  %v940_v52 = vld [vmem:[#allocation7 + $0x910] sm:$0xff] }
 0x335   :  { %7530 = vmatpush1.bf16.msra.mxu1 %v11988_v33  ;;  %7617 = vmatprep.subr.bf16.mxu0 %v11231_v24  ;;  %v12028_v33 = vcombine.low %v1667_v0, %v1671_v4  ;;  %v11271_v24 = vcombine.high %v908_v61, %v912_v49  ;;  %v944_v55 = vld [vmem:[#allocation7 + $0x930] sm:$0xff]  ;;  %v685_v0 = vld [vmem:[#allocation7 + $0x118] sm:$0xff] }
 0x336   :  { %7531 = vmatprep.subr.bf16.mxu1 %v11997_v48  ;;  %v11017_v48 = vcombine.high %v653_v53, %v657_v63  ;;  %v689_v4 = vld [vmem:[#allocation7 + $0x138] sm:$0xff]  ;;  %v952_v61 = vld [vmem:[#allocation7 + $0x970] sm:$0xff] }
 0x337   :  { %v693_v49 = vld [vmem:[#allocation7 + $0x158] sm:$0xff] }
 0x338   :  { %7618 = vmatpush1.bf16.msra.mxu0 %v11230_v59  ;;  %v665_v59 = vld [vmem:[#allocation7 + $0x78] sm:$0xff] }
 0x339   :  { %7532 = vmatpush1.bf16.msra.mxu1 %v11996_v50  ;;  %7619 = vmatprep.subr.bf16.mxu0 %v11239_v16  ;;  %v11016_v50 = vcombine.low %v653_v53, %v657_v63  ;;  %v11279_v16 = vcombine.high %v916_v36, %v920_v30  ;;  %v11025_v18 = vcombine.high %v661_v62, %v665_v59  ;;  %v697_v53 = vld [vmem:[#allocation7 + $0x178] sm:$0xff] }
 0x33a   :  { %7533 = vmatprep.subr.bf16.mxu1 %v12005_v43  ;;  %v924_v43 = vld [vmem:[#allocation7 + $0x890] sm:$0xff]  ;;  %v11302_v63 = vcombine.low %v940_v52, %v944_v55 }
 0x33c   :  { %7620 = vmatpush1.bf16.msra.mxu0 %v11238_v28  ;;  %v11278_v28 = vcombine.low %v916_v36, %v920_v30  ;;  %v960_v36 = vld [vmem:[#allocation7 + $0x9b0] sm:$0xff]  ;;  %v701_v30 = vld [vmem:[#allocation7 + $0x198] sm:$0xff] }
 0x33d   :  { %7534 = vmatpush1.bf16.msra.mxu1 %v12004_v45  ;;  %7621 = vmatprep.subr.bf16.mxu0 %v11247_v17  ;;  %v11024_v45 = vcombine.low %v661_v62, %v665_v59  ;;  %v11287_v17 = vcombine.high %v924_v43, %v928_v27  ;;  %v11056_v59 = vcombine.low %v693_v49, %v697_v53 }
 0x33e   :  { %7535 = vmatprep.subr.bf16.mxu1 %v12013_v37  ;;  %v11033_v37 = vcombine.high %v669_v19, %v673_v34 }
 0x340   :  { %7622 = vmatpush1.bf16.msra.mxu0 %v11246_v25  ;;  %v11286_v25 = vcombine.low %v924_v43, %v928_v27  ;;  %v964_v43 = vld [vmem:[#allocation7 + $0x9d0] sm:$0xff] }
 0x341   :  { %7536 = vmatpush1.bf16.msra.mxu1 %v12012_v12  ;;  %7623 = vmatprep.subr.bf16.mxu0 %v11255_v35  ;;  %v11032_v12 = vcombine.low %v669_v19, %v673_v34  ;;  %v11295_v35 = vcombine.high %v932_v54, %v936_v11  ;;  %v968_v27 = vld [vmem:[#allocation7 + $0x9f0] sm:$0xff]  ;;  %v713_v19 = vld [vmem:[#allocation7 + $0x1f8] sm:$0xff] }
 0x342   :  { %7537 = vmatprep.subr.bf16.mxu1 %v12021_v47  ;;  %v11041_v47 = vcombine.high %v677_v2, %v681_v39 }
 0x344   :  { %7624 = vmatpush1.bf16.msra.mxu0 %v11254_v40  ;;  %v11040_v40 = vcombine.low %v677_v2, %v681_v39  ;;  %v721_v2 = vld [vmem:[#allocation7 + $0x238] sm:$0xff]  ;;  %v11326_v39 = vcombine.low %v964_v43, %v968_v27 }
 0x345   :  { %7538 = vmatpush1.bf16.msra.mxu1 %v12020_v5  ;;  %7625 = vmatprep.subr.bf16.mxu0 %v11263_v58  ;;  %v11303_v5 = vcombine.high %v940_v52, %v944_v55  ;;  %v11049_v58 = vcombine.high %v685_v0, %v689_v4  ;;  %v984_v52 = vld [vmem:[#allocation7 + $0xa70] sm:$0xff]  ;;  %v725_v55 = vld [vmem:[#allocation7 + $0x258] sm:$0xff] }
 0x346   :  { %7539 = vmatprep.subr.bf16.mxu1 %v12029_v10  ;;  %v948_v10 = vld [vmem:[#allocation7 + $0x950] sm:$0xff] }
 0x347   :  { %v11310_v62 = vcombine.low %v948_v10, %v952_v61 }
 0x348   :  { %7626 = vmatpush1.bf16.msra.mxu0 %v11262_v32  ;;  %v11048_v32 = vcombine.low %v685_v0, %v689_v4  ;;  %v729_v0 = vld [vmem:[#allocation7 + $0x278] sm:$0xff] }
 0x349   :  { %7540 = vmatpush1.bf16.msra.mxu1 %v12028_v33  ;;  %7638 = vmatprep.subr.bf16.mxu0 %v11271_v24  ;;  %v11311_v33 = vcombine.high %v948_v10, %v952_v61  ;;  %v11057_v24 = vcombine.high %v693_v49, %v697_v53  ;;  %v992_v10 = vld [vmem:[#allocation7 + $0xab0] sm:$0xff]  ;;  %v733_v61 = vld [vmem:[#allocation7 + $0x298] sm:$0xff] }
 0x34a   :  { %7896 = vmatprep.subr.bf16.mxu1 %v11017_v48  ;;  %v956_v48 = vld [vmem:[#allocation7 + $0x990] sm:$0xff]  ;;  %v737_v49 = vld [vmem:[#allocation7 + $0x2b8] sm:$0xff] }
 0x34b   :  { %7628 = vmatmul.mubr.bf16.vlgmr.msra.gmra.mrb[4].mxu0 %v14580_v57  ;;  %v11318_v34 = vcombine.low %v956_v48, %v960_v36 }
 0x34c   :  { %7542 = vmatmul.mubr.bf16.vlgmr.msra.gmra.mrb[4].mxu1 %v14144_v29  ;;  %7639 = vmatpush1.bf16.msra.mxu0 %v11270_v1  ;;  %v705_v1 = vld [vmem:[#allocation7 + $0x1b8] sm:$0xff] }
 0x34d   :  { %7670 = vmatprep.mubr.bf16.mxu0 %v14582_v14  ;;  %7897 = vmatpush1.bf16.msra.mxu1 %v11016_v50  ;;  %v11319_v50 = vcombine.high %v956_v48, %v960_v36  ;;  %v1000_v48 = vld [vmem:[#allocation7 + $0xaf0] sm:$0xff]  ;;  %v741_v36 = vld [vmem:[#allocation7 + $0x2d8] sm:$0xff] }
 0x34e   :  { %7928 = vmatprep.mubr.bf16.mxu1 %v14583_v44  ;;  %7640 = vmatprep.subr.bf16.mxu0 %v11279_v16  ;;  %v11294_v44 = vcombine.low %v932_v54, %v936_v11  ;;  %v11065_v16 = vcombine.high %v701_v30, %v705_v1  ;;  %v976_v54 = vld [vmem:[#allocation7 + $0xa30] sm:$0xff]  ;;  %v717_v11 = vld [vmem:[#allocation7 + $0x218] sm:$0xff] }
 0x34f   :  { %7898 = vmatprep.subr.bf16.mxu1 %v11025_v18  ;;  %v709_v18 = vld [vmem:[#allocation7 + $0x1d8] sm:$0xff] }
 0x350   :  { %7641 = vmatpush1.bf16.msra.mxu0 %v11278_v28  ;;  %v11064_v28 = vcombine.low %v701_v30, %v705_v1  ;;  %v745_v30 = vld [vmem:[#allocation7 + $0x2f8] sm:$0xff] }
 0x351   :  { %7899 = vmatpush1.bf16.msra.mxu1 %v11024_v45  ;;  %7642 = vmatprep.subr.bf16.mxu0 %v11287_v17  ;;  %v11327_v45 = vcombine.high %v964_v43, %v968_v27  ;;  %v11073_v17 = vcombine.high %v709_v18, %v713_v19  ;;  %v1008_v43 = vld [vmem:[#allocation7 + $0xb30] sm:$0xff]  ;;  %v749_v27 = vld [vmem:[#allocation7 + $0x318] sm:$0xff] }
 0x352   :  { %7900 = vmatprep.subr.bf16.mxu1 %v11033_v37  ;;  %v972_v37 = vld [vmem:[#allocation7 + $0xa10] sm:$0xff]  ;;  %v857_v29 = vld [vmem:[#allocation7 + $0x678] sm:$0xff] }
 0x353   :  { %v11334_v4 = vcombine.low %v972_v37, %v976_v54 }
 0x354   :  { %7643 = vmatpush1.bf16.msra.mxu0 %v11286_v25  ;;  %v11072_v25 = vcombine.low %v709_v18, %v713_v19  ;;  %v753_v18 = vld [vmem:[#allocation7 + $0x338] sm:$0xff] }
 0x355   :  { %7901 = vmatpush1.bf16.msra.mxu1 %v11032_v12  ;;  %7644 = vmatprep.subr.bf16.mxu0 %v11295_v35  ;;  %v11335_v12 = vcombine.high %v972_v37, %v976_v54  ;;  %v11081_v35 = vcombine.high %v717_v11, %v721_v2  ;;  %v1016_v37 = vld [vmem:[#allocation7 + $0xb70] sm:$0xff]  ;;  %v757_v54 = vld [vmem:[#allocation7 + $0x358] sm:$0xff] }
 0x356   :  { %7902 = vmatprep.subr.bf16.mxu1 %v11041_v47  ;;  %v980_v47 = vld [vmem:[#allocation7 + $0xa50] sm:$0xff] }
 0x357   :  { %v11342_v53 = vcombine.low %v980_v47, %v984_v52 }
 0x358   :  { %7645 = vmatpush1.bf16.msra.mxu0 %v11294_v44  ;;  %v11080_v44 = vcombine.low %v717_v11, %v721_v2  ;;  %v761_v11 = vld [vmem:[#allocation7 + $0x378] sm:$0xff] }
 0x359   :  { %7903 = vmatpush1.bf16.msra.mxu1 %v11040_v40  ;;  %7646 = vmatprep.subr.bf16.mxu0 %v11303_v5  ;;  %v11343_v40 = vcombine.high %v980_v47, %v984_v52  ;;  %v11089_v5 = vcombine.high %v725_v55, %v729_v0  ;;  %v1024_v47 = vld [vmem:[#allocation7 + $0xbb0] sm:$0xff]  ;;  %v765_v52 = vld [vmem:[#allocation7 + $0x398] sm:$0xff] }
 0x35a   :  { %7904 = vmatprep.subr.bf16.mxu1 %v11049_v58  ;;  %v988_v58 = vld [vmem:[#allocation7 + $0xa90] sm:$0xff] }
 0x35b   :  { %v11350_v1 = vcombine.low %v988_v58, %v992_v10 }
 0x35c   :  { %7647 = vmatpush1.bf16.msra.mxu0 %v11302_v63  ;;  %v11088_v63 = vcombine.low %v725_v55, %v729_v0  ;;  %v769_v55 = vld [vmem:[#allocation7 + $0x3b8] sm:$0xff] }
 0x35d   :  { %7905 = vmatpush1.bf16.msra.mxu1 %v11048_v32  ;;  %7648 = vmatprep.subr.bf16.mxu0 %v11311_v33  ;;  %v11351_v32 = vcombine.high %v988_v58, %v992_v10  ;;  %v11097_v33 = vcombine.high %v733_v61, %v737_v49  ;;  %v1032_v58 = vld [vmem:[#allocation7 + $0xbf0] sm:$0xff]  ;;  %v773_v10 = vld [vmem:[#allocation7 + $0x3d8] sm:$0xff] }
 0x35e   :  { %7906 = vmatprep.subr.bf16.mxu1 %v11057_v24  ;;  %v996_v24 = vld [vmem:[#allocation7 + $0xad0] sm:$0xff] }
 0x35f   :  { %v11358_v19 = vcombine.low %v996_v24, %v1000_v48 }
 0x360   :  { %7649 = vmatpush1.bf16.msra.mxu0 %v11310_v62  ;;  %v11096_v62 = vcombine.low %v733_v61, %v737_v49  ;;  %v777_v61 = vld [vmem:[#allocation7 + $0x3f8] sm:$0xff]  ;;  %v14202_v49 = vpop.permute.xlu1 %1684 }
 0x361   :  { %7907 = vmatpush1.bf16.msra.mxu1 %v11056_v59  ;;  %7650 = vmatprep.subr.bf16.mxu0 %v11319_v50  ;;  %v11359_v59 = vcombine.high %v996_v24, %v1000_v48  ;;  %v11105_v50 = vcombine.high %v741_v36, %v745_v30  ;;  %v1036_v24 = vld [vmem:[#allocation7 + $0xc10] sm:$0xff] }
 0x362   :  { %7908 = vmatprep.subr.bf16.mxu1 %v11065_v16  ;;  %v1004_v16 = vld [vmem:[#allocation7 + $0xb10] sm:$0xff] }
 0x363   :  { %v11366_v2 = vcombine.low %v1004_v16, %v1008_v43  ;;  %v1040_v48 = vld [vmem:[#allocation7 + $0xc30] sm:$0xff] }
 0x364   :  { %7651 = vmatpush1.bf16.msra.mxu0 %v11318_v34  ;;  %v11104_v34 = vcombine.low %v741_v36, %v745_v30  ;;  %v781_v36 = vld [vmem:[#allocation7 + $0x418] sm:$0xff] }
 0x365   :  { %7909 = vmatpush1.bf16.msra.mxu1 %v11064_v28  ;;  %7652 = vmatprep.subr.bf16.mxu0 %v11327_v45  ;;  %v11367_v28 = vcombine.high %v1004_v16, %v1008_v43  ;;  %v11113_v45 = vcombine.high %v749_v27, %v753_v18  ;;  %v785_v30 = vld [vmem:[#allocation7 + $0x438] sm:$0xff]  ;;  %v1044_v43 = vld [vmem:[#allocation7 + $0xc50] sm:$0xff] }
 0x366   :  { %7910 = vmatprep.subr.bf16.mxu1 %v11073_v17  ;;  %v1012_v17 = vld [vmem:[#allocation7 + $0xb50] sm:$0xff]  ;;  %v11145_v16 = vcombine.high %v781_v36, %v785_v30 }
 0x367   :  { %v11374_v0 = vcombine.low %v1012_v17, %v1016_v37 }
 0x368   :  { %7653 = vmatpush1.bf16.msra.mxu0 %v11326_v39  ;;  %v11112_v39 = vcombine.low %v749_v27, %v753_v18  ;;  %v1048_v27 = vld [vmem:[#allocation7 + $0xc70] sm:$0xff]  ;;  %v11398_v18 = vcombine.low %v1036_v24, %v1040_v48 }
 0x369   :  { %7911 = vmatpush1.bf16.msra.mxu1 %v11072_v25  ;;  %7654 = vmatprep.subr.bf16.mxu0 %v11335_v12  ;;  %v11375_v25 = vcombine.high %v1012_v17, %v1016_v37  ;;  %v11121_v12 = vcombine.high %v757_v54, %v761_v11  ;;  %v1052_v17 = vld [vmem:[#allocation7 + $0xc90] sm:$0xff] }
 0x36a   :  { %7912 = vmatprep.subr.bf16.mxu1 %v11081_v35  ;;  %v1020_v35 = vld [vmem:[#allocation7 + $0xb90] sm:$0xff] }
 0x36b   :  { %v1056_v37 = vld [vmem:[#allocation7 + $0xcb0] sm:$0xff] }
 0x36c   :  { %7655 = vmatpush1.bf16.msra.mxu0 %v11334_v4  ;;  %v11120_v4 = vcombine.low %v757_v54, %v761_v11 }
 0x36d   :  { %7913 = vmatpush1.bf16.msra.mxu1 %v11080_v44  ;;  %7656 = vmatprep.subr.bf16.mxu0 %v11343_v40  ;;  %v11383_v44 = vcombine.high %v1020_v35, %v1024_v47  ;;  %v11129_v40 = vcombine.high %v765_v52, %v769_v55 }
 0x36e   :  { %7914 = vmatprep.subr.bf16.mxu1 %v11089_v5  ;;  %v1028_v5 = vld [vmem:[#allocation7 + $0xbd0] sm:$0xff] }
 0x370   :  { %7657 = vmatpush1.bf16.msra.mxu0 %v11342_v53  ;;  %v11382_v53 = vcombine.low %v1020_v35, %v1024_v47  ;;  %v11415_v35 = vcombine.high %v1052_v17, %v1056_v37 }
 0x371   :  { %7915 = vmatpush1.bf16.msra.mxu1 %v11088_v63  ;;  %7658 = vmatprep.subr.bf16.mxu0 %v11351_v32  ;;  %v11128_v63 = vcombine.low %v765_v52, %v769_v55  ;;  %v11391_v32 = vcombine.high %v1028_v5, %v1032_v58  ;;  %v1060_v52 = vld [vmem:[#allocation7 + $0xcd0] sm:$0xff] }
 0x372   :  { %7916 = vmatprep.subr.bf16.mxu1 %v11097_v33  ;;  %v11137_v33 = vcombine.high %v773_v10, %v777_v61  ;;  %v1064_v55 = vld [vmem:[#allocation7 + $0xcf0] sm:$0xff] }
 0x374   :  { %7659 = vmatpush1.bf16.msra.mxu0 %v11350_v1  ;;  %v11390_v1 = vcombine.low %v1028_v5, %v1032_v58  ;;  %v11423_v58 = vcombine.high %v1060_v52, %v1064_v55 }
 0x375   :  { %7917 = vmatpush1.bf16.msra.mxu1 %v11096_v62  ;;  %7660 = vmatprep.subr.bf16.mxu0 %v11359_v59  ;;  %v14204_v62 = vpop.permute.xlu1 %8243  ;;  %v11136_v59 = vcombine.low %v773_v10, %v777_v61  ;;  %v1072_v61 = vld [vmem:[#allocation7 + $0xd30] sm:$0xff] }
 0x376   :  { %7918 = vmatprep.subr.bf16.mxu1 %v11105_v50  ;;  %v11399_v50 = vcombine.high %v1036_v24, %v1040_v48  ;;  %v11422_v24 = vcombine.low %v1060_v52, %v1064_v55  ;;  %v14218_v48 = vpop.permute.xlu0 %1679  ;;  %v1088_v52 = vld [vmem:[#allocation7 + $0xdb0] sm:$0xff] }
 0x378   :  { %7661 = vmatpush1.bf16.msra.mxu0 %v11358_v19  ;;  %v789_v19 = vld [vmem:[#allocation7 + $0x458] sm:$0xff] }
 0x379   :  { %7919 = vmatpush1.bf16.msra.mxu1 %v11104_v34  ;;  %7662 = vmatprep.subr.bf16.mxu0 %v11367_v28  ;;  %v793_v34 = vld [vmem:[#allocation7 + $0x478] sm:$0xff]  ;;  %v11144_v28 = vcombine.low %v781_v36, %v785_v30  ;;  %v14206_v54 = vpop.permute.xlu1 %8247  ;;  %v14585_v36 = vld [vmem:[#allocation24_spill] sm:$0xff] }
 0x37a   :  { %7920 = vmatprep.subr.bf16.mxu1 %v11113_v45  ;;  %v11407_v45 = vcombine.high %v1044_v43, %v1048_v27  ;;  %v11153_v11 = vcombine.high %v789_v19, %v793_v34 }
 0x37c   :  { %7663 = vmatpush1.bf16.msra.mxu0 %v11366_v2  ;;  %v797_v2 = vld [vmem:[#allocation7 + $0x498] sm:$0xff] }
 0x37d   :  { %7921 = vmatpush1.bf16.msra.mxu1 %v11112_v39  ;;  %7664 = vmatprep.subr.bf16.mxu0 %v11375_v25  ;;  %v801_v39 = vld [vmem:[#allocation7 + $0x4b8] sm:$0xff]  ;;  %v11406_v25 = vcombine.low %v1044_v43, %v1048_v27  ;;  %v1076_v43 = vld [vmem:[#allocation7 + $0xd50] sm:$0xff] }
 0x37e   :  { %7922 = vmatprep.subr.bf16.mxu1 %v11121_v12  ;;  %v11152_v12 = vcombine.low %v789_v19, %v793_v34  ;;  %v11161_v47 = vcombine.high %v797_v2, %v801_v39  ;;  %v11160_v5 = vcombine.low %v797_v2, %v801_v39  ;;  %v1080_v27 = vld [vmem:[#allocation7 + $0xd70] sm:$0xff]  ;;  %v821_v19 = vld [vmem:[#allocation7 + $0x558] sm:$0xff] }
 0x37f   :  { %v825_v34 = vld [vmem:[#allocation7 + $0x578] sm:$0xff]  ;;  %v11439_v2 = vcombine.high %v1076_v43, %v1080_v27 }
 0x380   :  { %7665 = vmatpush1.bf16.msra.mxu0 %v11374_v0  ;;  %v805_v0 = vld [vmem:[#allocation7 + $0x4d8] sm:$0xff] }
 0x381   :  { %7923 = vmatpush1.bf16.msra.mxu1 %v11120_v4  ;;  %7666 = vmatprep.subr.bf16.mxu0 %v11383_v44  ;;  %v809_v4 = vld [vmem:[#allocation7 + $0x4f8] sm:$0xff]  ;;  %v11414_v44 = vcombine.low %v1052_v17, %v1056_v37 }
 0x382   :  { %7924 = vmatprep.subr.bf16.mxu1 %v11129_v40  ;;  %v14212_v40 = vpop.permute.xlu1 %8326  ;;  %v11169_v10 = vcombine.high %v805_v0, %v809_v4  ;;  %v14227_v17 = vld [vmem:[#allocation8 + $0x2] ss:$4 sm:$0xff] }
 0x384   :  { %7667 = vmatpush1.bf16.msra.mxu0 %v11382_v53  ;;  %v813_v53 = vld [vmem:[#allocation7 + $0x518] sm:$0xff] }
 0x385   :  { %7925 = vmatpush1.bf16.msra.mxu1 %v11128_v63  ;;  %7668 = vmatprep.subr.bf16.mxu0 %v11391_v32  ;;  %v817_v63 = vld [vmem:[#allocation7 + $0x538] sm:$0xff] }
 0x386   :  { %7926 = vmatprep.subr.bf16.mxu1 %v11137_v33  ;;  %v14584_v32 = vld [vmem:[#allocation26_spill] sm:$0xff] }
 0x387   :  { %v8337_v55 = vrot.slane %v14227_v17, %v14584_v32 }
 0x388   :  { %7669 = vmatpush1.bf16.msra.mxu0 %v11390_v1  ;;  %v11168_v1 = vcombine.low %v805_v0, %v809_v4  ;;  %v829_v0 = vld [vmem:[#allocation7 + $0x598] sm:$0xff] }
 0x389   :  { %7927 = vmatpush1.bf16.msra.mxu1 %v11136_v59  ;;  %7681 = vmatprep.subr.bf16.mxu0 %v11399_v50  ;;  %v11177_v50 = vcombine.high %v813_v53, %v817_v63  ;;  %v833_v4 = vld [vmem:[#allocation7 + $0x5b8] sm:$0xff] }
 0x38a   :  { %7939 = vmatprep.subr.bf16.mxu1 %v11145_v16  ;;  %v14222_v16 = vpop.permute.xlu1 %8330 }
 0x38b   :  { %7671 = vmatmul.mubr.bf16.vlgmr.msra.gmra.mrb[4].mxu0 %v13784_v13 }
 0x38c   :  { %7929 = vmatmul.mubr.bf16.vlgmr.msra.gmra.mrb[8].mxu1 %v13679_v42  ;;  %7682 = vmatpush1.bf16.msra.mxu0 %v11398_v18  ;;  %v14214_v42 = vld [vmem:[#allocation8] ss:$4 sm:$0xff]  ;;  %v14224_v18 = vld [vmem:[#allocation8 + $0x1] ss:$4 sm:$0xff] }
 0x38d   :  { %7713 = vmatprep.mubr.bf16.mxu0 %v13814_v9  ;;  %7940 = vmatpush1.bf16.msra.mxu1 %v11144_v28  ;;  %v1691_v33 = vrot.slane %v14214_v42, %v14584_v32  ;;  %v1695_v30 = vrot.slane %v14214_v42, %v14585_v36 }
 0x38e   :  { %7971 = vmatprep.mubr.bf16.mxu1 %v13677_v46  ;;  %7683 = vmatprep.subr.bf16.mxu0 %v11407_v45  ;;  %v1068_v46 = vld [vmem:[#allocation7 + $0xd10] sm:$0xff] }
 0x38f   :  { %7941 = vmatprep.subr.bf16.mxu1 %v11153_v11  ;;  %v11431_v59 = vcombine.high %v1068_v46, %v1072_v61  ;;  %v1728_v28 = vmul.f32 %v1691_v33, %v14218_v48  ;;  %v11430_v45 = vcombine.low %v1068_v46, %v1072_v61  ;;  %v1729_v37 = vmul.f32 %v1695_v30, %v14218_v48 }
 0x390   :  { %7684 = vmatpush1.bf16.msra.mxu0 %v11406_v25  ;;  %v11176_v11 = vcombine.low %v813_v53, %v817_v63  ;;  %v1736_v39 = vmul.f32 %v1691_v33, %v14202_v49  ;;  %v1737_v25 = vmul.f32 %v1695_v30, %v14202_v49  ;;  %v11184_v61 = vcombine.low %v821_v19, %v825_v34 }
 0x391   :  { %7942 = vmatpush1.bf16.msra.mxu1 %v11152_v12  ;;  %7685 = vmatprep.subr.bf16.mxu0 %v11415_v35  ;;  %v8254_v12 = vrot.slane %v14224_v18, %v14584_v32  ;;  %v11185_v35 = vcombine.high %v821_v19, %v825_v34  ;;  %v6901_v46 = vadd.f32 %v14160_v51, %v1729_v37  ;;  %v837_v34 = vld [vmem:[#allocation7 + $0x5d8] sm:$0xff] }
 0x392   :  { %7943 = vmatprep.subr.bf16.mxu1 %v11161_v47  ;;  %v1084_v47 = vld [vmem:[#allocation7 + $0xd90] sm:$0xff]  ;;  %v6903_v63 = vadd.f32 %v14162_v20, %v1736_v39  ;;  %v6905_v33 = vadd.f32 %v14164_v22, %v1737_v25  ;;  %v11193_v30 = vcombine.high %v829_v0, %v833_v4  ;;  %v8341_v51 = vrot.slane %v14227_v17, %v14585_v36  ;;  %v841_v20 = vld [vmem:[#allocation7 + $0x5f8] sm:$0xff] }
 0x393   :  { %v11447_v53 = vcombine.high %v1084_v47, %v1088_v52  ;;  %v8299_v19 = vmul.f32 %v8254_v12, %v14206_v54 }
 0x394   :  { %7686 = vmatpush1.bf16.msra.mxu0 %v11414_v44  ;;  %v6899_v44 = vadd.f32 %v14158_v8, %v1728_v28  ;;  %v8291_v8 = vmul.f32 %v8254_v12, %v14204_v62  ;;  %v14249_v28 = vld [vmem:[#allocation8 + $0x3] ss:$4 sm:$0xff] }
 0x395   :  { %7944 = vmatpush1.bf16.msra.mxu1 %v11160_v5  ;;  %7687 = vmatprep.subr.bf16.mxu0 %v11423_v58  ;;  %v8258_v5 = vrot.slane %v14224_v18, %v14585_v36  ;;  %v11438_v58 = vcombine.low %v1076_v43, %v1080_v27  ;;  %v8374_v43 = vmul.f32 %v8337_v55, %v14212_v40  ;;  %v1104_v12 = vld [vmem:[#allocation7 + $0xe30] sm:$0xff] }
 0x396   :  { %7945 = vmatprep.subr.bf16.mxu1 %v11169_v10  ;;  %v14239_v10 = vpop.permute.xlu1 %8409 }
 0x398   :  { %7688 = vmatpush1.bf16.msra.mxu0 %v11422_v24 }
 0x399   :  { %7946 = vmatpush1.bf16.msra.mxu1 %v11168_v1  ;;  %7689 = vmatprep.subr.bf16.mxu0 %v11431_v59  ;;  %v1092_v1 = vld [vmem:[#allocation7 + $0xdd0] sm:$0xff] }
 0x39a   :  { %7947 = vmatprep.subr.bf16.mxu1 %v11177_v50  ;;  %v1096_v59 = vld [vmem:[#allocation7 + $0xdf0] sm:$0xff]  ;;  %v14253_v6 = vpop.permute.xlu1 %8413 }
 0x39c   :  { %7690 = vmatpush1.bf16.msra.mxu0 %v11430_v45  ;;  %v8292_v45 = vmul.f32 %v8258_v5, %v14204_v62 }
 0x39d   :  { %7948 = vmatpush1.bf16.msra.mxu1 %v11176_v11  ;;  %7691 = vmatprep.subr.bf16.mxu0 %v11439_v2  ;;  %v8382_v11 = vmul.f32 %v8337_v55, %v14222_v16  ;;  %v11446_v2 = vcombine.low %v1084_v47, %v1088_v52  ;;  %v8420_v55 = vrot.slane %v14249_v28, %v14584_v32 }
 0x39e   :  { %v7199_v24 = vpop.f32.mrb[0].mxu0  ;;  %7949 = vmatprep.subr.bf16.mxu1 %v11185_v35  ;;  %v11192_v35 = vcombine.low %v829_v0, %v833_v4  ;;  %v8375_v47 = vmul.f32 %v8341_v51, %v14212_v40  ;;  %v11454_v0 = vcombine.low %v1092_v1, %v1096_v59  ;;  %v11200_v4 = vcombine.low %v837_v34, %v841_v20 }
 0x39f   :  { %v12355_v50 = vadd.f32 %v7199_v24, %v6899_v44  ;;  %v7201_v27 = vpop.f32.mrb[1].mxu0  ;;  %v11455_v44 = vcombine.high %v1092_v1, %v1096_v59  ;;  %v1100_v24 = vld [vmem:[#allocation7 + $0xe10] sm:$0xff]  ;;  %v8457_v1 = vmul.f32 %v8420_v55, %v14239_v10  ;;  %v14263_v59 = vld [vmem:[#allocation10] sm:$0xff] }
 0x3a0   :  { %v12357_v22 = vadd.f32 %v7201_v27, %v6901_v46  ;;  %v7203_v37 = vpop.f32.mrb[2].mxu0  ;;  %7692 = vmatpush1.bf16.msra.mxu0 %v11438_v58  ;;  %v11201_v46 = vcombine.high %v837_v34, %v841_v20  ;;  %v845_v27 = vld [vmem:[#allocation7 + $0x618] sm:$0xff]  ;;  %v8300_v58 = vmul.f32 %v8258_v5, %v14206_v54  ;;  %v8424_v5 = vrot.slane %v14249_v28, %v14585_v36 }
 0x3a1   :  { %v12359_v39 = vadd.f32 %v7203_v37, %v6903_v63  ;;  %7950 = vmatpush1.bf16.msra.mxu1 %v11184_v61  ;;  %v7205_v25 = vpop.f32.mrb[3].mxu0  ;;  %7693 = vmatprep.subr.bf16.mxu0 %v11447_v53  ;;  %v8307_v60 = vadd.f32 %v12355_v50, %v8291_v8  ;;  %v11463_v61 = vcombine.high %v1100_v24, %v1104_v12  ;;  %v1112_v37 = vld [vmem:[#allocation7 + $0xe70] sm:$0xff] }
 0x3a2   :  { %v12361_v7 = vadd.f32 %v7205_v25, %v6905_v33  ;;  %7951 = vmatprep.subr.bf16.mxu1 %v11193_v30  ;;  %v11209_v63 = vcombine.high %v845_v27, %v849_v21  ;;  %v1108_v33 = vld [vmem:[#allocation7 + $0xe50] sm:$0xff]  ;;  %v8465_v8 = vmul.f32 %v8420_v55, %v14253_v6  ;;  %v8308_v50 = vadd.f32 %v12357_v22, %v8292_v45  ;;  %v853_v25 = vld [vmem:[#allocation7 + $0x658] sm:$0xff] }
 0x3a3   :  { %v8315_v52 = vadd.f32 %v12359_v39, %v8299_v19  ;;  %v8390_v30 = vadd.f32 %v8374_v43, %v8307_v60  ;;  %v8383_v34 = vmul.f32 %v8341_v51, %v14222_v16  ;;  %v11462_v20 = vcombine.low %v1100_v24, %v1104_v12  ;;  %v1120_v39 = vld [vmem:[#allocation7 + $0xeb0] sm:$0xff]  ;;  %v865_v51 = vld [vmem:[#allocation7 + $0x6b8] sm:$0xff] }
 0x3a4   :  { %7694 = vmatpush1.bf16.msra.mxu0 %v11446_v2  ;;  %v8316_v19 = vadd.f32 %v12361_v7, %v8300_v58  ;;  %v11471_v60 = vcombine.high %v1108_v33, %v1112_v37  ;;  %v11217_v43 = vcombine.high %v853_v25, %v857_v29  ;;  %v8391_v45 = vadd.f32 %v8375_v47, %v8308_v50  ;;  %v1116_v2 = vld [vmem:[#allocation7 + $0xe90] sm:$0xff] }
 0x3a5   :  { %v8398_v53 = vadd.f32 %v8382_v11, %v8315_v52  ;;  %7952 = vmatpush1.bf16.msra.mxu1 %v11192_v35  ;;  %7695 = vmatprep.subr.bf16.mxu0 %v11455_v44  ;;  %v11208_v11 = vcombine.low %v845_v27, %v849_v21  ;;  %v8458_v35 = vmul.f32 %v8424_v5, %v14239_v10  ;;  %v1124_v58 = vld [vmem:[#allocation7 + $0xed0] sm:$0xff] }
 0x3a6   :  { %7953 = vmatprep.subr.bf16.mxu1 %v11201_v46  ;;  %v8473_v44 = vadd.f32 %v8457_v1, %v8390_v30  ;;  %v8494_v7 = vrot.slane %v14263_v59, %v14584_v32  ;;  %v861_v46 = vld [vmem:[#allocation7 + $0x698] sm:$0xff]  ;;  %v8399_v55 = vadd.f32 %v8383_v34, %v8316_v19  ;;  %v11470_v21 = vcombine.low %v1108_v33, %v1112_v37  ;;  %v1136_v1 = vld [vmem:[#allocation7 + $0xf30] sm:$0xff] }
 0x3a7   :  { %v8481_v22 = vadd.f32 %v8465_v8, %v8398_v53  ;;  %v8466_v24 = vmul.f32 %v8424_v5, %v14253_v6  ;;  %v11216_v12 = vcombine.low %v853_v25, %v857_v29  ;;  %v11479_v27 = vcombine.high %v1116_v2, %v1120_v39  ;;  %v873_v8 = vld [vmem:[#allocation7 + $0x6f8] sm:$0xff]  ;;  %v1132_v5 = vld [vmem:[#allocation7 + $0xf10] sm:$0xff] }
 0x3a8   :  { %7696 = vmatpush1.bf16.msra.mxu0 %v11454_v0  ;;  %v11225_v52 = vcombine.high %v861_v46, %v865_v51  ;;  %v1128_v0 = vld [vmem:[#allocation7 + $0xef0] sm:$0xff]  ;;  %v8531_v53 = vadd.f32 %v8494_v7, %v8473_v44  ;;  %v11478_v33 = vcombine.low %v1116_v2, %v1120_v39  ;;  %v11224_v50 = vcombine.low %v861_v46, %v865_v51  ;;  %v885_v51 = vld [vmem:[#allocation7 + $0x758] sm:$0xff] }
 0x3a9   :  { %7954 = vmatpush1.bf16.msra.mxu1 %v11200_v4  ;;  %7697 = vmatprep.subr.bf16.mxu0 %v11463_v61  ;;  %v8539_v47 = vadd.f32 %v8494_v7, %v8481_v22  ;;  %v8474_v4 = vadd.f32 %v8458_v35, %v8391_v45  ;;  %v8498_v61 = vrot.slane %v14263_v59, %v14585_v36  ;;  %v1140_v35 = vld [vmem:[#allocation7 + $0xf50] sm:$0xff] }
 0x3aa   :  { %7955 = vmatprep.subr.bf16.mxu1 %v11209_v63  ;;  %v869_v63 = vld [vmem:[#allocation7 + $0x6d8] sm:$0xff]  ;;  %v8482_v30 = vadd.f32 %v8466_v24, %v8399_v55  ;;  %v11487_v29 = vcombine.high %v1124_v58, %v1128_v0  ;;  %v8547_v34 = vmax.f32 %v8531_v53, 0.0  ;;  %v11495_v2 = vcombine.high %v1132_v5, %v1136_v1  ;;  %v1144_v44 = vld [vmem:[#allocation7 + $0xf70] sm:$0xff] }
 0x3ab   :  { %v8555_v37 = vmax.f32 %v8539_v47, 0.0  ;;  %v11233_v25 = vcombine.high %v869_v63, %v873_v8  ;;  %v8532_v19 = vadd.f32 %v8498_v61, %v8474_v4  ;;  %v11232_v45 = vcombine.low %v869_v63, %v873_v8  ;;  %v889_v55 = vld [vmem:[#allocation7 + $0x778] sm:$0xff] }
 0x3ac   :  { %7698 = vmatpush1.bf16.msra.mxu0 %v11462_v20  ;;  %v877_v20 = vld [vmem:[#allocation7 + $0x718] sm:$0xff]  ;;  %v11249_v47 = vcombine.high %v885_v51, %v889_v55  ;;  %v11248_v53 = vcombine.low %v885_v51, %v889_v55 }
 0x3ad   :  { %7956 = vmatpush1.bf16.msra.mxu1 %v11208_v11  ;;  %7699 = vmatprep.subr.bf16.mxu0 %v11471_v60  ;;  %v881_v11 = vld [vmem:[#allocation7 + $0x738] sm:$0xff]  ;;  %v11486_v60 = vcombine.low %v1124_v58, %v1128_v0  ;;  %v14272_v22 = vpack.c.bf16 %v8555_v37, %v8547_v34  ;;  %v8548_v7 = vmax.f32 %v8532_v19, 0.0  ;;  %v1152_v58 = vld [vmem:[#allocation7 + $0xfb0] sm:$0xff] }
 0x3ae   :  { %7957 = vmatprep.subr.bf16.mxu1 %v11217_v43  ;;  %v8540_v43 = vadd.f32 %v8498_v61, %v8482_v30  ;;  %v11241_v39 = vcombine.high %v877_v20, %v881_v11  ;;  %v893_v0 = vld [vmem:[#allocation7 + $0x798] sm:$0xff]  ;;  %v11502_v61 = vcombine.low %v1140_v35, %v1144_v44  ;;  %v1160_v30 = vld [vmem:[#allocation7 + $0xff0] sm:$0xff] }
 0x3af   :  { %v897_v4 = vld [vmem:[#allocation7 + $0x7b8] sm:$0xff]  ;;  %v1164_v19 = vld [vmem:[#allocation7 + $0x1010] sm:$0xff] }
 0x3b0   :  { %7700 = vmatpush1.bf16.msra.mxu0 %v11470_v21  ;;  %v8556_v46 = vmax.f32 %v8540_v43, 0.0  ;;  %v11494_v21 = vcombine.low %v1132_v5, %v1136_v1  ;;  %v11257_v8 = vcombine.high %v893_v0, %v897_v4  ;;  %v1168_v34 = vld [vmem:[#allocation7 + $0x1030] sm:$0xff] }
 0x3b1   :  { %7958 = vmatpush1.bf16.msra.mxu1 %v11216_v12  ;;  %7701 = vmatprep.subr.bf16.mxu0 %v11479_v27  ;;  %v11240_v12 = vcombine.low %v877_v20, %v881_v11  ;;  %v11503_v27 = vcombine.high %v1140_v35, %v1144_v44  ;;  %v909_v20 = vld [vmem:[#allocation7 + $0x818] sm:$0xff]  ;;  %v1176_v35 = vld [vmem:[#allocation7 + $0x1070] sm:$0xff]  ;;  %v11526_v44 = vcombine.low %v1164_v19, %v1168_v34 }
 0x3b2   :  { %7959 = vmatprep.subr.bf16.mxu1 %v11225_v52  ;;  %v14274_v24 = vpack.c.bf16 %v8556_v46, %v8548_v7  ;;  %v1148_v52 = vld [vmem:[#allocation7 + $0xf90] sm:$0xff]  ;;  %v913_v11 = vld [vmem:[#allocation7 + $0x838] sm:$0xff] }
 0x3b3   :  { %v11511_v63 = vcombine.high %v1148_v52, %v1152_v58  ;;  %v11510_v37 = vcombine.low %v1148_v52, %v1152_v58  ;;  %v917_v7 = vld [vmem:[#allocation7 + $0x858] sm:$0xff]  ;;  %v11272_v51 = vcombine.low %v909_v20, %v913_v11 }
 0x3b4   :  { %7702 = vmatpush1.bf16.msra.mxu0 %v11478_v33  ;;  %v1156_v33 = vld [vmem:[#allocation7 + $0xfd0] sm:$0xff]  ;;  %v921_v46 = vld [vmem:[#allocation7 + $0x878] sm:$0xff] }
 0x3b5   :  { %7960 = vmatpush1.bf16.msra.mxu1 %v11224_v50  ;;  %7703 = vmatprep.subr.bf16.mxu0 %v11487_v29  ;;  %v901_v50 = vld [vmem:[#allocation7 + $0x7d8] sm:$0xff]  ;;  %v11519_v5 = vcombine.high %v1156_v33, %v1160_v30 }
 0x3b6   :  { %7961 = vmatprep.subr.bf16.mxu1 %v11233_v25  ;;  %v905_v29 = vld [vmem:[#allocation7 + $0x7f8] sm:$0xff]  ;;  %v11256_v25 = vcombine.low %v893_v0, %v897_v4  ;;  %v11280_v0 = vcombine.low %v917_v7, %v921_v46 }
 0x3b7   :  { %v11265_v1 = vcombine.high %v901_v50, %v905_v29  ;;  %v11264_v43 = vcombine.low %v901_v50, %v905_v29  ;;  %v929_v52 = vld [vmem:[#allocation7 + $0x8b8] sm:$0xff] }
 0x3b8   :  { %7704 = vmatpush1.bf16.msra.mxu0 %v11486_v60  ;;  %v11518_v60 = vcombine.low %v1156_v33, %v1160_v30  ;;  %v937_v33 = vld [vmem:[#allocation7 + $0x8f8] sm:$0xff] }
 0x3b9   :  { %7962 = vmatpush1.bf16.msra.mxu1 %v11232_v45  ;;  %7705 = vmatprep.subr.bf16.mxu0 %v11495_v2  ;;  %v11527_v45 = vcombine.high %v1164_v19, %v1168_v34  ;;  %v11273_v2 = vcombine.high %v909_v20, %v913_v11  ;;  %v1204_v11 = vld [vmem:[#allocation7 + $0x1150] sm:$0xff] }
 0x3ba   :  { %7963 = vmatprep.subr.bf16.mxu1 %v11241_v39  ;;  %v1172_v39 = vld [vmem:[#allocation7 + $0x1050] sm:$0xff] }
 0x3bb   :  { %v11535_v55 = vcombine.high %v1172_v39, %v1176_v35  ;;  %v11534_v58 = vcombine.low %v1172_v39, %v1176_v35 }
 0x3bc   :  { %7706 = vmatpush1.bf16.msra.mxu0 %v11494_v21  ;;  %v1180_v21 = vld [vmem:[#allocation7 + $0x1090] sm:$0xff] }
 0x3bd   :  { %7964 = vmatpush1.bf16.msra.mxu1 %v11240_v12  ;;  %7707 = vmatprep.subr.bf16.mxu0 %v11503_v27  ;;  %v1184_v12 = vld [vmem:[#allocation7 + $0x10b0] sm:$0xff]  ;;  %v11281_v27 = vcombine.high %v917_v7, %v921_v46 }
 0x3be   :  { %7965 = vmatprep.subr.bf16.mxu1 %v11249_v47  ;;  %v925_v47 = vld [vmem:[#allocation7 + $0x898] sm:$0xff]  ;;  %v11543_v4 = vcombine.high %v1180_v21, %v1184_v12  ;;  %v11542_v30 = vcombine.low %v1180_v21, %v1184_v12  ;;  %v1212_v7 = vld [vmem:[#allocation7 + $0x1190] sm:$0xff] }
 0x3bf   :  { %v1216_v46 = vld [vmem:[#allocation7 + $0x11b0] sm:$0xff] }
 0x3c0   :  { %7708 = vmatpush1.bf16.msra.mxu0 %v11502_v61  ;;  %v11289_v61 = vcombine.high %v925_v47, %v929_v52 }
 0x3c1   :  { %7966 = vmatpush1.bf16.msra.mxu1 %v11248_v53  ;;  %7709 = vmatprep.subr.bf16.mxu0 %v11511_v63  ;;  %v1188_v53 = vld [vmem:[#allocation7 + $0x10d0] sm:$0xff] }
 0x3c2   :  { %7967 = vmatprep.subr.bf16.mxu1 %v11257_v8  ;;  %v1192_v63 = vld [vmem:[#allocation7 + $0x10f0] sm:$0xff]  ;;  %v933_v8 = vld [vmem:[#allocation7 + $0x8d8] sm:$0xff] }
 0x3c3   :  { %v11551_v50 = vcombine.high %v1188_v53, %v1192_v63  ;;  %v11297_v29 = vcombine.high %v933_v8, %v937_v33  ;;  %v11296_v19 = vcombine.low %v933_v8, %v937_v33  ;;  %v1228_v33 = vld [vmem:[#allocation7 + $0x1210] sm:$0xff] }
 0x3c4   :  { %7710 = vmatpush1.bf16.msra.mxu0 %v11510_v37  ;;  %v1196_v37 = vld [vmem:[#allocation7 + $0x1110] sm:$0xff] }
 0x3c5   :  { %7968 = vmatpush1.bf16.msra.mxu1 %v11256_v25  ;;  %7711 = vmatprep.subr.bf16.mxu0 %v11519_v5  ;;  %v1200_v25 = vld [vmem:[#allocation7 + $0x1130] sm:$0xff]  ;;  %v941_v5 = vld [vmem:[#allocation7 + $0x918] sm:$0xff] }
 0x3c6   :  { %7969 = vmatprep.subr.bf16.mxu1 %v11265_v1  ;;  %v945_v1 = vld [vmem:[#allocation7 + $0x938] sm:$0xff]  ;;  %v11559_v34 = vcombine.high %v1196_v37, %v1200_v25 }
 0x3c7   :  { %v11305_v20 = vcombine.high %v941_v5, %v945_v1  ;;  %v11304_v39 = vcombine.low %v941_v5, %v945_v1  ;;  %v1236_v1 = vld [vmem:[#allocation7 + $0x1250] sm:$0xff] }
 0x3c8   :  { %7712 = vmatpush1.bf16.msra.mxu0 %v11518_v60  ;;  %v1208_v60 = vld [vmem:[#allocation7 + $0x1170] sm:$0xff] }
 0x3c9   :  { %7970 = vmatpush1.bf16.msra.mxu1 %v11264_v43  ;;  %7724 = vmatprep.subr.bf16.mxu0 %v11527_v45  ;;  %v949_v43 = vld [vmem:[#allocation7 + $0x958] sm:$0xff]  ;;  %v11567_v35 = vcombine.high %v1204_v11, %v1208_v60  ;;  %v11566_v21 = vcombine.low %v1204_v11, %v1208_v60 }
 0x3ca   :  { %7982 = vmatprep.subr.bf16.mxu1 %v11273_v2  ;;  %v953_v45 = vld [vmem:[#allocation7 + $0x978] sm:$0xff]  ;;  %v11558_v2 = vcombine.low %v1196_v37, %v1200_v25 }
 0x3cb   :  { %7714 = vmatmul.mubr.bf16.vlgmr.msra.gmra.mrb[4].mxu0 %v14579_v23  ;;  %v11312_v12 = vcombine.low %v949_v43, %v953_v45 }
 0x3cc   :  { %7972 = vmatmul.mubr.bf16.vlgmr.msra.gmra.mrb[8].mxu1 %v14580_v57  ;;  %7725 = vmatpush1.bf16.msra.mxu0 %v11526_v44  ;;  %v11288_v57 = vcombine.low %v925_v47, %v929_v52  ;;  %v11313_v44 = vcombine.high %v949_v43, %v953_v45  ;;  %v1220_v52 = vld [vmem:[#allocation7 + $0x11d0] sm:$0xff] }
 0x3cd   :  { %7756 = vmatprep.mubr.bf16.mxu0 %v14581_v31  ;;  %7983 = vmatpush1.bf16.msra.mxu1 %v11272_v51  ;;  %v957_v51 = vld [vmem:[#allocation7 + $0x998] sm:$0xff]  ;;  %v1244_v45 = vld [vmem:[#allocation7 + $0x1290] sm:$0xff] }
 0x3ce   :  { %8014 = vmatprep.mubr.bf16.mxu1 %v14582_v14  ;;  %7726 = vmatprep.subr.bf16.mxu0 %v11535_v55  ;;  %v11550_v14 = vcombine.low %v1188_v53, %v1192_v63  ;;  %v961_v55 = vld [vmem:[#allocation7 + $0x9b8] sm:$0xff] }
 0x3cf   :  { %7984 = vmatprep.subr.bf16.mxu1 %v11281_v27  ;;  %v11575_v27 = vcombine.high %v1212_v7, %v1216_v46  ;;  %v11321_v47 = vcombine.high %v957_v51, %v961_v55  ;;  %v11320_v53 = vcombine.low %v957_v51, %v961_v55  ;;  %v1252_v55 = vld [vmem:[#allocation7 + $0x12d0] sm:$0xff] }
 0x3d0   :  { %7727 = vmatpush1.bf16.msra.mxu0 %v11534_v58  ;;  %v1224_v58 = vld [vmem:[#allocation7 + $0x11f0] sm:$0xff] }
 0x3d1   :  { %7985 = vmatpush1.bf16.msra.mxu1 %v11280_v0  ;;  %7728 = vmatprep.subr.bf16.mxu0 %v11543_v4  ;;  %v965_v0 = vld [vmem:[#allocation7 + $0x9d8] sm:$0xff]  ;;  %v11583_v63 = vcombine.high %v1220_v52, %v1224_v58 }
 0x3d2   :  { %7986 = vmatprep.subr.bf16.mxu1 %v11289_v61  ;;  %v969_v4 = vld [vmem:[#allocation7 + $0x9f8] sm:$0xff]  ;;  %v11574_v61 = vcombine.low %v1212_v7, %v1216_v46 }
 0x3d3   :  { %v11329_v8 = vcombine.high %v965_v0, %v969_v4  ;;  %v11328_v37 = vcombine.low %v965_v0, %v969_v4  ;;  %v1260_v4 = vld [vmem:[#allocation7 + $0x1310] sm:$0xff] }
 0x3d4   :  { %7729 = vmatpush1.bf16.msra.mxu0 %v11542_v30  ;;  %v1232_v30 = vld [vmem:[#allocation7 + $0x1230] sm:$0xff] }
 0x3d5   :  { %7987 = vmatpush1.bf16.msra.mxu1 %v11288_v57  ;;  %7730 = vmatprep.subr.bf16.mxu0 %v11551_v50  ;;  %v973_v57 = vld [vmem:[#allocation7 + $0xa18] sm:$0xff]  ;;  %v11591_v25 = vcombine.high %v1228_v33, %v1232_v30 }
 0x3d6   :  { %7988 = vmatprep.subr.bf16.mxu1 %v11297_v29  ;;  %v977_v50 = vld [vmem:[#allocation7 + $0xa38] sm:$0xff]  ;;  %v11582_v29 = vcombine.low %v1220_v52, %v1224_v58 }
 0x3d7   :  { %v11337_v5 = vcombine.high %v973_v57, %v977_v50  ;;  %v11336_v11 = vcombine.low %v973_v57, %v977_v50  ;;  %v1268_v50 = vld [vmem:[#allocation7 + $0x1350] sm:$0xff] }
 0x3d8   :  { %7731 = vmatpush1.bf16.msra.mxu0 %v11550_v14  ;;  %v1240_v14 = vld [vmem:[#allocation7 + $0x1270] sm:$0xff] }
 0x3d9   :  { %7989 = vmatpush1.bf16.msra.mxu1 %v11296_v19  ;;  %7732 = vmatprep.subr.bf16.mxu0 %v11559_v34  ;;  %v981_v19 = vld [vmem:[#allocation7 + $0xa58] sm:$0xff]  ;;  %v11599_v60 = vcombine.high %v1236_v1, %v1240_v14 }
 0x3da   :  { %7990 = vmatprep.subr.bf16.mxu1 %v11305_v20  ;;  %v985_v34 = vld [vmem:[#allocation7 + $0xa78] sm:$0xff]  ;;  %v11590_v20 = vcombine.low %v1228_v33, %v1232_v30 }
 0x3db   :  { %v11345_v43 = vcombine.high %v981_v19, %v985_v34  ;;  %v11344_v7 = vcombine.low %v981_v19, %v985_v34  ;;  %v1276_v34 = vld [vmem:[#allocation7 + $0x1390] sm:$0xff] }
 0x3dc   :  { %7733 = vmatpush1.bf16.msra.mxu0 %v11558_v2  ;;  %v1248_v2 = vld [vmem:[#allocation7 + $0x12b0] sm:$0xff] }
 0x3dd   :  { %7991 = vmatpush1.bf16.msra.mxu1 %v11304_v39  ;;  %7734 = vmatprep.subr.bf16.mxu0 %v11567_v35  ;;  %v989_v39 = vld [vmem:[#allocation7 + $0xa98] sm:$0xff]  ;;  %v11607_v46 = vcombine.high %v1244_v45, %v1248_v2 }
 0x3de   :  { %7992 = vmatprep.subr.bf16.mxu1 %v11313_v44  ;;  %v993_v35 = vld [vmem:[#allocation7 + $0xab8] sm:$0xff]  ;;  %v11598_v44 = vcombine.low %v1236_v1, %v1240_v14 }
 0x3df   :  { %v11353_v51 = vcombine.high %v989_v39, %v993_v35  ;;  %v11352_v52 = vcombine.low %v989_v39, %v993_v35  ;;  %v1284_v35 = vld [vmem:[#allocation7 + $0x13d0] sm:$0xff] }
 0x3e0   :  { %7735 = vmatpush1.bf16.msra.mxu0 %v11566_v21  ;;  %v1256_v21 = vld [vmem:[#allocation7 + $0x12f0] sm:$0xff] }
 0x3e1   :  { %7993 = vmatpush1.bf16.msra.mxu1 %v11312_v12  ;;  %7736 = vmatprep.subr.bf16.mxu0 %v11575_v27  ;;  %v997_v12 = vld [vmem:[#allocation7 + $0xad8] sm:$0xff]  ;;  %v11615_v58 = vcombine.high %v1252_v55, %v1256_v21 }
 0x3e2   :  { %7994 = vmatprep.subr.bf16.mxu1 %v11321_v47  ;;  %v1001_v27 = vld [vmem:[#allocation7 + $0xaf8] sm:$0xff]  ;;  %v11606_v47 = vcombine.low %v1244_v45, %v1248_v2 }
 0x3e3   :  { %v11361_v0 = vcombine.high %v997_v12, %v1001_v27  ;;  %v11360_v33 = vcombine.low %v997_v12, %v1001_v27  ;;  %v1292_v27 = vld [vmem:[#allocation7 + $0x1410] sm:$0xff] }
 0x3e4   :  { %7737 = vmatpush1.bf16.msra.mxu0 %v11574_v61  ;;  %v1264_v61 = vld [vmem:[#allocation7 + $0x1330] sm:$0xff] }
 0x3e5   :  { %7995 = vmatpush1.bf16.msra.mxu1 %v11320_v53  ;;  %7738 = vmatprep.subr.bf16.mxu0 %v11583_v63  ;;  %v1005_v53 = vld [vmem:[#allocation7 + $0xb18] sm:$0xff]  ;;  %v11623_v30 = vcombine.high %v1260_v4, %v1264_v61 }
 0x3e6   :  { %7996 = vmatprep.subr.bf16.mxu1 %v11329_v8  ;;  %v1009_v63 = vld [vmem:[#allocation7 + $0xb38] sm:$0xff]  ;;  %v11614_v8 = vcombine.low %v1252_v55, %v1256_v21 }
 0x3e7   :  { %v11369_v57 = vcombine.high %v1005_v53, %v1009_v63  ;;  %v11368_v1 = vcombine.low %v1005_v53, %v1009_v63  ;;  %v1300_v63 = vld [vmem:[#allocation7 + $0x1450] sm:$0xff] }
 0x3e8   :  { %7739 = vmatpush1.bf16.msra.mxu0 %v11582_v29  ;;  %v1272_v29 = vld [vmem:[#allocation7 + $0x1370] sm:$0xff] }
 0x3e9   :  { %7997 = vmatpush1.bf16.msra.mxu1 %v11328_v37  ;;  %7740 = vmatprep.subr.bf16.mxu0 %v11591_v25  ;;  %v1013_v37 = vld [vmem:[#allocation7 + $0xb58] sm:$0xff]  ;;  %v11631_v14 = vcombine.high %v1268_v50, %v1272_v29 }
 0x3ea   :  { %7998 = vmatprep.subr.bf16.mxu1 %v11337_v5  ;;  %v1017_v25 = vld [vmem:[#allocation7 + $0xb78] sm:$0xff]  ;;  %v11622_v5 = vcombine.low %v1260_v4, %v1264_v61 }
 0x3eb   :  { %v11377_v19 = vcombine.high %v1013_v37, %v1017_v25  ;;  %v11376_v45 = vcombine.low %v1013_v37, %v1017_v25  ;;  %v1308_v37 = vld [vmem:[#allocation7 + $0x1490] sm:$0xff] }
 0x3ec   :  { %7741 = vmatpush1.bf16.msra.mxu0 %v11590_v20  ;;  %v1280_v20 = vld [vmem:[#allocation7 + $0x13b0] sm:$0xff] }
 0x3ed   :  { %7999 = vmatpush1.bf16.msra.mxu1 %v11336_v11  ;;  %7742 = vmatprep.subr.bf16.mxu0 %v11599_v60  ;;  %v1021_v11 = vld [vmem:[#allocation7 + $0xb98] sm:$0xff]  ;;  %v11639_v2 = vcombine.high %v1276_v34, %v1280_v20  ;;  %v1312_v25 = vld [vmem:[#allocation7 + $0x14b0] sm:$0xff] }
 0x3ee   :  { %8000 = vmatprep.subr.bf16.mxu1 %v11345_v43  ;;  %v1025_v60 = vld [vmem:[#allocation7 + $0xbb8] sm:$0xff]  ;;  %v11630_v43 = vcombine.low %v1268_v50, %v1272_v29 }
 0x3ef   :  { %v11385_v39 = vcombine.high %v1021_v11, %v1025_v60  ;;  %v11384_v55 = vcombine.low %v1021_v11, %v1025_v60  ;;  %v1316_v60 = vld [vmem:[#allocation7 + $0x14d0] sm:$0xff] }
 0x3f0   :  { %7743 = vmatpush1.bf16.msra.mxu0 %v11598_v44  ;;  %v1288_v44 = vld [vmem:[#allocation7 + $0x13f0] sm:$0xff] }
 0x3f1   :  { %8001 = vmatpush1.bf16.msra.mxu1 %v11344_v7  ;;  %7744 = vmatprep.subr.bf16.mxu0 %v11607_v46  ;;  %v1029_v7 = vld [vmem:[#allocation7 + $0xbd8] sm:$0xff]  ;;  %v11647_v21 = vcombine.high %v1284_v35, %v1288_v44 }
 0x3f2   :  { %8002 = vmatprep.subr.bf16.mxu1 %v11353_v51  ;;  %v1033_v46 = vld [vmem:[#allocation7 + $0xbf8] sm:$0xff]  ;;  %v11638_v51 = vcombine.low %v1276_v34, %v1280_v20  ;;  %v11671_v20 = vcombine.high %v1308_v37, %v1312_v25 }
 0x3f3   :  { %v11393_v12 = vcombine.high %v1029_v7, %v1033_v46  ;;  %v11392_v4 = vcombine.low %v1029_v7, %v1033_v46  ;;  %v1324_v7 = vld [vmem:[#allocation7 + $0x1510] sm:$0xff] }
 0x3f4   :  { %7745 = vmatpush1.bf16.msra.mxu0 %v11606_v47  ;;  %v1296_v47 = vld [vmem:[#allocation7 + $0x1430] sm:$0xff] }
 0x3f5   :  { %8003 = vmatpush1.bf16.msra.mxu1 %v11352_v52  ;;  %7746 = vmatprep.subr.bf16.mxu0 %v11615_v58  ;;  %v1037_v52 = vld [vmem:[#allocation7 + $0xc18] sm:$0xff]  ;;  %v11655_v61 = vcombine.high %v1292_v27, %v1296_v47  ;;  %v1328_v46 = vld [vmem:[#allocation7 + $0x1530] sm:$0xff] }
 0x3f6   :  { %8004 = vmatprep.subr.bf16.mxu1 %v11361_v0  ;;  %v1041_v58 = vld [vmem:[#allocation7 + $0xc38] sm:$0xff]  ;;  %v11646_v0 = vcombine.low %v1284_v35, %v1288_v44 }
 0x3f7   :  { %v11401_v53 = vcombine.high %v1037_v52, %v1041_v58  ;;  %v11400_v50 = vcombine.low %v1037_v52, %v1041_v58  ;;  %v1336_v52 = vld [vmem:[#allocation7 + $0x1570] sm:$0xff]  ;;  %v14586_v58 = vld [vmem:[#allocation27_spill] sm:$0xff] }
 0x3f8   :  { %7747 = vmatpush1.bf16.msra.mxu0 %v11614_v8  ;;  %v1304_v8 = vld [vmem:[#allocation7 + $0x1470] sm:$0xff] }
 0x3f9   :  { %8005 = vmatpush1.bf16.msra.mxu1 %v11360_v33  ;;  %7748 = vmatprep.subr.bf16.mxu0 %v11623_v30  ;;  %v11654_v33 = vcombine.low %v1292_v27, %v1296_v47  ;;  %v1045_v30 = vld [vmem:[#allocation7 + $0xc58] sm:$0xff]  ;;  %v11663_v29 = vcombine.high %v1300_v63, %v1304_v8  ;;  %v1332_v47 = vld [vmem:[#allocation7 + $0x1550] sm:$0xff] }
 0x3fa   :  { %8006 = vmatprep.subr.bf16.mxu1 %v11369_v57  ;;  %v1049_v57 = vld [vmem:[#allocation7 + $0xc78] sm:$0xff] }
 0x3fb   :  { %v11408_v34 = vcombine.low %v1045_v30, %v1049_v57 }
 0x3fc   :  { %7749 = vmatpush1.bf16.msra.mxu0 %v11622_v5  ;;  %v11409_v5 = vcombine.high %v1045_v30, %v1049_v57  ;;  %v14587_v57 = vld [vmem:[#allocation25_spill] sm:$0xff] }
 0x3fd   :  { %8007 = vmatpush1.bf16.msra.mxu1 %v11368_v1  ;;  %7750 = vmatprep.subr.bf16.mxu0 %v11631_v14  ;;  %v1053_v1 = vld [vmem:[#allocation7 + $0xc98] sm:$0xff] }
 0x3fe   :  { %8008 = vmatprep.subr.bf16.mxu1 %v11377_v19  ;;  %v1057_v14 = vld [vmem:[#allocation7 + $0xcb8] sm:$0xff]  ;;  %v11662_v19 = vcombine.low %v1300_v63, %v1304_v8  ;;  %v11686_v63 = vcombine.low %v1324_v7, %v1328_v46  ;;  %v8345_v8 = vrot.slane %v14227_v17, %v14586_v58 }
 0x3ff   :  { %v11417_v11 = vcombine.high %v1053_v1, %v1057_v14 }
 0x400   :  { %7751 = vmatpush1.bf16.msra.mxu0 %v11630_v43  ;;  %v1320_v43 = vld [vmem:[#allocation7 + $0x14f0] sm:$0xff] }
 0x401   :  { %8009 = vmatpush1.bf16.msra.mxu1 %v11376_v45  ;;  %7752 = vmatprep.subr.bf16.mxu0 %v11639_v2  ;;  %v1061_v45 = vld [vmem:[#allocation7 + $0xcd8] sm:$0xff]  ;;  %v11679_v35 = vcombine.high %v1316_v60, %v1320_v43 }
 0x402   :  { %8010 = vmatprep.subr.bf16.mxu1 %v11385_v39  ;;  %v1065_v2 = vld [vmem:[#allocation7 + $0xcf8] sm:$0xff]  ;;  %v11670_v39 = vcombine.low %v1308_v37, %v1312_v25  ;;  %v8266_v37 = vrot.slane %v14224_v18, %v14587_v57 }
 0x403   :  { %v11425_v44 = vcombine.high %v1061_v45, %v1065_v2 }
 0x404   :  { %7753 = vmatpush1.bf16.msra.mxu0 %v11638_v51  ;;  %v1069_v51 = vld [vmem:[#allocation7 + $0xd18] sm:$0xff] }
 0x405   :  { %8011 = vmatpush1.bf16.msra.mxu1 %v11384_v55  ;;  %7754 = vmatprep.subr.bf16.mxu0 %v11647_v21  ;;  %v1073_v55 = vld [vmem:[#allocation7 + $0xd38] sm:$0xff]  ;;  %v11424_v21 = vcombine.low %v1061_v45, %v1065_v2  ;;  %v11694_v45 = vcombine.low %v1332_v47, %v1336_v52 }
 0x406   :  { %8012 = vmatprep.subr.bf16.mxu1 %v11393_v12  ;;  %v11687_v12 = vcombine.high %v1324_v7, %v1328_v46  ;;  %v11433_v27 = vcombine.high %v1069_v51, %v1073_v55  ;;  %v11432_v30 = vcombine.low %v1069_v51, %v1073_v55  ;;  %v1348_v7 = vld [vmem:[#allocation7 + $0x15d0] sm:$0xff] }
 0x407   :  { %v1352_v46 = vld [vmem:[#allocation7 + $0x15f0] sm:$0xff] }
 0x408   :  { %7755 = vmatpush1.bf16.msra.mxu0 %v11646_v0  ;;  %v1699_v0 = vrot.slane %v14214_v42, %v14586_v58 }
 0x409   :  { %8013 = vmatpush1.bf16.msra.mxu1 %v11392_v4  ;;  %7767 = vmatprep.subr.bf16.mxu0 %v11655_v61  ;;  %v8262_v4 = vrot.slane %v14224_v18, %v14586_v58  ;;  %v1077_v61 = vld [vmem:[#allocation7 + $0xd58] sm:$0xff] }
 0x40a   :  { %8025 = vmatprep.subr.bf16.mxu1 %v11401_v53  ;;  %v1081_v53 = vld [vmem:[#allocation7 + $0xd78] sm:$0xff] }
 0x40b   :  { %7757 = vmatmul.mubr.bf16.vlgmr.msra.gmra.mrb[4].mxu0 %v14022_v38  ;;  %v11441_v25 = vcombine.high %v1077_v61, %v1081_v53 }
 0x40c   :  { %8015 = vmatmul.mubr.bf16.vlgmr.msra.gmra.mrb[8].mxu1 %v13784_v13  ;;  %7768 = vmatpush1.bf16.msra.mxu0 %v11654_v33  ;;  %v11416_v13 = vcombine.low %v1053_v1, %v1057_v14  ;;  %v8428_v33 = vrot.slane %v14249_v28, %v14586_v58  ;;  %v1344_v1 = vld [vmem:[#allocation7 + $0x15b0] sm:$0xff]  ;;  %v1730_v14 = vmul.f32 %v1699_v0, %v14218_v48 }
 0x40d   :  { %7799 = vmatprep.mubr.bf16.mxu0 %v14064_v56  ;;  %8026 = vmatpush1.bf16.msra.mxu1 %v11400_v50  ;;  %v1703_v50 = vrot.slane %v14214_v42, %v14587_v57  ;;  %v1089_v42 = vld [vmem:[#allocation7 + $0xdb8] sm:$0xff] }
 0x40e   :  { %8057 = vmatprep.mubr.bf16.mxu1 %v13814_v9  ;;  %7769 = vmatprep.subr.bf16.mxu0 %v11663_v29  ;;  %v11678_v9 = vcombine.low %v1316_v60, %v1320_v43  ;;  %v11695_v29 = vcombine.high %v1332_v47, %v1336_v52  ;;  %v8376_v60 = vmul.f32 %v8345_v8, %v14212_v40  ;;  %v1097_v47 = vld [vmem:[#allocation7 + $0xdf8] sm:$0xff] }
 0x40f   :  { %8027 = vmatprep.subr.bf16.mxu1 %v11409_v5  ;;  %v1340_v5 = vld [vmem:[#allocation7 + $0x1590] sm:$0xff]  ;;  %v8459_v18 = vmul.f32 %v8428_v33, %v14239_v10  ;;  %v14306_v43 = vrot.slane %v14263_v59, %v14586_v58  ;;  %v1731_v2 = vmul.f32 %v1703_v50, %v14218_v48 }
 0x410   :  { %7770 = vmatpush1.bf16.msra.mxu0 %v11662_v19  ;;  %v8293_v19 = vmul.f32 %v8262_v4, %v14204_v62  ;;  %v1356_v58 = vld [vmem:[#allocation7 + $0x1610] sm:$0xff] }
 0x411   :  { %8028 = vmatpush1.bf16.msra.mxu1 %v11408_v34  ;;  %7771 = vmatprep.subr.bf16.mxu0 %v11671_v20  ;;  %v8349_v34 = vrot.slane %v14227_v17, %v14587_v57  ;;  %v8432_v20 = vrot.slane %v14249_v28, %v14587_v57  ;;  %v11440_v17 = vcombine.low %v1077_v61, %v1081_v53 }
 0x412   :  { %8029 = vmatprep.subr.bf16.mxu1 %v11417_v11  ;;  %v1085_v11 = vld [vmem:[#allocation7 + $0xd98] sm:$0xff]  ;;  %v8294_v28 = vmul.f32 %v8266_v37, %v14204_v62  ;;  %v11702_v53 = vcombine.low %v1340_v5, %v1344_v1 }
 0x413   :  { %v8377_v55 = vmul.f32 %v8349_v34, %v14212_v40 }
 0x414   :  { %7772 = vmatpush1.bf16.msra.mxu0 %v11670_v39  ;;  %v11703_v39 = vcombine.high %v1340_v5, %v1344_v1  ;;  %v11710_v5 = vcombine.low %v1348_v7, %v1352_v46  ;;  %v1101_v1 = vld [vmem:[#allocation7 + $0xe18] sm:$0xff] }
 0x415   :  { %8030 = vmatpush1.bf16.msra.mxu1 %v11416_v13  ;;  %7773 = vmatprep.subr.bf16.mxu0 %v11679_v35  ;;  %v1738_v13 = vmul.f32 %v1699_v0, %v14202_v49  ;;  %v8301_v35 = vmul.f32 %v8262_v4, %v14206_v54  ;;  %v8467_v0 = vmul.f32 %v8428_v33, %v14253_v6 }
 0x416   :  { %8031 = vmatprep.subr.bf16.mxu1 %v11425_v44  ;;  %v11449_v44 = vcombine.high %v1085_v11, %v1089_v42  ;;  %v8302_v4 = vmul.f32 %v8266_v37, %v14206_v54  ;;  %v8468_v37 = vmul.f32 %v8432_v20, %v14253_v6 }
 0x418   :  { %7774 = vmatpush1.bf16.msra.mxu0 %v11678_v9  ;;  %v8460_v9 = vmul.f32 %v8432_v20, %v14239_v10  ;;  %v1364_v20 = vld [vmem:[#allocation7 + $0x1650] sm:$0xff] }
 0x419   :  { %8032 = vmatpush1.bf16.msra.mxu1 %v11424_v21  ;;  %7775 = vmatprep.subr.bf16.mxu0 %v11687_v12  ;;  %v8384_v21 = vmul.f32 %v8345_v8, %v14222_v16  ;;  %v1739_v12 = vmul.f32 %v1703_v50, %v14202_v49  ;;  %v1360_v8 = vld [vmem:[#allocation7 + $0x1630] sm:$0xff] }
 0x41a   :  { %8033 = vmatprep.subr.bf16.mxu1 %v11433_v27  ;;  %v1093_v27 = vld [vmem:[#allocation7 + $0xdd8] sm:$0xff] }
 0x41c   :  { %7776 = vmatpush1.bf16.msra.mxu0 %v11686_v63 }
 0x41d   :  { %8034 = vmatpush1.bf16.msra.mxu1 %v11432_v30  ;;  %7777 = vmatprep.subr.bf16.mxu0 %v11695_v29  ;;  %v11448_v29 = vcombine.low %v1085_v11, %v1089_v42  ;;  %v11456_v11 = vcombine.low %v1093_v27, %v1097_v47  ;;  %v11719_v42 = vcombine.high %v1356_v58, %v1360_v8 }
 0x41e   :  { %8035 = vmatprep.subr.bf16.mxu1 %v11441_v25  ;;  %v11711_v25 = vcombine.high %v1348_v7, %v1352_v46 }
 0x41f   :  { %v7543_v51 = vpop.f32.mrb[4].mxu1 }
 0x420   :  { %v12362_v52 = vadd.f32 %v7543_v51, %v1730_v14  ;;  %v7545_v61 = vpop.f32.mrb[5].mxu1  ;;  %7778 = vmatpush1.bf16.msra.mxu0 %v11694_v45  ;;  %v8385_v14 = vmul.f32 %v8349_v34, %v14222_v16  ;;  %v11457_v51 = vcombine.high %v1093_v27, %v1097_v47  ;;  %v8506_v34 = vrot.slane %v14263_v59, %v14587_v57 }
 0x421   :  { %v12363_v63 = vadd.f32 %v7545_v61, %v1731_v2  ;;  %v7547_v30 = vpop.f32.mrb[6].mxu1  ;;  %8036 = vmatpush1.bf16.msra.mxu1 %v11440_v17  ;;  %7779 = vmatprep.subr.bf16.mxu0 %v11703_v39  ;;  %v1105_v2 = vld [vmem:[#allocation7 + $0xe38] sm:$0xff] }
 0x422   :  { %v8309_v36 = vadd.f32 %v12362_v52, %v8293_v19  ;;  %v12364_v50 = vadd.f32 %v7547_v30, %v1738_v13  ;;  %v7549_v32 = vpop.f32.mrb[7].mxu1  ;;  %8037 = vmatprep.subr.bf16.mxu1 %v11449_v44  ;;  %v1368_v44 = vld [vmem:[#allocation7 + $0x1670] sm:$0xff]  ;;  %v11464_v27 = vcombine.low %v1101_v1, %v1105_v2 }
 0x423   :  { %v8310_v33 = vadd.f32 %v12363_v63, %v8294_v28  ;;  %v12365_v45 = vadd.f32 %v7549_v32, %v1739_v12  ;;  %v11465_v32 = vcombine.high %v1101_v1, %v1105_v2  ;;  %v11727_v59 = vcombine.high %v1364_v20, %v1368_v44  ;;  %v1121_v63 = vld [vmem:[#allocation7 + $0xeb8] sm:$0xff] }
 0x424   :  { %v8392_v17 = vadd.f32 %v8376_v60, %v8309_v36  ;;  %v8317_v39 = vadd.f32 %v12364_v50, %v8301_v35  ;;  %7780 = vmatpush1.bf16.msra.mxu0 %v11702_v53  ;;  %v1109_v36 = vld [vmem:[#allocation7 + $0xe58] sm:$0xff] }
 0x425   :  { %v8393_v61 = vadd.f32 %v8377_v55, %v8310_v33  ;;  %v8318_v19 = vadd.f32 %v12365_v45, %v8302_v4  ;;  %8038 = vmatpush1.bf16.msra.mxu1 %v11448_v29  ;;  %7781 = vmatprep.subr.bf16.mxu0 %v11711_v25  ;;  %v1113_v60 = vld [vmem:[#allocation7 + $0xe78] sm:$0xff]  ;;  %v11718_v55 = vcombine.low %v1356_v58, %v1360_v8  ;;  %v1372_v4 = vld [vmem:[#allocation7 + $0x1690] sm:$0xff] }
 0x426   :  { %v8475_v13 = vadd.f32 %v8459_v18, %v8392_v17  ;;  %v8400_v28 = vadd.f32 %v8384_v21, %v8317_v39  ;;  %8039 = vmatprep.subr.bf16.mxu1 %v11457_v51  ;;  %v11473_v52 = vcombine.high %v1109_v36, %v1113_v60  ;;  %v1117_v53 = vld [vmem:[#allocation7 + $0xe98] sm:$0xff]  ;;  %v11472_v58 = vcombine.low %v1109_v36, %v1113_v60  ;;  %v1384_v33 = vld [vmem:[#allocation7 + $0x16f0] sm:$0xff] }
 0x427   :  { %v8476_v7 = vadd.f32 %v8460_v9, %v8393_v61  ;;  %v8401_v46 = vadd.f32 %v8385_v14, %v8318_v19  ;;  %v1376_v9 = vld [vmem:[#allocation7 + $0x16b0] sm:$0xff]  ;;  %v11481_v51 = vcombine.high %v1117_v53, %v1121_v63  ;;  %v11480_v17 = vcombine.low %v1117_v53, %v1121_v63  ;;  %v1133_v19 = vld [vmem:[#allocation7 + $0xf18] sm:$0xff] }
 0x428   :  { %v8533_v35 = vadd.f32 %v14306_v43, %v8475_v13  ;;  %v8483_v12 = vadd.f32 %v8467_v0, %v8400_v28  ;;  %7782 = vmatpush1.bf16.msra.mxu0 %v11710_v5  ;;  %v11726_v0 = vcombine.low %v1364_v20, %v1368_v44  ;;  %v11735_v8 = vcombine.high %v1372_v4, %v1376_v9  ;;  %v1129_v5 = vld [vmem:[#allocation7 + $0xef8] sm:$0xff]  ;;  %v1392_v61 = vld [vmem:[#allocation7 + $0x1730] sm:$0xff] }
 0x429   :  { %v8484_v47 = vadd.f32 %v8468_v37, %v8401_v46  ;;  %8040 = vmatpush1.bf16.msra.mxu1 %v11456_v11  ;;  %7783 = vmatprep.subr.bf16.mxu0 %v11719_v42  ;;  %v8534_v18 = vadd.f32 %v8506_v34, %v8476_v7  ;;  %v1125_v37 = vld [vmem:[#allocation7 + $0xed8] sm:$0xff]  ;;  %v11734_v2 = vcombine.low %v1372_v4, %v1376_v9  ;;  %v1388_v42 = vld [vmem:[#allocation7 + $0x1710] sm:$0xff] }
 0x42a   :  { %v8541_v21 = vadd.f32 %v14306_v43, %v8483_v12  ;;  %8041 = vmatprep.subr.bf16.mxu1 %v11465_v32  ;;  %v8549_v29 = vmax.f32 %v8533_v35, 0.0  ;;  %v1380_v43 = vld [vmem:[#allocation7 + $0x16d0] sm:$0xff]  ;;  %v11489_v11 = vcombine.high %v1125_v37, %v1129_v5  ;;  %v11488_v28 = vcombine.low %v1125_v37, %v1129_v5  ;;  %v1141_v46 = vld [vmem:[#allocation7 + $0xf58] sm:$0xff] }
 0x42b   :  { %v8542_v30 = vadd.f32 %v8506_v34, %v8484_v47  ;;  %v8550_v50 = vmax.f32 %v8534_v18, 0.0  ;;  %v11743_v39 = vcombine.high %v1380_v43, %v1384_v33  ;;  %v1137_v34 = vld [vmem:[#allocation7 + $0xf38] sm:$0xff]  ;;  %v11742_v13 = vcombine.low %v1380_v43, %v1384_v33  ;;  %v1396_v44 = vld [vmem:[#allocation7 + $0x1750] sm:$0xff] }
 0x42c   :  { %v8557_v25 = vmax.f32 %v8541_v21, 0.0  ;;  %7784 = vmatpush1.bf16.msra.mxu0 %v11718_v55  ;;  %v11751_v32 = vcombine.high %v1388_v42, %v1392_v61  ;;  %v11497_v20 = vcombine.high %v1133_v19, %v1137_v34  ;;  %v1400_v7 = vld [vmem:[#allocation7 + $0x1770] sm:$0xff]  ;;  %v1145_v36 = vld [vmem:[#allocation7 + $0xf78] sm:$0xff]  ;;  %v11750_v60 = vcombine.low %v1388_v42, %v1392_v61 }
 0x42d   :  { %8042 = vmatpush1.bf16.msra.mxu1 %v11464_v27  ;;  %7785 = vmatprep.subr.bf16.mxu0 %v11727_v59  ;;  %v8558_v14 = vmax.f32 %v8542_v30, 0.0  ;;  %v11496_v35 = vcombine.low %v1133_v19, %v1137_v34  ;;  %v11759_v12 = vcombine.high %v1396_v44, %v1400_v7  ;;  %v11505_v55 = vcombine.high %v1141_v46, %v1145_v36  ;;  %v1404_v27 = vld [vmem:[#allocation7 + $0x1790] sm:$0xff]  ;;  %v1149_v59 = vld [vmem:[#allocation7 + $0xf98] sm:$0xff] }
 0x42e   :  { %8043 = vmatprep.subr.bf16.mxu1 %v11473_v52  ;;  %v14324_v45 = vpack.c.bf16 %v8557_v25, %v8549_v29  ;;  %v1408_v47 = vld [vmem:[#allocation7 + $0x17b0] sm:$0xff]  ;;  %v1153_v18 = vld [vmem:[#allocation7 + $0xfb8] sm:$0xff]  ;;  %v11758_v21 = vcombine.low %v1396_v44, %v1400_v7  ;;  %v11504_v52 = vcombine.low %v1141_v46, %v1145_v36 }
 0x42f   :  { %v14326_v1 = vpack.c.bf16 %v8558_v14, %v8550_v50  ;;  %v11767_v4 = vcombine.high %v1404_v27, %v1408_v47  ;;  %v11513_v9 = vcombine.high %v1149_v59, %v1153_v18  ;;  %v1412_v53 = vld [vmem:[#allocation7 + $0x17d0] sm:$0xff]  ;;  %v1157_v30 = vld [vmem:[#allocation7 + $0xfd8] sm:$0xff]  ;;  %v11766_v25 = vcombine.low %v1404_v27, %v1408_v47 }
 0x430   :  { %7786 = vmatpush1.bf16.msra.mxu0 %v11726_v0  ;;  %v1416_v63 = vld [vmem:[#allocation7 + $0x17f0] sm:$0xff]  ;;  %v1161_v29 = vld [vmem:[#allocation7 + $0xff8] sm:$0xff]  ;;  %v11512_v0 = vcombine.low %v1149_v59, %v1153_v18 }
 0x431   :  { %8044 = vmatpush1.bf16.msra.mxu1 %v11472_v58  ;;  %7787 = vmatprep.subr.bf16.mxu0 %v11735_v8  ;;  %v11775_v58 = vcombine.high %v1412_v53, %v1416_v63  ;;  %v11521_v8 = vcombine.high %v1157_v30, %v1161_v29  ;;  %v1420_v50 = vld [vmem:[#allocation7 + $0x1810] sm:$0xff]  ;;  %v1169_v43 = vld [vmem:[#allocation7 + $0x1038] sm:$0xff]  ;;  %v11774_v33 = vcombine.low %v1412_v53, %v1416_v63 }
 0x432   :  { %8045 = vmatprep.subr.bf16.mxu1 %v11481_v51  ;;  %v1424_v14 = vld [vmem:[#allocation7 + $0x1830] sm:$0xff]  ;;  %v1165_v51 = vld [vmem:[#allocation7 + $0x1018] sm:$0xff]  ;;  %v11520_v37 = vcombine.low %v1157_v30, %v1161_v29 }
 0x433   :  { %v11783_v5 = vcombine.high %v1420_v50, %v1424_v14  ;;  %v1173_v42 = vld [vmem:[#allocation7 + $0x1058] sm:$0xff]  ;;  %v11528_v19 = vcombine.low %v1165_v51, %v1169_v43  ;;  %v1460_v29 = vld [vmem:[#allocation7 + $0x1950] sm:$0xff] }
 0x434   :  { %7788 = vmatpush1.bf16.msra.mxu0 %v11734_v2  ;;  %v11529_v2 = vcombine.high %v1165_v51, %v1169_v43  ;;  %v1177_v61 = vld [vmem:[#allocation7 + $0x1078] sm:$0xff]  ;;  %v1468_v43 = vld [vmem:[#allocation7 + $0x1990] sm:$0xff] }
 0x435   :  { %8046 = vmatpush1.bf16.msra.mxu1 %v11480_v17  ;;  %7789 = vmatprep.subr.bf16.mxu0 %v11743_v39  ;;  %v1428_v17 = vld [vmem:[#allocation7 + $0x1850] sm:$0xff]  ;;  %v1185_v44 = vld [vmem:[#allocation7 + $0x10b8] sm:$0xff]  ;;  %v11536_v46 = vcombine.low %v1173_v42, %v1177_v61 }
 0x436   :  { %8047 = vmatprep.subr.bf16.mxu1 %v11489_v11  ;;  %v1432_v39 = vld [vmem:[#allocation7 + $0x1870] sm:$0xff]  ;;  %v11782_v11 = vcombine.low %v1420_v50, %v1424_v14  ;;  %v1193_v27 = vld [vmem:[#allocation7 + $0x10f8] sm:$0xff] }
 0x437   :  { %v11791_v34 = vcombine.high %v1428_v17, %v1432_v39  ;;  %v11790_v7 = vcombine.low %v1428_v17, %v1432_v39 }
 0x438   :  { %7790 = vmatpush1.bf16.msra.mxu0 %v11742_v13  ;;  %v1436_v13 = vld [vmem:[#allocation7 + $0x1890] sm:$0xff] }
 0x439   :  { %8048 = vmatpush1.bf16.msra.mxu1 %v11488_v28  ;;  %7791 = vmatprep.subr.bf16.mxu0 %v11751_v32  ;;  %v1440_v28 = vld [vmem:[#allocation7 + $0x18b0] sm:$0xff]  ;;  %v11537_v32 = vcombine.high %v1173_v42, %v1177_v61 }
 0x43a   :  { %8049 = vmatprep.subr.bf16.mxu1 %v11497_v20  ;;  %v1181_v20 = vld [vmem:[#allocation7 + $0x1098] sm:$0xff]  ;;  %v11799_v36 = vcombine.high %v1436_v13, %v1440_v28  ;;  %v11798_v47 = vcombine.low %v1436_v13, %v1440_v28  ;;  %v1476_v42 = vld [vmem:[#allocation7 + $0x19d0] sm:$0xff] }
 0x43b   :  { %v1480_v61 = vld [vmem:[#allocation7 + $0x19f0] sm:$0xff] }
 0x43c   :  { %7792 = vmatpush1.bf16.msra.mxu0 %v11750_v60  ;;  %v11545_v60 = vcombine.high %v1181_v20, %v1185_v44 }
 0x43d   :  { %8050 = vmatpush1.bf16.msra.mxu1 %v11496_v35  ;;  %7793 = vmatprep.subr.bf16.mxu0 %v11759_v12  ;;  %v1444_v35 = vld [vmem:[#allocation7 + $0x18d0] sm:$0xff] }
 0x43e   :  { %8051 = vmatprep.subr.bf16.mxu1 %v11505_v55  ;;  %v1448_v12 = vld [vmem:[#allocation7 + $0x18f0] sm:$0xff]  ;;  %v1189_v55 = vld [vmem:[#allocation7 + $0x10d8] sm:$0xff] }
 0x43f   :  { %v11807_v59 = vcombine.high %v1444_v35, %v1448_v12  ;;  %v11553_v18 = vcombine.high %v1189_v55, %v1193_v27  ;;  %v11552_v53 = vcombine.low %v1189_v55, %v1193_v27  ;;  %v1492_v27 = vld [vmem:[#allocation7 + $0x1a50] sm:$0xff] }
 0x440   :  { %7794 = vmatpush1.bf16.msra.mxu0 %v11758_v21  ;;  %v1452_v21 = vld [vmem:[#allocation7 + $0x1910] sm:$0xff] }
 0x441   :  { %8052 = vmatpush1.bf16.msra.mxu1 %v11504_v52  ;;  %7795 = vmatprep.subr.bf16.mxu0 %v11767_v4  ;;  %v1456_v52 = vld [vmem:[#allocation7 + $0x1930] sm:$0xff]  ;;  %v1197_v4 = vld [vmem:[#allocation7 + $0x1118] sm:$0xff] }
 0x442   :  { %8053 = vmatprep.subr.bf16.mxu1 %v11513_v9  ;;  %v1201_v9 = vld [vmem:[#allocation7 + $0x1138] sm:$0xff]  ;;  %v11815_v63 = vcombine.high %v1452_v21, %v1456_v52 }
 0x443   :  { %v11561_v30 = vcombine.high %v1197_v4, %v1201_v9  ;;  %v11560_v50 = vcombine.low %v1197_v4, %v1201_v9  ;;  %v1500_v9 = vld [vmem:[#allocation7 + $0x1a90] sm:$0xff] }
 0x444   :  { %7796 = vmatpush1.bf16.msra.mxu0 %v11766_v25  ;;  %v1464_v25 = vld [vmem:[#allocation7 + $0x1970] sm:$0xff] }
 0x445   :  { %8054 = vmatpush1.bf16.msra.mxu1 %v11512_v0  ;;  %7797 = vmatprep.subr.bf16.mxu0 %v11775_v58  ;;  %v1205_v0 = vld [vmem:[#allocation7 + $0x1158] sm:$0xff]  ;;  %v11823_v14 = vcombine.high %v1460_v29, %v1464_v25 }
 0x446   :  { %8055 = vmatprep.subr.bf16.mxu1 %v11521_v8  ;;  %v1209_v58 = vld [vmem:[#allocation7 + $0x1178] sm:$0xff]  ;;  %v11814_v8 = vcombine.low %v1452_v21, %v1456_v52 }
 0x447   :  { %v11569_v51 = vcombine.high %v1205_v0, %v1209_v58  ;;  %v11568_v17 = vcombine.low %v1205_v0, %v1209_v58  ;;  %v1508_v58 = vld [vmem:[#allocation7 + $0x1ad0] sm:$0xff] }
 0x448   :  { %7798 = vmatpush1.bf16.msra.mxu0 %v11774_v33  ;;  %v1472_v33 = vld [vmem:[#allocation7 + $0x19b0] sm:$0xff] }
 0x449   :  { %8056 = vmatpush1.bf16.msra.mxu1 %v11520_v37  ;;  %7810 = vmatprep.subr.bf16.mxu0 %v11783_v5  ;;  %v1213_v37 = vld [vmem:[#allocation7 + $0x1198] sm:$0xff]  ;;  %v11831_v39 = vcombine.high %v1468_v43, %v1472_v33  ;;  %v11830_v13 = vcombine.low %v1468_v43, %v1472_v33 }
 0x44a   :  { %8068 = vmatprep.subr.bf16.mxu1 %v11529_v2  ;;  %v1217_v5 = vld [vmem:[#allocation7 + $0x11b8] sm:$0xff]  ;;  %v11822_v2 = vcombine.low %v1460_v29, %v1464_v25 }
 0x44b   :  { %7800 = vmatmul.mubr.bf16.vlgmr.msra.gmra.mrb[4].mxu0 %v14084_v3  ;;  %v11576_v28 = vcombine.low %v1213_v37, %v1217_v5 }
 0x44c   :  { %8058 = vmatmul.mubr.bf16.vlgmr.msra.gmra.mrb[8].mxu1 %v14579_v23  ;;  %7811 = vmatpush1.bf16.msra.mxu0 %v11782_v11  ;;  %v11544_v23 = vcombine.low %v1181_v20, %v1185_v44  ;;  %v11577_v11 = vcombine.high %v1213_v37, %v1217_v5  ;;  %v1484_v44 = vld [vmem:[#allocation7 + $0x1a10] sm:$0xff] }
 0x44d   :  { %7842 = vmatprep.mubr.bf16.mxu0 %v14119_v41  ;;  %8069 = vmatpush1.bf16.msra.mxu1 %v11528_v19  ;;  %v1221_v19 = vld [vmem:[#allocation7 + $0x11d8] sm:$0xff]  ;;  %v1516_v5 = vld [vmem:[#allocation7 + $0x1b10] sm:$0xff] }
 0x44e   :  { %8100 = vmatprep.mubr.bf16.mxu1 %v14581_v31  ;;  %7812 = vmatprep.subr.bf16.mxu0 %v11791_v34  ;;  %v11806_v31 = vcombine.low %v1444_v35, %v1448_v12  ;;  %v1225_v34 = vld [vmem:[#allocation7 + $0x11f8] sm:$0xff] }
 0x44f   :  { %8070 = vmatprep.subr.bf16.mxu1 %v11537_v32  ;;  %v11839_v32 = vcombine.high %v1476_v42, %v1480_v61  ;;  %v11585_v20 = vcombine.high %v1221_v19, %v1225_v34  ;;  %v11584_v35 = vcombine.low %v1221_v19, %v1225_v34  ;;  %v1524_v34 = vld [vmem:[#allocation7 + $0x1b50] sm:$0xff] }
 0x450   :  { %7813 = vmatpush1.bf16.msra.mxu0 %v11790_v7  ;;  %v1488_v7 = vld [vmem:[#allocation7 + $0x1a30] sm:$0xff] }
 0x451   :  { %8071 = vmatpush1.bf16.msra.mxu1 %v11536_v46  ;;  %7814 = vmatprep.subr.bf16.mxu0 %v11799_v36  ;;  %v1229_v46 = vld [vmem:[#allocation7 + $0x1218] sm:$0xff]  ;;  %v11847_v12 = vcombine.high %v1484_v44, %v1488_v7 }
 0x452   :  { %8072 = vmatprep.subr.bf16.mxu1 %v11545_v60  ;;  %v1233_v36 = vld [vmem:[#allocation7 + $0x1238] sm:$0xff]  ;;  %v11838_v60 = vcombine.low %v1476_v42, %v1480_v61 }
 0x453   :  { %v11593_v55 = vcombine.high %v1229_v46, %v1233_v36  ;;  %v11592_v21 = vcombine.low %v1229_v46, %v1233_v36  ;;  %v1532_v36 = vld [vmem:[#allocation7 + $0x1b90] sm:$0xff] }
 0x454   :  { %7815 = vmatpush1.bf16.msra.mxu0 %v11798_v47  ;;  %v1496_v47 = vld [vmem:[#allocation7 + $0x1a70] sm:$0xff] }
 0x455   :  { %8073 = vmatpush1.bf16.msra.mxu1 %v11544_v23  ;;  %7816 = vmatprep.subr.bf16.mxu0 %v11807_v59  ;;  %v1237_v23 = vld [vmem:[#allocation7 + $0x1258] sm:$0xff]  ;;  %v11855_v52 = vcombine.high %v1492_v27, %v1496_v47 }
 0x456   :  { %8074 = vmatprep.subr.bf16.mxu1 %v11553_v18  ;;  %v1241_v59 = vld [vmem:[#allocation7 + $0x1278] sm:$0xff]  ;;  %v11846_v18 = vcombine.low %v1484_v44, %v1488_v7 }
 0x457   :  { %v11601_v4 = vcombine.high %v1237_v23, %v1241_v59  ;;  %v11600_v29 = vcombine.low %v1237_v23, %v1241_v59  ;;  %v1540_v59 = vld [vmem:[#allocation7 + $0x1bd0] sm:$0xff] }
 0x458   :  { %7817 = vmatpush1.bf16.msra.mxu0 %v11806_v31  ;;  %v1504_v31 = vld [vmem:[#allocation7 + $0x1ab0] sm:$0xff] }
 0x459   :  { %8075 = vmatpush1.bf16.msra.mxu1 %v11552_v53  ;;  %7818 = vmatprep.subr.bf16.mxu0 %v11815_v63  ;;  %v1245_v53 = vld [vmem:[#allocation7 + $0x1298] sm:$0xff]  ;;  %v11863_v25 = vcombine.high %v1500_v9, %v1504_v31 }
 0x45a   :  { %8076 = vmatprep.subr.bf16.mxu1 %v11561_v30  ;;  %v1249_v63 = vld [vmem:[#allocation7 + $0x12b8] sm:$0xff]  ;;  %v11854_v30 = vcombine.low %v1492_v27, %v1496_v47 }
 0x45b   :  { %v11609_v0 = vcombine.high %v1245_v53, %v1249_v63  ;;  %v11608_v43 = vcombine.low %v1245_v53, %v1249_v63  ;;  %v1548_v63 = vld [vmem:[#allocation7 + $0x1c10] sm:$0xff] }
 0x45c   :  { %7819 = vmatpush1.bf16.msra.mxu0 %v11814_v8  ;;  %v1512_v8 = vld [vmem:[#allocation7 + $0x1af0] sm:$0xff] }
 0x45d   :  { %8077 = vmatpush1.bf16.msra.mxu1 %v11560_v50  ;;  %7820 = vmatprep.subr.bf16.mxu0 %v11823_v14  ;;  %v1253_v50 = vld [vmem:[#allocation7 + $0x12d8] sm:$0xff]  ;;  %v11871_v33 = vcombine.high %v1508_v58, %v1512_v8 }
 0x45e   :  { %8078 = vmatprep.subr.bf16.mxu1 %v11569_v51  ;;  %v1257_v14 = vld [vmem:[#allocation7 + $0x12f8] sm:$0xff]  ;;  %v11862_v51 = vcombine.low %v1500_v9, %v1504_v31 }
 0x45f   :  { %v11617_v37 = vcombine.high %v1253_v50, %v1257_v14  ;;  %v11616_v42 = vcombine.low %v1253_v50, %v1257_v14  ;;  %v1556_v14 = vld [vmem:[#allocation7 + $0x1c50] sm:$0xff] }
 0x460   :  { %7821 = vmatpush1.bf16.msra.mxu0 %v11822_v2  ;;  %v1520_v2 = vld [vmem:[#allocation7 + $0x1b30] sm:$0xff] }
 0x461   :  { %8079 = vmatpush1.bf16.msra.mxu1 %v11568_v17  ;;  %7822 = vmatprep.subr.bf16.mxu0 %v11831_v39  ;;  %v1261_v17 = vld [vmem:[#allocation7 + $0x1318] sm:$0xff]  ;;  %v11879_v61 = vcombine.high %v1516_v5, %v1520_v2 }
 0x462   :  { %8080 = vmatprep.subr.bf16.mxu1 %v11577_v11  ;;  %v1265_v39 = vld [vmem:[#allocation7 + $0x1338] sm:$0xff]  ;;  %v11870_v11 = vcombine.low %v1508_v58, %v1512_v8 }
 0x463   :  { %v11625_v19 = vcombine.high %v1261_v17, %v1265_v39  ;;  %v11624_v44 = vcombine.low %v1261_v17, %v1265_v39  ;;  %v1564_v17 = vld [vmem:[#allocation7 + $0x1c90] sm:$0xff] }
 0x464   :  { %7823 = vmatpush1.bf16.msra.mxu0 %v11830_v13  ;;  %v1528_v13 = vld [vmem:[#allocation7 + $0x1b70] sm:$0xff] }
 0x465   :  { %8081 = vmatpush1.bf16.msra.mxu1 %v11576_v28  ;;  %7824 = vmatprep.subr.bf16.mxu0 %v11839_v32  ;;  %v1269_v28 = vld [vmem:[#allocation7 + $0x1358] sm:$0xff]  ;;  %v11887_v7 = vcombine.high %v1524_v34, %v1528_v13  ;;  %v1568_v39 = vld [vmem:[#allocation7 + $0x1cb0] sm:$0xff] }
 0x466   :  { %8082 = vmatprep.subr.bf16.mxu1 %v11585_v20  ;;  %v1273_v32 = vld [vmem:[#allocation7 + $0x1378] sm:$0xff]  ;;  %v11878_v20 = vcombine.low %v1516_v5, %v1520_v2 }
 0x467   :  { %v11633_v46 = vcombine.high %v1269_v28, %v1273_v32  ;;  %v11632_v27 = vcombine.low %v1269_v28, %v1273_v32  ;;  %v1572_v32 = vld [vmem:[#allocation7 + $0x1cd0] sm:$0xff] }
 0x468   :  { %7825 = vmatpush1.bf16.msra.mxu0 %v11838_v60  ;;  %v1536_v60 = vld [vmem:[#allocation7 + $0x1bb0] sm:$0xff] }
 0x469   :  { %8083 = vmatpush1.bf16.msra.mxu1 %v11584_v35  ;;  %7826 = vmatprep.subr.bf16.mxu0 %v11847_v12  ;;  %v1277_v35 = vld [vmem:[#allocation7 + $0x1398] sm:$0xff]  ;;  %v11895_v47 = vcombine.high %v1532_v36, %v1536_v60 }
 0x46a   :  { %8084 = vmatprep.subr.bf16.mxu1 %v11593_v55  ;;  %v1281_v12 = vld [vmem:[#allocation7 + $0x13b8] sm:$0xff]  ;;  %v11886_v55 = vcombine.low %v1524_v34, %v1528_v13  ;;  %v11927_v13 = vcombine.high %v1564_v17, %v1568_v39 }
 0x46b   :  { %v11641_v23 = vcombine.high %v1277_v35, %v1281_v12  ;;  %v11640_v9 = vcombine.low %v1277_v35, %v1281_v12  ;;  %v1580_v35 = vld [vmem:[#allocation7 + $0x1d10] sm:$0xff] }
 0x46c   :  { %7827 = vmatpush1.bf16.msra.mxu0 %v11846_v18  ;;  %v1544_v18 = vld [vmem:[#allocation7 + $0x1bf0] sm:$0xff] }
 0x46d   :  { %8085 = vmatpush1.bf16.msra.mxu1 %v11592_v21  ;;  %7828 = vmatprep.subr.bf16.mxu0 %v11855_v52  ;;  %v1285_v21 = vld [vmem:[#allocation7 + $0x13d8] sm:$0xff]  ;;  %v11903_v31 = vcombine.high %v1540_v59, %v1544_v18  ;;  %v1584_v12 = vld [vmem:[#allocation7 + $0x1d30] sm:$0xff] }
 0x46e   :  { %8086 = vmatprep.subr.bf16.mxu1 %v11601_v4  ;;  %v1289_v52 = vld [vmem:[#allocation7 + $0x13f8] sm:$0xff]  ;;  %v11894_v4 = vcombine.low %v1532_v36, %v1536_v60 }
 0x46f   :  { %v11649_v53 = vcombine.high %v1285_v21, %v1289_v52  ;;  %v11648_v58 = vcombine.low %v1285_v21, %v1289_v52  ;;  %v1592_v21 = vld [vmem:[#allocation7 + $0x1d70] sm:$0xff]  ;;  %v1333_v52 = vld [vmem:[#allocation7 + $0x1558] sm:$0xff] }
 0x470   :  { %7829 = vmatpush1.bf16.msra.mxu0 %v11854_v30  ;;  %v1552_v30 = vld [vmem:[#allocation7 + $0x1c30] sm:$0xff] }
 0x471   :  { %8087 = vmatpush1.bf16.msra.mxu1 %v11600_v29  ;;  %7830 = vmatprep.subr.bf16.mxu0 %v11863_v25  ;;  %v1293_v29 = vld [vmem:[#allocation7 + $0x1418] sm:$0xff]  ;;  %v11911_v8 = vcombine.high %v1548_v63, %v1552_v30 }
 0x472   :  { %8088 = vmatprep.subr.bf16.mxu1 %v11609_v0  ;;  %v1297_v25 = vld [vmem:[#allocation7 + $0x1438] sm:$0xff]  ;;  %v11902_v0 = vcombine.low %v1540_v59, %v1544_v18  ;;  %v1588_v18 = vld [vmem:[#allocation7 + $0x1d50] sm:$0xff] }
 0x473   :  { %v11657_v50 = vcombine.high %v1293_v29, %v1297_v25  ;;  %v11656_v5 = vcombine.low %v1293_v29, %v1297_v25  ;;  %v1600_v29 = vld [vmem:[#allocation7 + $0x1db0] sm:$0xff]  ;;  %v1341_v25 = vld [vmem:[#allocation7 + $0x1598] sm:$0xff] }
 0x474   :  { %7831 = vmatpush1.bf16.msra.mxu0 %v11862_v51  ;;  %v1560_v51 = vld [vmem:[#allocation7 + $0x1c70] sm:$0xff] }
 0x475   :  { %8089 = vmatpush1.bf16.msra.mxu1 %v11608_v43  ;;  %7832 = vmatprep.subr.bf16.mxu0 %v11871_v33  ;;  %v11910_v43 = vcombine.low %v1548_v63, %v1552_v30  ;;  %v1301_v33 = vld [vmem:[#allocation7 + $0x1458] sm:$0xff]  ;;  %v11919_v2 = vcombine.high %v1556_v14, %v1560_v51  ;;  %v1596_v30 = vld [vmem:[#allocation7 + $0x1d90] sm:$0xff] }
 0x476   :  { %8090 = vmatprep.subr.bf16.mxu1 %v11617_v37  ;;  %v1305_v37 = vld [vmem:[#allocation7 + $0x1478] sm:$0xff] }
 0x477   :  { %v11664_v34 = vcombine.low %v1301_v33, %v1305_v37 }
 0x478   :  { %7833 = vmatpush1.bf16.msra.mxu0 %v11870_v11  ;;  %v11665_v11 = vcombine.high %v1301_v33, %v1305_v37  ;;  %v1349_v33 = vld [vmem:[#allocation7 + $0x15d8] sm:$0xff] }
 0x479   :  { %8091 = vmatpush1.bf16.msra.mxu1 %v11616_v42  ;;  %7834 = vmatprep.subr.bf16.mxu0 %v11879_v61  ;;  %v1309_v42 = vld [vmem:[#allocation7 + $0x1498] sm:$0xff] }
 0x47a   :  { %8092 = vmatprep.subr.bf16.mxu1 %v11625_v19  ;;  %v1313_v61 = vld [vmem:[#allocation7 + $0x14b8] sm:$0xff]  ;;  %v11918_v19 = vcombine.low %v1556_v14, %v1560_v51  ;;  %v1604_v51 = vld [vmem:[#allocation7 + $0x1dd0] sm:$0xff] }
 0x47b   :  { %v11673_v28 = vcombine.high %v1309_v42, %v1313_v61  ;;  %v1353_v37 = vld [vmem:[#allocation7 + $0x15f8] sm:$0xff] }
 0x47c   :  { %7835 = vmatpush1.bf16.msra.mxu0 %v11878_v20  ;;  %v1576_v20 = vld [vmem:[#allocation7 + $0x1cf0] sm:$0xff] }
 0x47d   :  { %8093 = vmatpush1.bf16.msra.mxu1 %v11624_v44  ;;  %7836 = vmatprep.subr.bf16.mxu0 %v11887_v7  ;;  %v1317_v44 = vld [vmem:[#allocation7 + $0x14d8] sm:$0xff]  ;;  %v11935_v36 = vcombine.high %v1572_v32, %v1576_v20 }
 0x47e   :  { %8094 = vmatprep.subr.bf16.mxu1 %v11633_v46  ;;  %v1321_v7 = vld [vmem:[#allocation7 + $0x14f8] sm:$0xff]  ;;  %v11926_v46 = vcombine.low %v1564_v17, %v1568_v39  ;;  %v11713_v39 = vcombine.high %v1349_v33, %v1353_v37 }
 0x47f   :  { %v11681_v60 = vcombine.high %v1317_v44, %v1321_v7 }
 0x480   :  { %7837 = vmatpush1.bf16.msra.mxu0 %v11886_v55  ;;  %v1325_v55 = vld [vmem:[#allocation7 + $0x1518] sm:$0xff] }
 0x481   :  { %8095 = vmatpush1.bf16.msra.mxu1 %v11632_v27  ;;  %7838 = vmatprep.subr.bf16.mxu0 %v11895_v47  ;;  %v1329_v27 = vld [vmem:[#allocation7 + $0x1538] sm:$0xff]  ;;  %v11680_v47 = vcombine.low %v1317_v44, %v1321_v7  ;;  %v1624_v44 = vld [vmem:[#allocation7 + $0x1e70] sm:$0xff] }
 0x482   :  { %8096 = vmatprep.subr.bf16.mxu1 %v11641_v23  ;;  %v11943_v23 = vcombine.high %v1580_v35, %v1584_v12  ;;  %v11689_v59 = vcombine.high %v1325_v55, %v1329_v27  ;;  %v1365_v7 = vld [vmem:[#allocation7 + $0x1658] sm:$0xff] }
 0x484   :  { %7839 = vmatpush1.bf16.msra.mxu0 %v11894_v4  ;;  %v1337_v4 = vld [vmem:[#allocation7 + $0x1578] sm:$0xff] }
 0x485   :  { %8097 = vmatpush1.bf16.msra.mxu1 %v11640_v9  ;;  %7840 = vmatprep.subr.bf16.mxu0 %v11903_v31  ;;  %v11942_v9 = vcombine.low %v1580_v35, %v1584_v12  ;;  %v11688_v31 = vcombine.low %v1325_v55, %v1329_v27  ;;  %v11697_v63 = vcombine.high %v1333_v52, %v1337_v4  ;;  %v1628_v12 = vld [vmem:[#allocation7 + $0x1e90] sm:$0xff]  ;;  %v1373_v27 = vld [vmem:[#allocation7 + $0x1698] sm:$0xff] }
 0x486   :  { %8098 = vmatprep.subr.bf16.mxu1 %v11649_v53  ;;  %v11951_v53 = vcombine.high %v1588_v18, %v1592_v21  ;;  %v1632_v55 = vld [vmem:[#allocation7 + $0x1eb0] sm:$0xff] }
 0x488   :  { %7841 = vmatpush1.bf16.msra.mxu0 %v11902_v0  ;;  %v1345_v0 = vld [vmem:[#allocation7 + $0x15b8] sm:$0xff] }
 0x489   :  { %8099 = vmatpush1.bf16.msra.mxu1 %v11648_v58  ;;  %7853 = vmatprep.subr.bf16.mxu0 %v11911_v8  ;;  %v11950_v58 = vcombine.low %v1588_v18, %v1592_v21  ;;  %v11696_v8 = vcombine.low %v1333_v52, %v1337_v4  ;;  %v11705_v14 = vcombine.high %v1341_v25, %v1345_v0  ;;  %v1636_v21 = vld [vmem:[#allocation7 + $0x1ed0] sm:$0xff]  ;;  %v1381_v4 = vld [vmem:[#allocation7 + $0x16d8] sm:$0xff] }
 0x48a   :  { %8111 = vmatprep.subr.bf16.mxu1 %v11657_v50  ;;  %v11959_v50 = vcombine.high %v1596_v30, %v1600_v29  ;;  %v1640_v52 = vld [vmem:[#allocation7 + $0x1ef0] sm:$0xff] }
 0x48b   :  { %7843 = vmatmul.mubr.bf16.vlgmr.msra.gmra.mrb[4].mxu0 %v14135_v26 }
 0x48c   :  { %8101 = vmatmul.mubr.bf16.vlgmr.msra.gmra.mrb[8].mxu1 %v14022_v38  ;;  %7854 = vmatpush1.bf16.msra.mxu0 %v11910_v43  ;;  %v11672_v38 = vcombine.low %v1309_v42, %v1313_v61  ;;  %v1608_v43 = vld [vmem:[#allocation7 + $0x1df0] sm:$0xff]  ;;  %v1357_v61 = vld [vmem:[#allocation7 + $0x1618] sm:$0xff] }
 0x48d   :  { %7885 = vmatprep.mubr.bf16.mxu0 %v14142_v15  ;;  %8112 = vmatpush1.bf16.msra.mxu1 %v11656_v5  ;;  %v11958_v5 = vcombine.low %v1596_v30, %v1600_v29  ;;  %v11967_v17 = vcombine.high %v1604_v51, %v1608_v43  ;;  %v1616_v42 = vld [vmem:[#allocation7 + $0x1e30] sm:$0xff] }
 0x48e   :  { %8143 = vmatprep.mubr.bf16.mxu1 %v14064_v56  ;;  %7855 = vmatprep.subr.bf16.mxu0 %v11919_v2  ;;  %v11934_v56 = vcombine.low %v1572_v32, %v1576_v20  ;;  %v11704_v2 = vcombine.low %v1341_v25, %v1345_v0  ;;  %v1620_v20 = vld [vmem:[#allocation7 + $0x1e50] sm:$0xff]  ;;  %v1389_v0 = vld [vmem:[#allocation7 + $0x1718] sm:$0xff] }
 0x48f   :  { %8113 = vmatprep.subr.bf16.mxu1 %v11665_v11  ;;  %v1612_v11 = vld [vmem:[#allocation7 + $0x1e10] sm:$0xff] }
 0x490   :  { %7856 = vmatpush1.bf16.msra.mxu0 %v11918_v19  ;;  %v1361_v19 = vld [vmem:[#allocation7 + $0x1638] sm:$0xff]  ;;  %v1644_v29 = vld [vmem:[#allocation7 + $0x1f10] sm:$0xff] }
 0x491   :  { %8114 = vmatpush1.bf16.msra.mxu1 %v11664_v34  ;;  %7857 = vmatprep.subr.bf16.mxu0 %v11927_v13  ;;  %v11966_v34 = vcombine.low %v1604_v51, %v1608_v43  ;;  %v11712_v13 = vcombine.low %v1349_v33, %v1353_v37  ;;  %v11721_v32 = vcombine.high %v1357_v61, %v1361_v19  ;;  %v1648_v25 = vld [vmem:[#allocation7 + $0x1f30] sm:$0xff]  ;;  %v1397_v37 = vld [vmem:[#allocation7 + $0x1758] sm:$0xff] }
 0x492   :  { %8115 = vmatprep.subr.bf16.mxu1 %v11673_v28  ;;  %v11975_v28 = vcombine.high %v1612_v11, %v1616_v42  ;;  %v1652_v43 = vld [vmem:[#allocation7 + $0x1f50] sm:$0xff] }
 0x493   :  { %v1656_v33 = vld [vmem:[#allocation7 + $0x1f70] sm:$0xff] }
 0x494   :  { %7858 = vmatpush1.bf16.msra.mxu0 %v11926_v46  ;;  %v1369_v46 = vld [vmem:[#allocation7 + $0x1678] sm:$0xff] }
 0x495   :  { %8116 = vmatpush1.bf16.msra.mxu1 %v11672_v38  ;;  %7859 = vmatprep.subr.bf16.mxu0 %v11935_v36  ;;  %v11974_v38 = vcombine.low %v1612_v11, %v1616_v42  ;;  %v11720_v36 = vcombine.low %v1357_v61, %v1361_v19  ;;  %v11729_v35 = vcombine.high %v1365_v7, %v1369_v46  ;;  %v1660_v42 = vld [vmem:[#allocation7 + $0x1f90] sm:$0xff]  ;;  %v1405_v19 = vld [vmem:[#allocation7 + $0x1798] sm:$0xff] }
 0x496   :  { %8117 = vmatprep.subr.bf16.mxu1 %v11681_v60  ;;  %v11983_v60 = vcombine.high %v1620_v20, %v1624_v44  ;;  %v1664_v61 = vld [vmem:[#allocation7 + $0x1fb0] sm:$0xff] }
 0x498   :  { %7860 = vmatpush1.bf16.msra.mxu0 %v11934_v56  ;;  %v1377_v56 = vld [vmem:[#allocation7 + $0x16b8] sm:$0xff] }
 0x499   :  { %8118 = vmatpush1.bf16.msra.mxu1 %v11680_v47  ;;  %7861 = vmatprep.subr.bf16.mxu0 %v11943_v23  ;;  %v11982_v47 = vcombine.low %v1620_v20, %v1624_v44  ;;  %v11728_v23 = vcombine.low %v1365_v7, %v1369_v46  ;;  %v11737_v18 = vcombine.high %v1373_v27, %v1377_v56  ;;  %v1668_v44 = vld [vmem:[#allocation7 + $0x1fd0] sm:$0xff]  ;;  %v1413_v46 = vld [vmem:[#allocation7 + $0x17d8] sm:$0xff] }
 0x49a   :  { %8119 = vmatprep.subr.bf16.mxu1 %v11689_v59  ;;  %v11991_v59 = vcombine.high %v1628_v12, %v1632_v55  ;;  %v1672_v7 = vld [vmem:[#allocation7 + $0x1ff0] sm:$0xff] }
 0x49c   :  { %7862 = vmatpush1.bf16.msra.mxu0 %v11942_v9  ;;  %v1385_v9 = vld [vmem:[#allocation7 + $0x16f8] sm:$0xff] }
 0x49d   :  { %8120 = vmatpush1.bf16.msra.mxu1 %v11688_v31  ;;  %7863 = vmatprep.subr.bf16.mxu0 %v11951_v53  ;;  %v11990_v31 = vcombine.low %v1628_v12, %v1632_v55  ;;  %v11736_v53 = vcombine.low %v1373_v27, %v1377_v56  ;;  %v11745_v30 = vcombine.high %v1381_v4, %v1385_v9  ;;  %v1421_v55 = vld [vmem:[#allocation7 + $0x1818] sm:$0xff] }
 0x49e   :  { %8121 = vmatprep.subr.bf16.mxu1 %v11697_v63  ;;  %v11999_v63 = vcombine.high %v1636_v21, %v1640_v52  ;;  %v1425_v27 = vld [vmem:[#allocation7 + $0x1838] sm:$0xff]  ;;  %v12030_v56 = vcombine.low %v1668_v44, %v1672_v7 }
 0x4a0   :  { %7864 = vmatpush1.bf16.msra.mxu0 %v11950_v58  ;;  %v1393_v58 = vld [vmem:[#allocation7 + $0x1738] sm:$0xff] }
 0x4a1   :  { %8122 = vmatpush1.bf16.msra.mxu1 %v11696_v8  ;;  %7865 = vmatprep.subr.bf16.mxu0 %v11959_v50  ;;  %v11998_v8 = vcombine.low %v1636_v21, %v1640_v52  ;;  %v11744_v50 = vcombine.low %v1381_v4, %v1385_v9  ;;  %v11753_v51 = vcombine.high %v1389_v0, %v1393_v58  ;;  %v1433_v21 = vld [vmem:[#allocation7 + $0x1878] sm:$0xff] }
 0x4a2   :  { %8123 = vmatprep.subr.bf16.mxu1 %v11705_v14  ;;  %v12007_v14 = vcombine.high %v1644_v29, %v1648_v25  ;;  %v12550_v52 = vld [vmem:[#allocation11] ss:$16 sps:$4 sm:$0xff]   ;;  %v11784_v4 = vcombine.low %v1421_v55, %v1425_v27 }
 0x4a4   :  { %7866 = vmatpush1.bf16.msra.mxu0 %v11958_v5  ;;  %v1401_v5 = vld [vmem:[#allocation7 + $0x1778] sm:$0xff] }
 0x4a5   :  { %8124 = vmatpush1.bf16.msra.mxu1 %v11704_v2  ;;  %7867 = vmatprep.subr.bf16.mxu0 %v11967_v17  ;;  %v12006_v2 = vcombine.low %v1644_v29, %v1648_v25  ;;  %v11752_v17 = vcombine.low %v1389_v0, %v1393_v58  ;;  %v11761_v11 = vcombine.high %v1397_v37, %v1401_v5  ;;  %v12553_v29 = vld [vmem:[#allocation11 + $0x20] ss:$16 sps:$4 sm:$0xff]   ;;  %v12558_v0 = vld [vmem:[#allocation11 + $0x44] ss:$16 sps:$4 sm:$0xff]  }
 0x4a6   :  { %8125 = vmatprep.subr.bf16.mxu1 %v11713_v39  ;;  %v12015_v39 = vcombine.high %v1652_v43, %v1656_v33 }
 0x4a8   :  { %7868 = vmatpush1.bf16.msra.mxu0 %v11966_v34  ;;  %v1409_v34 = vld [vmem:[#allocation7 + $0x17b8] sm:$0xff] }
 0x4a9   :  { %8126 = vmatpush1.bf16.msra.mxu1 %v11712_v13  ;;  %7869 = vmatprep.subr.bf16.mxu0 %v11975_v28  ;;  %v12014_v13 = vcombine.low %v1652_v43, %v1656_v33  ;;  %v11760_v28 = vcombine.low %v1397_v37, %v1401_v5  ;;  %v11769_v20 = vcombine.high %v1405_v19, %v1409_v34  ;;  %v1453_v33 = vld [vmem:[#allocation7 + $0x1918] sm:$0xff] }
 0x4aa   :  { %8127 = vmatprep.subr.bf16.mxu1 %v11721_v32  ;;  %v12023_v32 = vcombine.high %v1660_v42, %v1664_v61  ;;  %v1457_v37 = vld [vmem:[#allocation7 + $0x1938] sm:$0xff] }
 0x4ac   :  { %7870 = vmatpush1.bf16.msra.mxu0 %v11974_v38  ;;  %v1417_v38 = vld [vmem:[#allocation7 + $0x17f8] sm:$0xff] }
 0x4ad   :  { %8128 = vmatpush1.bf16.msra.mxu1 %v11720_v36  ;;  %7871 = vmatprep.subr.bf16.mxu0 %v11983_v60  ;;  %v12022_v36 = vcombine.low %v1660_v42, %v1664_v61  ;;  %v11768_v60 = vcombine.low %v1405_v19, %v1409_v34  ;;  %v11777_v12 = vcombine.high %v1413_v46, %v1417_v38  ;;  %v12562_v42 = vld [vmem:[#allocation11 + $0x80] ss:$16 sps:$4 sm:$0xff]   ;;  %v12567_v19 = vld [vmem:[#allocation11 + $0xa4] ss:$16 sps:$4 sm:$0xff]  }
 0x4ae   :  { %8129 = vmatprep.subr.bf16.mxu1 %v11729_v35  ;;  %v12031_v35 = vcombine.high %v1668_v44, %v1672_v7  ;;  %v11816_v61 = vcombine.low %v1453_v33, %v1457_v37  ;;  %v12570_v44 = vld [vmem:[#allocation11 + $0xc4] ss:$16 sps:$4 sm:$0xff]  }
 0x4b0   :  { %7872 = vmatpush1.bf16.msra.mxu0 %v11982_v47  ;;  %v11776_v47 = vcombine.low %v1413_v46, %v1417_v38  ;;  %v1477_v46 = vld [vmem:[#allocation7 + $0x19d8] sm:$0xff] }
 0x4b1   :  { %8130 = vmatpush1.bf16.msra.mxu1 %v11728_v23  ;;  %7873 = vmatprep.subr.bf16.mxu0 %v11991_v59  ;;  %v12552_v23 = vld [vmem:[#allocation11 + $0x4] ss:$16 sps:$4 sm:$0xff]   ;;  %v11785_v59 = vcombine.high %v1421_v55, %v1425_v27 }
 0x4b2   :  { %8131 = vmatprep.subr.bf16.mxu1 %v11737_v18  ;;  %v1429_v18 = vld [vmem:[#allocation7 + $0x1858] sm:$0xff] }
 0x4b3   :  { %v11793_v9 = vcombine.high %v1429_v18, %v1433_v21  ;;  %v11792_v25 = vcombine.low %v1429_v18, %v1433_v21  ;;  %v1481_v38 = vld [vmem:[#allocation7 + $0x19f8] sm:$0xff] }
 0x4b4   :  { %7874 = vmatpush1.bf16.msra.mxu0 %v11990_v31  ;;  %v14588_v31 = vld [vmem:[#allocation34_spill] sm:$0xff] }
 0x4b5   :  { %8132 = vmatpush1.bf16.msra.mxu1 %v11736_v53  ;;  %7875 = vmatprep.subr.bf16.mxu0 %v11999_v63  ;;  %v12555_v53 = vld [vmem:[#allocation11 + $0x24] ss:$16 sps:$4 sm:$0xff]  }
 0x4b6   :  { %8133 = vmatprep.subr.bf16.mxu1 %v11745_v30  ;;  %v1437_v63 = vld [vmem:[#allocation7 + $0x1898] sm:$0xff] }
 0x4b7   :  { %v1441_v30 = vld [vmem:[#allocation7 + $0x18b8] sm:$0xff] }
 0x4b8   :  { %7876 = vmatpush1.bf16.msra.mxu0 %v11998_v8  ;;  %v11801_v58 = vcombine.high %v1437_v63, %v1441_v30  ;;  %v1445_v8 = vld [vmem:[#allocation7 + $0x18d8] sm:$0xff] }
 0x4b9   :  { %8134 = vmatpush1.bf16.msra.mxu1 %v11744_v50  ;;  %7877 = vmatprep.subr.bf16.mxu0 %v12007_v14  ;;  %v1449_v50 = vld [vmem:[#allocation7 + $0x18f8] sm:$0xff] }
 0x4ba   :  { %8135 = vmatprep.subr.bf16.mxu1 %v11753_v51  ;;  %v12556_v14 = vld [vmem:[#allocation11 + $0x40] ss:$16 sps:$4 sm:$0xff]   ;;  %v11800_v51 = vcombine.low %v1437_v63, %v1441_v30  ;;  %v11809_v43 = vcombine.high %v1445_v8, %v1449_v50  ;;  %v11808_v5 = vcombine.low %v1445_v8, %v1449_v50 }
 0x4bb   :  { %v1485_v55 = vld [vmem:[#allocation7 + $0x1a18] sm:$0xff] }
 0x4bc   :  { %7878 = vmatpush1.bf16.msra.mxu0 %v12006_v2  ;;  %v12564_v2 = vld [vmem:[#allocation11 + $0x84] ss:$16 sps:$4 sm:$0xff]  }
 0x4bd   :  { %8136 = vmatpush1.bf16.msra.mxu1 %v11752_v17  ;;  %7879 = vmatprep.subr.bf16.mxu0 %v12015_v39  ;;  %v11817_v17 = vcombine.high %v1453_v33, %v1457_v37  ;;  %v1461_v39 = vld [vmem:[#allocation7 + $0x1958] sm:$0xff] }
 0x4be   :  { %8137 = vmatprep.subr.bf16.mxu1 %v11761_v11  ;;  %v1465_v11 = vld [vmem:[#allocation7 + $0x1978] sm:$0xff] }
 0x4bf   :  { %v11825_v34 = vcombine.high %v1461_v39, %v1465_v11  ;;  %v1489_v27 = vld [vmem:[#allocation7 + $0x1a38] sm:$0xff] }
 0x4c0   :  { %7880 = vmatpush1.bf16.msra.mxu0 %v12014_v13  ;;  %v1469_v13 = vld [vmem:[#allocation7 + $0x1998] sm:$0xff] }
 0x4c1   :  { %8138 = vmatpush1.bf16.msra.mxu1 %v11760_v28  ;;  %7881 = vmatprep.subr.bf16.mxu0 %v12023_v32  ;;  %v1473_v28 = vld [vmem:[#allocation7 + $0x19b8] sm:$0xff] }
 0x4c2   :  { %8139 = vmatprep.subr.bf16.mxu1 %v11769_v20  ;;  %v12565_v32 = vld [vmem:[#allocation11 + $0xa0] ss:$16 sps:$4 sm:$0xff]   ;;  %v11824_v20 = vcombine.low %v1461_v39, %v1465_v11  ;;  %v11833_v7 = vcombine.high %v1469_v13, %v1473_v28 }
 0x4c3   :  { %v1493_v18 = vld [vmem:[#allocation7 + $0x1a58] sm:$0xff] }
 0x4c4   :  { %7882 = vmatpush1.bf16.msra.mxu0 %v12022_v36  ;;  %v12568_v36 = vld [vmem:[#allocation11 + $0xc0] ss:$16 sps:$4 sm:$0xff]  }
 0x4c5   :  { %8140 = vmatpush1.bf16.msra.mxu1 %v11768_v60  ;;  %7883 = vmatprep.subr.bf16.mxu0 %v12031_v35  ;;  %v11832_v60 = vcombine.low %v1469_v13, %v1473_v28  ;;  %v12573_v35 = vld [vmem:[#allocation11 + $0xe4] ss:$16 sps:$4 sm:$0xff]  }
 0x4c6   :  { %8141 = vmatprep.subr.bf16.mxu1 %v11777_v12  ;;  %v11841_v12 = vcombine.high %v1477_v46, %v1481_v38  ;;  %v1497_v21 = vld [vmem:[#allocation7 + $0x1a78] sm:$0xff] }
 0x4c7   :  { %v1501_v63 = vld [vmem:[#allocation7 + $0x1a98] sm:$0xff] }
 0x4c8   :  { %7884 = vmatpush1.bf16.msra.mxu0 %v12030_v56  ;;  %v12571_v56 = vld [vmem:[#allocation11 + $0xe0] ss:$16 sps:$4 sm:$0xff]  }
 0x4c9   :  { %8142 = vmatpush1.bf16.msra.mxu1 %v11776_v47  ;;  %10129 = vmatprep.subr.bf16.mxu0 %v12552_v23  ;;  %v11840_v47 = vcombine.low %v1477_v46, %v1481_v38  ;;  %v12576_v23 = vld [vmem:[#allocation11 + $0x104] ss:$16 sps:$4 sm:$0xff]  }
 0x4ca   :  { %8154 = vmatprep.subr.bf16.mxu1 %v11785_v59  ;;  %v11849_v59 = vcombine.high %v1485_v55, %v1489_v27  ;;  %v1505_v30 = vld [vmem:[#allocation7 + $0x1ab8] sm:$0xff] }
 0x4cb   :  { %7886 = vmatmul.mubr.bf16.vlgmr.msra.gmra.mrb[4].mxu0 %v14588_v31  ;;  %v1509_v8 = vld [vmem:[#allocation7 + $0x1ad8] sm:$0xff] }
 0x4cc   :  { %8144 = vmatmul.mubr.bf16.vlgmr.msra.gmra.mrb[8].mxu1 %v14084_v3  ;;  %10130 = vmatpush1.bf16.msra.mxu0 %v12550_v52  ;;  %v12561_v3 = vld [vmem:[#allocation11 + $0x64] ss:$16 sps:$4 sm:$0xff]   ;;  %v12574_v52 = vld [vmem:[#allocation11 + $0x100] ss:$16 sps:$4 sm:$0xff]  }
 0x4cd   :  { %8155 = vmatpush1.bf16.msra.mxu1 %v11784_v4  ;;  %8186 = vmatprep.mubr.bf16.mxu1 %v14119_v41  ;;  %v12559_v41 = vld [vmem:[#allocation11 + $0x60] ss:$16 sps:$4 sm:$0xff]   ;;  %v11848_v4 = vcombine.low %v1485_v55, %v1489_v27 }
 0x4ce   :  { %10161 = vmatprep.mubr.bf16.mxu0 %v14274_v24  ;;  %8156 = vmatprep.subr.bf16.mxu1 %v11793_v9  ;;  %v12579_v9 = vld [vmem:[#allocation11 + $0x124] ss:$16 sps:$4 sm:$0xff]  }
 0x4cf   :  { %10131 = vmatprep.subr.bf16.mxu0 %v12555_v53  ;;  %v11857_v53 = vcombine.high %v1493_v18, %v1497_v21  ;;  %v1513_v50 = vld [vmem:[#allocation7 + $0x1af8] sm:$0xff] }
 0x4d0   :  { %10132 = vmatpush1.bf16.msra.mxu0 %v12553_v29  ;;  %v12577_v29 = vld [vmem:[#allocation11 + $0x120] ss:$16 sps:$4 sm:$0xff]  }
 0x4d1   :  { %8157 = vmatpush1.bf16.msra.mxu1 %v11792_v25  ;;  %10133 = vmatprep.subr.bf16.mxu0 %v12558_v0  ;;  %v11856_v25 = vcombine.low %v1493_v18, %v1497_v21  ;;  %v12582_v0 = vld [vmem:[#allocation11 + $0x144] ss:$16 sps:$4 sm:$0xff]  }
 0x4d2   :  { %8158 = vmatprep.subr.bf16.mxu1 %v11801_v58  ;;  %v11865_v58 = vcombine.high %v1501_v63, %v1505_v30  ;;  %v1517_v33 = vld [vmem:[#allocation7 + $0x1b18] sm:$0xff] }
 0x4d3   :  { %v1521_v37 = vld [vmem:[#allocation7 + $0x1b38] sm:$0xff] }
 0x4d4   :  { %10134 = vmatpush1.bf16.msra.mxu0 %v12556_v14  ;;  %v12580_v14 = vld [vmem:[#allocation11 + $0x140] ss:$16 sps:$4 sm:$0xff]  }
 0x4d5   :  { %8159 = vmatpush1.bf16.msra.mxu1 %v11800_v51  ;;  %10135 = vmatprep.subr.bf16.mxu0 %v12561_v3  ;;  %v11864_v51 = vcombine.low %v1501_v63, %v1505_v30  ;;  %v12585_v3 = vld [vmem:[#allocation11 + $0x164] ss:$16 sps:$4 sm:$0xff]  }
 0x4d6   :  { %8160 = vmatprep.subr.bf16.mxu1 %v11809_v43  ;;  %v11873_v43 = vcombine.high %v1509_v8, %v1513_v50  ;;  %v1525_v39 = vld [vmem:[#allocation7 + $0x1b58] sm:$0xff] }
 0x4d7   :  { %v1529_v11 = vld [vmem:[#allocation7 + $0x1b78] sm:$0xff] }
 0x4d8   :  { %10136 = vmatpush1.bf16.msra.mxu0 %v12559_v41  ;;  %v12583_v41 = vld [vmem:[#allocation11 + $0x160] ss:$16 sps:$4 sm:$0xff]  }
 0x4d9   :  { %8161 = vmatpush1.bf16.msra.mxu1 %v11808_v5  ;;  %10137 = vmatprep.subr.bf16.mxu0 %v12564_v2  ;;  %v11872_v5 = vcombine.low %v1509_v8, %v1513_v50  ;;  %v12588_v2 = vld [vmem:[#allocation11 + $0x184] ss:$16 sps:$4 sm:$0xff]  }
 0x4da   :  { %8162 = vmatprep.subr.bf16.mxu1 %v11817_v17  ;;  %v11881_v17 = vcombine.high %v1517_v33, %v1521_v37  ;;  %v1533_v13 = vld [vmem:[#allocation7 + $0x1b98] sm:$0xff] }
 0x4db   :  { %v1537_v28 = vld [vmem:[#allocation7 + $0x1bb8] sm:$0xff] }
 0x4dc   :  { %10138 = vmatpush1.bf16.msra.mxu0 %v12562_v42  ;;  %v12586_v42 = vld [vmem:[#allocation11 + $0x180] ss:$16 sps:$4 sm:$0xff]  }
 0x4dd   :  { %8163 = vmatpush1.bf16.msra.mxu1 %v11816_v61  ;;  %10139 = vmatprep.subr.bf16.mxu0 %v12567_v19  ;;  %v11880_v61 = vcombine.low %v1517_v33, %v1521_v37  ;;  %v12591_v19 = vld [vmem:[#allocation11 + $0x1a4] ss:$16 sps:$4 sm:$0xff]  }
 0x4de   :  { %8164 = vmatprep.subr.bf16.mxu1 %v11825_v34  ;;  %v11889_v34 = vcombine.high %v1525_v39, %v1529_v11  ;;  %v1541_v46 = vld [vmem:[#allocation7 + $0x1bd8] sm:$0xff] }
 0x4df   :  { %v1545_v38 = vld [vmem:[#allocation7 + $0x1bf8] sm:$0xff] }
 0x4e0   :  { %10140 = vmatpush1.bf16.msra.mxu0 %v12565_v32  ;;  %v12589_v32 = vld [vmem:[#allocation11 + $0x1a0] ss:$16 sps:$4 sm:$0xff]  }
 0x4e1   :  { %8165 = vmatpush1.bf16.msra.mxu1 %v11824_v20  ;;  %10141 = vmatprep.subr.bf16.mxu0 %v12570_v44  ;;  %v11888_v20 = vcombine.low %v1525_v39, %v1529_v11  ;;  %v12594_v44 = vld [vmem:[#allocation11 + $0x1c4] ss:$16 sps:$4 sm:$0xff]   ;;  %v12610_v39 = vld [vmem:[#allocation11 + $0x280] ss:$16 sps:$4 sm:$0xff]  }
 0x4e2   :  { %8166 = vmatprep.subr.bf16.mxu1 %v11833_v7  ;;  %v11897_v7 = vcombine.high %v1533_v13, %v1537_v28  ;;  %v1549_v55 = vld [vmem:[#allocation7 + $0x1c18] sm:$0xff] }
 0x4e3   :  { %v1553_v27 = vld [vmem:[#allocation7 + $0x1c38] sm:$0xff] }
 0x4e4   :  { %10142 = vmatpush1.bf16.msra.mxu0 %v12568_v36  ;;  %v12592_v36 = vld [vmem:[#allocation11 + $0x1c0] ss:$16 sps:$4 sm:$0xff]  }
 0x4e5   :  { %8167 = vmatpush1.bf16.msra.mxu1 %v11832_v60  ;;  %10143 = vmatprep.subr.bf16.mxu0 %v12573_v35  ;;  %v11896_v60 = vcombine.low %v1533_v13, %v1537_v28  ;;  %v12597_v35 = vld [vmem:[#allocation11 + $0x1e4] ss:$16 sps:$4 sm:$0xff]   ;;  %v12613_v13 = vld [vmem:[#allocation11 + $0x2a0] ss:$16 sps:$4 sm:$0xff]  }
 0x4e6   :  { %8168 = vmatprep.subr.bf16.mxu1 %v11841_v12  ;;  %v11905_v12 = vcombine.high %v1541_v46, %v1545_v38  ;;  %v1557_v18 = vld [vmem:[#allocation7 + $0x1c58] sm:$0xff] }
 0x4e7   :  { %v1561_v21 = vld [vmem:[#allocation7 + $0x1c78] sm:$0xff] }
 0x4e8   :  { %10144 = vmatpush1.bf16.msra.mxu0 %v12571_v56  ;;  %v12595_v56 = vld [vmem:[#allocation11 + $0x1e0] ss:$16 sps:$4 sm:$0xff]  }
 0x4e9   :  { %8169 = vmatpush1.bf16.msra.mxu1 %v11840_v47  ;;  %10145 = vmatprep.subr.bf16.mxu0 %v12576_v23  ;;  %v11904_v47 = vcombine.low %v1541_v46, %v1545_v38  ;;  %v12600_v23 = vld [vmem:[#allocation11 + $0x204] ss:$16 sps:$4 sm:$0xff]   ;;  %v12616_v46 = vld [vmem:[#allocation11 + $0x2c0] ss:$16 sps:$4 sm:$0xff]  }
 0x4ea   :  { %8170 = vmatprep.subr.bf16.mxu1 %v11849_v59  ;;  %v11913_v59 = vcombine.high %v1549_v55, %v1553_v27  ;;  %v1565_v63 = vld [vmem:[#allocation7 + $0x1c98] sm:$0xff] }
 0x4eb   :  { %v1569_v30 = vld [vmem:[#allocation7 + $0x1cb8] sm:$0xff] }
 0x4ec   :  { %10146 = vmatpush1.bf16.msra.mxu0 %v12574_v52  ;;  %v12598_v52 = vld [vmem:[#allocation11 + $0x200] ss:$16 sps:$4 sm:$0xff]  }
 0x4ed   :  { %8171 = vmatpush1.bf16.msra.mxu1 %v11848_v4  ;;  %10147 = vmatprep.subr.bf16.mxu0 %v12579_v9  ;;  %v11912_v4 = vcombine.low %v1549_v55, %v1553_v27  ;;  %v11921_v9 = vcombine.high %v1557_v18, %v1561_v21  ;;  %v1573_v8 = vld [vmem:[#allocation7 + $0x1cd8] sm:$0xff] }
 0x4ee   :  { %8172 = vmatprep.subr.bf16.mxu1 %v11857_v53  ;;  %v12603_v53 = vld [vmem:[#allocation11 + $0x224] ss:$16 sps:$4 sm:$0xff]   ;;  %v12619_v55 = vld [vmem:[#allocation11 + $0x2e0] ss:$16 sps:$4 sm:$0xff]  }
 0x4ef   :  { %v1577_v50 = vld [vmem:[#allocation7 + $0x1cf8] sm:$0xff] }
 0x4f0   :  { %10148 = vmatpush1.bf16.msra.mxu0 %v12577_v29  ;;  %v12601_v29 = vld [vmem:[#allocation11 + $0x220] ss:$16 sps:$4 sm:$0xff]   ;;  %v11936_v37 = vcombine.low %v1573_v8, %v1577_v50 }
 0x4f1   :  { %8173 = vmatpush1.bf16.msra.mxu1 %v11856_v25  ;;  %10149 = vmatprep.subr.bf16.mxu0 %v12582_v0  ;;  %v11920_v25 = vcombine.low %v1557_v18, %v1561_v21  ;;  %v12606_v0 = vld [vmem:[#allocation11 + $0x244] ss:$16 sps:$4 sm:$0xff]   ;;  %v12622_v18 = vld [vmem:[#allocation11 + $0x300] ss:$16 sps:$4 sm:$0xff]  }
 0x4f2   :  { %8174 = vmatprep.subr.bf16.mxu1 %v11865_v58  ;;  %v11929_v58 = vcombine.high %v1565_v63, %v1569_v30  ;;  %v1585_v33 = vld [vmem:[#allocation7 + $0x1d38] sm:$0xff] }
 0x4f4   :  { %10150 = vmatpush1.bf16.msra.mxu0 %v12580_v14  ;;  %v12604_v14 = vld [vmem:[#allocation11 + $0x240] ss:$16 sps:$4 sm:$0xff]  }
 0x4f5   :  { %8175 = vmatpush1.bf16.msra.mxu1 %v11864_v51  ;;  %10151 = vmatprep.subr.bf16.mxu0 %v12585_v3  ;;  %v11928_v51 = vcombine.low %v1565_v63, %v1569_v30  ;;  %v11937_v3 = vcombine.high %v1573_v8, %v1577_v50  ;;  %v12625_v63 = vld [vmem:[#allocation11 + $0x320] ss:$16 sps:$4 sm:$0xff]  }
 0x4f6   :  { %8176 = vmatprep.subr.bf16.mxu1 %v11873_v43  ;;  %v1581_v43 = vld [vmem:[#allocation7 + $0x1d18] sm:$0xff] }
 0x4f7   :  { %v11944_v11 = vcombine.low %v1581_v43, %v1585_v33  ;;  %v12628_v8 = vld [vmem:[#allocation11 + $0x340] ss:$16 sps:$4 sm:$0xff]  }
 0x4f8   :  { %10152 = vmatpush1.bf16.msra.mxu0 %v12583_v41  ;;  %v12612_v41 = vld [vmem:[#allocation11 + $0x284] ss:$16 sps:$4 sm:$0xff]  }
 0x4f9   :  { %8177 = vmatpush1.bf16.msra.mxu1 %v11872_v5  ;;  %10153 = vmatprep.subr.bf16.mxu0 %v12588_v2  ;;  %v11945_v5 = vcombine.high %v1581_v43, %v1585_v33  ;;  %v1589_v2 = vld [vmem:[#allocation7 + $0x1d58] sm:$0xff] }
 0x4fa   :  { %8178 = vmatprep.subr.bf16.mxu1 %v11881_v17  ;;  %v1593_v17 = vld [vmem:[#allocation7 + $0x1d78] sm:$0xff] }
 0x4fb   :  { %v11952_v28 = vcombine.low %v1589_v2, %v1593_v17  ;;  %v12631_v43 = vld [vmem:[#allocation11 + $0x360] ss:$16 sps:$4 sm:$0xff]  }
 0x4fc   :  { %10154 = vmatpush1.bf16.msra.mxu0 %v12586_v42  ;;  %v12615_v42 = vld [vmem:[#allocation11 + $0x2a4] ss:$16 sps:$4 sm:$0xff]  }
 0x4fd   :  { %8179 = vmatpush1.bf16.msra.mxu1 %v11880_v61  ;;  %10155 = vmatprep.subr.bf16.mxu0 %v12591_v19  ;;  %v11953_v61 = vcombine.high %v1589_v2, %v1593_v17  ;;  %v1597_v19 = vld [vmem:[#allocation7 + $0x1d98] sm:$0xff] }
 0x4fe   :  { %8180 = vmatprep.subr.bf16.mxu1 %v11889_v34  ;;  %v1601_v34 = vld [vmem:[#allocation7 + $0x1db8] sm:$0xff] }
 0x4ff   :  { %v11960_v38 = vcombine.low %v1597_v19, %v1601_v34  ;;  %v12634_v2 = vld [vmem:[#allocation11 + $0x380] ss:$16 sps:$4 sm:$0xff]  }
 0x500   :  { %10156 = vmatpush1.bf16.msra.mxu0 %v12589_v32  ;;  %v12618_v32 = vld [vmem:[#allocation11 + $0x2c4] ss:$16 sps:$4 sm:$0xff]  }
 0x501   :  { %8181 = vmatpush1.bf16.msra.mxu1 %v11888_v20  ;;  %10157 = vmatprep.subr.bf16.mxu0 %v12594_v44  ;;  %v11961_v20 = vcombine.high %v1597_v19, %v1601_v34  ;;  %v1605_v44 = vld [vmem:[#allocation7 + $0x1dd8] sm:$0xff] }
 0x502   :  { %8182 = vmatprep.subr.bf16.mxu1 %v11897_v7  ;;  %v1609_v7 = vld [vmem:[#allocation7 + $0x1df8] sm:$0xff] }
 0x503   :  { %v11968_v27 = vcombine.low %v1605_v44, %v1609_v7  ;;  %v12637_v19 = vld [vmem:[#allocation11 + $0x3a0] ss:$16 sps:$4 sm:$0xff]  }
 0x504   :  { %10158 = vmatpush1.bf16.msra.mxu0 %v12592_v36  ;;  %v12621_v36 = vld [vmem:[#allocation11 + $0x2e4] ss:$16 sps:$4 sm:$0xff]  }
 0x505   :  { %8183 = vmatpush1.bf16.msra.mxu1 %v11896_v60  ;;  %10159 = vmatprep.subr.bf16.mxu0 %v12597_v35  ;;  %v11969_v60 = vcombine.high %v1605_v44, %v1609_v7  ;;  %v1613_v35 = vld [vmem:[#allocation7 + $0x1e18] sm:$0xff] }
 0x506   :  { %8184 = vmatprep.subr.bf16.mxu1 %v11905_v12  ;;  %v1617_v12 = vld [vmem:[#allocation7 + $0x1e38] sm:$0xff] }
 0x507   :  { %v11976_v21 = vcombine.low %v1613_v35, %v1617_v12  ;;  %v12640_v44 = vld [vmem:[#allocation11 + $0x3c0] ss:$16 sps:$4 sm:$0xff]  }
 0x508   :  { %10160 = vmatpush1.bf16.msra.mxu0 %v12595_v56  ;;  %v12624_v56 = vld [vmem:[#allocation11 + $0x304] ss:$16 sps:$4 sm:$0xff]  }
 0x509   :  { %8185 = vmatpush1.bf16.msra.mxu1 %v11904_v47  ;;  %10172 = vmatprep.subr.bf16.mxu0 %v12600_v23  ;;  %v11977_v47 = vcombine.high %v1613_v35, %v1617_v12  ;;  %v1621_v23 = vld [vmem:[#allocation7 + $0x1e58] sm:$0xff]  ;;  %v12648_v12 = vld [vmem:[#allocation11 + $0xc] ss:$16 sps:$4 sm:$0xff]  }
 0x50a   :  { %8197 = vmatprep.subr.bf16.mxu1 %v11913_v59  ;;  %v1625_v59 = vld [vmem:[#allocation7 + $0x1e78] sm:$0xff] }
 0x50b   :  { %10162 = vmatmul.mubr.bf16.vlgmr.msra.gmra.mrb[8].mxu0 %v14272_v22  ;;  %v11984_v30 = vcombine.low %v1621_v23, %v1625_v59  ;;  %v12678_v35 = vld [vmem:[#allocation11 + $0x404] ss:$16 sps:$4 sm:$0xff]  }
 0x50c   :  { %8187 = vmatmul.mubr.bf16.vlgmr.msra.gmra.mrb[8].mxu1 %v14135_v26  ;;  %10173 = vmatpush1.bf16.msra.mxu0 %v12598_v52  ;;  %v12609_v26 = vld [vmem:[#allocation11 + $0x264] ss:$16 sps:$4 sm:$0xff]  }
 0x50d   :  { %8198 = vmatpush1.bf16.msra.mxu1 %v11912_v4  ;;  %8229 = vmatprep.mubr.bf16.mxu1 %v14142_v15  ;;  %v12607_v15 = vld [vmem:[#allocation11 + $0x260] ss:$16 sps:$4 sm:$0xff]   ;;  %v12627_v52 = vld [vmem:[#allocation11 + $0x324] ss:$16 sps:$4 sm:$0xff]   ;;  %v11985_v4 = vcombine.high %v1621_v23, %v1625_v59  ;;  %v12649_v59 = vld [vmem:[#allocation11 + $0x28] ss:$16 sps:$4 sm:$0xff]  }
 0x50e   :  { %10204 = vmatprep.mubr.bf16.mxu0 %v14326_v1  ;;  %8199 = vmatprep.subr.bf16.mxu1 %v11921_v9  ;;  %v1629_v9 = vld [vmem:[#allocation7 + $0x1e98] sm:$0xff] }
 0x50f   :  { %10174 = vmatprep.subr.bf16.mxu0 %v12603_v53  ;;  %v1633_v53 = vld [vmem:[#allocation7 + $0x1eb8] sm:$0xff] }
 0x510   :  { %10175 = vmatpush1.bf16.msra.mxu0 %v12601_v29  ;;  %v12630_v29 = vld [vmem:[#allocation11 + $0x344] ss:$16 sps:$4 sm:$0xff]   ;;  %v11992_v50 = vcombine.low %v1629_v9, %v1633_v53  ;;  %v12682_v23 = vld [vmem:[#allocation11 + $0x420] ss:$16 sps:$4 sm:$0xff]  }
 0x511   :  { %8200 = vmatpush1.bf16.msra.mxu1 %v11920_v25  ;;  %10176 = vmatprep.subr.bf16.mxu0 %v12606_v0  ;;  %v11993_v25 = vcombine.high %v1629_v9, %v1633_v53  ;;  %v1637_v0 = vld [vmem:[#allocation7 + $0x1ed8] sm:$0xff]  ;;  %v12657_v53 = vld [vmem:[#allocation11 + $0x6c] ss:$16 sps:$4 sm:$0xff]  }
 0x512   :  { %8201 = vmatprep.subr.bf16.mxu1 %v11929_v58  ;;  %v1641_v58 = vld [vmem:[#allocation7 + $0x1ef8] sm:$0xff] }
 0x513   :  { %v12000_v33 = vcombine.low %v1637_v0, %v1641_v58  ;;  %v12696_v9 = vld [vmem:[#allocation11 + $0x464] ss:$16 sps:$4 sm:$0xff]  }
 0x514   :  { %10177 = vmatpush1.bf16.msra.mxu0 %v12604_v14  ;;  %v12633_v14 = vld [vmem:[#allocation11 + $0x364] ss:$16 sps:$4 sm:$0xff]  }
 0x515   :  { %8202 = vmatpush1.bf16.msra.mxu1 %v11928_v51  ;;  %10178 = vmatprep.subr.bf16.mxu0 %v12609_v26  ;;  %v12001_v51 = vcombine.high %v1637_v0, %v1641_v58  ;;  %v1645_v26 = vld [vmem:[#allocation7 + $0x1f18] sm:$0xff]  ;;  %v12663_v58 = vld [vmem:[#allocation11 + $0xac] ss:$16 sps:$4 sm:$0xff]  }
 0x516   :  { %8203 = vmatprep.subr.bf16.mxu1 %v11937_v3  ;;  %v1649_v3 = vld [vmem:[#allocation7 + $0x1f38] sm:$0xff] }
 0x517   :  { %v12008_v17 = vcombine.low %v1645_v26, %v1649_v3  ;;  %v12708_v0 = vld [vmem:[#allocation11 + $0x4a4] ss:$16 sps:$4 sm:$0xff]  }
 0x518   :  { %10179 = vmatpush1.bf16.msra.mxu0 %v12607_v15  ;;  %v12636_v15 = vld [vmem:[#allocation11 + $0x384] ss:$16 sps:$4 sm:$0xff]  }
 0x519   :  { %8204 = vmatpush1.bf16.msra.mxu1 %v11936_v37  ;;  %10180 = vmatprep.subr.bf16.mxu0 %v12612_v41  ;;  %v12009_v37 = vcombine.high %v1645_v26, %v1649_v3  ;;  %v1653_v41 = vld [vmem:[#allocation7 + $0x1f58] sm:$0xff]  ;;  %v12664_v3 = vld [vmem:[#allocation11 + $0xc8] ss:$16 sps:$4 sm:$0xff]  }
 0x51a   :  { %8205 = vmatprep.subr.bf16.mxu1 %v11945_v5  ;;  %v1657_v5 = vld [vmem:[#allocation7 + $0x1f78] sm:$0xff] }
 0x51b   :  { %v12016_v34 = vcombine.low %v1653_v41, %v1657_v5  ;;  %v12712_v26 = vld [vmem:[#allocation11 + $0x4c0] ss:$16 sps:$4 sm:$0xff]  }
 0x51c   :  { %10181 = vmatpush1.bf16.msra.mxu0 %v12610_v39  ;;  %v12639_v39 = vld [vmem:[#allocation11 + $0x3a4] ss:$16 sps:$4 sm:$0xff]  }
 0x51d   :  { %8206 = vmatpush1.bf16.msra.mxu1 %v11944_v11  ;;  %10182 = vmatprep.subr.bf16.mxu0 %v12615_v42  ;;  %v12017_v11 = vcombine.high %v1653_v41, %v1657_v5  ;;  %v1661_v42 = vld [vmem:[#allocation7 + $0x1f98] sm:$0xff]  ;;  %v12672_v5 = vld [vmem:[#allocation11 + $0x10c] ss:$16 sps:$4 sm:$0xff]  }
 0x51e   :  { %8207 = vmatprep.subr.bf16.mxu1 %v11953_v61  ;;  %v1665_v61 = vld [vmem:[#allocation7 + $0x1fb8] sm:$0xff] }
 0x51f   :  { %v12024_v7 = vcombine.low %v1661_v42, %v1665_v61  ;;  %v12726_v41 = vld [vmem:[#allocation11 + $0x504] ss:$16 sps:$4 sm:$0xff]  }
 0x520   :  { %10183 = vmatpush1.bf16.msra.mxu0 %v12613_v13  ;;  %v12642_v13 = vld [vmem:[#allocation11 + $0x3c4] ss:$16 sps:$4 sm:$0xff]  }
 0x521   :  { %8208 = vmatpush1.bf16.msra.mxu1 %v11952_v28  ;;  %10184 = vmatprep.subr.bf16.mxu0 %v12618_v32  ;;  %v12025_v28 = vcombine.high %v1661_v42, %v1665_v61  ;;  %v1669_v32 = vld [vmem:[#allocation7 + $0x1fd8] sm:$0xff]  ;;  %v12673_v61 = vld [vmem:[#allocation11 + $0x128] ss:$16 sps:$4 sm:$0xff]  }
 0x522   :  { %8209 = vmatprep.subr.bf16.mxu1 %v11961_v20  ;;  %v1673_v20 = vld [vmem:[#allocation7 + $0x1ff8] sm:$0xff] }
 0x523   :  { %v12730_v42 = vld [vmem:[#allocation11 + $0x520] ss:$16 sps:$4 sm:$0xff]  }
 0x524   :  { %10185 = vmatpush1.bf16.msra.mxu0 %v12616_v46  ;;  %v12645_v46 = vld [vmem:[#allocation11 + $0x3e4] ss:$16 sps:$4 sm:$0xff]  }
 0x525   :  { %8210 = vmatpush1.bf16.msra.mxu1 %v11960_v38  ;;  %10186 = vmatprep.subr.bf16.mxu0 %v12621_v36  ;;  %v12033_v38 = vcombine.high %v1669_v32, %v1673_v20  ;;  %v12643_v36 = vld [vmem:[#allocation11 + $0x3e0] ss:$16 sps:$4 sm:$0xff]  }
 0x526   :  { %8211 = vmatprep.subr.bf16.mxu1 %v11969_v60  ;;  %v12032_v60 = vcombine.low %v1669_v32, %v1673_v20  ;;  %v12744_v32 = vld [vmem:[#allocation11 + $0x564] ss:$16 sps:$4 sm:$0xff]   ;;  %v12687_v20 = vld [vmem:[#allocation11 + $0x16c] ss:$16 sps:$4 sm:$0xff]  }
 0x528   :  { %10187 = vmatpush1.bf16.msra.mxu0 %v12619_v55  ;;  %v12676_v55 = vld [vmem:[#allocation11 + $0x400] ss:$16 sps:$4 sm:$0xff]  }
 0x529   :  { %8212 = vmatpush1.bf16.msra.mxu1 %v11968_v27  ;;  %10188 = vmatprep.subr.bf16.mxu0 %v12624_v56  ;;  %v12646_v27 = vld [vmem:[#allocation11 + $0x8] ss:$16 sps:$4 sm:$0xff]   ;;  %v12651_v56 = vld [vmem:[#allocation11 + $0x2c] ss:$16 sps:$4 sm:$0xff]  }
 0x52a   :  { %8213 = vmatprep.subr.bf16.mxu1 %v11977_v47  ;;  %v12684_v47 = vld [vmem:[#allocation11 + $0x424] ss:$16 sps:$4 sm:$0xff]  }
 0x52c   :  { %10189 = vmatpush1.bf16.msra.mxu0 %v12622_v18  ;;  %v12690_v18 = vld [vmem:[#allocation11 + $0x444] ss:$16 sps:$4 sm:$0xff]  }
 0x52d   :  { %8214 = vmatpush1.bf16.msra.mxu1 %v11976_v21  ;;  %10190 = vmatprep.subr.bf16.mxu0 %v12627_v52  ;;  %v12654_v21 = vld [vmem:[#allocation11 + $0x4c] ss:$16 sps:$4 sm:$0xff]   ;;  %v12688_v52 = vld [vmem:[#allocation11 + $0x440] ss:$16 sps:$4 sm:$0xff]  }
 0x52e   :  { %8215 = vmatprep.subr.bf16.mxu1 %v11985_v4  ;;  %v12652_v4 = vld [vmem:[#allocation11 + $0x48] ss:$16 sps:$4 sm:$0xff]  }
 0x530   :  { %10191 = vmatpush1.bf16.msra.mxu0 %v12625_v63  ;;  %v12655_v63 = vld [vmem:[#allocation11 + $0x68] ss:$16 sps:$4 sm:$0xff]  }
 0x531   :  { %8216 = vmatpush1.bf16.msra.mxu1 %v11984_v30  ;;  %10192 = vmatprep.subr.bf16.mxu0 %v12630_v29  ;;  %v12702_v30 = vld [vmem:[#allocation11 + $0x484] ss:$16 sps:$4 sm:$0xff]   ;;  %v12700_v29 = vld [vmem:[#allocation11 + $0x480] ss:$16 sps:$4 sm:$0xff]  }
 0x532   :  { %8217 = vmatprep.subr.bf16.mxu1 %v11993_v25  ;;  %v12658_v25 = vld [vmem:[#allocation11 + $0x88] ss:$16 sps:$4 sm:$0xff]  }
 0x534   :  { %10193 = vmatpush1.bf16.msra.mxu0 %v12628_v8  ;;  %v12706_v8 = vld [vmem:[#allocation11 + $0x4a0] ss:$16 sps:$4 sm:$0xff]  }
 0x535   :  { %8218 = vmatpush1.bf16.msra.mxu1 %v11992_v50  ;;  %10194 = vmatprep.subr.bf16.mxu0 %v12633_v14  ;;  %v12661_v50 = vld [vmem:[#allocation11 + $0xa8] ss:$16 sps:$4 sm:$0xff]   ;;  %v12714_v14 = vld [vmem:[#allocation11 + $0x4c4] ss:$16 sps:$4 sm:$0xff]  }
 0x536   :  { %8219 = vmatprep.subr.bf16.mxu1 %v12001_v51  ;;  %v12666_v51 = vld [vmem:[#allocation11 + $0xcc] ss:$16 sps:$4 sm:$0xff]  }
 0x538   :  { %10195 = vmatpush1.bf16.msra.mxu0 %v12631_v43  ;;  %v12720_v43 = vld [vmem:[#allocation11 + $0x4e4] ss:$16 sps:$4 sm:$0xff]  }
 0x539   :  { %8220 = vmatpush1.bf16.msra.mxu1 %v12000_v33  ;;  %10196 = vmatprep.subr.bf16.mxu0 %v12636_v15  ;;  %v12669_v33 = vld [vmem:[#allocation11 + $0xec] ss:$16 sps:$4 sm:$0xff]   ;;  %v12718_v15 = vld [vmem:[#allocation11 + $0x4e0] ss:$16 sps:$4 sm:$0xff]  }
 0x53a   :  { %8221 = vmatprep.subr.bf16.mxu1 %v12009_v37  ;;  %v12667_v37 = vld [vmem:[#allocation11 + $0xe8] ss:$16 sps:$4 sm:$0xff]  }
 0x53c   :  { %10197 = vmatpush1.bf16.msra.mxu0 %v12634_v2  ;;  %v12724_v2 = vld [vmem:[#allocation11 + $0x500] ss:$16 sps:$4 sm:$0xff]  }
 0x53d   :  { %8222 = vmatpush1.bf16.msra.mxu1 %v12008_v17  ;;  %10198 = vmatprep.subr.bf16.mxu0 %v12639_v39  ;;  %v12670_v17 = vld [vmem:[#allocation11 + $0x108] ss:$16 sps:$4 sm:$0xff]   ;;  %v12732_v39 = vld [vmem:[#allocation11 + $0x524] ss:$16 sps:$4 sm:$0xff]  }
 0x53e   :  { %8223 = vmatprep.subr.bf16.mxu1 %v12017_v11  ;;  %v12675_v11 = vld [vmem:[#allocation11 + $0x12c] ss:$16 sps:$4 sm:$0xff]  }
 0x540   :  { %10199 = vmatpush1.bf16.msra.mxu0 %v12637_v19  ;;  %v12738_v19 = vld [vmem:[#allocation11 + $0x544] ss:$16 sps:$4 sm:$0xff]  }
 0x541   :  { %8224 = vmatpush1.bf16.msra.mxu1 %v12016_v34  ;;  %10200 = vmatprep.subr.bf16.mxu0 %v12642_v13  ;;  %v12681_v34 = vld [vmem:[#allocation11 + $0x14c] ss:$16 sps:$4 sm:$0xff]   ;;  %v12736_v13 = vld [vmem:[#allocation11 + $0x540] ss:$16 sps:$4 sm:$0xff]  }
 0x542   :  { %8225 = vmatprep.subr.bf16.mxu1 %v12025_v28  ;;  %v12679_v28 = vld [vmem:[#allocation11 + $0x148] ss:$16 sps:$4 sm:$0xff]  }
 0x544   :  { %10201 = vmatpush1.bf16.msra.mxu0 %v12640_v44  ;;  %v12742_v44 = vld [vmem:[#allocation11 + $0x560] ss:$16 sps:$4 sm:$0xff]  }
 0x545   :  { %8226 = vmatpush1.bf16.msra.mxu1 %v12024_v7  ;;  %10202 = vmatprep.subr.bf16.mxu0 %v12645_v46  ;;  %v12685_v7 = vld [vmem:[#allocation11 + $0x168] ss:$16 sps:$4 sm:$0xff]   ;;  %v12750_v46 = vld [vmem:[#allocation11 + $0x584] ss:$16 sps:$4 sm:$0xff]  }
 0x546   :  { %8227 = vmatprep.subr.bf16.mxu1 %v12033_v38  ;;  %v12693_v38 = vld [vmem:[#allocation11 + $0x18c] ss:$16 sps:$4 sm:$0xff]  }
 0x548   :  { %10203 = vmatpush1.bf16.msra.mxu0 %v12643_v36  ;;  %v12748_v36 = vld [vmem:[#allocation11 + $0x580] ss:$16 sps:$4 sm:$0xff]  }
 0x549   :  { %8228 = vmatpush1.bf16.msra.mxu1 %v12032_v60  ;;  %10215 = vmatprep.subr.bf16.mxu0 %v12678_v35  ;;  %v12691_v60 = vld [vmem:[#allocation11 + $0x188] ss:$16 sps:$4 sm:$0xff]   ;;  %v12756_v35 = vld [vmem:[#allocation11 + $0x5a4] ss:$16 sps:$4 sm:$0xff]  }
 0x54a   :  { %10301 = vmatprep.subr.bf16.mxu1 %v12648_v12  ;;  %v12699_v12 = vld [vmem:[#allocation11 + $0x1ac] ss:$16 sps:$4 sm:$0xff]  }
 0x54b   :  { %10205 = vmatmul.mubr.bf16.vlgmr.msra.gmra.mrb[8].mxu0 %v14324_v45 }
 0x54c   :  { %8230 = vmatmul.mubr.bf16.vlgmr.msra.gmra.mrb[8].mxu1 %v14588_v31  ;;  %10216 = vmatpush1.bf16.msra.mxu0 %v12676_v55  ;;  %v12694_v31 = vld [vmem:[#allocation11 + $0x460] ss:$16 sps:$4 sm:$0xff]  }
 0x54d   :  { %10302 = vmatpush1.bf16.msra.mxu1 %v12646_v27  ;;  %10333 = vmatprep.mubr.bf16.mxu1 %v14274_v24  ;;  %v12660_v24 = vld [vmem:[#allocation11 + $0x8c] ss:$16 sps:$4 sm:$0xff]   ;;  %v12754_v55 = vld [vmem:[#allocation11 + $0x5a0] ss:$16 sps:$4 sm:$0xff]   ;;  %v12697_v27 = vld [vmem:[#allocation11 + $0x1a8] ss:$16 sps:$4 sm:$0xff]  }
 0x54e   :  { %10303 = vmatprep.subr.bf16.mxu1 %v12651_v56  ;;  %10217 = vmatprep.subr.bf16.mxu0 %v12684_v47  ;;  %v12762_v56 = vld [vmem:[#allocation11 + $0x5c4] ss:$16 sps:$4 sm:$0xff]   ;;  %v12705_v47 = vld [vmem:[#allocation11 + $0x1cc] ss:$16 sps:$4 sm:$0xff]  }
 0x550   :  { %10218 = vmatpush1.bf16.msra.mxu0 %v12682_v23  ;;  %v12760_v23 = vld [vmem:[#allocation11 + $0x5c0] ss:$16 sps:$4 sm:$0xff]  }
 0x551   :  { %10304 = vmatpush1.bf16.msra.mxu1 %v12649_v59  ;;  %10219 = vmatprep.subr.bf16.mxu0 %v12690_v18  ;;  %v12703_v59 = vld [vmem:[#allocation11 + $0x1c8] ss:$16 sps:$4 sm:$0xff]   ;;  %v12768_v18 = vld [vmem:[#allocation11 + $0x5e4] ss:$16 sps:$4 sm:$0xff]  }
 0x552   :  { %10305 = vmatprep.subr.bf16.mxu1 %v12654_v21  ;;  %v12711_v21 = vld [vmem:[#allocation11 + $0x1ec] ss:$16 sps:$4 sm:$0xff]  }
 0x554   :  { %10220 = vmatpush1.bf16.msra.mxu0 %v12688_v52  ;;  %v12766_v52 = vld [vmem:[#allocation11 + $0x5e0] ss:$16 sps:$4 sm:$0xff]  }
 0x555   :  { %10306 = vmatpush1.bf16.msra.mxu1 %v12652_v4  ;;  %10221 = vmatprep.subr.bf16.mxu0 %v12696_v9  ;;  %v12709_v4 = vld [vmem:[#allocation11 + $0x1e8] ss:$16 sps:$4 sm:$0xff]   ;;  %v12822_v9 = vld [vmem:[#allocation11 + $0x604] ss:$16 sps:$4 sm:$0xff]  }
 0x556   :  { %10307 = vmatprep.subr.bf16.mxu1 %v12657_v53  ;;  %v12717_v53 = vld [vmem:[#allocation11 + $0x20c] ss:$16 sps:$4 sm:$0xff]  }
 0x558   :  { %10222 = vmatpush1.bf16.msra.mxu0 %v12694_v31  ;;  %v12715_v31 = vld [vmem:[#allocation11 + $0x208] ss:$16 sps:$4 sm:$0xff]  }
 0x559   :  { %10308 = vmatpush1.bf16.msra.mxu1 %v12655_v63  ;;  %10223 = vmatprep.subr.bf16.mxu0 %v12702_v30  ;;  %v12723_v63 = vld [vmem:[#allocation11 + $0x22c] ss:$16 sps:$4 sm:$0xff]   ;;  %v12721_v30 = vld [vmem:[#allocation11 + $0x228] ss:$16 sps:$4 sm:$0xff]  }
 0x55a   :  { %10309 = vmatprep.subr.bf16.mxu1 %v12660_v24  ;;  %v12729_v24 = vld [vmem:[#allocation11 + $0x24c] ss:$16 sps:$4 sm:$0xff]  }
 0x55c   :  { %10224 = vmatpush1.bf16.msra.mxu0 %v12700_v29  ;;  %v12727_v29 = vld [vmem:[#allocation11 + $0x248] ss:$16 sps:$4 sm:$0xff]  }
 0x55d   :  { %10310 = vmatpush1.bf16.msra.mxu1 %v12658_v25  ;;  %10225 = vmatprep.subr.bf16.mxu0 %v12708_v0  ;;  %v12735_v25 = vld [vmem:[#allocation11 + $0x26c] ss:$16 sps:$4 sm:$0xff]   ;;  %v12733_v0 = vld [vmem:[#allocation11 + $0x268] ss:$16 sps:$4 sm:$0xff]  }
 0x55e   :  { %10311 = vmatprep.subr.bf16.mxu1 %v12663_v58  ;;  %v12741_v58 = vld [vmem:[#allocation11 + $0x28c] ss:$16 sps:$4 sm:$0xff]  }
 0x560   :  { %10226 = vmatpush1.bf16.msra.mxu0 %v12706_v8  ;;  %v12739_v8 = vld [vmem:[#allocation11 + $0x288] ss:$16 sps:$4 sm:$0xff]  }
 0x561   :  { %10312 = vmatpush1.bf16.msra.mxu1 %v12661_v50  ;;  %10227 = vmatprep.subr.bf16.mxu0 %v12714_v14  ;;  %v14349_v50 = vld [vmem:[#allocation8] ss:$4 sm:$0xff] }
 0x562   :  { %10313 = vmatprep.subr.bf16.mxu1 %v12666_v51 }
 0x564   :  { %10228 = vmatpush1.bf16.msra.mxu0 %v12712_v26  ;;  %v12747_v26 = vld [vmem:[#allocation11 + $0x2ac] ss:$16 sps:$4 sm:$0xff]  }
 0x565   :  { %10314 = vmatpush1.bf16.msra.mxu1 %v12664_v3  ;;  %10229 = vmatprep.subr.bf16.mxu0 %v12720_v43  ;;  %v14355_v3 = vld [vmem:[#allocation8 + $0x1] ss:$4 sm:$0xff] }
 0x566   :  { %10315 = vmatprep.subr.bf16.mxu1 %v12669_v33 }
 0x568   :  { %10230 = vmatpush1.bf16.msra.mxu0 %v12718_v15 }
 0x569   :  { %10316 = vmatpush1.bf16.msra.mxu1 %v12667_v37  ;;  %10231 = vmatprep.subr.bf16.mxu0 %v12726_v41  ;;  %v14362_v37 = vld [vmem:[#allocation8 + $0x2] ss:$4 sm:$0xff] }
 0x56a   :  { %10317 = vmatprep.subr.bf16.mxu1 %v12672_v5 }
 0x56c   :  { %10232 = vmatpush1.bf16.msra.mxu0 %v12724_v2  ;;  %v12745_v2 = vld [vmem:[#allocation11 + $0x2a8] ss:$16 sps:$4 sm:$0xff]  }
 0x56d   :  { %10318 = vmatpush1.bf16.msra.mxu1 %v12670_v17  ;;  %10233 = vmatprep.subr.bf16.mxu0 %v12732_v39 }
 0x56e   :  { %10319 = vmatprep.subr.bf16.mxu1 %v12675_v11 }
 0x570   :  { %10234 = vmatpush1.bf16.msra.mxu0 %v12730_v42 }
 0x571   :  { %10320 = vmatpush1.bf16.msra.mxu1 %v12673_v61  ;;  %10235 = vmatprep.subr.bf16.mxu0 %v12738_v19  ;;  %v12753_v61 = vld [vmem:[#allocation11 + $0x2cc] ss:$16 sps:$4 sm:$0xff]  }
 0x572   :  { %10321 = vmatprep.subr.bf16.mxu1 %v12681_v34 }
 0x574   :  { %10236 = vmatpush1.bf16.msra.mxu0 %v12736_v13  ;;  %v14372_v13 = vld [vmem:[#allocation8 + $0x3] ss:$4 sm:$0xff] }
 0x575   :  { %10322 = vmatpush1.bf16.msra.mxu1 %v12679_v28  ;;  %10237 = vmatprep.subr.bf16.mxu0 %v12744_v32 }
 0x576   :  { %10323 = vmatprep.subr.bf16.mxu1 %v12687_v20 }
 0x578   :  { %10238 = vmatpush1.bf16.msra.mxu0 %v12742_v44 }
 0x579   :  { %10324 = vmatpush1.bf16.msra.mxu1 %v12685_v7  ;;  %10239 = vmatprep.subr.bf16.mxu0 %v12750_v46 }
 0x57a   :  { %10325 = vmatprep.subr.bf16.mxu1 %v12693_v38 }
 0x57c   :  { %10240 = vmatpush1.bf16.msra.mxu0 %v12748_v36 }
 0x57d   :  { %10326 = vmatpush1.bf16.msra.mxu1 %v12691_v60  ;;  %10241 = vmatprep.subr.bf16.mxu0 %v12756_v35 }
 0x57e   :  { %10327 = vmatprep.subr.bf16.mxu1 %v12699_v12 }
 0x580   :  { %10242 = vmatpush1.bf16.msra.mxu0 %v12754_v55 }
 0x581   :  { %10328 = vmatpush1.bf16.msra.mxu1 %v12697_v27  ;;  %10243 = vmatprep.subr.bf16.mxu0 %v12762_v56  ;;  %v12751_v56 = vld [vmem:[#allocation11 + $0x2c8] ss:$16 sps:$4 sm:$0xff]  }
 0x582   :  { %10329 = vmatprep.subr.bf16.mxu1 %v12705_v47 }
 0x584   :  { %10244 = vmatpush1.bf16.msra.mxu0 %v12760_v23 }
 0x585   :  { %10330 = vmatpush1.bf16.msra.mxu1 %v12703_v59  ;;  %10245 = vmatprep.subr.bf16.mxu0 %v12768_v18 }
 0x586   :  { %10331 = vmatprep.subr.bf16.mxu1 %v12711_v21  ;;  %v12759_v21 = vld [vmem:[#allocation11 + $0x2ec] ss:$16 sps:$4 sm:$0xff]  }
 0x588   :  { %10246 = vmatpush1.bf16.msra.mxu0 %v12766_v52 }
 0x589   :  { %10332 = vmatpush1.bf16.msra.mxu1 %v12709_v4  ;;  %10258 = vmatprep.subr.bf16.mxu0 %v12822_v9  ;;  %v14386_v9 = vld [vmem:[#allocation10] sm:$0xff] }
 0x58a   :  { %10344 = vmatprep.subr.bf16.mxu1 %v12717_v53 }
 0x58c   :  { %10334 = vmatmul.mubr.bf16.vlgmr.msra.gmra.mrb[12].mxu1 %v14272_v22  ;;  %v14589_v22 = vld [vmem:[#allocation30_spill] sm:$0xff] }
 0x58d   :  { %10345 = vmatpush1.bf16.msra.mxu1 %v12715_v31  ;;  %10376 = vmatprep.mubr.bf16.mxu1 %v14326_v1  ;;  %v1707_v14 = vrot.slane %v14349_v50, %v14589_v22  ;;  %v14590_v1 = vld [vmem:[#allocation29_spill] sm:$0xff]  ;;  %v8270_v43 = vrot.slane %v14355_v3, %v14589_v22  ;;  %v8353_v41 = vrot.slane %v14362_v37, %v14589_v22 }
 0x58e   :  { %10346 = vmatprep.subr.bf16.mxu1 %v12723_v63  ;;  %v1711_v51 = vrot.slane %v14349_v50, %v14590_v1  ;;  %v8274_v33 = vrot.slane %v14355_v3, %v14590_v1  ;;  %v8357_v5 = vrot.slane %v14362_v37, %v14590_v1  ;;  %v8436_v28 = vrot.slane %v14372_v13, %v14589_v22 }
 0x58f   :  { %v1732_v15 = vmul.f32 %v1707_v14, %v14218_v48  ;;  %v1740_v11 = vmul.f32 %v1707_v14, %v14202_v49  ;;  %v8295_v34 = vmul.f32 %v8270_v43, %v14204_v62  ;;  %v8440_v7 = vrot.slane %v14372_v13, %v14590_v1 }
 0x590   :  { %v1733_v39 = vmul.f32 %v1711_v51, %v14218_v48  ;;  %v1741_v42 = vmul.f32 %v1711_v51, %v14202_v49  ;;  %v8296_v20 = vmul.f32 %v8274_v33, %v14204_v62  ;;  %v8303_v38 = vmul.f32 %v8270_v43, %v14206_v54 }
 0x591   :  { %10347 = vmatpush1.bf16.msra.mxu1 %v12721_v30  ;;  %v8304_v36 = vmul.f32 %v8274_v33, %v14206_v54  ;;  %v8378_v35 = vmul.f32 %v8353_v41, %v14212_v40  ;;  %v8379_v12 = vmul.f32 %v8357_v5, %v14212_v40  ;;  %v8386_v23 = vmul.f32 %v8353_v41, %v14222_v16 }
 0x592   :  { %10348 = vmatprep.subr.bf16.mxu1 %v12729_v24  ;;  %v8387_v18 = vmul.f32 %v8357_v5, %v14222_v16  ;;  %v8461_v4 = vmul.f32 %v8436_v28, %v14239_v10  ;;  %v8510_v53 = vrot.slane %v14386_v9, %v14589_v22  ;;  %v8462_v30 = vmul.f32 %v8440_v7, %v14239_v10  ;;  %v12765_v22 = vld [vmem:[#allocation11 + $0x30c] ss:$16 sps:$4 sm:$0xff]  }
 0x595   :  { %10349 = vmatpush1.bf16.msra.mxu1 %v12727_v29  ;;  %v8514_v29 = vrot.slane %v14386_v9, %v14590_v1  ;;  %v12771_v1 = vld [vmem:[#allocation11 + $0x32c] ss:$16 sps:$4 sm:$0xff]  }
 0x596   :  { %10350 = vmatprep.subr.bf16.mxu1 %v12735_v25 }
 0x599   :  { %10351 = vmatpush1.bf16.msra.mxu1 %v12733_v0 }
 0x59a   :  { %10352 = vmatprep.subr.bf16.mxu1 %v12741_v58  ;;  %v8469_v58 = vmul.f32 %v8436_v28, %v14253_v6 }
 0x59d   :  { %10353 = vmatpush1.bf16.msra.mxu1 %v12739_v8  ;;  %v12757_v8 = vld [vmem:[#allocation11 + $0x2e8] ss:$16 sps:$4 sm:$0xff]  }
 0x59e   :  { %v7887_v17 = vpop.f32.mrb[4].mxu0  ;;  %10354 = vmatprep.subr.bf16.mxu1 %v12747_v26  ;;  %v8470_v26 = vmul.f32 %v8440_v7, %v14253_v6  ;;  %v12772_v7 = vld [vmem:[#allocation11 + $0x348] ss:$16 sps:$4 sm:$0xff]  }
 0x59f   :  { %v12366_v19 = vadd.f32 %v7887_v17, %v1732_v15  ;;  %v7889_v32 = vpop.f32.mrb[5].mxu0 }
 0x5a0   :  { %v12367_v44 = vadd.f32 %v7889_v32, %v1733_v39  ;;  %v7891_v46 = vpop.f32.mrb[6].mxu0  ;;  %v12774_v32 = vld [vmem:[#allocation11 + $0x34c] ss:$16 sps:$4 sm:$0xff]  }
 0x5a1   :  { %v8311_v60 = vadd.f32 %v12366_v19, %v8295_v34  ;;  %v12368_v55 = vadd.f32 %v7891_v46, %v1740_v11  ;;  %10355 = vmatpush1.bf16.msra.mxu1 %v12745_v2  ;;  %v7893_v27 = vpop.f32.mrb[7].mxu0  ;;  %v12763_v2 = vld [vmem:[#allocation11 + $0x308] ss:$16 sps:$4 sm:$0xff]   ;;  %v12777_v46 = vld [vmem:[#allocation11 + $0x36c] ss:$16 sps:$4 sm:$0xff]  }
 0x5a2   :  { %v8312_v47 = vadd.f32 %v12367_v44, %v8296_v20  ;;  %v12369_v59 = vadd.f32 %v7893_v27, %v1741_v42  ;;  %10356 = vmatprep.subr.bf16.mxu1 %v12753_v61  ;;  %v12769_v19 = vld [vmem:[#allocation11 + $0x328] ss:$16 sps:$4 sm:$0xff]   ;;  %v12820_v20 = vld [vmem:[#allocation11 + $0x600] ss:$16 sps:$4 sm:$0xff]   ;;  %v12828_v44 = vld [vmem:[#allocation11 + $0x624] ss:$16 sps:$4 sm:$0xff]  }
 0x5a3   :  { %v8394_v52 = vadd.f32 %v8378_v35, %v8311_v60  ;;  %v8319_v31 = vadd.f32 %v12368_v55, %v8303_v38  ;;  %v12826_v38 = vld [vmem:[#allocation11 + $0x620] ss:$16 sps:$4 sm:$0xff]   ;;  %v12775_v60 = vld [vmem:[#allocation11 + $0x368] ss:$16 sps:$4 sm:$0xff]   ;;  %v12780_v35 = vld [vmem:[#allocation11 + $0x38c] ss:$16 sps:$4 sm:$0xff]  }
 0x5a4   :  { %v8395_v63 = vadd.f32 %v8379_v12, %v8312_v47  ;;  %v8320_v24 = vadd.f32 %v12369_v59, %v8304_v36  ;;  %v12834_v36 = vld [vmem:[#allocation11 + $0x644] ss:$16 sps:$4 sm:$0xff]   ;;  %v12832_v12 = vld [vmem:[#allocation11 + $0x640] ss:$16 sps:$4 sm:$0xff]   ;;  %v12778_v27 = vld [vmem:[#allocation11 + $0x388] ss:$16 sps:$4 sm:$0xff]  }
 0x5a5   :  { %v8477_v25 = vadd.f32 %v8461_v4, %v8394_v52  ;;  %v8402_v0 = vadd.f32 %v8386_v23, %v8319_v31  ;;  %10357 = vmatpush1.bf16.msra.mxu1 %v12751_v56  ;;  %v12840_v55 = vld [vmem:[#allocation11 + $0x664] ss:$16 sps:$4 sm:$0xff]   ;;  %v12783_v56 = vld [vmem:[#allocation11 + $0x3ac] ss:$16 sps:$4 sm:$0xff]   ;;  %v12838_v47 = vld [vmem:[#allocation11 + $0x660] ss:$16 sps:$4 sm:$0xff]  }
 0x5a6   :  { %v8478_v14 = vadd.f32 %v8462_v30, %v8395_v63  ;;  %v8403_v51 = vadd.f32 %v8387_v18, %v8320_v24  ;;  %10358 = vmatprep.subr.bf16.mxu1 %v12759_v21  ;;  %v12846_v23 = vld [vmem:[#allocation11 + $0x684] ss:$16 sps:$4 sm:$0xff]   ;;  %v12781_v59 = vld [vmem:[#allocation11 + $0x3a8] ss:$16 sps:$4 sm:$0xff]   ;;  %v12786_v18 = vld [vmem:[#allocation11 + $0x3cc] ss:$16 sps:$4 sm:$0xff]  }
 0x5a7   :  { %v8535_v43 = vadd.f32 %v8510_v53, %v8477_v25  ;;  %v8485_v33 = vadd.f32 %v8469_v58, %v8402_v0  ;;  %v12844_v21 = vld [vmem:[#allocation11 + $0x680] ss:$16 sps:$4 sm:$0xff]   ;;  %v12852_v52 = vld [vmem:[#allocation11 + $0x6a4] ss:$16 sps:$4 sm:$0xff]   ;;  %v12784_v4 = vld [vmem:[#allocation11 + $0x3c8] ss:$16 sps:$4 sm:$0xff]  }
 0x5a8   :  { %v8486_v15 = vadd.f32 %v8470_v26, %v8403_v51  ;;  %v8536_v41 = vadd.f32 %v8514_v29, %v8478_v14  ;;  %v12850_v31 = vld [vmem:[#allocation11 + $0x6a0] ss:$16 sps:$4 sm:$0xff]   ;;  %v12858_v63 = vld [vmem:[#allocation11 + $0x6c4] ss:$16 sps:$4 sm:$0xff]   ;;  %v12787_v30 = vld [vmem:[#allocation11 + $0x3e8] ss:$16 sps:$4 sm:$0xff]  }
 0x5a9   :  { %v8543_v5 = vadd.f32 %v8510_v53, %v8485_v33  ;;  %10359 = vmatpush1.bf16.msra.mxu1 %v12757_v8  ;;  %v8551_v39 = vmax.f32 %v8535_v43, 0.0  ;;  %v12789_v53 = vld [vmem:[#allocation11 + $0x3ec] ss:$16 sps:$4 sm:$0xff]   ;;  %v12864_v25 = vld [vmem:[#allocation11 + $0x6e4] ss:$16 sps:$4 sm:$0xff]  }
 0x5aa   :  { %10360 = vmatprep.subr.bf16.mxu1 %v12765_v22  ;;  %v8544_v17 = vadd.f32 %v8514_v29, %v8486_v15  ;;  %v8552_v42 = vmax.f32 %v8536_v41, 0.0  ;;  %v12792_v24 = vld [vmem:[#allocation11 + $0x40c] ss:$16 sps:$4 sm:$0xff]   ;;  %v12856_v29 = vld [vmem:[#allocation11 + $0x6c0] ss:$16 sps:$4 sm:$0xff]  }
 0x5ab   :  { %v8559_v11 = vmax.f32 %v8543_v5, 0.0  ;;  %v12790_v0 = vld [vmem:[#allocation11 + $0x408] ss:$16 sps:$4 sm:$0xff]   ;;  %v12795_v58 = vld [vmem:[#allocation11 + $0x42c] ss:$16 sps:$4 sm:$0xff]  }
 0x5ac   :  { %v8560_v61 = vmax.f32 %v8544_v17, 0.0  ;;  %v12862_v8 = vld [vmem:[#allocation11 + $0x6e0] ss:$16 sps:$4 sm:$0xff]   ;;  %v12870_v14 = vld [vmem:[#allocation11 + $0x704] ss:$16 sps:$4 sm:$0xff]  }
 0x5ad   :  { %10361 = vmatpush1.bf16.msra.mxu1 %v12763_v2  ;;  %v14395_v34 = vpack.c.bf16 %v8559_v11, %v8551_v39  ;;  %v12793_v51 = vld [vmem:[#allocation11 + $0x428] ss:$16 sps:$4 sm:$0xff]   ;;  %v12798_v26 = vld [vmem:[#allocation11 + $0x44c] ss:$16 sps:$4 sm:$0xff]   ;;  %v12868_v22 = vld [vmem:[#allocation11 + $0x700] ss:$16 sps:$4 sm:$0xff]  }
 0x5ae   :  { %10362 = vmatprep.subr.bf16.mxu1 %v12771_v1  ;;  %v14397_v28 = vpack.c.bf16 %v8560_v61, %v8552_v42  ;;  %v12876_v43 = vld [vmem:[#allocation11 + $0x724] ss:$16 sps:$4 sm:$0xff]   ;;  %v12796_v33 = vld [vmem:[#allocation11 + $0x448] ss:$16 sps:$4 sm:$0xff]   ;;  %v12801_v15 = vld [vmem:[#allocation11 + $0x46c] ss:$16 sps:$4 sm:$0xff]  }
 0x5af   :  { %v12874_v41 = vld [vmem:[#allocation11 + $0x720] ss:$16 sps:$4 sm:$0xff]   ;;  %v12882_v5 = vld [vmem:[#allocation11 + $0x744] ss:$16 sps:$4 sm:$0xff]   ;;  %v12804_v2 = vld [vmem:[#allocation11 + $0x48c] ss:$16 sps:$4 sm:$0xff]  }
 0x5b0   :  { %10247 = vmatprep.mubr.bf16.mxu0 %v14397_v28  ;;  %v12880_v1 = vld [vmem:[#allocation11 + $0x740] ss:$16 sps:$4 sm:$0xff]   ;;  %v12888_v17 = vld [vmem:[#allocation11 + $0x764] ss:$16 sps:$4 sm:$0xff]   ;;  %v12802_v39 = vld [vmem:[#allocation11 + $0x488] ss:$16 sps:$4 sm:$0xff]  }
 0x5b1   :  { %10363 = vmatpush1.bf16.msra.mxu1 %v12769_v19  ;;  %10248 = vmatmul.mubr.bf16.vlgmr.msra.gmra.mrb[8].mxu0 %v14395_v34  ;;  %v12807_v11 = vld [vmem:[#allocation11 + $0x4ac] ss:$16 sps:$4 sm:$0xff]   ;;  %v12886_v42 = vld [vmem:[#allocation11 + $0x760] ss:$16 sps:$4 sm:$0xff]   ;;  %v12894_v61 = vld [vmem:[#allocation11 + $0x784] ss:$16 sps:$4 sm:$0xff]  }
 0x5b2   :  { %10364 = vmatprep.subr.bf16.mxu1 %v12774_v32  ;;  %10259 = vmatpush1.bf16.msra.mxu0 %v12820_v20  ;;  %v12805_v19 = vld [vmem:[#allocation11 + $0x4a8] ss:$16 sps:$4 sm:$0xff]   ;;  %v12892_v32 = vld [vmem:[#allocation11 + $0x780] ss:$16 sps:$4 sm:$0xff]   ;;  %v12900_v20 = vld [vmem:[#allocation11 + $0x7a4] ss:$16 sps:$4 sm:$0xff]  }
 0x5b3   :  { %10260 = vmatprep.subr.bf16.mxu0 %v12828_v44  ;;  %v12808_v44 = vld [vmem:[#allocation11 + $0x4c8] ss:$16 sps:$4 sm:$0xff]  }
 0x5b5   :  { %10365 = vmatpush1.bf16.msra.mxu1 %v12772_v7  ;;  %v12813_v7 = vld [vmem:[#allocation11 + $0x4ec] ss:$16 sps:$4 sm:$0xff]  }
 0x5b6   :  { %10366 = vmatprep.subr.bf16.mxu1 %v12777_v46  ;;  %10261 = vmatpush1.bf16.msra.mxu0 %v12826_v38  ;;  %v12898_v46 = vld [vmem:[#allocation11 + $0x7a0] ss:$16 sps:$4 sm:$0xff]   ;;  %v12906_v38 = vld [vmem:[#allocation11 + $0x7c4] ss:$16 sps:$4 sm:$0xff]  }
 0x5b7   :  { %10262 = vmatprep.subr.bf16.mxu0 %v12834_v36  ;;  %v12811_v36 = vld [vmem:[#allocation11 + $0x4e8] ss:$16 sps:$4 sm:$0xff]  }
 0x5b9   :  { %10367 = vmatpush1.bf16.msra.mxu1 %v12775_v60  ;;  %v12816_v60 = vld [vmem:[#allocation11 + $0x50c] ss:$16 sps:$4 sm:$0xff]  }
 0x5ba   :  { %10368 = vmatprep.subr.bf16.mxu1 %v12780_v35  ;;  %10263 = vmatpush1.bf16.msra.mxu0 %v12832_v12  ;;  %v12904_v35 = vld [vmem:[#allocation11 + $0x7c0] ss:$16 sps:$4 sm:$0xff]   ;;  %v12912_v12 = vld [vmem:[#allocation11 + $0x7e4] ss:$16 sps:$4 sm:$0xff]  }
 0x5bb   :  { %10264 = vmatprep.subr.bf16.mxu0 %v12840_v55  ;;  %v12814_v55 = vld [vmem:[#allocation11 + $0x508] ss:$16 sps:$4 sm:$0xff]  }
 0x5bd   :  { %10369 = vmatpush1.bf16.msra.mxu1 %v12778_v27  ;;  %v12819_v27 = vld [vmem:[#allocation11 + $0x52c] ss:$16 sps:$4 sm:$0xff]  }
 0x5be   :  { %10370 = vmatprep.subr.bf16.mxu1 %v12783_v56  ;;  %10265 = vmatpush1.bf16.msra.mxu0 %v12838_v47  ;;  %v12910_v56 = vld [vmem:[#allocation11 + $0x7e0] ss:$16 sps:$4 sm:$0xff]  }
 0x5bf   :  { %10266 = vmatprep.subr.bf16.mxu0 %v12846_v23  ;;  %v12936_v47 = vld [vmem:[#allocation14 + $0x4] ss:$8 sps:$4 sm:$0xff]  }
 0x5c0   :  { %v12817_v23 = vld [vmem:[#allocation11 + $0x528] ss:$16 sps:$4 sm:$0xff]  }
 0x5c1   :  { %10371 = vmatpush1.bf16.msra.mxu1 %v12781_v59  ;;  %v12825_v59 = vld [vmem:[#allocation11 + $0x54c] ss:$16 sps:$4 sm:$0xff]  }
 0x5c2   :  { %10372 = vmatprep.subr.bf16.mxu1 %v12786_v18  ;;  %10267 = vmatpush1.bf16.msra.mxu0 %v12844_v21  ;;  %v12823_v18 = vld [vmem:[#allocation11 + $0x548] ss:$16 sps:$4 sm:$0xff]   ;;  %v12831_v21 = vld [vmem:[#allocation11 + $0x56c] ss:$16 sps:$4 sm:$0xff]  }
 0x5c3   :  { %10268 = vmatprep.subr.bf16.mxu0 %v12852_v52  ;;  %v12829_v52 = vld [vmem:[#allocation11 + $0x568] ss:$16 sps:$4 sm:$0xff]  }
 0x5c5   :  { %10373 = vmatpush1.bf16.msra.mxu1 %v12784_v4  ;;  %v12837_v4 = vld [vmem:[#allocation11 + $0x58c] ss:$16 sps:$4 sm:$0xff]  }
 0x5c6   :  { %10374 = vmatprep.subr.bf16.mxu1 %v12789_v53  ;;  %10269 = vmatpush1.bf16.msra.mxu0 %v12850_v31  ;;  %v12835_v53 = vld [vmem:[#allocation11 + $0x588] ss:$16 sps:$4 sm:$0xff]   ;;  %v12843_v31 = vld [vmem:[#allocation11 + $0x5ac] ss:$16 sps:$4 sm:$0xff]  }
 0x5c7   :  { %10270 = vmatprep.subr.bf16.mxu0 %v12858_v63  ;;  %v12841_v63 = vld [vmem:[#allocation11 + $0x5a8] ss:$16 sps:$4 sm:$0xff]  }
 0x5c9   :  { %10375 = vmatpush1.bf16.msra.mxu1 %v12787_v30  ;;  %v12849_v30 = vld [vmem:[#allocation11 + $0x5cc] ss:$16 sps:$4 sm:$0xff]  }
 0x5ca   :  { %10387 = vmatprep.subr.bf16.mxu1 %v12792_v24  ;;  %10271 = vmatpush1.bf16.msra.mxu0 %v12856_v29  ;;  %v12847_v24 = vld [vmem:[#allocation11 + $0x5c8] ss:$16 sps:$4 sm:$0xff]   ;;  %v12855_v29 = vld [vmem:[#allocation11 + $0x5ec] ss:$16 sps:$4 sm:$0xff]  }
 0x5cb   :  { %10272 = vmatprep.subr.bf16.mxu0 %v12864_v25  ;;  %v12853_v25 = vld [vmem:[#allocation11 + $0x5e8] ss:$16 sps:$4 sm:$0xff]  }
 0x5cc   :  { %10377 = vmatmul.mubr.bf16.vlgmr.msra.gmra.mrb[12].mxu1 %v14324_v45  ;;  %v12799_v45 = vld [vmem:[#allocation11 + $0x468] ss:$16 sps:$4 sm:$0xff]  }
 0x5cd   :  { %10388 = vmatpush1.bf16.msra.mxu1 %v12790_v0  ;;  %10419 = vmatprep.mubr.bf16.mxu1 %v14397_v28  ;;  %v12810_v28 = vld [vmem:[#allocation11 + $0x4cc] ss:$16 sps:$4 sm:$0xff]  }
 0x5ce   :  { %10389 = vmatprep.subr.bf16.mxu1 %v12795_v58  ;;  %10273 = vmatpush1.bf16.msra.mxu0 %v12862_v8  ;;  %v12861_v0 = vld [vmem:[#allocation11 + $0x60c] ss:$16 sps:$4 sm:$0xff]   ;;  %v12859_v58 = vld [vmem:[#allocation11 + $0x608] ss:$16 sps:$4 sm:$0xff]  }
 0x5cf   :  { %10274 = vmatprep.subr.bf16.mxu0 %v12870_v14  ;;  %v12867_v8 = vld [vmem:[#allocation11 + $0x62c] ss:$16 sps:$4 sm:$0xff]   ;;  %v12865_v14 = vld [vmem:[#allocation11 + $0x628] ss:$16 sps:$4 sm:$0xff]  }
 0x5d1   :  { %10390 = vmatpush1.bf16.msra.mxu1 %v12793_v51  ;;  %v12873_v51 = vld [vmem:[#allocation11 + $0x64c] ss:$16 sps:$4 sm:$0xff]  }
 0x5d2   :  { %10391 = vmatprep.subr.bf16.mxu1 %v12798_v26  ;;  %10275 = vmatpush1.bf16.msra.mxu0 %v12868_v22  ;;  %v12871_v26 = vld [vmem:[#allocation11 + $0x648] ss:$16 sps:$4 sm:$0xff]   ;;  %v12879_v22 = vld [vmem:[#allocation11 + $0x66c] ss:$16 sps:$4 sm:$0xff]  }
 0x5d3   :  { %10276 = vmatprep.subr.bf16.mxu0 %v12876_v43  ;;  %v12877_v43 = vld [vmem:[#allocation11 + $0x668] ss:$16 sps:$4 sm:$0xff]  }
 0x5d5   :  { %10392 = vmatpush1.bf16.msra.mxu1 %v12796_v33  ;;  %v12885_v33 = vld [vmem:[#allocation11 + $0x68c] ss:$16 sps:$4 sm:$0xff]  }
 0x5d6   :  { %10393 = vmatprep.subr.bf16.mxu1 %v12801_v15  ;;  %10277 = vmatpush1.bf16.msra.mxu0 %v12874_v41  ;;  %v12883_v15 = vld [vmem:[#allocation11 + $0x688] ss:$16 sps:$4 sm:$0xff]   ;;  %v12891_v41 = vld [vmem:[#allocation11 + $0x6ac] ss:$16 sps:$4 sm:$0xff]  }
 0x5d7   :  { %10278 = vmatprep.subr.bf16.mxu0 %v12882_v5  ;;  %v14591_v5 = vld [vmem:[#allocation32_spill] sm:$0xff] }
 0x5d9   :  { %10394 = vmatpush1.bf16.msra.mxu1 %v12799_v45  ;;  %v1715_v45 = vrot.slane %v14349_v50, %v14591_v5 }
 0x5da   :  { %10395 = vmatprep.subr.bf16.mxu1 %v12804_v2  ;;  %10279 = vmatpush1.bf16.msra.mxu0 %v12880_v1  ;;  %v8278_v1 = vrot.slane %v14355_v3, %v14591_v5 }
 0x5db   :  { %10280 = vmatprep.subr.bf16.mxu0 %v12888_v17 }
 0x5dd   :  { %10396 = vmatpush1.bf16.msra.mxu1 %v12802_v39  ;;  %v12889_v39 = vld [vmem:[#allocation11 + $0x6a8] ss:$16 sps:$4 sm:$0xff]  }
 0x5de   :  { %10397 = vmatprep.subr.bf16.mxu1 %v12807_v11  ;;  %10281 = vmatpush1.bf16.msra.mxu0 %v12886_v42  ;;  %v1734_v11 = vmul.f32 %v1715_v45, %v14218_v48  ;;  %v8361_v42 = vrot.slane %v14362_v37, %v14591_v5 }
 0x5df   :  { %10282 = vmatprep.subr.bf16.mxu0 %v12894_v61 }
 0x5e1   :  { %10398 = vmatpush1.bf16.msra.mxu1 %v12805_v19  ;;  %v12897_v19 = vld [vmem:[#allocation11 + $0x6cc] ss:$16 sps:$4 sm:$0xff]  }
 0x5e2   :  { %10399 = vmatprep.subr.bf16.mxu1 %v12810_v28  ;;  %10283 = vmatpush1.bf16.msra.mxu0 %v12892_v32  ;;  %v1742_v32 = vmul.f32 %v1715_v45, %v14202_v49 }
 0x5e3   :  { %10284 = vmatprep.subr.bf16.mxu0 %v12900_v20 }
 0x5e5   :  { %10400 = vmatpush1.bf16.msra.mxu1 %v12808_v44  ;;  %v8297_v44 = vmul.f32 %v8278_v1, %v14204_v62 }
 0x5e6   :  { %10401 = vmatprep.subr.bf16.mxu1 %v12813_v7  ;;  %10285 = vmatpush1.bf16.msra.mxu0 %v12898_v46  ;;  %v8444_v7 = vrot.slane %v14372_v13, %v14591_v5 }
 0x5e7   :  { %10286 = vmatprep.subr.bf16.mxu0 %v12906_v38 }
 0x5e9   :  { %10402 = vmatpush1.bf16.msra.mxu1 %v12811_v36 }
 0x5ea   :  { %10403 = vmatprep.subr.bf16.mxu1 %v12816_v60  ;;  %10287 = vmatpush1.bf16.msra.mxu0 %v12904_v35 }
 0x5eb   :  { %10288 = vmatprep.subr.bf16.mxu0 %v12912_v12 }
 0x5ed   :  { %10404 = vmatpush1.bf16.msra.mxu1 %v12814_v55  ;;  %v8380_v55 = vmul.f32 %v8361_v42, %v14212_v40 }
 0x5ee   :  { %10405 = vmatprep.subr.bf16.mxu1 %v12819_v27  ;;  %10289 = vmatpush1.bf16.msra.mxu0 %v12910_v56 }
 0x5ef   :  { %10881 = vmatprep.subr.bf16.mxu0 %v12936_v47 }
 0x5f1   :  { %10406 = vmatpush1.bf16.msra.mxu1 %v12817_v23 }
 0x5f2   :  { %10407 = vmatprep.subr.bf16.mxu1 %v12825_v59  ;;  %v8388_v59 = vmul.f32 %v8361_v42, %v14222_v16  ;;  %v12921_v42 = vld [vmem:[#allocation11 + $0x76c] ss:$16 sps:$4 sm:$0xff]  }
 0x5f5   :  { %10408 = vmatpush1.bf16.msra.mxu1 %v12823_v18 }
 0x5f6   :  { %10409 = vmatprep.subr.bf16.mxu1 %v12831_v21 }
 0x5f9   :  { %10410 = vmatpush1.bf16.msra.mxu1 %v12829_v52  ;;  %v8463_v52 = vmul.f32 %v8444_v7, %v14239_v10 }
 0x5fa   :  { %10411 = vmatprep.subr.bf16.mxu1 %v12837_v4 }
 0x5fd   :  { %10412 = vmatpush1.bf16.msra.mxu1 %v12835_v53 }
 0x5fe   :  { %10413 = vmatprep.subr.bf16.mxu1 %v12843_v31 }
 0x601   :  { %10414 = vmatpush1.bf16.msra.mxu1 %v12841_v63  ;;  %v12901_v63 = vld [vmem:[#allocation11 + $0x6e8] ss:$16 sps:$4 sm:$0xff]  }
 0x602   :  { %10415 = vmatprep.subr.bf16.mxu1 %v12849_v30 }
 0x605   :  { %10416 = vmatpush1.bf16.msra.mxu1 %v12847_v24 }
 0x606   :  { %10417 = vmatprep.subr.bf16.mxu1 %v12855_v29 }
 0x609   :  { %10418 = vmatpush1.bf16.msra.mxu1 %v12853_v25  ;;  %v12909_v25 = vld [vmem:[#allocation11 + $0x70c] ss:$16 sps:$4 sm:$0xff]  }
 0x60a   :  { %10430 = vmatprep.subr.bf16.mxu1 %v12861_v0 }
 0x60c   :  { %10420 = vmatmul.mubr.bf16.vlgmr.msra.gmra.mrb[12].mxu1 %v14395_v34  ;;  %v14592_v34 = vld [vmem:[#allocation31_spill] sm:$0xff] }
 0x60d   :  { %10431 = vmatpush1.bf16.msra.mxu1 %v12859_v58  ;;  %v1719_v2 = vrot.slane %v14349_v50, %v14592_v34  ;;  %v8282_v17 = vrot.slane %v14355_v3, %v14592_v34  ;;  %v8365_v61 = vrot.slane %v14362_v37, %v14592_v34  ;;  %v8448_v37 = vrot.slane %v14372_v13, %v14592_v34 }
 0x60e   :  { %10432 = vmatprep.subr.bf16.mxu1 %v12867_v8  ;;  %v8522_v30 = vrot.slane %v14386_v9, %v14592_v34 }
 0x60f   :  { %v1735_v50 = vmul.f32 %v1719_v2, %v14218_v48  ;;  %v1743_v20 = vmul.f32 %v1719_v2, %v14202_v49  ;;  %v8298_v38 = vmul.f32 %v8282_v17, %v14204_v62  ;;  %v8305_v48 = vmul.f32 %v8278_v1, %v14206_v54  ;;  %v12895_v49 = vld [vmem:[#allocation11 + $0x6c8] ss:$16 sps:$4 sm:$0xff]   ;;  %v12903_v62 = vld [vmem:[#allocation11 + $0x6ec] ss:$16 sps:$4 sm:$0xff]  }
 0x610   :  { %v8306_v35 = vmul.f32 %v8282_v17, %v14206_v54  ;;  %v8381_v27 = vmul.f32 %v8365_v61, %v14212_v40  ;;  %v8389_v18 = vmul.f32 %v8365_v61, %v14222_v16  ;;  %v8518_v54 = vrot.slane %v14386_v9, %v14591_v5  ;;  %v12913_v5 = vld [vmem:[#allocation11 + $0x728] ss:$16 sps:$4 sm:$0xff]   ;;  %v12934_v17 = vld [vmem:[#allocation14] ss:$8 sps:$4 sm:$0xff]   ;;  %v12937_v61 = vld [vmem:[#allocation14 + $0x10] ss:$8 sps:$4 sm:$0xff]  }
 0x611   :  { %10433 = vmatpush1.bf16.msra.mxu1 %v12865_v14  ;;  %v8464_v40 = vmul.f32 %v8448_v37, %v14239_v10  ;;  %v8471_v16 = vmul.f32 %v8444_v7, %v14253_v6  ;;  %v8472_v8 = vmul.f32 %v8448_v37, %v14253_v6  ;;  %v12907_v10 = vld [vmem:[#allocation11 + $0x708] ss:$16 sps:$4 sm:$0xff]   ;;  %v12918_v6 = vld [vmem:[#allocation11 + $0x74c] ss:$16 sps:$4 sm:$0xff]  }
 0x612   :  { %10434 = vmatprep.subr.bf16.mxu1 %v12873_v51  ;;  %v12943_v7 = vld [vmem:[#allocation14 + $0x30] ss:$8 sps:$4 sm:$0xff]   ;;  %v12946_v37 = vld [vmem:[#allocation14 + $0x40] ss:$8 sps:$4 sm:$0xff]  }
 0x615   :  { %10435 = vmatpush1.bf16.msra.mxu1 %v12871_v26 }
 0x616   :  { %10436 = vmatprep.subr.bf16.mxu1 %v12879_v22 }
 0x619   :  { %10437 = vmatpush1.bf16.msra.mxu1 %v12877_v43 }
 0x61a   :  { %10438 = vmatprep.subr.bf16.mxu1 %v12885_v33  ;;  %v12915_v33 = vld [vmem:[#allocation11 + $0x72c] ss:$16 sps:$4 sm:$0xff]  }
 0x61d   :  { %10439 = vmatpush1.bf16.msra.mxu1 %v12883_v15 }
 0x61e   :  { %10440 = vmatprep.subr.bf16.mxu1 %v12891_v41 }
 0x61f   :  { %v8231_v28 = vpop.f32.mrb[8].mxu1 }
 0x620   :  { %v12370_v3 = vadd.f32 %v8231_v28, %v1734_v11  ;;  %v8233_v46 = vpop.f32.mrb[9].mxu1  ;;  %v12916_v11 = vld [vmem:[#allocation11 + $0x748] ss:$16 sps:$4 sm:$0xff]  }
 0x621   :  { %v12371_v36 = vadd.f32 %v8233_v46, %v1735_v50  ;;  %v8235_v60 = vpop.f32.mrb[10].mxu1  ;;  %10441 = vmatpush1.bf16.msra.mxu1 %v12889_v39  ;;  %v12939_v39 = vld [vmem:[#allocation14 + $0x14] ss:$8 sps:$4 sm:$0xff]   ;;  %v12924_v50 = vld [vmem:[#allocation11 + $0x78c] ss:$16 sps:$4 sm:$0xff]  }
 0x622   :  { %v8313_v12 = vadd.f32 %v12370_v3, %v8297_v44  ;;  %v12372_v56 = vadd.f32 %v8235_v60, %v1742_v32  ;;  %v8237_v47 = vpop.f32.mrb[11].mxu1  ;;  %10442 = vmatprep.subr.bf16.mxu1 %v12897_v19  ;;  %v12942_v19 = vld [vmem:[#allocation14 + $0x24] ss:$8 sps:$4 sm:$0xff]   ;;  %v12940_v32 = vld [vmem:[#allocation14 + $0x20] ss:$8 sps:$4 sm:$0xff]  }
 0x623   :  { %v8314_v23 = vadd.f32 %v12371_v36, %v8298_v38  ;;  %v12373_v13 = vadd.f32 %v8237_v47, %v1743_v20  ;;  %v12919_v28 = vld [vmem:[#allocation11 + $0x768] ss:$16 sps:$4 sm:$0xff]   ;;  %v12927_v44 = vld [vmem:[#allocation11 + $0x7ac] ss:$16 sps:$4 sm:$0xff]  }
 0x624   :  { %v8396_v21 = vadd.f32 %v8380_v55, %v8313_v12  ;;  %v8321_v4 = vadd.f32 %v12372_v56, %v8305_v48  ;;  %v12945_v20 = vld [vmem:[#allocation14 + $0x34] ss:$8 sps:$4 sm:$0xff]   ;;  %v12948_v46 = vld [vmem:[#allocation14 + $0x44] ss:$8 sps:$4 sm:$0xff]   ;;  %v12930_v36 = vld [vmem:[#allocation11 + $0x7cc] ss:$16 sps:$4 sm:$0xff]  }
 0x625   :  { %v8397_v53 = vadd.f32 %v8381_v27, %v8314_v23  ;;  %v8322_v31 = vadd.f32 %v12373_v13, %v8306_v35  ;;  %10443 = vmatpush1.bf16.msra.mxu1 %v12895_v49  ;;  %v12922_v3 = vld [vmem:[#allocation11 + $0x788] ss:$16 sps:$4 sm:$0xff]   ;;  %v12933_v35 = vld [vmem:[#allocation11 + $0x7ec] ss:$16 sps:$4 sm:$0xff]  }
 0x626   :  { %v8479_v24 = vadd.f32 %v8463_v52, %v8396_v21  ;;  %v8404_v29 = vadd.f32 %v8388_v59, %v8321_v4  ;;  %10444 = vmatprep.subr.bf16.mxu1 %v12903_v62  ;;  %v12925_v38 = vld [vmem:[#allocation11 + $0x7a8] ss:$16 sps:$4 sm:$0xff]   ;;  %v12949_v49 = vld [vmem:[#allocation14 + $0x50] ss:$8 sps:$4 sm:$0xff]   ;;  %v12952_v27 = vld [vmem:[#allocation14 + $0x60] ss:$8 sps:$4 sm:$0xff]  }
 0x627   :  { %v8480_v0 = vadd.f32 %v8464_v40, %v8397_v53  ;;  %v8405_v58 = vadd.f32 %v8389_v18, %v8322_v31  ;;  %v12951_v60 = vld [vmem:[#allocation14 + $0x54] ss:$8 sps:$4 sm:$0xff]   ;;  %v12954_v12 = vld [vmem:[#allocation14 + $0x64] ss:$8 sps:$4 sm:$0xff]   ;;  %v12955_v47 = vld [vmem:[#allocation14 + $0x70] ss:$8 sps:$4 sm:$0xff]  }
 0x628   :  { %v8537_v14 = vadd.f32 %v8518_v54, %v8479_v24  ;;  %v8487_v51 = vadd.f32 %v8471_v16, %v8404_v29  ;;  %v12928_v48 = vld [vmem:[#allocation11 + $0x7c8] ss:$16 sps:$4 sm:$0xff]   ;;  %v12958_v23 = vld [vmem:[#allocation14 + $0x80] ss:$8 sps:$4 sm:$0xff]   ;;  %v12961_v13 = vld [vmem:[#allocation14 + $0x90] ss:$8 sps:$4 sm:$0xff]  }
 0x629   :  { %v8488_v26 = vadd.f32 %v8472_v8, %v8405_v58  ;;  %10445 = vmatpush1.bf16.msra.mxu1 %v12901_v63  ;;  %v8538_v22 = vadd.f32 %v8522_v30, %v8480_v0  ;;  %v12931_v55 = vld [vmem:[#allocation11 + $0x7e8] ss:$16 sps:$4 sm:$0xff]   ;;  %v12964_v21 = vld [vmem:[#allocation14 + $0xa0] ss:$8 sps:$4 sm:$0xff]   ;;  %v12973_v31 = vld [vmem:[#allocation14 + $0xd0] ss:$8 sps:$4 sm:$0xff]  }
 0x62a   :  { %v8545_v43 = vadd.f32 %v8518_v54, %v8487_v51  ;;  %10446 = vmatprep.subr.bf16.mxu1 %v12909_v25  ;;  %v8553_v15 = vmax.f32 %v8537_v14, 0.0  ;;  %v12957_v56 = vld [vmem:[#allocation14 + $0x74] ss:$8 sps:$4 sm:$0xff]   ;;  %v12960_v62 = vld [vmem:[#allocation14 + $0x84] ss:$8 sps:$4 sm:$0xff]  }
 0x62b   :  { %v8546_v9 = vadd.f32 %v8522_v30, %v8488_v26  ;;  %v8554_v45 = vmax.f32 %v8538_v22, 0.0  ;;  %v12963_v59 = vld [vmem:[#allocation14 + $0x94] ss:$8 sps:$4 sm:$0xff]   ;;  %v12966_v18 = vld [vmem:[#allocation14 + $0xa4] ss:$8 sps:$4 sm:$0xff]  }
 0x62c   :  { %v8561_v41 = vmax.f32 %v8545_v43, 0.0  ;;  %v12969_v52 = vld [vmem:[#allocation14 + $0xb4] ss:$8 sps:$4 sm:$0xff]   ;;  %v12967_v54 = vld [vmem:[#allocation14 + $0xb0] ss:$8 sps:$4 sm:$0xff]   ;;  %v14594_v8 = vld [vmem:[#allocation24_spill] sm:$0xff] }
 0x62d   :  { %10447 = vmatpush1.bf16.msra.mxu1 %v12907_v10  ;;  %v8562_v34 = vmax.f32 %v8546_v9, 0.0  ;;  %v12972_v4 = vld [vmem:[#allocation14 + $0xc4] ss:$8 sps:$4 sm:$0xff]   ;;  %v12970_v53 = vld [vmem:[#allocation14 + $0xc0] ss:$8 sps:$4 sm:$0xff]   ;;  %v14593_v0 = vld [vmem:[#allocation26_spill] sm:$0xff] }
 0x62e   :  { %10448 = vmatprep.subr.bf16.mxu1 %v12915_v33  ;;  %v8569_v2 = vpack.c.bf16 %v8561_v41, %v8553_v15  ;;  %v12975_v40 = vld [vmem:[#allocation14 + $0xd4] ss:$8 sps:$4 sm:$0xff]   ;;  %v12976_v63 = vld [vmem:[#allocation14 + $0xe0] ss:$8 sps:$4 sm:$0xff]   ;;  %v12978_v30 = vld [vmem:[#allocation14 + $0xe4] ss:$8 sps:$4 sm:$0xff]  }
 0x62f   :  { %v8570_v1 = vpack.c.bf16 %v8562_v34, %v8554_v45  ;;  %v12981_v24 = vld [vmem:[#allocation14 + $0xf4] ss:$8 sps:$4 sm:$0xff]   ;;  %v12979_v29 = vld [vmem:[#allocation14 + $0xf0] ss:$8 sps:$4 sm:$0xff]   ;;  %v12984_v16 = vld [vmem:[#allocation14 + $0x104] ss:$8 sps:$4 sm:$0xff]  }
 0x630   :  { %v8827_v25 = vld [vmem:[#allocation13] sm:$0xf] }
 0x631   :  { %10290 = vmatprep.mubr.bf16.mxu0 %v8570_v1  ;;  %10449 = vmatpush1.bf16.msra.mxu1 %v12913_v5  ;;  %v8832_v58 = vrot.slane %v8827_v25, %v14593_v0  ;;  %v8836_v14 = vrot.slane %v8827_v25, %v14594_v8 }
 0x632   :  { %10462 = vmatprep.mubr.bf16.mxu1 %v8570_v1  ;;  %10291 = vmatmul.mubr.bf16.vlgmr.msra.gmra.mrb[8].mxu0 %v8569_v2 }
 0x633   :  { %10450 = vmatprep.subr.bf16.mxu1 %v12918_v6  ;;  %10882 = vmatpush1.bf16.msra.mxu0 %v12934_v17  ;;  %v12982_v6 = vld [vmem:[#allocation14 + $0x100] ss:$8 sps:$4 sm:$0xff]   ;;  %v12987_v17 = vld [vmem:[#allocation14 + $0x114] ss:$8 sps:$4 sm:$0xff]  }
 0x634   :  { %10883 = vmatprep.subr.bf16.mxu0 %v12939_v39  ;;  %v12985_v39 = vld [vmem:[#allocation14 + $0x110] ss:$8 sps:$4 sm:$0xff]  }
 0x635   :  { %10451 = vmatpush1.bf16.msra.mxu1 %v12916_v11  ;;  %v12990_v11 = vld [vmem:[#allocation14 + $0x124] ss:$8 sps:$4 sm:$0xff]  }
 0x636   :  { %10452 = vmatprep.subr.bf16.mxu1 %v12921_v42  ;;  %v12988_v42 = vld [vmem:[#allocation14 + $0x120] ss:$8 sps:$4 sm:$0xff]  }
 0x637   :  { %10884 = vmatpush1.bf16.msra.mxu0 %v12937_v61  ;;  %v12993_v61 = vld [vmem:[#allocation14 + $0x134] ss:$8 sps:$4 sm:$0xff]  }
 0x638   :  { %10885 = vmatprep.subr.bf16.mxu0 %v12942_v19  ;;  %v12991_v19 = vld [vmem:[#allocation14 + $0x130] ss:$8 sps:$4 sm:$0xff]  }
 0x639   :  { %10453 = vmatpush1.bf16.msra.mxu1 %v12919_v28  ;;  %v12996_v28 = vld [vmem:[#allocation14 + $0x144] ss:$8 sps:$4 sm:$0xff]  }
 0x63a   :  { %10454 = vmatprep.subr.bf16.mxu1 %v12924_v50  ;;  %v14595_v50 = vld [vmem:[#allocation27_spill] sm:$0xff] }
 0x63b   :  { %10886 = vmatpush1.bf16.msra.mxu0 %v12940_v32  ;;  %v8840_v32 = vrot.slane %v8827_v25, %v14595_v50 }
 0x63c   :  { %10887 = vmatprep.subr.bf16.mxu0 %v12945_v20  ;;  %v12994_v20 = vld [vmem:[#allocation14 + $0x140] ss:$8 sps:$4 sm:$0xff]  }
 0x63d   :  { %10455 = vmatpush1.bf16.msra.mxu1 %v12922_v3  ;;  %v8844_v3 = vrot.slane %v8827_v25, %v14587_v57  ;;  %v13000_v57 = vld [vmem:[#allocation14 + $0x160] ss:$8 sps:$4 sm:$0xff]  }
 0x63e   :  { %10456 = vmatprep.subr.bf16.mxu1 %v12927_v44  ;;  %v12999_v44 = vld [vmem:[#allocation14 + $0x154] ss:$8 sps:$4 sm:$0xff]   ;;  %v13024_v25 = vld [vmem:[#allocation14 + $0x1e0] ss:$8 sps:$4 sm:$0xff]  }
 0x63f   :  { %10888 = vmatpush1.bf16.msra.mxu0 %v12943_v7 }
 0x640   :  { %10889 = vmatprep.subr.bf16.mxu0 %v12948_v46 }
 0x641   :  { %10457 = vmatpush1.bf16.msra.mxu1 %v12925_v38 }
 0x642   :  { %10458 = vmatprep.subr.bf16.mxu1 %v12930_v36 }
 0x643   :  { %10890 = vmatpush1.bf16.msra.mxu0 %v12946_v37 }
 0x644   :  { %10891 = vmatprep.subr.bf16.mxu0 %v12951_v60  ;;  %v12997_v60 = vld [vmem:[#allocation14 + $0x150] ss:$8 sps:$4 sm:$0xff]  }
 0x645   :  { %10459 = vmatpush1.bf16.msra.mxu1 %v12928_v48 }
 0x646   :  { %10460 = vmatprep.subr.bf16.mxu1 %v12933_v35 }
 0x647   :  { %10892 = vmatpush1.bf16.msra.mxu0 %v12949_v49  ;;  %v13002_v49 = vld [vmem:[#allocation14 + $0x164] ss:$8 sps:$4 sm:$0xff]  }
 0x648   :  { %10893 = vmatprep.subr.bf16.mxu0 %v12954_v12 }
 0x649   :  { %10461 = vmatpush1.bf16.msra.mxu1 %v12931_v55 }
 0x64b   :  { %10894 = vmatpush1.bf16.msra.mxu0 %v12952_v27 }
 0x64c   :  { %10463 = vmatmul.mubr.bf16.vlgmr.msra.gmra.mrb[12].mxu1 %v8569_v2  ;;  %10895 = vmatprep.subr.bf16.mxu0 %v12957_v56 }
 0x64f   :  { %10896 = vmatpush1.bf16.msra.mxu0 %v12955_v47 }
 0x650   :  { %10897 = vmatprep.subr.bf16.mxu0 %v12960_v62 }
 0x653   :  { %10898 = vmatpush1.bf16.msra.mxu0 %v12958_v23  ;;  %v13005_v23 = vld [vmem:[#allocation14 + $0x174] ss:$8 sps:$4 sm:$0xff]  }
 0x654   :  { %10899 = vmatprep.subr.bf16.mxu0 %v12963_v59 }
 0x657   :  { %10900 = vmatpush1.bf16.msra.mxu0 %v12961_v13  ;;  %v13003_v13 = vld [vmem:[#allocation14 + $0x170] ss:$8 sps:$4 sm:$0xff]  }
 0x658   :  { %10901 = vmatprep.subr.bf16.mxu0 %v12966_v18  ;;  %v13008_v18 = vld [vmem:[#allocation14 + $0x184] ss:$8 sps:$4 sm:$0xff]  }
 0x65b   :  { %10902 = vmatpush1.bf16.msra.mxu0 %v12964_v21  ;;  %v13006_v21 = vld [vmem:[#allocation14 + $0x180] ss:$8 sps:$4 sm:$0xff]  }
 0x65c   :  { %10903 = vmatprep.subr.bf16.mxu0 %v12969_v52  ;;  %v13011_v52 = vld [vmem:[#allocation14 + $0x194] ss:$8 sps:$4 sm:$0xff]  }
 0x65f   :  { %10904 = vmatpush1.bf16.msra.mxu0 %v12967_v54  ;;  %v13009_v54 = vld [vmem:[#allocation14 + $0x190] ss:$8 sps:$4 sm:$0xff]  }
 0x660   :  { %10905 = vmatprep.subr.bf16.mxu0 %v12972_v4  ;;  %v13014_v4 = vld [vmem:[#allocation14 + $0x1a4] ss:$8 sps:$4 sm:$0xff]  }
 0x663   :  { %10906 = vmatpush1.bf16.msra.mxu0 %v12970_v53  ;;  %v13012_v53 = vld [vmem:[#allocation14 + $0x1a0] ss:$8 sps:$4 sm:$0xff]  }
 0x664   :  { %10907 = vmatprep.subr.bf16.mxu0 %v12975_v40  ;;  %v13017_v40 = vld [vmem:[#allocation14 + $0x1b4] ss:$8 sps:$4 sm:$0xff]  }
 0x667   :  { %10908 = vmatpush1.bf16.msra.mxu0 %v12973_v31  ;;  %v13015_v31 = vld [vmem:[#allocation14 + $0x1b0] ss:$8 sps:$4 sm:$0xff]  }
 0x668   :  { %10909 = vmatprep.subr.bf16.mxu0 %v12978_v30  ;;  %v13018_v30 = vld [vmem:[#allocation14 + $0x1c0] ss:$8 sps:$4 sm:$0xff]  }
 0x66b   :  { %10910 = vmatpush1.bf16.msra.mxu0 %v12976_v63  ;;  %v13020_v63 = vld [vmem:[#allocation14 + $0x1c4] ss:$8 sps:$4 sm:$0xff]  }
 0x66c   :  { %10911 = vmatprep.subr.bf16.mxu0 %v12981_v24  ;;  %v13023_v24 = vld [vmem:[#allocation14 + $0x1d4] ss:$8 sps:$4 sm:$0xff]  }
 0x66f   :  { %10912 = vmatpush1.bf16.msra.mxu0 %v12979_v29  ;;  %v13021_v29 = vld [vmem:[#allocation14 + $0x1d0] ss:$8 sps:$4 sm:$0xff]  }
 0x670   :  { %10924 = vmatprep.subr.bf16.mxu0 %v12984_v16  ;;  %v13026_v16 = vld [vmem:[#allocation14 + $0x1e4] ss:$8 sps:$4 sm:$0xff]  }
 0x705   :  { %v10292_v51 = vpop.f32.mrb[8].mxu0 }
 0x706   :  { %v12374_v26 = vadd.f32 %v10292_v51, %v8832_v58  ;;  %v10294_v10 = vpop.f32.mrb[9].mxu0  ;;  %v10549_v51 = vld [vmem:[#allocation16] sm:$0x3] }
 0x707   :  { %v12375_v22 = vadd.f32 %v10294_v10, %v8836_v14  ;;  %v10296_v43 = vpop.f32.mrb[10].mxu0  ;;  %v10558_v10 = vrot.slane %v10549_v51, %v14594_v8 }
 0x708   :  { %v12376_v33 = vadd.f32 %v10296_v43, %v8832_v58  ;;  %v10298_v9 = vpop.f32.mrb[11].mxu0  ;;  %v10473_v41 = vmax.f32 %v12374_v26, 0.0  ;;  %v13029_v58 = vld [vmem:[#allocation14 + $0x1f4] ss:$8 sps:$4 sm:$0xff]   ;;  %v10554_v26 = vrot.slane %v10549_v51, %v14593_v0 }
 0x709   :  { %v12377_v15 = vadd.f32 %v10298_v9, %v8836_v14  ;;  %v10474_v45 = vmax.f32 %v12375_v22, 0.0  ;;  %v13027_v14 = vld [vmem:[#allocation14 + $0x1f0] ss:$8 sps:$4 sm:$0xff]  }
 0x70a   :  { %v10477_v5 = vmax.f32 %v12376_v33, 0.0 }
 0x70b   :  { %v10478_v34 = vmax.f32 %v12377_v15, 0.0 }
 0x70c   :  { %v10481_v2 = vpack.c.bf16 %v10477_v5, %v10473_v41 }
 0x70d   :  { %v10482_v1 = vpack.c.bf16 %v10478_v34, %v10474_v45 }
 0x70f   :  { %10913 = vmatprep.mubr.bf16.mxu0 %v10482_v1 }
 0x710   :  { %10914 = vmatmul.mubr.bf16.vlgmr.msra.gmra.mrb[12].mxu0 %v10481_v2 }
 0x711   :  { %10925 = vmatpush1.bf16.msra.mxu0 %v12982_v6 }
 0x712   :  { %10926 = vmatprep.subr.bf16.mxu0 %v12987_v17 }
 0x715   :  { %10927 = vmatpush1.bf16.msra.mxu0 %v12985_v39 }
 0x716   :  { %10928 = vmatprep.subr.bf16.mxu0 %v12990_v11 }
 0x719   :  { %10929 = vmatpush1.bf16.msra.mxu0 %v12988_v42 }
 0x71a   :  { %10930 = vmatprep.subr.bf16.mxu0 %v12993_v61 }
 0x71d   :  { %10931 = vmatpush1.bf16.msra.mxu0 %v12991_v19 }
 0x71e   :  { %10932 = vmatprep.subr.bf16.mxu0 %v12996_v28 }
 0x71f   :  { %v10464_v7 = vpop.f32.mrb[12].mxu1 }
 0x720   :  { %v12378_v46 = vadd.f32 %v10464_v7, %v8840_v32  ;;  %v10466_v38 = vpop.f32.mrb[13].mxu1 }
 0x721   :  { %v12379_v36 = vadd.f32 %v10466_v38, %v8844_v3  ;;  %10933 = vmatpush1.bf16.msra.mxu0 %v12994_v20  ;;  %v10468_v37 = vpop.f32.mrb[14].mxu1 }
 0x722   :  { %v12380_v48 = vadd.f32 %v10468_v37, %v8840_v32  ;;  %v10470_v35 = vpop.f32.mrb[15].mxu1  ;;  %10934 = vmatprep.subr.bf16.mxu0 %v12999_v44  ;;  %v10475_v55 = vmax.f32 %v12378_v46, 0.0 }
 0x723   :  { %v12381_v12 = vadd.f32 %v10470_v35, %v8844_v3  ;;  %v10476_v56 = vmax.f32 %v12379_v36, 0.0 }
 0x724   :  { %v10479_v27 = vmax.f32 %v12380_v48, 0.0 }
 0x725   :  { %v10480_v47 = vmax.f32 %v12381_v12, 0.0  ;;  %10935 = vmatpush1.bf16.msra.mxu0 %v12997_v60 }
 0x726   :  { %v10483_v62 = vpack.c.bf16 %v10479_v27, %v10475_v55  ;;  %10936 = vmatprep.subr.bf16.mxu0 %v13002_v49 }
 0x727   :  { %v10484_v59 = vpack.c.bf16 %v10480_v47, %v10476_v56 }
 0x729   :  { %10937 = vmatpush1.bf16.msra.mxu0 %v13000_v57  ;;  %10956 = vmatprep.mubr.bf16.mxu0 %v10484_v59 }
 0x72a   :  { %10938 = vmatprep.subr.bf16.mxu0 %v13005_v23 }
 0x72d   :  { %10939 = vmatpush1.bf16.msra.mxu0 %v13003_v13 }
 0x72e   :  { %10940 = vmatprep.subr.bf16.mxu0 %v13008_v18 }
 0x731   :  { %10941 = vmatpush1.bf16.msra.mxu0 %v13006_v21 }
 0x732   :  { %10942 = vmatprep.subr.bf16.mxu0 %v13011_v52 }
 0x735   :  { %10943 = vmatpush1.bf16.msra.mxu0 %v13009_v54 }
 0x736   :  { %10944 = vmatprep.subr.bf16.mxu0 %v13014_v4 }
 0x739   :  { %10945 = vmatpush1.bf16.msra.mxu0 %v13012_v53 }
 0x73a   :  { %10946 = vmatprep.subr.bf16.mxu0 %v13017_v40 }
 0x73d   :  { %10947 = vmatpush1.bf16.msra.mxu0 %v13015_v31 }
 0x73e   :  { %10948 = vmatprep.subr.bf16.mxu0 %v13020_v63 }
 0x741   :  { %10949 = vmatpush1.bf16.msra.mxu0 %v13018_v30 }
 0x742   :  { %10950 = vmatprep.subr.bf16.mxu0 %v13023_v24 }
 0x745   :  { %10951 = vmatpush1.bf16.msra.mxu0 %v13021_v29 }
 0x746   :  { %10952 = vmatprep.subr.bf16.mxu0 %v13026_v16 }
 0x749   :  { %10953 = vmatpush1.bf16.msra.mxu0 %v13024_v25 }
 0x74a   :  { %10954 = vmatprep.subr.bf16.mxu0 %v13029_v58 }
 0x74d   :  { %10955 = vmatpush1.bf16.msra.mxu0 %v13027_v14 }
 0x750   :  { %10957 = vmatmul.mubr.bf16.vlgmr.msra.gmra.mrb[12].mxu0 %v10483_v62 }
 0x823   :  { %v10958_v22 = vpop.f32.mrb[12].mxu0 }
 0x824   :  { %v12382_v43 = vadd.f32 %v10958_v22, %v10554_v26  ;;  %v10960_v33 = vpop.f32.mrb[13].mxu0 }
 0x825   :  { %v12383_v9 = vadd.f32 %v10960_v33, %v10558_v10  ;;  %v10962_v15 = vpop.f32.mrb[14].mxu0 }
 0x826   :  { %v10967_v41 = vmul.f32 %v12382_v43, %v12382_v43  ;;  %v12384_v5 = vadd.f32 %v10962_v15, %v10554_v26  ;;  %v10964_v45 = vpop.f32.mrb[15].mxu0 }
 0x827   :  { %v10968_v34 = vmul.f32 %v12383_v9, %v12383_v9  ;;  %v12385_v2 = vadd.f32 %v10964_v45, %v10558_v10 }
 0x828   :  { %v10969_v1 = vmul.f32 %v12384_v5, %v12384_v5 }
 0x829   :  { %v10970_v6 = vmul.f32 %v12385_v2, %v12385_v2  ;;  %v10971_v17 = vadd.f32 %v10968_v34, %v10967_v41 }
 0x82b   :  { %10972 = vadd.xlane.f32.xlu1 %v10971_v17  ;;  %v10974_v39 = vadd.f32 %v10970_v6, %v10969_v1 }
 0x82d   :  { %10975 = vadd.xlane.f32.xlu0 %v10974_v39 }
 0x8b8   :  { %v10973_v11 = vpop.xlane.xlu1 %10972 }
 0x8b9   :  { %v10977_v0 = vmax.f32 %v10973_v11, 1e-24 }
 0x8ba   :  { %v10976_v42 = vpop.xlane.xlu0 %10975 }
 0x8bb   :  { %13030 = vrsqrt.f32 %v10977_v0  ;;  %v10978_v8 = vmax.f32 %v10976_v42, 1e-24 }
 0x8bd   :  { %13032 = vrsqrt.f32 %v10978_v8 }
 0x8c5   :  { %v13031_v61 = vpop.eup %13030 }
 0x8c6   :  { %v10981_v19 = vmul.f32 %v13031_v61, %v12382_v43  ;;  %v10982_v28 = vmul.f32 %v13031_v61, %v12383_v9 }
 0x8c7   :  { %v13033_v50 = vpop.eup %13032 }
 0x8c8   :  { %v10983_v32 = vmul.f32 %v13033_v50, %v12384_v5  ;;  %v10984_v20 = vmul.f32 %v13033_v50, %v12385_v2  ;;  %10985 = vst [vmem:[#allocation17] sm:$0xff] %v10981_v19  ;;  %10986 = vst [vmem:[#allocation17 + $0x8] sm:$0xff] %v10982_v28 }
 0x8ca   :  { %10987 = vst [vmem:[#allocation17 + $0x10] sm:$0xff] %v10983_v32  ;;  %10988 = vst [vmem:[#allocation17 + $0x18] sm:$0xff] %v10984_v20 }
 0x8cb   :  { %13250 = shalt.err (!%p13247_p6)
}
 0x8cc   :  { %s13251_s23 = scalar_lea.hbm %s14471_s10, 512 }
 0x8cd   :  { %p13252_p7 = scmp.ne.s32.totalorder %s14471_s10, %s13251_s23  ;;  %p13255_p8 = scmp.lt.u32.totalorder %s13251_s23, %s14471_s10 }
 0x8cf   :  { %p13257_p9 = pnand %p13255_p8, %p13252_p7 }
 0x8d1   :  { %13260 = shalt.err (!%p13257_p9)
}
 0x8d2   :  { %11000 = dma.vmem_to_hbm [thread:$0]  %s10995_s21, 512, %s14471_s10, [#allocation4], %s13276_s4, %s13276_s4, %s13277_s16  }
 0x8d3   :  { %13271 = dma.done.wait [#allocation4], 512  }
 0x8d4   :  { %13272 = vsyncadd [#allocation4], 4294966784 }
 0x8d5   :  { %11004 = vsyncpa [#allocation3], 1 }
 0x8d6   :  { %11005 = vsyncpa [#allocation6], 1 }
 0x8d7   :  { %11006 = vsyncpa [#allocation9], 1 }
 0x8d8   :  { %11007 = vsyncpa [#allocation12], 1 }
 0x8d9   :  { %11008 = vsyncpa [#allocation15], 1 }
 0x8da   :  { %11009 = vsyncpa [#allocation4], 1 }

</bundles_post_ra>
